<compile_context>
chip_gen: v7x
topology: tpu7x:2x2x1
jax: 0.10.0
libtpu: 0.0.40
codegen_flags: <defaults>
</compile_context>

<pallas_src>
import functools
import math

import jax
import jax.numpy as jnp
from jax import lax
from jax.experimental import pallas as pl
from jax.experimental.pallas import tpu as pltpu

LANE = 128
SUB_BF16 = 16                       # bf16 native sublane tiling is (16, 128)

GROWTH = 32
BN_SIZE = 4
BLOCK_CFG = (6, 12, 24, 16)
INIT_CH = 64

ROW_TILE_CAP = 1024                 # ~2.25 MiB A tile at Kp=1152; safe on v5e/v6e/v7x
VMEM_LIMIT = 32 * 1024 * 1024       # explicit scoped-VMEM budget (safe on all gens)


def _round_up(x, m):
    return ((x + m - 1) // m) * m


def _pick_tile(m, cap=ROW_TILE_CAP):
    """Row-tile choice: single block up to `cap`, else `cap`-sized tiles (padded)."""
    mp = _round_up(m, SUB_BF16)
    if mp <= cap:
        return mp, mp
    mp = _round_up(m, cap)
    return mp, cap


# ----------------------------------------------------------------------------
# Pallas kernels: fused  out = relu?( relu?(A*iscale+ishift) @ W + oshift )
# ----------------------------------------------------------------------------
def _mm_pro_kernel(a_ref, b_ref, isc_ref, ish_ref, osh_ref, o_ref, *, out_relu):
    # Prologue: pre-activation BN + ReLU on the A tile (f32 path, v5e-safe), then bf16
    # MXU matmul with f32 accumulate and f32 epilogue.
    a = a_ref[...].astype(jnp.float32)
    a = jnp.maximum(a * isc_ref[...] + ish_ref[...], 0.0).astype(jnp.bfloat16)
    acc = jnp.dot(a, b_ref[...], preferred_element_type=jnp.float32)
    out = acc + osh_ref[...]
    if out_relu:
        out = jnp.maximum(out, 0.0)
    o_ref[...] = out.astype(o_ref.dtype)


def _mm_kernel(a_ref, b_ref, osh_ref, o_ref, *, out_relu):
    acc = jnp.dot(a_ref[...], b_ref[...], preferred_element_type=jnp.float32)
    out = acc + osh_ref[...]
    if out_relu:
        out = jnp.maximum(out, 0.0)
    o_ref[...] = out.astype(o_ref.dtype)


def matmul_fused(a, w, oshift, iscale=None, ishift=None, out_relu=False,
                 out_dtype=jnp.bfloat16):
    """out = act( act(a*iscale+ishift) @ W + oshift ); W is pre-padded/folded bf16.

    Full weight kept VMEM-resident (constant index_map -> one DMA per call), single
    'parallel' grid axis over M tiles, full-width lane-dense output stores.
    """
    Kp, Np = w.shape
    a = a.astype(jnp.bfloat16)
    M, K = a.shape
    assert K <= Kp
    Mp, tm = _pick_tile(M)
    if Mp != M or Kp != K:
        a = jnp.pad(a, ((0, Mp - M), (0, Kp - K)))
    grid = (Mp // tm,)

    in_specs = [
        pl.BlockSpec((tm, Kp), lambda i: (i, 0)),     # A: tiled over M only
        pl.BlockSpec((Kp, Np), lambda i: (0, 0)),     # W: resident, fetched once
    ]
    if iscale is not None:
        kernel = functools.partial(_mm_pro_kernel, out_relu=out_relu)
        in_specs += [
            pl.BlockSpec((1, Kp), lambda i: (0, 0)),
            pl.BlockSpec((1, Kp), lambda i: (0, 0)),
            pl.BlockSpec((1, Np), lambda i: (0, 0)),
        ]
        args = (a, w, iscale, ishift, oshift)
    else:
        kernel = functools.partial(_mm_kernel, out_relu=out_relu)
        in_specs += [pl.BlockSpec((1, Np), lambda i: (0, 0))]
        args = (a, w, oshift)

    out = pl.pallas_call(
        kernel,
        out_shape=jax.ShapeDtypeStruct((Mp, Np), out_dtype),
        grid=grid,
        in_specs=in_specs,
        out_specs=pl.BlockSpec((tm, Np), lambda i: (i, 0)),
        compiler_params=pltpu.CompilerParams(
            dimension_semantics=("parallel",),        # large-M layers give >=2 steps (v7x)
            vmem_limit_bytes=VMEM_LIMIT),
    )(*args)
    return out  # caller slices valid rows / channels


# ----------------------------------------------------------------------------
# Plain-JAX glue: im2col, pooling, layer wiring
# ----------------------------------------------------------------------------
def _im2col(x, kh, kw, stride, pad):
    n, h, w, c = x.shape
    oh = (h + 2 * pad - kh) // stride + 1
    ow = (w + 2 * pad - kw) // stride + 1
    xp = jnp.pad(x, ((0, 0), (pad, pad), (pad, pad), (0, 0))) if pad else x
    cols = []
    for i in range(kh):
        for j in range(kw):
            cols.append(xp[:, i:i + stride * (oh - 1) + 1:stride,
                           j:j + stride * (ow - 1) + 1:stride, :])
    patches = jnp.stack(cols, axis=3)                 # (n, oh, ow, kh*kw, c)
    return patches.reshape(n * oh * ow, kh * kw * c), (n, oh, ow)


def conv_apply(x, conv, kh, kw, stride, pad, n_out, out_relu):
    if kh == 1 and kw == 1 and stride == 1 and pad == 0:
        n, h, w, c = x.shape
        a = x.reshape(n * h * w, c)
        oh, ow = h, w
    else:
        a, (n, oh, ow) = _im2col(x, kh, kw, stride, pad)
    out = matmul_fused(a, conv["w"], conv["oshift"],
                       conv.get("iscale"), conv.get("ishift"), out_relu)
    return out[:n * oh * ow, :n_out].reshape(n, oh, ow, n_out)


# TODO(synk): pooling stays plain-JAX reduce_window / reshape-mean (cheap glue, not the
# FLOP or bandwidth hot path).
def maxpool_3x3_s2_p1(x):
    neg_inf = jnp.array(-jnp.inf, dtype=x.dtype)
    return lax.reduce_window(x, neg_inf, lax.max,
                             window_dimensions=(1, 3, 3, 1),
                             window_strides=(1, 2, 2, 1),
                             padding=((0, 0), (1, 1), (1, 1), (0, 0)))


def avgpool_2x2_s2(x):
    # NOTE: assumes even H/W (true for every stage at the sizes used here).
    n, h, w, c = x.shape
    y = x.astype(jnp.float32).reshape(n, h // 2, 2, w // 2, 2, c).mean(axis=(2, 4))
    return y.astype(jnp.bfloat16)


def dense_block(x, block, c_in):
    """One DenseNet block, scanned over layers (stacked per-layer weights).

    The concat buffer is pre-allocated at the final channel count (a multiple of 128);
    the 1x1 bottleneck reads the full buffer with zero weight rows for not-yet-written
    channels, and each layer's 32 new channels are merged with a 128-lane-aligned
    group update (old_group + padded_new, exact since untouched lanes are zero).
    """
    n, h, w, _ = x.shape
    n_layers = block["grp"].shape[0]
    c_final = c_in + n_layers * GROWTH          # always a multiple of 128
    M = n * h * w
    buf = jnp.zeros((n, h, w, c_final), jnp.bfloat16)
    buf = lax.dynamic_update_slice(buf, x.astype(jnp.bfloat16), (0, 0, 0, 0))

    def step(buf, layer):
        # 1x1 bottleneck: prologue = norm1+relu1, epilogue = norm2 (folded) + relu2.
        a = buf.reshape(M, c_final)
        y = matmul_fused(a, layer["w1"], layer["osh1"],
                         layer["isc1"], layer["ish1"], out_relu=True)
        y = y[:M].reshape(n, h, w, LANE)
        # 3x3 growth conv, raw output; real 32 columns sit at lane offset (c_cur % 128)
        # inside the 128-wide zero-padded weight so the concat below stays lane-aligned.
        a2, _ = _im2col(y, 3, 3, 1, 1)
        z = matmul_fused(a2, layer["w2"], layer["osh2"], out_relu=False)
        z = z[:M].reshape(n, h, w, LANE)
        g = layer["grp"]                         # 128-aligned group start (traced int32)
        old = lax.dynamic_slice(buf, (0, 0, 0, g), (n, h, w, LANE))
        buf = lax.dynamic_update_slice(buf, old + z, (0, 0, 0, g))
        return buf, None

    layers = {k: block[k] for k in ("w1", "isc1", "ish1", "osh1", "w2", "osh2", "grp")}
    buf, _ = lax.scan(step, buf, layers)
    return buf


def transition_apply(x, t, n_out):
    # prologue norm+relu fused into the 1x1 conv; then 2x2 average pool.
    y = conv_apply(x, t, 1, 1, 1, 0, n_out, out_relu=False)
    return avgpool_2x2_s2(y)


def densenet_features(x, dp):
    y = conv_apply(x, dp["conv0"], 7, 7, 2, 3, 64, out_relu=True)   # conv0+norm0+relu0
    y = maxpool_3x3_s2_p1(y)
    c = INIT_CH
    for b, n_layers in enumerate(BLOCK_CFG):
        y = dense_block(y, dp["blocks"][b], c)
        c += n_layers * GROWTH
        if b < len(BLOCK_CFG) - 1:
            y = transition_apply(y, dp["transitions"][b], c // 2)
            c //= 2
    # norm5: tiny (2x1024 at this size) affine, no relu -- plain jnp, no kernel launch.
    return y.astype(jnp.float32) * dp["norm5_scale"] + dp["norm5_shift"]


def feature_tunk_push(color_nchw, depth_nchw, params):
    color = jnp.transpose(color_nchw, (0, 2, 3, 1)).astype(jnp.bfloat16)
    depth = jnp.transpose(depth_nchw, (0, 2, 3, 1)).astype(jnp.bfloat16)
    # Both extractors fused into block-diagonal 4->4 convs on the concatenated input;
    # the spec's BasicBlock has NO residual skip: relu(bn1(conv1)) ; relu(bn2(conv2)).
    x = jnp.concatenate([color, depth], axis=-1)
    x = conv_apply(x, params["extractor"]["conv_a"], 3, 3, 1, 1, 4, out_relu=True)
    x = conv_apply(x, params["extractor"]["conv_b"], 3, 3, 1, 1, 4, out_relu=True)
    y = densenet_features(x, params["dense"])
    return jnp.transpose(y, (0, 3, 1, 2))             # back to NCHW (f32)


# ----------------------------------------------------------------------------
# Deterministic parameter construction + one-time folding/padding/stacking
# ----------------------------------------------------------------------------
def _he_conv(key, oc, ic, kh, kw):
    # He-normal init (fan_in scaling keeps the synthetic 121-layer stack stable).
    std = math.sqrt(2.0 / (ic * kh * kw))
    return std * jax.random.normal(key, (oc, ic, kh, kw), dtype=jnp.float32)


def _bn(c, eps=1e-5):
    # Inference-mode BatchNorm: gamma=1, beta=0, running_mean=0, running_var=1.
    gamma = jnp.ones((c,), jnp.float32)
    beta = jnp.zeros((c,), jnp.float32)
    mean = jnp.zeros((c,), jnp.float32)
    var = jnp.ones((c,), jnp.float32)
    scale = gamma / jnp.sqrt(var + eps)
    shift = beta - mean * scale
    return scale, shift


def _prep_conv(w_oihw, kh, kw, out_bn=None, in_bn=None, k_full=None, col_offset=0):
    """Fold/pad a conv once: bf16 (Kp,Np) weight, f32 oshift, optional prologue BN.

    `k_full` pads the input-channel rows (1x1 convs reading the pre-allocated block
    buffer); `col_offset` places the real output columns inside the 128-wide padded N
    (used by growth convs for lane-aligned concat updates).
    """
    oc, ic = w_oihw.shape[0], w_oihw.shape[1]
    K = kh * kw * ic
    wmat = jnp.transpose(w_oihw, (2, 3, 1, 0)).reshape(K, oc)
    if out_bn is not None:
        osc, osh = out_bn
        wmat = wmat * osc.reshape(1, oc)              # fold output-BN scale into columns
        oshift = osh.reshape(1, oc).astype(jnp.float32)
    else:
        oshift = jnp.zeros((1, oc), jnp.float32)
    if k_full is not None:
        assert kh == 1 and kw == 1                    # only 1x1 convs read padded buffers
    Kp = _round_up(K if k_full is None else k_full, LANE)
    Np = _round_up(col_offset + oc, LANE)
    w_pad = jnp.zeros((Kp, Np), jnp.float32)
    w_pad = w_pad.at[:K, col_offset:col_offset + oc].set(wmat)
    osh_pad = jnp.zeros((1, Np), jnp.float32)
    osh_pad = osh_pad.at[:, col_offset:col_offset + oc].set(oshift)
    conv = {"w": w_pad.astype(jnp.bfloat16), "oshift": osh_pad}
    if in_bn is not None:
        isc, ish = in_bn
        isc_k = jnp.tile(isc.astype(jnp.float32), kh * kw).reshape(1, K)
        ish_k = jnp.tile(ish.astype(jnp.float32), kh * kw).reshape(1, K)
        conv["iscale"] = jnp.pad(isc_k, ((0, 0), (0, Kp - K)))
        conv["ishift"] = jnp.pad(ish_k, ((0, 0), (0, Kp - K)))
    return conv


def init_params(key):
    counter = [0]

    def nk():
        counter[0] += 1
        return jax.random.fold_in(key, counter[0])

    # --- BasicBlock extractors: block-diagonal combined color(3)+depth(1) convs ---
    def blockdiag(wc, wd):
        w = jnp.zeros((4, 4, 3, 3), jnp.float32)
        return w.at[:3, :3].set(wc).at[3:, 3:].set(wd)

    wc1, wc2 = _he_conv(nk(), 3, 3, 3, 3), _he_conv(nk(), 3, 3, 3, 3)
    wd1, wd2 = _he_conv(nk(), 1, 1, 3, 3), _he_conv(nk(), 1, 1, 3, 3)
    bnc1, bnc2, bnd1, bnd2 = _bn(3), _bn(3), _bn(1), _bn(1)
    bn_a = (jnp.concatenate([bnc1[0], bnd1[0]]), jnp.concatenate([bnc1[1], bnd1[1]]))
    bn_b = (jnp.concatenate([bnc2[0], bnd2[0]]), jnp.concatenate([bnc2[1], bnd2[1]]))
    extractor = {
        "conv_a": _prep_conv(blockdiag(wc1, wd1), 3, 3, out_bn=bn_a),
        "conv_b": _prep_conv(blockdiag(wc2, wd2), 3, 3, out_bn=bn_b),
    }

    # --- DenseNet-121 features with 4-channel conv0; per-block stacked layer weights ---
    dense = {"conv0": _prep_conv(_he_conv(nk(), 64, 4, 7, 7), 7, 7, out_bn=_bn(64))}
    c = INIT_CH
    blocks, transitions = [], []
    for b, n_layers in enumerate(BLOCK_CFG):
        c_final = c + n_layers * GROWTH
        w1s, isc1s, ish1s, osh1s, w2s, osh2s, grps = [], [], [], [], [], [], []
        for _ in range(n_layers):
            norm1, norm2 = _bn(c), _bn(BN_SIZE * GROWTH)
            w1 = _he_conv(nk(), BN_SIZE * GROWTH, c, 1, 1)
            w2 = _he_conv(nk(), GROWTH, BN_SIZE * GROWTH, 3, 3)
            c1 = _prep_conv(w1, 1, 1, out_bn=norm2, in_bn=norm1, k_full=c_final)
            c2 = _prep_conv(w2, 3, 3, col_offset=c % LANE)
            w1s.append(c1["w"]); isc1s.append(c1["iscale"]); ish1s.append(c1["ishift"])
            osh1s.append(c1["oshift"])
            w2s.append(c2["w"]); osh2s.append(c2["oshift"])
            grps.append((c // LANE) * LANE)
            c += GROWTH
        blocks.append({
            "w1": jnp.stack(w1s), "isc1": jnp.stack(isc1s), "ish1": jnp.stack(ish1s),
            "osh1": jnp.stack(osh1s), "w2": jnp.stack(w2s), "osh2": jnp.stack(osh2s),
            "grp": jnp.asarray(grps, jnp.int32),
        })
        if b != len(BLOCK_CFG) - 1:
            transitions.append(
                _prep_conv(_he_conv(nk(), c // 2, c, 1, 1), 1, 1, in_bn=_bn(c)))
            c //= 2
    dense["blocks"] = blocks
    dense["transitions"] = transitions
    sc5, sh5 = _bn(c)                                  # c == 1024
    dense["norm5_scale"], dense["norm5_shift"] = sc5, sh5
    return {"extractor": extractor, "dense": dense}


# ----------------------------------------------------------------------------
if __name__ == "__main__":
    key = jax.random.PRNGKey(0)
    params = init_params(jax.random.fold_in(key, 1000))   # folded/padded/stacked once
    kc, kd = jax.random.split(jax.random.fold_in(key, 0))
    # Smallest spatial size compatible with densenet121's 5 stride-2 stages.
    color = jax.random.normal(kc, (2, 3, 32, 32), dtype=jnp.float32)
    depth = jax.random.normal(kd, (2, 1, 32, 32), dtype=jnp.float32)

    fwd = jax.jit(feature_tunk_push)
    out = jax.block_until_ready(fwd(color, depth, params))

    assert out.shape == (2, 1024, 1, 1), out.shape
    assert bool(jnp.all(jnp.isfinite(out)))
    print("KERNEL_OK")
</pallas_src>

<mosaic_0001>
module attributes {stable_mosaic.version = 11 : i64} {
  func.func @_mm_kernel(%arg0: i32, %arg1: memref<1024x128xbf16, #tpu.memory_space<vmem>>, %arg2: memref<128x128xbf16, #tpu.memory_space<vmem>>, %arg3: memref<1x128xf32, #tpu.memory_space<vmem>>, %arg4: memref<1024x128xbf16, #tpu.memory_space<vmem>>) attributes {dimension_semantics = [#tpu.dimension_semantics<parallel>], iteration_bounds = array<i64: 2>, scalar_prefetch = 0 : i64, scratch_operands = 0 : i64, tpu.core_type = #tpu.core_type<tc>, window_params = [{transform_indices = @transform_0, window_bounds = array<i64: 1024, 128>}, {pipeline_mode = #tpu.pipeline_mode<synchronous>, transform_indices = @transform_1, window_bounds = array<i64: 128, 128>}, {pipeline_mode = #tpu.pipeline_mode<synchronous>, transform_indices = @transform_2, window_bounds = array<i64: 1, 128>}, {transform_indices = @transform_3, window_bounds = array<i64: 1024, 128>}]} {
    %c0 = arith.constant 0 : index
    %c0_0 = arith.constant 0 : index
    %0 = vector.load %arg1[%c0, %c0_0] : memref<1024x128xbf16, #tpu.memory_space<vmem>>, vector<1024x128xbf16>
    %c0_1 = arith.constant 0 : index
    %c0_2 = arith.constant 0 : index
    %1 = vector.load %arg2[%c0_1, %c0_2] : memref<128x128xbf16, #tpu.memory_space<vmem>>, vector<128x128xbf16>
    %cst = arith.constant dense<0.000000e+00> : vector<1024x128xf32>
    %2 = tpu.matmul %0, %1, %cst {dimension_numbers = #tpu.dot_dimension_numbers<[1], [0], [0], [1], [0, 0, 1, 1], [], []>} : vector<1024x128xbf16>, vector<128x128xbf16>, vector<1024x128xf32> -> vector<1024x128xf32>
    %c0_3 = arith.constant 0 : index
    %c0_4 = arith.constant 0 : index
    %3 = vector.load %arg3[%c0_3, %c0_4] : memref<1x128xf32, #tpu.memory_space<vmem>>, vector<1x128xf32>
    %4 = vector.broadcast %3 : vector<1x128xf32> to vector<1024x128xf32>
    %5 = arith.addf %2, %4 : vector<1024x128xf32>
    %cst_5 = arith.constant 0.000000e+00 : f32
    %6 = vector.broadcast %cst_5 : f32 to vector<1024x128xf32>
    %7 = arith.maximumf %5, %6 : vector<1024x128xf32>
    %8 = arith.truncf %7 : vector<1024x128xf32> to vector<1024x128xbf16>
    %c0_6 = arith.constant 0 : index
    %c0_7 = arith.constant 0 : index
    %9 = vector.load %arg4[%c0_6, %c0_7] : memref<1024x128xbf16, #tpu.memory_space<vmem>>, vector<1024x128xbf16>
    tpu.vector_store %arg4[%c0_6, %c0_7], %8 {strides = array<i32>} : memref<1024x128xbf16, #tpu.memory_space<vmem>>, vector<1024x128xbf16>,
    return
  }
  func.func @transform_0(%arg0: i32) -> (i32, i32) {
    %c0_i32 = arith.constant 0 : i32
    %c0_i32_0 = arith.constant 0 : i32
    return %arg0, %c0_i32 : i32, i32
  }
  func.func @transform_1(%arg0: i32) -> (i32, i32) {
    %c0_i32 = arith.constant 0 : i32
    %c0_i32_0 = arith.constant 0 : i32
    %c0_i32_1 = arith.constant 0 : i32
    return %c0_i32, %c0_i32_0 : i32, i32
  }
  func.func @transform_2(%arg0: i32) -> (i32, i32) {
    %c0_i32 = arith.constant 0 : i32
    %c0_i32_0 = arith.constant 0 : i32
    %c0_i32_1 = arith.constant 0 : i32
    return %c0_i32, %c0_i32_0 : i32, i32
  }
  func.func @transform_3(%arg0: i32) -> (i32, i32) {
    %c0_i32 = arith.constant 0 : i32
    %c0_i32_0 = arith.constant 0 : i32
    return %arg0, %c0_i32 : i32, i32
  }
}

module attributes {stable_mosaic.version = 11 : i64} {
  func.func @_mm_kernel(%arg0: i32, %arg1: memref<512x256xbf16, #tpu.memory_space<vmem>>, %arg2: memref<256x128xbf16, #tpu.memory_space<vmem>>, %arg3: memref<1x128xf32, #tpu.memory_space<vmem>>, %arg4: memref<512x128xbf16, #tpu.memory_space<vmem>>) attributes {dimension_semantics = [#tpu.dimension_semantics<parallel>], iteration_bounds = array<i64: 1>, scalar_prefetch = 0 : i64, scratch_operands = 0 : i64, tpu.core_type = #tpu.core_type<tc>, window_params = [{transform_indices = @transform_0, window_bounds = array<i64: 512, 256>}, {pipeline_mode = #tpu.pipeline_mode<synchronous>, transform_indices = @transform_1, window_bounds = array<i64: 256, 128>}, {pipeline_mode = #tpu.pipeline_mode<synchronous>, transform_indices = @transform_2, window_bounds = array<i64: 1, 128>}, {transform_indices = @transform_3, window_bounds = array<i64: 512, 128>}]} {
    %c0 = arith.constant 0 : index
    %c0_0 = arith.constant 0 : index
    %0 = vector.load %arg1[%c0, %c0_0] : memref<512x256xbf16, #tpu.memory_space<vmem>>, vector<512x256xbf16>
    %c0_1 = arith.constant 0 : index
    %c0_2 = arith.constant 0 : index
    %1 = vector.load %arg2[%c0_1, %c0_2] : memref<256x128xbf16, #tpu.memory_space<vmem>>, vector<256x128xbf16>
    %cst = arith.constant dense<0.000000e+00> : vector<512x128xf32>
    %2 = tpu.matmul %0, %1, %cst {dimension_numbers = #tpu.dot_dimension_numbers<[1], [0], [0], [1], [0, 0, 1, 1], [], []>} : vector<512x256xbf16>, vector<256x128xbf16>, vector<512x128xf32> -> vector<512x128xf32>
    %c0_3 = arith.constant 0 : index
    %c0_4 = arith.constant 0 : index
    %3 = vector.load %arg3[%c0_3, %c0_4] : memref<1x128xf32, #tpu.memory_space<vmem>>, vector<1x128xf32>
    %4 = vector.broadcast %3 : vector<1x128xf32> to vector<512x128xf32>
    %5 = arith.addf %2, %4 : vector<512x128xf32>
    %cst_5 = arith.constant 0.000000e+00 : f32
    %6 = vector.broadcast %cst_5 : f32 to vector<512x128xf32>
    %7 = arith.maximumf %5, %6 : vector<512x128xf32>
    %8 = arith.truncf %7 : vector<512x128xf32> to vector<512x128xbf16>
    %c0_6 = arith.constant 0 : index
    %c0_7 = arith.constant 0 : index
    %9 = vector.load %arg4[%c0_6, %c0_7] : memref<512x128xbf16, #tpu.memory_space<vmem>>, vector<512x128xbf16>
    tpu.vector_store %arg4[%c0_6, %c0_7], %8 {strides = array<i32>} : memref<512x128xbf16, #tpu.memory_space<vmem>>, vector<512x128xbf16>,
    return
  }
  func.func @transform_0(%arg0: i32) -> (i32, i32) {
    %c0_i32 = arith.constant 0 : i32
    %c0_i32_0 = arith.constant 0 : i32
    return %arg0, %c0_i32 : i32, i32
  }
  func.func @transform_1(%arg0: i32) -> (i32, i32) {
    %c0_i32 = arith.constant 0 : i32
    %c0_i32_0 = arith.constant 0 : i32
    %c0_i32_1 = arith.constant 0 : i32
    return %c0_i32, %c0_i32_0 : i32, i32
  }
  func.func @transform_2(%arg0: i32) -> (i32, i32) {
    %c0_i32 = arith.constant 0 : i32
    %c0_i32_0 = arith.constant 0 : i32
    %c0_i32_1 = arith.constant 0 : i32
    return %c0_i32, %c0_i32_0 : i32, i32
  }
  func.func @transform_3(%arg0: i32) -> (i32, i32) {
    %c0_i32 = arith.constant 0 : i32
    %c0_i32_0 = arith.constant 0 : i32
    return %arg0, %c0_i32 : i32, i32
  }
}

module attributes {stable_mosaic.version = 11 : i64} {
  func.func @_mm_pro_kernel(%arg0: i32, %arg1: memref<128x256xbf16, #tpu.memory_space<vmem>>, %arg2: memref<256x128xbf16, #tpu.memory_space<vmem>>, %arg3: memref<1x256xf32, #tpu.memory_space<vmem>>, %arg4: memref<1x256xf32, #tpu.memory_space<vmem>>, %arg5: memref<1x128xf32, #tpu.memory_space<vmem>>, %arg6: memref<128x128xbf16, #tpu.memory_space<vmem>>) attributes {dimension_semantics = [#tpu.dimension_semantics<parallel>], iteration_bounds = array<i64: 1>, scalar_prefetch = 0 : i64, scratch_operands = 0 : i64, tpu.core_type = #tpu.core_type<tc>, window_params = [{transform_indices = @transform_0, window_bounds = array<i64: 128, 256>}, {pipeline_mode = #tpu.pipeline_mode<synchronous>, transform_indices = @transform_1, window_bounds = array<i64: 256, 128>}, {pipeline_mode = #tpu.pipeline_mode<synchronous>, transform_indices = @transform_2, window_bounds = array<i64: 1, 256>}, {pipeline_mode = #tpu.pipeline_mode<synchronous>, transform_indices = @transform_3, window_bounds = array<i64: 1, 256>}, {pipeline_mode = #tpu.pipeline_mode<synchronous>, transform_indices = @transform_4, window_bounds = array<i64: 1, 128>}, {transform_indices = @transform_5, window_bounds = array<i64: 128, 128>}]} {
    %c0 = arith.constant 0 : index
    %c0_0 = arith.constant 0 : index
    %0 = vector.load %arg1[%c0, %c0_0] : memref<128x256xbf16, #tpu.memory_space<vmem>>, vector<128x256xbf16>
    %1 = arith.extf %0 : vector<128x256xbf16> to vector<128x256xf32>
    %c0_1 = arith.constant 0 : index
    %c0_2 = arith.constant 0 : index
    %2 = vector.load %arg3[%c0_1, %c0_2] : memref<1x256xf32, #tpu.memory_space<vmem>>, vector<1x256xf32>
    %3 = vector.broadcast %2 : vector<1x256xf32> to vector<128x256xf32>
    %4 = arith.mulf %1, %3 : vector<128x256xf32>
    %c0_3 = arith.constant 0 : index
    %c0_4 = arith.constant 0 : index
    %5 = vector.load %arg4[%c0_3, %c0_4] : memref<1x256xf32, #tpu.memory_space<vmem>>, vector<1x256xf32>
    %6 = vector.broadcast %5 : vector<1x256xf32> to vector<128x256xf32>
    %7 = arith.addf %4, %6 : vector<128x256xf32>
    %cst = arith.constant 0.000000e+00 : f32
    %8 = vector.broadcast %cst : f32 to vector<128x256xf32>
    %9 = arith.maximumf %7, %8 : vector<128x256xf32>
    %10 = arith.truncf %9 : vector<128x256xf32> to vector<128x256xbf16>
    %c0_5 = arith.constant 0 : index
    %c0_6 = arith.constant 0 : index
    %11 = vector.load %arg2[%c0_5, %c0_6] : memref<256x128xbf16, #tpu.memory_space<vmem>>, vector<256x128xbf16>
    %cst_7 = arith.constant dense<0.000000e+00> : vector<128x128xf32>
    %12 = tpu.matmul %10, %11, %cst_7 {dimension_numbers = #tpu.dot_dimension_numbers<[1], [0], [0], [1], [0, 0, 1, 1], [], []>} : vector<128x256xbf16>, vector<256x128xbf16>, vector<128x128xf32> -> vector<128x128xf32>
    %c0_8 = arith.constant 0 : index
    %c0_9 = arith.constant 0 : index
    %13 = vector.load %arg5[%c0_8, %c0_9] : memref<1x128xf32, #tpu.memory_space<vmem>>, vector<1x128xf32>
    %14 = vector.broadcast %13 : vector<1x128xf32> to vector<128x128xf32>
    %15 = arith.addf %12, %14 : vector<128x128xf32>
    %cst_10 = arith.constant 0.000000e+00 : f32
    %16 = vector.broadcast %cst_10 : f32 to vector<128x128xf32>
    %17 = arith.maximumf %15, %16 : vector<128x128xf32>
    %18 = arith.truncf %17 : vector<128x128xf32> to vector<128x128xbf16>
    %c0_11 = arith.constant 0 : index
    %c0_12 = arith.constant 0 : index
    %19 = vector.load %arg6[%c0_11, %c0_12] : memref<128x128xbf16, #tpu.memory_space<vmem>>, vector<128x128xbf16>
    tpu.vector_store %arg6[%c0_11, %c0_12], %18 {strides = array<i32>} : memref<128x128xbf16, #tpu.memory_space<vmem>>, vector<128x128xbf16>,
    return
  }
  func.func @transform_0(%arg0: i32) -> (i32, i32) {
    %c0_i32 = arith.constant 0 : i32
    %c0_i32_0 = arith.constant 0 : i32
    return %arg0, %c0_i32 : i32, i32
  }
  func.func @transform_1(%arg0: i32) -> (i32, i32) {
    %c0_i32 = arith.constant 0 : i32
    %c0_i32_0 = arith.constant 0 : i32
    %c0_i32_1 = arith.constant 0 : i32
    return %c0_i32, %c0_i32_0 : i32, i32
  }
  func.func @transform_2(%arg0: i32) -> (i32, i32) {
    %c0_i32 = arith.constant 0 : i32
    %c0_i32_0 = arith.constant 0 : i32
    %c0_i32_1 = arith.constant 0 : i32
    return %c0_i32, %c0_i32_0 : i32, i32
  }
  func.func @transform_3(%arg0: i32) -> (i32, i32) {
    %c0_i32 = arith.constant 0 : i32
    %c0_i32_0 = arith.constant 0 : i32
    %c0_i32_1 = arith.constant 0 : i32
    return %c0_i32, %c0_i32_0 : i32, i32
  }
  func.func @transform_4(%arg0: i32) -> (i32, i32) {
    %c0_i32 = arith.constant 0 : i32
    %c0_i32_0 = arith.constant 0 : i32
    %c0_i32_1 = arith.constant 0 : i32
    return %c0_i32, %c0_i32_0 : i32, i32
  }
  func.func @transform_5(%arg0: i32) -> (i32, i32) {
    %c0_i32 = arith.constant 0 : i32
    %c0_i32_0 = arith.constant 0 : i32
    return %arg0, %c0_i32 : i32, i32
  }
}

module attributes {stable_mosaic.version = 11 : i64} {
  func.func @_mm_kernel(%arg0: i32, %arg1: memref<128x1152xbf16, #tpu.memory_space<vmem>>, %arg2: memref<1152x128xbf16, #tpu.memory_space<vmem>>, %arg3: memref<1x128xf32, #tpu.memory_space<vmem>>, %arg4: memref<128x128xbf16, #tpu.memory_space<vmem>>) attributes {dimension_semantics = [#tpu.dimension_semantics<parallel>], iteration_bounds = array<i64: 1>, scalar_prefetch = 0 : i64, scratch_operands = 0 : i64, tpu.core_type = #tpu.core_type<tc>, window_params = [{transform_indices = @transform_0, window_bounds = array<i64: 128, 1152>}, {pipeline_mode = #tpu.pipeline_mode<synchronous>, transform_indices = @transform_1, window_bounds = array<i64: 1152, 128>}, {pipeline_mode = #tpu.pipeline_mode<synchronous>, transform_indices = @transform_2, window_bounds = array<i64: 1, 128>}, {transform_indices = @transform_3, window_bounds = array<i64: 128, 128>}]} {
    %c0 = arith.constant 0 : index
    %c0_0 = arith.constant 0 : index
    %0 = vector.load %arg1[%c0, %c0_0] : memref<128x1152xbf16, #tpu.memory_space<vmem>>, vector<128x1152xbf16>
    %c0_1 = arith.constant 0 : index
    %c0_2 = arith.constant 0 : index
    %1 = vector.load %arg2[%c0_1, %c0_2] : memref<1152x128xbf16, #tpu.memory_space<vmem>>, vector<1152x128xbf16>
    %cst = arith.constant dense<0.000000e+00> : vector<128x128xf32>
    %2 = tpu.matmul %0, %1, %cst {dimension_numbers = #tpu.dot_dimension_numbers<[1], [0], [0], [1], [0, 0, 1, 1], [], []>} : vector<128x1152xbf16>, vector<1152x128xbf16>, vector<128x128xf32> -> vector<128x128xf32>
    %c0_3 = arith.constant 0 : index
    %c0_4 = arith.constant 0 : index
    %3 = vector.load %arg3[%c0_3, %c0_4] : memref<1x128xf32, #tpu.memory_space<vmem>>, vector<1x128xf32>
    %4 = vector.broadcast %3 : vector<1x128xf32> to vector<128x128xf32>
    %5 = arith.addf %2, %4 : vector<128x128xf32>
    %6 = arith.truncf %5 : vector<128x128xf32> to vector<128x128xbf16>
    %c0_5 = arith.constant 0 : index
    %c0_6 = arith.constant 0 : index
    %7 = vector.load %arg4[%c0_5, %c0_6] : memref<128x128xbf16, #tpu.memory_space<vmem>>, vector<128x128xbf16>
    tpu.vector_store %arg4[%c0_5, %c0_6], %6 {strides = array<i32>} : memref<128x128xbf16, #tpu.memory_space<vmem>>, vector<128x128xbf16>,
    return
  }
  func.func @transform_0(%arg0: i32) -> (i32, i32) {
    %c0_i32 = arith.constant 0 : i32
    %c0_i32_0 = arith.constant 0 : i32
    return %arg0, %c0_i32 : i32, i32
  }
  func.func @transform_1(%arg0: i32) -> (i32, i32) {
    %c0_i32 = arith.constant 0 : i32
    %c0_i32_0 = arith.constant 0 : i32
    %c0_i32_1 = arith.constant 0 : i32
    return %c0_i32, %c0_i32_0 : i32, i32
  }
  func.func @transform_2(%arg0: i32) -> (i32, i32) {
    %c0_i32 = arith.constant 0 : i32
    %c0_i32_0 = arith.constant 0 : i32
    %c0_i32_1 = arith.constant 0 : i32
    return %c0_i32, %c0_i32_0 : i32, i32
  }
  func.func @transform_3(%arg0: i32) -> (i32, i32) {
    %c0_i32 = arith.constant 0 : i32
    %c0_i32_0 = arith.constant 0 : i32
    return %arg0, %c0_i32 : i32, i32
  }
}

module attributes {stable_mosaic.version = 11 : i64} {
  func.func @_mm_pro_kernel(%arg0: i32, %arg1: memref<128x256xbf16, #tpu.memory_space<vmem>>, %arg2: memref<256x128xbf16, #tpu.memory_space<vmem>>, %arg3: memref<1x256xf32, #tpu.memory_space<vmem>>, %arg4: memref<1x256xf32, #tpu.memory_space<vmem>>, %arg5: memref<1x128xf32, #tpu.memory_space<vmem>>, %arg6: memref<128x128xbf16, #tpu.memory_space<vmem>>) attributes {dimension_semantics = [#tpu.dimension_semantics<parallel>], iteration_bounds = array<i64: 1>, scalar_prefetch = 0 : i64, scratch_operands = 0 : i64, tpu.core_type = #tpu.core_type<tc>, window_params = [{transform_indices = @transform_0, window_bounds = array<i64: 128, 256>}, {pipeline_mode = #tpu.pipeline_mode<synchronous>, transform_indices = @transform_1, window_bounds = array<i64: 256, 128>}, {pipeline_mode = #tpu.pipeline_mode<synchronous>, transform_indices = @transform_2, window_bounds = array<i64: 1, 256>}, {pipeline_mode = #tpu.pipeline_mode<synchronous>, transform_indices = @transform_3, window_bounds = array<i64: 1, 256>}, {pipeline_mode = #tpu.pipeline_mode<synchronous>, transform_indices = @transform_4, window_bounds = array<i64: 1, 128>}, {transform_indices = @transform_5, window_bounds = array<i64: 128, 128>}]} {
    %c0 = arith.constant 0 : index
    %c0_0 = arith.constant 0 : index
    %0 = vector.load %arg1[%c0, %c0_0] : memref<128x256xbf16, #tpu.memory_space<vmem>>, vector<128x256xbf16>
    %1 = arith.extf %0 : vector<128x256xbf16> to vector<128x256xf32>
    %c0_1 = arith.constant 0 : index
    %c0_2 = arith.constant 0 : index
    %2 = vector.load %arg3[%c0_1, %c0_2] : memref<1x256xf32, #tpu.memory_space<vmem>>, vector<1x256xf32>
    %3 = vector.broadcast %2 : vector<1x256xf32> to vector<128x256xf32>
    %4 = arith.mulf %1, %3 : vector<128x256xf32>
    %c0_3 = arith.constant 0 : index
    %c0_4 = arith.constant 0 : index
    %5 = vector.load %arg4[%c0_3, %c0_4] : memref<1x256xf32, #tpu.memory_space<vmem>>, vector<1x256xf32>
    %6 = vector.broadcast %5 : vector<1x256xf32> to vector<128x256xf32>
    %7 = arith.addf %4, %6 : vector<128x256xf32>
    %cst = arith.constant 0.000000e+00 : f32
    %8 = vector.broadcast %cst : f32 to vector<128x256xf32>
    %9 = arith.maximumf %7, %8 : vector<128x256xf32>
    %10 = arith.truncf %9 : vector<128x256xf32> to vector<128x256xbf16>
    %c0_5 = arith.constant 0 : index
    %c0_6 = arith.constant 0 : index
    %11 = vector.load %arg2[%c0_5, %c0_6] : memref<256x128xbf16, #tpu.memory_space<vmem>>, vector<256x128xbf16>
    %cst_7 = arith.constant dense<0.000000e+00> : vector<128x128xf32>
    %12 = tpu.matmul %10, %11, %cst_7 {dimension_numbers = #tpu.dot_dimension_numbers<[1], [0], [0], [1], [0, 0, 1, 1], [], []>} : vector<128x256xbf16>, vector<256x128xbf16>, vector<128x128xf32> -> vector<128x128xf32>
    %c0_8 = arith.constant 0 : index
    %c0_9 = arith.constant 0 : index
    %13 = vector.load %arg5[%c0_8, %c0_9] : memref<1x128xf32, #tpu.memory_space<vmem>>, vector<1x128xf32>
    %14 = vector.broadcast %13 : vector<1x128xf32> to vector<128x128xf32>
    %15 = arith.addf %12, %14 : vector<128x128xf32>
    %16 = arith.truncf %15 : vector<128x128xf32> to vector<128x128xbf16>
    %c0_10 = arith.constant 0 : index
    %c0_11 = arith.constant 0 : index
    %17 = vector.load %arg6[%c0_10, %c0_11] : memref<128x128xbf16, #tpu.memory_space<vmem>>, vector<128x128xbf16>
    tpu.vector_store %arg6[%c0_10, %c0_11], %16 {strides = array<i32>} : memref<128x128xbf16, #tpu.memory_space<vmem>>, vector<128x128xbf16>,
    return
  }
  func.func @transform_0(%arg0: i32) -> (i32, i32) {
    %c0_i32 = arith.constant 0 : i32
    %c0_i32_0 = arith.constant 0 : i32
    return %arg0, %c0_i32 : i32, i32
  }
  func.func @transform_1(%arg0: i32) -> (i32, i32) {
    %c0_i32 = arith.constant 0 : i32
    %c0_i32_0 = arith.constant 0 : i32
    %c0_i32_1 = arith.constant 0 : i32
    return %c0_i32, %c0_i32_0 : i32, i32
  }
  func.func @transform_2(%arg0: i32) -> (i32, i32) {
    %c0_i32 = arith.constant 0 : i32
    %c0_i32_0 = arith.constant 0 : i32
    %c0_i32_1 = arith.constant 0 : i32
    return %c0_i32, %c0_i32_0 : i32, i32
  }
  func.func @transform_3(%arg0: i32) -> (i32, i32) {
    %c0_i32 = arith.constant 0 : i32
    %c0_i32_0 = arith.constant 0 : i32
    %c0_i32_1 = arith.constant 0 : i32
    return %c0_i32, %c0_i32_0 : i32, i32
  }
  func.func @transform_4(%arg0: i32) -> (i32, i32) {
    %c0_i32 = arith.constant 0 : i32
    %c0_i32_0 = arith.constant 0 : i32
    %c0_i32_1 = arith.constant 0 : i32
    return %c0_i32, %c0_i32_0 : i32, i32
  }
  func.func @transform_5(%arg0: i32) -> (i32, i32) {
    %c0_i32 = arith.constant 0 : i32
    %c0_i32_0 = arith.constant 0 : i32
    return %arg0, %c0_i32 : i32, i32
  }
}

module attributes {stable_mosaic.version = 11 : i64} {
  func.func @_mm_pro_kernel(%arg0: i32, %arg1: memref<32x512xbf16, #tpu.memory_space<vmem>>, %arg2: memref<512x128xbf16, #tpu.memory_space<vmem>>, %arg3: memref<1x512xf32, #tpu.memory_space<vmem>>, %arg4: memref<1x512xf32, #tpu.memory_space<vmem>>, %arg5: memref<1x128xf32, #tpu.memory_space<vmem>>, %arg6: memref<32x128xbf16, #tpu.memory_space<vmem>>) attributes {dimension_semantics = [#tpu.dimension_semantics<parallel>], iteration_bounds = array<i64: 1>, scalar_prefetch = 0 : i64, scratch_operands = 0 : i64, tpu.core_type = #tpu.core_type<tc>, window_params = [{transform_indices = @transform_0, window_bounds = array<i64: 32, 512>}, {pipeline_mode = #tpu.pipeline_mode<synchronous>, transform_indices = @transform_1, window_bounds = array<i64: 512, 128>}, {pipeline_mode = #tpu.pipeline_mode<synchronous>, transform_indices = @transform_2, window_bounds = array<i64: 1, 512>}, {pipeline_mode = #tpu.pipeline_mode<synchronous>, transform_indices = @transform_3, window_bounds = array<i64: 1, 512>}, {pipeline_mode = #tpu.pipeline_mode<synchronous>, transform_indices = @transform_4, window_bounds = array<i64: 1, 128>}, {transform_indices = @transform_5, window_bounds = array<i64: 32, 128>}]} {
    %c0 = arith.constant 0 : index
    %c0_0 = arith.constant 0 : index
    %0 = vector.load %arg1[%c0, %c0_0] : memref<32x512xbf16, #tpu.memory_space<vmem>>, vector<32x512xbf16>
    %1 = arith.extf %0 : vector<32x512xbf16> to vector<32x512xf32>
    %c0_1 = arith.constant 0 : index
    %c0_2 = arith.constant 0 : index
    %2 = vector.load %arg3[%c0_1, %c0_2] : memref<1x512xf32, #tpu.memory_space<vmem>>, vector<1x512xf32>
    %3 = vector.broadcast %2 : vector<1x512xf32> to vector<32x512xf32>
    %4 = arith.mulf %1, %3 : vector<32x512xf32>
    %c0_3 = arith.constant 0 : index
    %c0_4 = arith.constant 0 : index
    %5 = vector.load %arg4[%c0_3, %c0_4] : memref<1x512xf32, #tpu.memory_space<vmem>>, vector<1x512xf32>
    %6 = vector.broadcast %5 : vector<1x512xf32> to vector<32x512xf32>
    %7 = arith.addf %4, %6 : vector<32x512xf32>
    %cst = arith.constant 0.000000e+00 : f32
    %8 = vector.broadcast %cst : f32 to vector<32x512xf32>
    %9 = arith.maximumf %7, %8 : vector<32x512xf32>
    %10 = arith.truncf %9 : vector<32x512xf32> to vector<32x512xbf16>
    %c0_5 = arith.constant 0 : index
    %c0_6 = arith.constant 0 : index
    %11 = vector.load %arg2[%c0_5, %c0_6] : memref<512x128xbf16, #tpu.memory_space<vmem>>, vector<512x128xbf16>
    %cst_7 = arith.constant dense<0.000000e+00> : vector<32x128xf32>
    %12 = tpu.matmul %10, %11, %cst_7 {dimension_numbers = #tpu.dot_dimension_numbers<[1], [0], [0], [1], [0, 0, 1, 1], [], []>} : vector<32x512xbf16>, vector<512x128xbf16>, vector<32x128xf32> -> vector<32x128xf32>
    %c0_8 = arith.constant 0 : index
    %c0_9 = arith.constant 0 : index
    %13 = vector.load %arg5[%c0_8, %c0_9] : memref<1x128xf32, #tpu.memory_space<vmem>>, vector<1x128xf32>
    %14 = vector.broadcast %13 : vector<1x128xf32> to vector<32x128xf32>
    %15 = arith.addf %12, %14 : vector<32x128xf32>
    %cst_10 = arith.constant 0.000000e+00 : f32
    %16 = vector.broadcast %cst_10 : f32 to vector<32x128xf32>
    %17 = arith.maximumf %15, %16 : vector<32x128xf32>
    %18 = arith.truncf %17 : vector<32x128xf32> to vector<32x128xbf16>
    %c0_11 = arith.constant 0 : index
    %c0_12 = arith.constant 0 : index
    %19 = vector.load %arg6[%c0_11, %c0_12] : memref<32x128xbf16, #tpu.memory_space<vmem>>, vector<32x128xbf16>
    tpu.vector_store %arg6[%c0_11, %c0_12], %18 {strides = array<i32>} : memref<32x128xbf16, #tpu.memory_space<vmem>>, vector<32x128xbf16>,
    return
  }
  func.func @transform_0(%arg0: i32) -> (i32, i32) {
    %c0_i32 = arith.constant 0 : i32
    %c0_i32_0 = arith.constant 0 : i32
    return %arg0, %c0_i32 : i32, i32
  }
  func.func @transform_1(%arg0: i32) -> (i32, i32) {
    %c0_i32 = arith.constant 0 : i32
    %c0_i32_0 = arith.constant 0 : i32
    %c0_i32_1 = arith.constant 0 : i32
    return %c0_i32, %c0_i32_0 : i32, i32
  }
  func.func @transform_2(%arg0: i32) -> (i32, i32) {
    %c0_i32 = arith.constant 0 : i32
    %c0_i32_0 = arith.constant 0 : i32
    %c0_i32_1 = arith.constant 0 : i32
    return %c0_i32, %c0_i32_0 : i32, i32
  }
  func.func @transform_3(%arg0: i32) -> (i32, i32) {
    %c0_i32 = arith.constant 0 : i32
    %c0_i32_0 = arith.constant 0 : i32
    %c0_i32_1 = arith.constant 0 : i32
    return %c0_i32, %c0_i32_0 : i32, i32
  }
  func.func @transform_4(%arg0: i32) -> (i32, i32) {
    %c0_i32 = arith.constant 0 : i32
    %c0_i32_0 = arith.constant 0 : i32
    %c0_i32_1 = arith.constant 0 : i32
    return %c0_i32, %c0_i32_0 : i32, i32
  }
  func.func @transform_5(%arg0: i32) -> (i32, i32) {
    %c0_i32 = arith.constant 0 : i32
    %c0_i32_0 = arith.constant 0 : i32
    return %arg0, %c0_i32 : i32, i32
  }
}

module attributes {stable_mosaic.version = 11 : i64} {
  func.func @_mm_kernel(%arg0: i32, %arg1: memref<32x1152xbf16, #tpu.memory_space<vmem>>, %arg2: memref<1152x128xbf16, #tpu.memory_space<vmem>>, %arg3: memref<1x128xf32, #tpu.memory_space<vmem>>, %arg4: memref<32x128xbf16, #tpu.memory_space<vmem>>) attributes {dimension_semantics = [#tpu.dimension_semantics<parallel>], iteration_bounds = array<i64: 1>, scalar_prefetch = 0 : i64, scratch_operands = 0 : i64, tpu.core_type = #tpu.core_type<tc>, window_params = [{transform_indices = @transform_0, window_bounds = array<i64: 32, 1152>}, {pipeline_mode = #tpu.pipeline_mode<synchronous>, transform_indices = @transform_1, window_bounds = array<i64: 1152, 128>}, {pipeline_mode = #tpu.pipeline_mode<synchronous>, transform_indices = @transform_2, window_bounds = array<i64: 1, 128>}, {transform_indices = @transform_3, window_bounds = array<i64: 32, 128>}]} {
    %c0 = arith.constant 0 : index
    %c0_0 = arith.constant 0 : index
    %0 = vector.load %arg1[%c0, %c0_0] : memref<32x1152xbf16, #tpu.memory_space<vmem>>, vector<32x1152xbf16>
    %c0_1 = arith.constant 0 : index
    %c0_2 = arith.constant 0 : index
    %1 = vector.load %arg2[%c0_1, %c0_2] : memref<1152x128xbf16, #tpu.memory_space<vmem>>, vector<1152x128xbf16>
    %cst = arith.constant dense<0.000000e+00> : vector<32x128xf32>
    %2 = tpu.matmul %0, %1, %cst {dimension_numbers = #tpu.dot_dimension_numbers<[1], [0], [0], [1], [0, 0, 1, 1], [], []>} : vector<32x1152xbf16>, vector<1152x128xbf16>, vector<32x128xf32> -> vector<32x128xf32>
    %c0_3 = arith.constant 0 : index
    %c0_4 = arith.constant 0 : index
    %3 = vector.load %arg3[%c0_3, %c0_4] : memref<1x128xf32, #tpu.memory_space<vmem>>, vector<1x128xf32>
    %4 = vector.broadcast %3 : vector<1x128xf32> to vector<32x128xf32>
    %5 = arith.addf %2, %4 : vector<32x128xf32>
    %6 = arith.truncf %5 : vector<32x128xf32> to vector<32x128xbf16>
    %c0_5 = arith.constant 0 : index
    %c0_6 = arith.constant 0 : index
    %7 = vector.load %arg4[%c0_5, %c0_6] : memref<32x128xbf16, #tpu.memory_space<vmem>>, vector<32x128xbf16>
    tpu.vector_store %arg4[%c0_5, %c0_6], %6 {strides = array<i32>} : memref<32x128xbf16, #tpu.memory_space<vmem>>, vector<32x128xbf16>,
    return
  }
  func.func @transform_0(%arg0: i32) -> (i32, i32) {
    %c0_i32 = arith.constant 0 : i32
    %c0_i32_0 = arith.constant 0 : i32
    return %arg0, %c0_i32 : i32, i32
  }
  func.func @transform_1(%arg0: i32) -> (i32, i32) {
    %c0_i32 = arith.constant 0 : i32
    %c0_i32_0 = arith.constant 0 : i32
    %c0_i32_1 = arith.constant 0 : i32
    return %c0_i32, %c0_i32_0 : i32, i32
  }
  func.func @transform_2(%arg0: i32) -> (i32, i32) {
    %c0_i32 = arith.constant 0 : i32
    %c0_i32_0 = arith.constant 0 : i32
    %c0_i32_1 = arith.constant 0 : i32
    return %c0_i32, %c0_i32_0 : i32, i32
  }
  func.func @transform_3(%arg0: i32) -> (i32, i32) {
    %c0_i32 = arith.constant 0 : i32
    %c0_i32_0 = arith.constant 0 : i32
    return %arg0, %c0_i32 : i32, i32
  }
}

module attributes {stable_mosaic.version = 11 : i64} {
  func.func @_mm_pro_kernel(%arg0: i32, %arg1: memref<32x512xbf16, #tpu.memory_space<vmem>>, %arg2: memref<512x256xbf16, #tpu.memory_space<vmem>>, %arg3: memref<1x512xf32, #tpu.memory_space<vmem>>, %arg4: memref<1x512xf32, #tpu.memory_space<vmem>>, %arg5: memref<1x256xf32, #tpu.memory_space<vmem>>, %arg6: memref<32x256xbf16, #tpu.memory_space<vmem>>) attributes {dimension_semantics = [#tpu.dimension_semantics<parallel>], iteration_bounds = array<i64: 1>, scalar_prefetch = 0 : i64, scratch_operands = 0 : i64, tpu.core_type = #tpu.core_type<tc>, window_params = [{transform_indices = @transform_0, window_bounds = array<i64: 32, 512>}, {pipeline_mode = #tpu.pipeline_mode<synchronous>, transform_indices = @transform_1, window_bounds = array<i64: 512, 256>}, {pipeline_mode = #tpu.pipeline_mode<synchronous>, transform_indices = @transform_2, window_bounds = array<i64: 1, 512>}, {pipeline_mode = #tpu.pipeline_mode<synchronous>, transform_indices = @transform_3, window_bounds = array<i64: 1, 512>}, {pipeline_mode = #tpu.pipeline_mode<synchronous>, transform_indices = @transform_4, window_bounds = array<i64: 1, 256>}, {transform_indices = @transform_5, window_bounds = array<i64: 32, 256>}]} {
    %c0 = arith.constant 0 : index
    %c0_0 = arith.constant 0 : index
    %0 = vector.load %arg1[%c0, %c0_0] : memref<32x512xbf16, #tpu.memory_space<vmem>>, vector<32x512xbf16>
    %1 = arith.extf %0 : vector<32x512xbf16> to vector<32x512xf32>
    %c0_1 = arith.constant 0 : index
    %c0_2 = arith.constant 0 : index
    %2 = vector.load %arg3[%c0_1, %c0_2] : memref<1x512xf32, #tpu.memory_space<vmem>>, vector<1x512xf32>
    %3 = vector.broadcast %2 : vector<1x512xf32> to vector<32x512xf32>
    %4 = arith.mulf %1, %3 : vector<32x512xf32>
    %c0_3 = arith.constant 0 : index
    %c0_4 = arith.constant 0 : index
    %5 = vector.load %arg4[%c0_3, %c0_4] : memref<1x512xf32, #tpu.memory_space<vmem>>, vector<1x512xf32>
    %6 = vector.broadcast %5 : vector<1x512xf32> to vector<32x512xf32>
    %7 = arith.addf %4, %6 : vector<32x512xf32>
    %cst = arith.constant 0.000000e+00 : f32
    %8 = vector.broadcast %cst : f32 to vector<32x512xf32>
    %9 = arith.maximumf %7, %8 : vector<32x512xf32>
    %10 = arith.truncf %9 : vector<32x512xf32> to vector<32x512xbf16>
    %c0_5 = arith.constant 0 : index
    %c0_6 = arith.constant 0 : index
    %11 = vector.load %arg2[%c0_5, %c0_6] : memref<512x256xbf16, #tpu.memory_space<vmem>>, vector<512x256xbf16>
    %cst_7 = arith.constant dense<0.000000e+00> : vector<32x256xf32>
    %12 = tpu.matmul %10, %11, %cst_7 {dimension_numbers = #tpu.dot_dimension_numbers<[1], [0], [0], [1], [0, 0, 1, 1], [], []>} : vector<32x512xbf16>, vector<512x256xbf16>, vector<32x256xf32> -> vector<32x256xf32>
    %c0_8 = arith.constant 0 : index
    %c0_9 = arith.constant 0 : index
    %13 = vector.load %arg5[%c0_8, %c0_9] : memref<1x256xf32, #tpu.memory_space<vmem>>, vector<1x256xf32>
    %14 = vector.broadcast %13 : vector<1x256xf32> to vector<32x256xf32>
    %15 = arith.addf %12, %14 : vector<32x256xf32>
    %16 = arith.truncf %15 : vector<32x256xf32> to vector<32x256xbf16>
    %c0_10 = arith.constant 0 : index
    %c0_11 = arith.constant 0 : index
    %17 = vector.load %arg6[%c0_10, %c0_11] : memref<32x256xbf16, #tpu.memory_space<vmem>>, vector<32x256xbf16>
    tpu.vector_store %arg6[%c0_10, %c0_11], %16 {strides = array<i32>} : memref<32x256xbf16, #tpu.memory_space<vmem>>, vector<32x256xbf16>,
    return
  }
  func.func @transform_0(%arg0: i32) -> (i32, i32) {
    %c0_i32 = arith.constant 0 : i32
    %c0_i32_0 = arith.constant 0 : i32
    return %arg0, %c0_i32 : i32, i32
  }
  func.func @transform_1(%arg0: i32) -> (i32, i32) {
    %c0_i32 = arith.constant 0 : i32
    %c0_i32_0 = arith.constant 0 : i32
    %c0_i32_1 = arith.constant 0 : i32
    return %c0_i32, %c0_i32_0 : i32, i32
  }
  func.func @transform_2(%arg0: i32) -> (i32, i32) {
    %c0_i32 = arith.constant 0 : i32
    %c0_i32_0 = arith.constant 0 : i32
    %c0_i32_1 = arith.constant 0 : i32
    return %c0_i32, %c0_i32_0 : i32, i32
  }
  func.func @transform_3(%arg0: i32) -> (i32, i32) {
    %c0_i32 = arith.constant 0 : i32
    %c0_i32_0 = arith.constant 0 : i32
    %c0_i32_1 = arith.constant 0 : i32
    return %c0_i32, %c0_i32_0 : i32, i32
  }
  func.func @transform_4(%arg0: i32) -> (i32, i32) {
    %c0_i32 = arith.constant 0 : i32
    %c0_i32_0 = arith.constant 0 : i32
    %c0_i32_1 = arith.constant 0 : i32
    return %c0_i32, %c0_i32_0 : i32, i32
  }
  func.func @transform_5(%arg0: i32) -> (i32, i32) {
    %c0_i32 = arith.constant 0 : i32
    %c0_i32_0 = arith.constant 0 : i32
    return %arg0, %c0_i32 : i32, i32
  }
}

module attributes {stable_mosaic.version = 11 : i64} {
  func.func @_mm_pro_kernel(%arg0: i32, %arg1: memref<16x1024xbf16, #tpu.memory_space<vmem>>, %arg2: memref<1024x128xbf16, #tpu.memory_space<vmem>>, %arg3: memref<1x1024xf32, #tpu.memory_space<vmem>>, %arg4: memref<1x1024xf32, #tpu.memory_space<vmem>>, %arg5: memref<1x128xf32, #tpu.memory_space<vmem>>, %arg6: memref<16x128xbf16, #tpu.memory_space<vmem>>) attributes {dimension_semantics = [#tpu.dimension_semantics<parallel>], iteration_bounds = array<i64: 1>, scalar_prefetch = 0 : i64, scratch_operands = 0 : i64, tpu.core_type = #tpu.core_type<tc>, window_params = [{transform_indices = @transform_0, window_bounds = array<i64: 16, 1024>}, {pipeline_mode = #tpu.pipeline_mode<synchronous>, transform_indices = @transform_1, window_bounds = array<i64: 1024, 128>}, {pipeline_mode = #tpu.pipeline_mode<synchronous>, transform_indices = @transform_2, window_bounds = array<i64: 1, 1024>}, {pipeline_mode = #tpu.pipeline_mode<synchronous>, transform_indices = @transform_3, window_bounds = array<i64: 1, 1024>}, {pipeline_mode = #tpu.pipeline_mode<synchronous>, transform_indices = @transform_4, window_bounds = array<i64: 1, 128>}, {transform_indices = @transform_5, window_bounds = array<i64: 16, 128>}]} {
    %c0 = arith.constant 0 : index
    %c0_0 = arith.constant 0 : index
    %0 = vector.load %arg1[%c0, %c0_0] : memref<16x1024xbf16, #tpu.memory_space<vmem>>, vector<16x1024xbf16>
    %1 = arith.extf %0 : vector<16x1024xbf16> to vector<16x1024xf32>
    %c0_1 = arith.constant 0 : index
    %c0_2 = arith.constant 0 : index
    %2 = vector.load %arg3[%c0_1, %c0_2] : memref<1x1024xf32, #tpu.memory_space<vmem>>, vector<1x1024xf32>
    %3 = vector.broadcast %2 : vector<1x1024xf32> to vector<16x1024xf32>
    %4 = arith.mulf %1, %3 : vector<16x1024xf32>
    %c0_3 = arith.constant 0 : index
    %c0_4 = arith.constant 0 : index
    %5 = vector.load %arg4[%c0_3, %c0_4] : memref<1x1024xf32, #tpu.memory_space<vmem>>, vector<1x1024xf32>
    %6 = vector.broadcast %5 : vector<1x1024xf32> to vector<16x1024xf32>
    %7 = arith.addf %4, %6 : vector<16x1024xf32>
    %cst = arith.constant 0.000000e+00 : f32
    %8 = vector.broadcast %cst : f32 to vector<16x1024xf32>
    %9 = arith.maximumf %7, %8 : vector<16x1024xf32>
    %10 = arith.truncf %9 : vector<16x1024xf32> to vector<16x1024xbf16>
    %c0_5 = arith.constant 0 : index
    %c0_6 = arith.constant 0 : index
    %11 = vector.load %arg2[%c0_5, %c0_6] : memref<1024x128xbf16, #tpu.memory_space<vmem>>, vector<1024x128xbf16>
    %cst_7 = arith.constant dense<0.000000e+00> : vector<16x128xf32>
    %12 = tpu.matmul %10, %11, %cst_7 {dimension_numbers = #tpu.dot_dimension_numbers<[1], [0], [0], [1], [0, 0, 1, 1], [], []>} : vector<16x1024xbf16>, vector<1024x128xbf16>, vector<16x128xf32> -> vector<16x128xf32>
    %c0_8 = arith.constant 0 : index
    %c0_9 = arith.constant 0 : index
    %13 = vector.load %arg5[%c0_8, %c0_9] : memref<1x128xf32, #tpu.memory_space<vmem>>, vector<1x128xf32>
    %14 = vector.broadcast %13 : vector<1x128xf32> to vector<16x128xf32>
    %15 = arith.addf %12, %14 : vector<16x128xf32>
    %cst_10 = arith.constant 0.000000e+00 : f32
    %16 = vector.broadcast %cst_10 : f32 to vector<16x128xf32>
    %17 = arith.maximumf %15, %16 : vector<16x128xf32>
    %18 = arith.truncf %17 : vector<16x128xf32> to vector<16x128xbf16>
    %c0_11 = arith.constant 0 : index
    %c0_12 = arith.constant 0 : index
    %19 = vector.load %arg6[%c0_11, %c0_12] : memref<16x128xbf16, #tpu.memory_space<vmem>>, vector<16x128xbf16>
    tpu.vector_store %arg6[%c0_11, %c0_12], %18 {strides = array<i32>} : memref<16x128xbf16, #tpu.memory_space<vmem>>, vector<16x128xbf16>,
    return
  }
  func.func @transform_0(%arg0: i32) -> (i32, i32) {
    %c0_i32 = arith.constant 0 : i32
    %c0_i32_0 = arith.constant 0 : i32
    return %arg0, %c0_i32 : i32, i32
  }
  func.func @transform_1(%arg0: i32) -> (i32, i32) {
    %c0_i32 = arith.constant 0 : i32
    %c0_i32_0 = arith.constant 0 : i32
    %c0_i32_1 = arith.constant 0 : i32
    return %c0_i32, %c0_i32_0 : i32, i32
  }
  func.func @transform_2(%arg0: i32) -> (i32, i32) {
    %c0_i32 = arith.constant 0 : i32
    %c0_i32_0 = arith.constant 0 : i32
    %c0_i32_1 = arith.constant 0 : i32
    return %c0_i32, %c0_i32_0 : i32, i32
  }
  func.func @transform_3(%arg0: i32) -> (i32, i32) {
    %c0_i32 = arith.constant 0 : i32
    %c0_i32_0 = arith.constant 0 : i32
    %c0_i32_1 = arith.constant 0 : i32
    return %c0_i32, %c0_i32_0 : i32, i32
  }
  func.func @transform_4(%arg0: i32) -> (i32, i32) {
    %c0_i32 = arith.constant 0 : i32
    %c0_i32_0 = arith.constant 0 : i32
    %c0_i32_1 = arith.constant 0 : i32
    return %c0_i32, %c0_i32_0 : i32, i32
  }
  func.func @transform_5(%arg0: i32) -> (i32, i32) {
    %c0_i32 = arith.constant 0 : i32
    %c0_i32_0 = arith.constant 0 : i32
    return %arg0, %c0_i32 : i32, i32
  }
}

module attributes {stable_mosaic.version = 11 : i64} {
  func.func @_mm_kernel(%arg0: i32, %arg1: memref<16x1152xbf16, #tpu.memory_space<vmem>>, %arg2: memref<1152x128xbf16, #tpu.memory_space<vmem>>, %arg3: memref<1x128xf32, #tpu.memory_space<vmem>>, %arg4: memref<16x128xbf16, #tpu.memory_space<vmem>>) attributes {dimension_semantics = [#tpu.dimension_semantics<parallel>], iteration_bounds = array<i64: 1>, scalar_prefetch = 0 : i64, scratch_operands = 0 : i64, tpu.core_type = #tpu.core_type<tc>, window_params = [{transform_indices = @transform_0, window_bounds = array<i64: 16, 1152>}, {pipeline_mode = #tpu.pipeline_mode<synchronous>, transform_indices = @transform_1, window_bounds = array<i64: 1152, 128>}, {pipeline_mode = #tpu.pipeline_mode<synchronous>, transform_indices = @transform_2, window_bounds = array<i64: 1, 128>}, {transform_indices = @transform_3, window_bounds = array<i64: 16, 128>}]} {
    %c0 = arith.constant 0 : index
    %c0_0 = arith.constant 0 : index
    %0 = vector.load %arg1[%c0, %c0_0] : memref<16x1152xbf16, #tpu.memory_space<vmem>>, vector<16x1152xbf16>
    %c0_1 = arith.constant 0 : index
    %c0_2 = arith.constant 0 : index
    %1 = vector.load %arg2[%c0_1, %c0_2] : memref<1152x128xbf16, #tpu.memory_space<vmem>>, vector<1152x128xbf16>
    %cst = arith.constant dense<0.000000e+00> : vector<16x128xf32>
    %2 = tpu.matmul %0, %1, %cst {dimension_numbers = #tpu.dot_dimension_numbers<[1], [0], [0], [1], [0, 0, 1, 1], [], []>} : vector<16x1152xbf16>, vector<1152x128xbf16>, vector<16x128xf32> -> vector<16x128xf32>
    %c0_3 = arith.constant 0 : index
    %c0_4 = arith.constant 0 : index
    %3 = vector.load %arg3[%c0_3, %c0_4] : memref<1x128xf32, #tpu.memory_space<vmem>>, vector<1x128xf32>
    %4 = vector.broadcast %3 : vector<1x128xf32> to vector<16x128xf32>
    %5 = arith.addf %2, %4 : vector<16x128xf32>
    %6 = arith.truncf %5 : vector<16x128xf32> to vector<16x128xbf16>
    %c0_5 = arith.constant 0 : index
    %c0_6 = arith.constant 0 : index
    %7 = vector.load %arg4[%c0_5, %c0_6] : memref<16x128xbf16, #tpu.memory_space<vmem>>, vector<16x128xbf16>
    tpu.vector_store %arg4[%c0_5, %c0_6], %6 {strides = array<i32>} : memref<16x128xbf16, #tpu.memory_space<vmem>>, vector<16x128xbf16>,
    return
  }
  func.func @transform_0(%arg0: i32) -> (i32, i32) {
    %c0_i32 = arith.constant 0 : i32
    %c0_i32_0 = arith.constant 0 : i32
    return %arg0, %c0_i32 : i32, i32
  }
  func.func @transform_1(%arg0: i32) -> (i32, i32) {
    %c0_i32 = arith.constant 0 : i32
    %c0_i32_0 = arith.constant 0 : i32
    %c0_i32_1 = arith.constant 0 : i32
    return %c0_i32, %c0_i32_0 : i32, i32
  }
  func.func @transform_2(%arg0: i32) -> (i32, i32) {
    %c0_i32 = arith.constant 0 : i32
    %c0_i32_0 = arith.constant 0 : i32
    %c0_i32_1 = arith.constant 0 : i32
    return %c0_i32, %c0_i32_0 : i32, i32
  }
  func.func @transform_3(%arg0: i32) -> (i32, i32) {
    %c0_i32 = arith.constant 0 : i32
    %c0_i32_0 = arith.constant 0 : i32
    return %arg0, %c0_i32 : i32, i32
  }
}

module attributes {stable_mosaic.version = 11 : i64} {
  func.func @_mm_pro_kernel(%arg0: i32, %arg1: memref<16x1024xbf16, #tpu.memory_space<vmem>>, %arg2: memref<1024x512xbf16, #tpu.memory_space<vmem>>, %arg3: memref<1x1024xf32, #tpu.memory_space<vmem>>, %arg4: memref<1x1024xf32, #tpu.memory_space<vmem>>, %arg5: memref<1x512xf32, #tpu.memory_space<vmem>>, %arg6: memref<16x512xbf16, #tpu.memory_space<vmem>>) attributes {dimension_semantics = [#tpu.dimension_semantics<parallel>], iteration_bounds = array<i64: 1>, scalar_prefetch = 0 : i64, scratch_operands = 0 : i64, tpu.core_type = #tpu.core_type<tc>, window_params = [{transform_indices = @transform_0, window_bounds = array<i64: 16, 1024>}, {pipeline_mode = #tpu.pipeline_mode<synchronous>, transform_indices = @transform_1, window_bounds = array<i64: 1024, 512>}, {pipeline_mode = #tpu.pipeline_mode<synchronous>, transform_indices = @transform_2, window_bounds = array<i64: 1, 1024>}, {pipeline_mode = #tpu.pipeline_mode<synchronous>, transform_indices = @transform_3, window_bounds = array<i64: 1, 1024>}, {pipeline_mode = #tpu.pipeline_mode<synchronous>, transform_indices = @transform_4, window_bounds = array<i64: 1, 512>}, {transform_indices = @transform_5, window_bounds = array<i64: 16, 512>}]} {
    %c0 = arith.constant 0 : index
    %c0_0 = arith.constant 0 : index
    %0 = vector.load %arg1[%c0, %c0_0] : memref<16x1024xbf16, #tpu.memory_space<vmem>>, vector<16x1024xbf16>
    %1 = arith.extf %0 : vector<16x1024xbf16> to vector<16x1024xf32>
    %c0_1 = arith.constant 0 : index
    %c0_2 = arith.constant 0 : index
    %2 = vector.load %arg3[%c0_1, %c0_2] : memref<1x1024xf32, #tpu.memory_space<vmem>>, vector<1x1024xf32>
    %3 = vector.broadcast %2 : vector<1x1024xf32> to vector<16x1024xf32>
    %4 = arith.mulf %1, %3 : vector<16x1024xf32>
    %c0_3 = arith.constant 0 : index
    %c0_4 = arith.constant 0 : index
    %5 = vector.load %arg4[%c0_3, %c0_4] : memref<1x1024xf32, #tpu.memory_space<vmem>>, vector<1x1024xf32>
    %6 = vector.broadcast %5 : vector<1x1024xf32> to vector<16x1024xf32>
    %7 = arith.addf %4, %6 : vector<16x1024xf32>
    %cst = arith.constant 0.000000e+00 : f32
    %8 = vector.broadcast %cst : f32 to vector<16x1024xf32>
    %9 = arith.maximumf %7, %8 : vector<16x1024xf32>
    %10 = arith.truncf %9 : vector<16x1024xf32> to vector<16x1024xbf16>
    %c0_5 = arith.constant 0 : index
    %c0_6 = arith.constant 0 : index
    %11 = vector.load %arg2[%c0_5, %c0_6] : memref<1024x512xbf16, #tpu.memory_space<vmem>>, vector<1024x512xbf16>
    %cst_7 = arith.constant dense<0.000000e+00> : vector<16x512xf32>
    %12 = tpu.matmul %10, %11, %cst_7 {dimension_numbers = #tpu.dot_dimension_numbers<[1], [0], [0], [1], [0, 0, 1, 1], [], []>} : vector<16x1024xbf16>, vector<1024x512xbf16>, vector<16x512xf32> -> vector<16x512xf32>
    %c0_8 = arith.constant 0 : index
    %c0_9 = arith.constant 0 : index
    %13 = vector.load %arg5[%c0_8, %c0_9] : memref<1x512xf32, #tpu.memory_space<vmem>>, vector<1x512xf32>
    %14 = vector.broadcast %13 : vector<1x512xf32> to vector<16x512xf32>
    %15 = arith.addf %12, %14 : vector<16x512xf32>
    %16 = arith.truncf %15 : vector<16x512xf32> to vector<16x512xbf16>
    %c0_10 = arith.constant 0 : index
    %c0_11 = arith.constant 0 : index
    %17 = vector.load %arg6[%c0_10, %c0_11] : memref<16x512xbf16, #tpu.memory_space<vmem>>, vector<16x512xbf16>
    tpu.vector_store %arg6[%c0_10, %c0_11], %16 {strides = array<i32>} : memref<16x512xbf16, #tpu.memory_space<vmem>>, vector<16x512xbf16>,
    return
  }
  func.func @transform_0(%arg0: i32) -> (i32, i32) {
    %c0_i32 = arith.constant 0 : i32
    %c0_i32_0 = arith.constant 0 : i32
    return %arg0, %c0_i32 : i32, i32
  }
  func.func @transform_1(%arg0: i32) -> (i32, i32) {
    %c0_i32 = arith.constant 0 : i32
    %c0_i32_0 = arith.constant 0 : i32
    %c0_i32_1 = arith.constant 0 : i32
    return %c0_i32, %c0_i32_0 : i32, i32
  }
  func.func @transform_2(%arg0: i32) -> (i32, i32) {
    %c0_i32 = arith.constant 0 : i32
    %c0_i32_0 = arith.constant 0 : i32
    %c0_i32_1 = arith.constant 0 : i32
    return %c0_i32, %c0_i32_0 : i32, i32
  }
  func.func @transform_3(%arg0: i32) -> (i32, i32) {
    %c0_i32 = arith.constant 0 : i32
    %c0_i32_0 = arith.constant 0 : i32
    %c0_i32_1 = arith.constant 0 : i32
    return %c0_i32, %c0_i32_0 : i32, i32
  }
  func.func @transform_4(%arg0: i32) -> (i32, i32) {
    %c0_i32 = arith.constant 0 : i32
    %c0_i32_0 = arith.constant 0 : i32
    %c0_i32_1 = arith.constant 0 : i32
    return %c0_i32, %c0_i32_0 : i32, i32
  }
  func.func @transform_5(%arg0: i32) -> (i32, i32) {
    %c0_i32 = arith.constant 0 : i32
    %c0_i32_0 = arith.constant 0 : i32
    return %arg0, %c0_i32 : i32, i32
  }
}

</mosaic_0001>

<bundles_post_ra>
// kernel: feature_tunk_push.6
= control target key start
LH: loop header
LB: loop body
LE: loop exit
PB: predicated region body
PF: predicated region fallthrough
CT: control target
= control target key end

     0   :  { %s3190_s12 = smov 0   ;;  %s3503_s0 = inlined_call_operand.vmem [shape: bf16[2048,128], index: 0, kind: input, shape index: {}]   ;;  %s3504_s1 = inlined_call_operand.vmem [shape: bf16[128,128], index: 1, kind: input, shape index: {}]   ;;  %s3505_s2 = inlined_call_operand.vmem [shape: f32[1,128], index: 2, kind: input, shape index: {}]   ;;  %s3506_s3 = inlined_call_operand.vmem [shape: bf16[2048,128], index: 3, kind: output, shape index: {}]  }
   0x1 LB: > { %s2127_s13 = sadd.s32 4294967295, %s3168_s12   ;;  %p2131_p0 = scmp.ge.s32.totalorder %s3168_s12, 1  ;;  %s3168_s12 = sphi %s3190_s12, %s13_s12  }
   0x2   : > { %p138_p1 = scmp.lt.s32.totalorder %s3168_s12, 3 }
   0x4   : > { %p139_p2 = pnand %p2131_p0, %p138_p1 }
   0x5   : > { %v3090_v0 = vld [vmem:[%s3504_s1] sm:$0xff] (!%p139_p2)   ;;  %s2132_s16 = sshll.u32 (!%p139_p2), %s2127_s13, 7  ;;  %v3091_v1 = vld [vmem:[%s3504_s1 + $0x8] sm:$0xff] (!%p139_p2)   ;;  %v3092_v2 = vld [vmem:[%s3504_s1 + $0x10] sm:$0xff] (!%p139_p2)  }
   0x6   : > { %142 = sbr.rel (%p139_p2) target bundleno = 380 (0x17c), region = 32  ;;  %p163_p3 = scmp.lt.s32.totalorder (!%p139_p2), %s2132_s16, 255  ;;  %2922 = vmatprep.subr.bf16.mxu0 (!%p139_p2), %v3090_v0  ;;  %3066 = vmatprep.subr.bf16.mxu1 (!%p139_p2), %v3090_v0  ;;  %v3093_v3 = vld [vmem:[%s3504_s1 + $0x18] sm:$0xff] (!%p139_p2)   ;;  %v3094_v6 = vld [vmem:[%s3504_s1 + $0x20] sm:$0xff] (!%p139_p2)   ;;  %v3095_v7 = vld [vmem:[%s3504_s1 + $0x28] sm:$0xff] (!%p139_p2)  }
   0x7   : > { %2923 = vmatpush3.bf16.msra.mxu0 (!%p139_p2), %v3090_v0  ;;  %3074 = vmatpush3.bf16.msra.mxu1 (!%p139_p2), %v3090_v0  ;;  %v3096_v8 = vld [vmem:[%s3504_s1 + $0x30] sm:$0xff] (!%p139_p2)   ;;  %v3097_v9 = vld [vmem:[%s3504_s1 + $0x38] sm:$0xff] (!%p139_p2)  }
   0x8   : > { %2924 = vmatprep.subr.bf16.mxu0 (!%p139_p2), %v3091_v1  ;;  %3067 = vmatprep.subr.bf16.mxu1 (!%p139_p2), %v3091_v1 }
   0xb   : > { %2925 = vmatpush3.bf16.msra.mxu0 (!%p139_p2), %v3091_v1  ;;  %3075 = vmatpush3.bf16.msra.mxu1 (!%p139_p2), %v3091_v1 }
   0xc   : > { %2926 = vmatprep.subr.bf16.mxu0 (!%p139_p2), %v3092_v2  ;;  %3068 = vmatprep.subr.bf16.mxu1 (!%p139_p2), %v3092_v2 }
   0xd   : > { %s3508_s16 = smov (!%p163_p3, %s2132_s16), 255 }
   0xe   : > { %s2133_s21 = sshll.u32 %s3508_s16, 2 }
   0xf   : > { %s3215_s24 = scalar_lea.vmem %s3503_s0, %s2133_s21  ;;  %2927 = vmatpush3.bf16.msra.mxu0 %v3092_v2  ;;  %3076 = vmatpush3.bf16.msra.mxu1 %v3092_v2  ;;  %s3314_s13 = scalar_lea.vmem %s3506_s3, %s2133_s21 }
  0x10   : > { %v3098_v4 = vld [vmem:[%s3215_s24] sm:$0xff]   ;;  %2928 = vmatprep.subr.bf16.mxu0 %v3093_v3  ;;  %3069 = vmatprep.subr.bf16.mxu1 %v3093_v3  ;;  %v3100_v10 = vld [vmem:[%s3215_s24 + $0x8] sm:$0xff]   ;;  %v3102_v12 = vld [vmem:[%s3215_s24 + $0x10] sm:$0xff]  }
  0x11   : > { %v3099_v5 = vld [vmem:[%s3215_s24 + $0x100] sm:$0xff]   ;;  %2938 = vmatprep.mubr.bf16.mxu0 %v3098_v4  ;;  %v3101_v11 = vld [vmem:[%s3215_s24 + $0x108] sm:$0xff]   ;;  %v3103_v13 = vld [vmem:[%s3215_s24 + $0x110] sm:$0xff]  }
  0x12   : > { %3002 = vmatprep.mubr.bf16.mxu1 %v3099_v5  ;;  %v3104_v14 = vld [vmem:[%s3215_s24 + $0x18] sm:$0xff]   ;;  %v3106_v16 = vld [vmem:[%s3215_s24 + $0x20] sm:$0xff]   ;;  %v3108_v18 = vld [vmem:[%s3215_s24 + $0x28] sm:$0xff]  }
  0x13   : > { %2929 = vmatpush3.bf16.msra.mxu0 %v3093_v3  ;;  %3077 = vmatpush3.bf16.msra.mxu1 %v3093_v3  ;;  %v3105_v15 = vld [vmem:[%s3215_s24 + $0x118] sm:$0xff]   ;;  %v3107_v17 = vld [vmem:[%s3215_s24 + $0x120] sm:$0xff]   ;;  %v3109_v19 = vld [vmem:[%s3215_s24 + $0x128] sm:$0xff]  }
  0x14   : > { %2930 = vmatprep.subr.bf16.mxu0 %v3094_v6  ;;  %3070 = vmatprep.subr.bf16.mxu1 %v3094_v6  ;;  %v3110_v20 = vld [vmem:[%s3215_s24 + $0x30] sm:$0xff]   ;;  %v3112_v22 = vld [vmem:[%s3215_s24 + $0x38] sm:$0xff]   ;;  %v3114_v24 = vld [vmem:[%s3215_s24 + $0x40] sm:$0xff]  }
  0x15   : > { %v3111_v21 = vld [vmem:[%s3215_s24 + $0x130] sm:$0xff]   ;;  %v3113_v23 = vld [vmem:[%s3215_s24 + $0x138] sm:$0xff]   ;;  %v3115_v25 = vld [vmem:[%s3215_s24 + $0x140] sm:$0xff]  }
  0x16   : > { %v3116_v26 = vld [vmem:[%s3215_s24 + $0x48] sm:$0xff]   ;;  %v3118_v28 = vld [vmem:[%s3215_s24 + $0x50] sm:$0xff]   ;;  %v3120_v30 = vld [vmem:[%s3215_s24 + $0x58] sm:$0xff]  }
  0x17   : > { %2931 = vmatpush3.bf16.msra.mxu0 %v3094_v6  ;;  %3078 = vmatpush3.bf16.msra.mxu1 %v3094_v6  ;;  %v3117_v27 = vld [vmem:[%s3215_s24 + $0x148] sm:$0xff]   ;;  %v3119_v29 = vld [vmem:[%s3215_s24 + $0x150] sm:$0xff]   ;;  %v3121_v31 = vld [vmem:[%s3215_s24 + $0x158] sm:$0xff]  }
  0x18   : > { %2932 = vmatprep.subr.bf16.mxu0 %v3095_v7  ;;  %3071 = vmatprep.subr.bf16.mxu1 %v3095_v7  ;;  %v3122_v32 = vld [vmem:[%s3215_s24 + $0x60] sm:$0xff]   ;;  %v3124_v34 = vld [vmem:[%s3215_s24 + $0x68] sm:$0xff]   ;;  %v3126_v36 = vld [vmem:[%s3215_s24 + $0x70] sm:$0xff]  }
  0x19   : > { %v3123_v33 = vld [vmem:[%s3215_s24 + $0x160] sm:$0xff]   ;;  %v3125_v35 = vld [vmem:[%s3215_s24 + $0x168] sm:$0xff]   ;;  %v3127_v37 = vld [vmem:[%s3215_s24 + $0x170] sm:$0xff]  }
  0x1a   : > { %v3128_v38 = vld [vmem:[%s3215_s24 + $0x78] sm:$0xff]   ;;  %v3130_v40 = vld [vmem:[%s3215_s24 + $0x80] sm:$0xff]   ;;  %v3132_v42 = vld [vmem:[%s3215_s24 + $0x88] sm:$0xff]  }
  0x1b   : > { %2933 = vmatpush3.bf16.msra.mxu0 %v3095_v7  ;;  %3079 = vmatpush3.bf16.msra.mxu1 %v3095_v7  ;;  %v3129_v39 = vld [vmem:[%s3215_s24 + $0x178] sm:$0xff]   ;;  %v3131_v41 = vld [vmem:[%s3215_s24 + $0x180] sm:$0xff]   ;;  %v3133_v43 = vld [vmem:[%s3215_s24 + $0x188] sm:$0xff]  }
  0x1c   : > { %2934 = vmatprep.subr.bf16.mxu0 %v3096_v8  ;;  %3072 = vmatprep.subr.bf16.mxu1 %v3096_v8  ;;  %v3134_v44 = vld [vmem:[%s3215_s24 + $0x90] sm:$0xff]   ;;  %v3136_v46 = vld [vmem:[%s3215_s24 + $0x98] sm:$0xff]   ;;  %v3138_v48 = vld [vmem:[%s3215_s24 + $0xa0] sm:$0xff]  }
  0x1d   : > { %v3135_v45 = vld [vmem:[%s3215_s24 + $0x190] sm:$0xff]   ;;  %v3137_v47 = vld [vmem:[%s3215_s24 + $0x198] sm:$0xff]   ;;  %v3139_v49 = vld [vmem:[%s3215_s24 + $0x1a0] sm:$0xff]  }
  0x1e   : > { %v3140_v50 = vld [vmem:[%s3215_s24 + $0xa8] sm:$0xff]   ;;  %v3142_v52 = vld [vmem:[%s3215_s24 + $0xb0] sm:$0xff]   ;;  %v3144_v54 = vld [vmem:[%s3215_s24 + $0xb8] sm:$0xff]  }
  0x1f   : > { %2935 = vmatpush3.bf16.msra.mxu0 %v3096_v8  ;;  %3080 = vmatpush3.bf16.msra.mxu1 %v3096_v8  ;;  %v3141_v51 = vld [vmem:[%s3215_s24 + $0x1a8] sm:$0xff]   ;;  %v3143_v53 = vld [vmem:[%s3215_s24 + $0x1b0] sm:$0xff]   ;;  %v3145_v55 = vld [vmem:[%s3215_s24 + $0x1b8] sm:$0xff]  }
  0x20   : > { %2936 = vmatprep.subr.bf16.mxu0 %v3097_v9  ;;  %3073 = vmatprep.subr.bf16.mxu1 %v3097_v9  ;;  %v3146_v56 = vld [vmem:[%s3215_s24 + $0xc0] sm:$0xff]   ;;  %v3148_v58 = vld [vmem:[%s3215_s24 + $0xc8] sm:$0xff]   ;;  %v3150_v60 = vld [vmem:[%s3215_s24 + $0xd0] sm:$0xff]  }
  0x21   : > { %v3147_v57 = vld [vmem:[%s3215_s24 + $0x1c0] sm:$0xff]   ;;  %v3149_v59 = vld [vmem:[%s3215_s24 + $0x1c8] sm:$0xff]   ;;  %v3151_v61 = vld [vmem:[%s3215_s24 + $0x1d0] sm:$0xff]  }
  0x22   : > { %v3152_v62 = vld [vmem:[%s3215_s24 + $0xd8] sm:$0xff]   ;;  %v3154_v0 = vld [vmem:[%s3215_s24 + $0xe0] sm:$0xff]   ;;  %v3156_v2 = vld [vmem:[%s3215_s24 + $0xe8] sm:$0xff]  }
  0x23   : > { %2937 = vmatpush3.bf16.msra.mxu0 %v3097_v9  ;;  %3081 = vmatpush3.bf16.msra.mxu1 %v3097_v9  ;;  %v3153_v63 = vld [vmem:[%s3215_s24 + $0x1d8] sm:$0xff]   ;;  %v3155_v1 = vld [vmem:[%s3215_s24 + $0x1e0] sm:$0xff]   ;;  %v3157_v3 = vld [vmem:[%s3215_s24 + $0x1e8] sm:$0xff]  }
  0x24   : > { %v3158_v4 = vld [vmem:[%s3215_s24 + $0xf0] sm:$0xff]   ;;  %v3160_v6 = vld [vmem:[%s3215_s24 + $0xf8] sm:$0xff]   ;;  %v3299_v8 = vld [vmem:[%s3505_s2] ss:$0 sm:$0xff] }
  0x25   : > { %v3159_v5 = vld [vmem:[%s3215_s24 + $0x1f0] sm:$0xff]   ;;  %v3161_v7 = vld [vmem:[%s3215_s24 + $0x1f8] sm:$0xff]  }
  0x26   : > { %2939 = vmatmul.mubr.bf16.vlgmr.msra.gmra.mrb[0].mxu0 %v3100_v10  ;;  %3003 = vmatmul.mubr.bf16.vlgmr.msra.gmra.mrb[0].mxu1 %v3101_v11 }
  0x27   : > { %2942 = vmatprep.mubr.bf16.mxu0 %v3102_v12  ;;  %3006 = vmatprep.mubr.bf16.mxu1 %v3103_v13 }
  0x2e   : > { %2943 = vmatmul.mubr.bf16.gmra.mrb[4].mxu0 %v3104_v14  ;;  %3007 = vmatmul.mubr.bf16.gmra.mrb[4].mxu1 %v3105_v15 }
  0x2f   : > { %2946 = vmatprep.mubr.bf16.mxu0 %v3106_v16  ;;  %3010 = vmatprep.mubr.bf16.mxu1 %v3107_v17 }
  0x36   : > { %2947 = vmatmul.mubr.bf16.gmra.mrb[8].mxu0 %v3108_v18  ;;  %3011 = vmatmul.mubr.bf16.gmra.mrb[8].mxu1 %v3109_v19 }
  0x37   : > { %2950 = vmatprep.mubr.bf16.mxu0 %v3110_v20  ;;  %3014 = vmatprep.mubr.bf16.mxu1 %v3111_v21 }
  0x3e   : > { %2951 = vmatmul.mubr.bf16.gmra.mrb[12].mxu0 %v3112_v22  ;;  %3015 = vmatmul.mubr.bf16.gmra.mrb[12].mxu1 %v3113_v23 }
  0x3f   : > { %2954 = vmatprep.mubr.bf16.mxu0 %v3114_v24  ;;  %3018 = vmatprep.mubr.bf16.mxu1 %v3115_v25 }
  0x46   : > { %2955 = vmatmul.mubr.bf16.gmra.mrb[16].mxu0 %v3116_v26  ;;  %3019 = vmatmul.mubr.bf16.gmra.mrb[16].mxu1 %v3117_v27 }
  0x47   : > { %2958 = vmatprep.mubr.bf16.mxu0 %v3118_v28  ;;  %3022 = vmatprep.mubr.bf16.mxu1 %v3119_v29 }
  0x4e   : > { %2959 = vmatmul.mubr.bf16.gmra.mrb[20].mxu0 %v3120_v30  ;;  %3023 = vmatmul.mubr.bf16.gmra.mrb[20].mxu1 %v3121_v31 }
  0x4f   : > { %2962 = vmatprep.mubr.bf16.mxu0 %v3122_v32  ;;  %3026 = vmatprep.mubr.bf16.mxu1 %v3123_v33 }
  0x56   : > { %2963 = vmatmul.mubr.bf16.gmra.mrb[24].mxu0 %v3124_v34  ;;  %3027 = vmatmul.mubr.bf16.gmra.mrb[24].mxu1 %v3125_v35 }
  0x57   : > { %2966 = vmatprep.mubr.bf16.mxu0 %v3126_v36  ;;  %3030 = vmatprep.mubr.bf16.mxu1 %v3127_v37 }
  0x5e   : > { %2967 = vmatmul.mubr.bf16.gmra.mrb[28].mxu0 %v3128_v38  ;;  %3031 = vmatmul.mubr.bf16.gmra.mrb[28].mxu1 %v3129_v39 }
  0x5f   : > { %2970 = vmatprep.mubr.bf16.mxu0 %v3130_v40  ;;  %3034 = vmatprep.mubr.bf16.mxu1 %v3131_v41 }
  0x66   : > { %2971 = vmatmul.mubr.bf16.gmra.mrb[32].mxu0 %v3132_v42  ;;  %3035 = vmatmul.mubr.bf16.gmra.mrb[32].mxu1 %v3133_v43 }
  0x67   : > { %2974 = vmatprep.mubr.bf16.mxu0 %v3134_v44  ;;  %3038 = vmatprep.mubr.bf16.mxu1 %v3135_v45 }
  0x6e   : > { %2975 = vmatmul.mubr.bf16.gmra.mrb[36].mxu0 %v3136_v46  ;;  %3039 = vmatmul.mubr.bf16.gmra.mrb[36].mxu1 %v3137_v47 }
  0x6f   : > { %2978 = vmatprep.mubr.bf16.mxu0 %v3138_v48  ;;  %3042 = vmatprep.mubr.bf16.mxu1 %v3139_v49 }
  0x76   : > { %2979 = vmatmul.mubr.bf16.gmra.mrb[40].mxu0 %v3140_v50  ;;  %3043 = vmatmul.mubr.bf16.gmra.mrb[40].mxu1 %v3141_v51 }
  0x77   : > { %2982 = vmatprep.mubr.bf16.mxu0 %v3142_v52  ;;  %3046 = vmatprep.mubr.bf16.mxu1 %v3143_v53 }
  0x7e   : > { %2983 = vmatmul.mubr.bf16.gmra.mrb[44].mxu0 %v3144_v54  ;;  %3047 = vmatmul.mubr.bf16.gmra.mrb[44].mxu1 %v3145_v55 }
  0x7f   : > { %2986 = vmatprep.mubr.bf16.mxu0 %v3146_v56  ;;  %3050 = vmatprep.mubr.bf16.mxu1 %v3147_v57 }
  0x86   : > { %2987 = vmatmul.mubr.bf16.gmra.mrb[48].mxu0 %v3148_v58  ;;  %3051 = vmatmul.mubr.bf16.gmra.mrb[48].mxu1 %v3149_v59 }
  0x87   : > { %2990 = vmatprep.mubr.bf16.mxu0 %v3150_v60  ;;  %3054 = vmatprep.mubr.bf16.mxu1 %v3151_v61 }
  0x8e   : > { %2991 = vmatmul.mubr.bf16.gmra.mrb[52].mxu0 %v3152_v62  ;;  %3055 = vmatmul.mubr.bf16.gmra.mrb[52].mxu1 %v3153_v63 }
  0x8f   : > { %2994 = vmatprep.mubr.bf16.mxu0 %v3154_v0  ;;  %3058 = vmatprep.mubr.bf16.mxu1 %v3155_v1 }
  0x96   : > { %2995 = vmatmul.mubr.bf16.gmra.mrb[56].mxu0 %v3156_v2  ;;  %3059 = vmatmul.mubr.bf16.gmra.mrb[56].mxu1 %v3157_v3 }
  0x97   : > { %2998 = vmatprep.mubr.bf16.mxu0 %v3158_v4  ;;  %3062 = vmatprep.mubr.bf16.mxu1 %v3159_v5 }
  0x9e   : > { %2999 = vmatmul.mubr.bf16.gmra.mrb[60].mxu0 %v3160_v6  ;;  %3063 = vmatmul.mubr.bf16.gmra.mrb[60].mxu1 %v3161_v7 }
  0xf9   : > { %v2940_v9 = vpop.f32.mrb[0].mxu0  ;;  %v3004_v10 = vpop.f32.mrb[0].mxu1 }
  0xfa   : > { %v801_v11 = vadd.f32 %v2940_v9, %v3299_v8  ;;  %v1057_v12 = vadd.f32 %v3004_v10, %v3299_v8  ;;  %v792_v13 = vpop.f32.mrb[1].mxu0  ;;  %v1048_v14 = vpop.f32.mrb[1].mxu1 }
  0xfb   : > { %v793_v15 = vadd.f32 %v3299_v8, %v792_v13  ;;  %v1049_v16 = vadd.f32 %v3299_v8, %v1048_v14  ;;  %v2941_v17 = vpop.f32.mrb[2].mxu0  ;;  %v3005_v18 = vpop.f32.mrb[2].mxu1 }
  0xfc   : > { %v804_v19 = vadd.f32 %v2941_v17, %v3299_v8  ;;  %v1060_v20 = vadd.f32 %v3005_v18, %v3299_v8  ;;  %v795_v21 = vpop.f32.mrb[3].mxu0  ;;  %v1051_v22 = vpop.f32.mrb[3].mxu1  ;;  %v1305_v25 = vmax.f32 %v801_v11, 0.0  ;;  %v1369_v26 = vmax.f32 %v1057_v12, 0.0 }
  0xfd   : > { %v796_v23 = vadd.f32 %v3299_v8, %v795_v21  ;;  %v1052_v24 = vadd.f32 %v3299_v8, %v1051_v22  ;;  %v1303_v29 = vmax.f32 %v793_v15, 0.0  ;;  %v1367_v30 = vmax.f32 %v1049_v16, 0.0 }
  0xfe   : > { %v1306_v27 = vmax.f32 %v804_v19, 0.0  ;;  %v1370_v28 = vmax.f32 %v1060_v20, 0.0 }
  0xff   : > { %v1304_v31 = vmax.f32 %v796_v23, 0.0  ;;  %v1368_v32 = vmax.f32 %v1052_v24, 0.0 }
 0x100   : > { %v2475_v33 = vpack.c.bf16 %v1306_v27, %v1305_v25  ;;  %v2635_v34 = vpack.c.bf16 %v1370_v28, %v1369_v26 }
 0x101   : > { %v2470_v35 = vpack.c.bf16 %v1304_v31, %v1303_v29  ;;  %v2630_v36 = vpack.c.bf16 %v1368_v32, %v1367_v30  ;;  %v2944_v37 = vpop.f32.mrb[4].mxu0  ;;  %v3008_v38 = vpop.f32.mrb[4].mxu1 }
 0x102   : > { %2787 = vst [vmem:[%s3314_s13 + $0x8] sm:$0xff] %v2475_v33   ;;  %2819 = vst [vmem:[%s3314_s13 + $0x108] sm:$0xff] %v2635_v34   ;;  %v817_v39 = vadd.f32 %v2944_v37, %v3299_v8  ;;  %v1073_v40 = vadd.f32 %v3008_v38, %v3299_v8  ;;  %v808_v41 = vpop.f32.mrb[5].mxu0  ;;  %v1064_v42 = vpop.f32.mrb[5].mxu1 }
 0x103   : > { %2471 = vst [vmem:[%s3314_s13] sm:$0xff] %v2470_v35   ;;  %2818 = vst [vmem:[%s3314_s13 + $0x100] sm:$0xff] %v2630_v36   ;;  %v809_v43 = vadd.f32 %v3299_v8, %v808_v41  ;;  %v1065_v44 = vadd.f32 %v3299_v8, %v1064_v42  ;;  %v2945_v45 = vpop.f32.mrb[6].mxu0  ;;  %v3009_v46 = vpop.f32.mrb[6].mxu1 }
 0x104   : > { %v820_v47 = vadd.f32 %v2945_v45, %v3299_v8  ;;  %v1076_v48 = vadd.f32 %v3009_v46, %v3299_v8  ;;  %v811_v49 = vpop.f32.mrb[7].mxu0  ;;  %v1067_v50 = vpop.f32.mrb[7].mxu1  ;;  %v1309_v53 = vmax.f32 %v817_v39, 0.0  ;;  %v1373_v54 = vmax.f32 %v1073_v40, 0.0 }
 0x105   : > { %v812_v51 = vadd.f32 %v3299_v8, %v811_v49  ;;  %v1068_v52 = vadd.f32 %v3299_v8, %v1067_v50  ;;  %v1307_v57 = vmax.f32 %v809_v43, 0.0  ;;  %v1371_v58 = vmax.f32 %v1065_v44, 0.0 }
 0x106   : > { %v1310_v55 = vmax.f32 %v820_v47, 0.0  ;;  %v1374_v56 = vmax.f32 %v1076_v48, 0.0 }
 0x107   : > { %v1308_v59 = vmax.f32 %v812_v51, 0.0  ;;  %v1372_v60 = vmax.f32 %v1068_v52, 0.0 }
 0x108   : > { %v2485_v61 = vpack.c.bf16 %v1310_v55, %v1309_v53  ;;  %v2645_v62 = vpack.c.bf16 %v1374_v56, %v1373_v54 }
 0x109   : > { %v2480_v63 = vpack.c.bf16 %v1308_v59, %v1307_v57  ;;  %v2640_v0 = vpack.c.bf16 %v1372_v60, %v1371_v58  ;;  %v2948_v1 = vpop.f32.mrb[8].mxu0  ;;  %v3012_v2 = vpop.f32.mrb[8].mxu1 }
 0x10a   : > { %2789 = vst [vmem:[%s3314_s13 + $0x18] sm:$0xff] %v2485_v61   ;;  %2821 = vst [vmem:[%s3314_s13 + $0x118] sm:$0xff] %v2645_v62   ;;  %v833_v3 = vadd.f32 %v2948_v1, %v3299_v8  ;;  %v1089_v4 = vadd.f32 %v3012_v2, %v3299_v8  ;;  %v824_v5 = vpop.f32.mrb[9].mxu0  ;;  %v1080_v6 = vpop.f32.mrb[9].mxu1 }
 0x10b   : > { %2788 = vst [vmem:[%s3314_s13 + $0x10] sm:$0xff] %v2480_v63   ;;  %2820 = vst [vmem:[%s3314_s13 + $0x110] sm:$0xff] %v2640_v0   ;;  %v825_v7 = vadd.f32 %v3299_v8, %v824_v5  ;;  %v1081_v9 = vadd.f32 %v3299_v8, %v1080_v6  ;;  %v2949_v10 = vpop.f32.mrb[10].mxu0  ;;  %v3013_v11 = vpop.f32.mrb[10].mxu1 }
 0x10c   : > { %v836_v12 = vadd.f32 %v2949_v10, %v3299_v8  ;;  %v1092_v13 = vadd.f32 %v3013_v11, %v3299_v8  ;;  %v827_v14 = vpop.f32.mrb[11].mxu0  ;;  %v1083_v15 = vpop.f32.mrb[11].mxu1  ;;  %v1313_v18 = vmax.f32 %v833_v3, 0.0  ;;  %v1377_v19 = vmax.f32 %v1089_v4, 0.0 }
 0x10d   : > { %v828_v16 = vadd.f32 %v3299_v8, %v827_v14  ;;  %v1084_v17 = vadd.f32 %v3299_v8, %v1083_v15  ;;  %v1311_v22 = vmax.f32 %v825_v7, 0.0  ;;  %v1375_v23 = vmax.f32 %v1081_v9, 0.0 }
 0x10e   : > { %v1314_v20 = vmax.f32 %v836_v12, 0.0  ;;  %v1378_v21 = vmax.f32 %v1092_v13, 0.0 }
 0x10f   : > { %v1312_v24 = vmax.f32 %v828_v16, 0.0  ;;  %v1376_v25 = vmax.f32 %v1084_v17, 0.0 }
 0x110   : > { %v2495_v26 = vpack.c.bf16 %v1314_v20, %v1313_v18  ;;  %v2655_v27 = vpack.c.bf16 %v1378_v21, %v1377_v19 }
 0x111   : > { %v2490_v28 = vpack.c.bf16 %v1312_v24, %v1311_v22  ;;  %v2650_v29 = vpack.c.bf16 %v1376_v25, %v1375_v23  ;;  %v2952_v30 = vpop.f32.mrb[12].mxu0  ;;  %v3016_v31 = vpop.f32.mrb[12].mxu1 }
 0x112   : > { %2791 = vst [vmem:[%s3314_s13 + $0x28] sm:$0xff] %v2495_v26   ;;  %2823 = vst [vmem:[%s3314_s13 + $0x128] sm:$0xff] %v2655_v27   ;;  %v849_v32 = vadd.f32 %v2952_v30, %v3299_v8  ;;  %v1105_v33 = vadd.f32 %v3016_v31, %v3299_v8  ;;  %v840_v34 = vpop.f32.mrb[13].mxu0  ;;  %v1096_v35 = vpop.f32.mrb[13].mxu1 }
 0x113   : > { %2790 = vst [vmem:[%s3314_s13 + $0x20] sm:$0xff] %v2490_v28   ;;  %2822 = vst [vmem:[%s3314_s13 + $0x120] sm:$0xff] %v2650_v29   ;;  %v841_v36 = vadd.f32 %v3299_v8, %v840_v34  ;;  %v1097_v37 = vadd.f32 %v3299_v8, %v1096_v35  ;;  %v2953_v38 = vpop.f32.mrb[14].mxu0  ;;  %v3017_v39 = vpop.f32.mrb[14].mxu1 }
 0x114   : > { %v852_v40 = vadd.f32 %v2953_v38, %v3299_v8  ;;  %v1108_v41 = vadd.f32 %v3017_v39, %v3299_v8  ;;  %v843_v42 = vpop.f32.mrb[15].mxu0  ;;  %v1099_v43 = vpop.f32.mrb[15].mxu1  ;;  %v1317_v46 = vmax.f32 %v849_v32, 0.0  ;;  %v1381_v47 = vmax.f32 %v1105_v33, 0.0 }
 0x115   : > { %v844_v44 = vadd.f32 %v3299_v8, %v843_v42  ;;  %v1100_v45 = vadd.f32 %v3299_v8, %v1099_v43  ;;  %v1315_v50 = vmax.f32 %v841_v36, 0.0  ;;  %v1379_v51 = vmax.f32 %v1097_v37, 0.0 }
 0x116   : > { %v1318_v48 = vmax.f32 %v852_v40, 0.0  ;;  %v1382_v49 = vmax.f32 %v1108_v41, 0.0 }
 0x117   : > { %v1316_v52 = vmax.f32 %v844_v44, 0.0  ;;  %v1380_v53 = vmax.f32 %v1100_v45, 0.0 }
 0x118   : > { %v2505_v54 = vpack.c.bf16 %v1318_v48, %v1317_v46  ;;  %v2665_v55 = vpack.c.bf16 %v1382_v49, %v1381_v47 }
 0x119   : > { %v2500_v56 = vpack.c.bf16 %v1316_v52, %v1315_v50  ;;  %v2660_v57 = vpack.c.bf16 %v1380_v53, %v1379_v51  ;;  %v2956_v58 = vpop.f32.mrb[16].mxu0  ;;  %v3020_v59 = vpop.f32.mrb[16].mxu1 }
 0x11a   : > { %2793 = vst [vmem:[%s3314_s13 + $0x38] sm:$0xff] %v2505_v54   ;;  %2825 = vst [vmem:[%s3314_s13 + $0x138] sm:$0xff] %v2665_v55   ;;  %v865_v60 = vadd.f32 %v2956_v58, %v3299_v8  ;;  %v1121_v61 = vadd.f32 %v3020_v59, %v3299_v8  ;;  %v856_v62 = vpop.f32.mrb[17].mxu0  ;;  %v1112_v63 = vpop.f32.mrb[17].mxu1 }
 0x11b   : > { %2792 = vst [vmem:[%s3314_s13 + $0x30] sm:$0xff] %v2500_v56   ;;  %2824 = vst [vmem:[%s3314_s13 + $0x130] sm:$0xff] %v2660_v57   ;;  %v857_v0 = vadd.f32 %v3299_v8, %v856_v62  ;;  %v1113_v1 = vadd.f32 %v3299_v8, %v1112_v63  ;;  %v2957_v2 = vpop.f32.mrb[18].mxu0  ;;  %v3021_v3 = vpop.f32.mrb[18].mxu1 }
 0x11c   : > { %v868_v4 = vadd.f32 %v2957_v2, %v3299_v8  ;;  %v1124_v5 = vadd.f32 %v3021_v3, %v3299_v8  ;;  %v859_v6 = vpop.f32.mrb[19].mxu0  ;;  %v1115_v7 = vpop.f32.mrb[19].mxu1  ;;  %v1321_v11 = vmax.f32 %v865_v60, 0.0  ;;  %v1385_v12 = vmax.f32 %v1121_v61, 0.0 }
 0x11d   : > { %v860_v9 = vadd.f32 %v3299_v8, %v859_v6  ;;  %v1116_v10 = vadd.f32 %v3299_v8, %v1115_v7  ;;  %v1319_v15 = vmax.f32 %v857_v0, 0.0  ;;  %v1383_v16 = vmax.f32 %v1113_v1, 0.0 }
 0x11e   : > { %v1322_v13 = vmax.f32 %v868_v4, 0.0  ;;  %v1386_v14 = vmax.f32 %v1124_v5, 0.0 }
 0x11f   : > { %v1320_v17 = vmax.f32 %v860_v9, 0.0  ;;  %v1384_v18 = vmax.f32 %v1116_v10, 0.0 }
 0x120   : > { %v2515_v19 = vpack.c.bf16 %v1322_v13, %v1321_v11  ;;  %v2675_v20 = vpack.c.bf16 %v1386_v14, %v1385_v12 }
 0x121   : > { %v2510_v21 = vpack.c.bf16 %v1320_v17, %v1319_v15  ;;  %v2670_v22 = vpack.c.bf16 %v1384_v18, %v1383_v16  ;;  %v2960_v23 = vpop.f32.mrb[20].mxu0  ;;  %v3024_v24 = vpop.f32.mrb[20].mxu1 }
 0x122   : > { %2795 = vst [vmem:[%s3314_s13 + $0x48] sm:$0xff] %v2515_v19   ;;  %2827 = vst [vmem:[%s3314_s13 + $0x148] sm:$0xff] %v2675_v20   ;;  %v881_v25 = vadd.f32 %v2960_v23, %v3299_v8  ;;  %v1137_v26 = vadd.f32 %v3024_v24, %v3299_v8  ;;  %v872_v27 = vpop.f32.mrb[21].mxu0  ;;  %v1128_v28 = vpop.f32.mrb[21].mxu1 }
 0x123   : > { %2794 = vst [vmem:[%s3314_s13 + $0x40] sm:$0xff] %v2510_v21   ;;  %2826 = vst [vmem:[%s3314_s13 + $0x140] sm:$0xff] %v2670_v22   ;;  %v873_v29 = vadd.f32 %v3299_v8, %v872_v27  ;;  %v1129_v30 = vadd.f32 %v3299_v8, %v1128_v28  ;;  %v2961_v31 = vpop.f32.mrb[22].mxu0  ;;  %v3025_v32 = vpop.f32.mrb[22].mxu1 }
 0x124   : > { %v884_v33 = vadd.f32 %v2961_v31, %v3299_v8  ;;  %v1140_v34 = vadd.f32 %v3025_v32, %v3299_v8  ;;  %v875_v35 = vpop.f32.mrb[23].mxu0  ;;  %v1131_v36 = vpop.f32.mrb[23].mxu1  ;;  %v1325_v39 = vmax.f32 %v881_v25, 0.0  ;;  %v1389_v40 = vmax.f32 %v1137_v26, 0.0 }
 0x125   : > { %v876_v37 = vadd.f32 %v3299_v8, %v875_v35  ;;  %v1132_v38 = vadd.f32 %v3299_v8, %v1131_v36  ;;  %v1323_v43 = vmax.f32 %v873_v29, 0.0  ;;  %v1387_v44 = vmax.f32 %v1129_v30, 0.0 }
 0x126   : > { %v1326_v41 = vmax.f32 %v884_v33, 0.0  ;;  %v1390_v42 = vmax.f32 %v1140_v34, 0.0 }
 0x127   : > { %v1324_v45 = vmax.f32 %v876_v37, 0.0  ;;  %v1388_v46 = vmax.f32 %v1132_v38, 0.0 }
 0x128   : > { %v2525_v47 = vpack.c.bf16 %v1326_v41, %v1325_v39  ;;  %v2685_v48 = vpack.c.bf16 %v1390_v42, %v1389_v40 }
 0x129   : > { %v2520_v49 = vpack.c.bf16 %v1324_v45, %v1323_v43  ;;  %v2680_v50 = vpack.c.bf16 %v1388_v46, %v1387_v44  ;;  %v2964_v51 = vpop.f32.mrb[24].mxu0  ;;  %v3028_v52 = vpop.f32.mrb[24].mxu1 }
 0x12a   : > { %2797 = vst [vmem:[%s3314_s13 + $0x58] sm:$0xff] %v2525_v47   ;;  %2829 = vst [vmem:[%s3314_s13 + $0x158] sm:$0xff] %v2685_v48   ;;  %v897_v53 = vadd.f32 %v2964_v51, %v3299_v8  ;;  %v1153_v54 = vadd.f32 %v3028_v52, %v3299_v8  ;;  %v888_v55 = vpop.f32.mrb[25].mxu0  ;;  %v1144_v56 = vpop.f32.mrb[25].mxu1 }
 0x12b   : > { %2796 = vst [vmem:[%s3314_s13 + $0x50] sm:$0xff] %v2520_v49   ;;  %2828 = vst [vmem:[%s3314_s13 + $0x150] sm:$0xff] %v2680_v50   ;;  %v889_v57 = vadd.f32 %v3299_v8, %v888_v55  ;;  %v1145_v58 = vadd.f32 %v3299_v8, %v1144_v56  ;;  %v2965_v59 = vpop.f32.mrb[26].mxu0  ;;  %v3029_v60 = vpop.f32.mrb[26].mxu1 }
 0x12c   : > { %v900_v61 = vadd.f32 %v2965_v59, %v3299_v8  ;;  %v1156_v62 = vadd.f32 %v3029_v60, %v3299_v8  ;;  %v891_v63 = vpop.f32.mrb[27].mxu0  ;;  %v1147_v0 = vpop.f32.mrb[27].mxu1  ;;  %v1329_v3 = vmax.f32 %v897_v53, 0.0  ;;  %v1393_v4 = vmax.f32 %v1153_v54, 0.0 }
 0x12d   : > { %v892_v1 = vadd.f32 %v3299_v8, %v891_v63  ;;  %v1148_v2 = vadd.f32 %v3299_v8, %v1147_v0  ;;  %v1327_v7 = vmax.f32 %v889_v57, 0.0  ;;  %v1391_v9 = vmax.f32 %v1145_v58, 0.0 }
 0x12e   : > { %v1330_v5 = vmax.f32 %v900_v61, 0.0  ;;  %v1394_v6 = vmax.f32 %v1156_v62, 0.0 }
 0x12f   : > { %v1328_v10 = vmax.f32 %v892_v1, 0.0  ;;  %v1392_v11 = vmax.f32 %v1148_v2, 0.0 }
 0x130   : > { %v2535_v12 = vpack.c.bf16 %v1330_v5, %v1329_v3  ;;  %v2695_v13 = vpack.c.bf16 %v1394_v6, %v1393_v4 }
 0x131   : > { %v2530_v14 = vpack.c.bf16 %v1328_v10, %v1327_v7  ;;  %v2690_v15 = vpack.c.bf16 %v1392_v11, %v1391_v9  ;;  %v2968_v16 = vpop.f32.mrb[28].mxu0  ;;  %v3032_v17 = vpop.f32.mrb[28].mxu1 }
 0x132   : > { %2799 = vst [vmem:[%s3314_s13 + $0x68] sm:$0xff] %v2535_v12   ;;  %2831 = vst [vmem:[%s3314_s13 + $0x168] sm:$0xff] %v2695_v13   ;;  %v913_v18 = vadd.f32 %v2968_v16, %v3299_v8  ;;  %v1169_v19 = vadd.f32 %v3032_v17, %v3299_v8  ;;  %v904_v20 = vpop.f32.mrb[29].mxu0  ;;  %v1160_v21 = vpop.f32.mrb[29].mxu1 }
 0x133   : > { %2798 = vst [vmem:[%s3314_s13 + $0x60] sm:$0xff] %v2530_v14   ;;  %2830 = vst [vmem:[%s3314_s13 + $0x160] sm:$0xff] %v2690_v15   ;;  %v905_v22 = vadd.f32 %v3299_v8, %v904_v20  ;;  %v1161_v23 = vadd.f32 %v3299_v8, %v1160_v21  ;;  %v2969_v24 = vpop.f32.mrb[30].mxu0  ;;  %v3033_v25 = vpop.f32.mrb[30].mxu1 }
 0x134   : > { %v916_v26 = vadd.f32 %v2969_v24, %v3299_v8  ;;  %v1172_v27 = vadd.f32 %v3033_v25, %v3299_v8  ;;  %v907_v28 = vpop.f32.mrb[31].mxu0  ;;  %v1163_v29 = vpop.f32.mrb[31].mxu1  ;;  %v1333_v32 = vmax.f32 %v913_v18, 0.0  ;;  %v1397_v33 = vmax.f32 %v1169_v19, 0.0 }
 0x135   : > { %v908_v30 = vadd.f32 %v3299_v8, %v907_v28  ;;  %v1164_v31 = vadd.f32 %v3299_v8, %v1163_v29  ;;  %v1331_v36 = vmax.f32 %v905_v22, 0.0  ;;  %v1395_v37 = vmax.f32 %v1161_v23, 0.0 }
 0x136   : > { %v1334_v34 = vmax.f32 %v916_v26, 0.0  ;;  %v1398_v35 = vmax.f32 %v1172_v27, 0.0 }
 0x137   : > { %v1332_v38 = vmax.f32 %v908_v30, 0.0  ;;  %v1396_v39 = vmax.f32 %v1164_v31, 0.0 }
 0x138   : > { %v2545_v40 = vpack.c.bf16 %v1334_v34, %v1333_v32  ;;  %v2705_v41 = vpack.c.bf16 %v1398_v35, %v1397_v33 }
 0x139   : > { %v2540_v42 = vpack.c.bf16 %v1332_v38, %v1331_v36  ;;  %v2700_v43 = vpack.c.bf16 %v1396_v39, %v1395_v37  ;;  %v2972_v44 = vpop.f32.mrb[32].mxu0  ;;  %v3036_v45 = vpop.f32.mrb[32].mxu1 }
 0x13a   : > { %2801 = vst [vmem:[%s3314_s13 + $0x78] sm:$0xff] %v2545_v40   ;;  %2833 = vst [vmem:[%s3314_s13 + $0x178] sm:$0xff] %v2705_v41   ;;  %v929_v46 = vadd.f32 %v2972_v44, %v3299_v8  ;;  %v1185_v47 = vadd.f32 %v3036_v45, %v3299_v8  ;;  %v920_v48 = vpop.f32.mrb[33].mxu0  ;;  %v1176_v49 = vpop.f32.mrb[33].mxu1 }
 0x13b   : > { %2800 = vst [vmem:[%s3314_s13 + $0x70] sm:$0xff] %v2540_v42   ;;  %2832 = vst [vmem:[%s3314_s13 + $0x170] sm:$0xff] %v2700_v43   ;;  %v921_v50 = vadd.f32 %v3299_v8, %v920_v48  ;;  %v1177_v51 = vadd.f32 %v3299_v8, %v1176_v49  ;;  %v2973_v52 = vpop.f32.mrb[34].mxu0  ;;  %v3037_v53 = vpop.f32.mrb[34].mxu1 }
 0x13c   : > { %v932_v54 = vadd.f32 %v2973_v52, %v3299_v8  ;;  %v1188_v55 = vadd.f32 %v3037_v53, %v3299_v8  ;;  %v923_v56 = vpop.f32.mrb[35].mxu0  ;;  %v1179_v57 = vpop.f32.mrb[35].mxu1  ;;  %v1337_v60 = vmax.f32 %v929_v46, 0.0  ;;  %v1401_v61 = vmax.f32 %v1185_v47, 0.0 }
 0x13d   : > { %v924_v58 = vadd.f32 %v3299_v8, %v923_v56  ;;  %v1180_v59 = vadd.f32 %v3299_v8, %v1179_v57  ;;  %v1335_v0 = vmax.f32 %v921_v50, 0.0  ;;  %v1399_v1 = vmax.f32 %v1177_v51, 0.0 }
 0x13e   : > { %v1338_v62 = vmax.f32 %v932_v54, 0.0  ;;  %v1402_v63 = vmax.f32 %v1188_v55, 0.0 }
 0x13f   : > { %v1336_v2 = vmax.f32 %v924_v58, 0.0  ;;  %v1400_v3 = vmax.f32 %v1180_v59, 0.0 }
 0x140   : > { %v2555_v4 = vpack.c.bf16 %v1338_v62, %v1337_v60  ;;  %v2715_v5 = vpack.c.bf16 %v1402_v63, %v1401_v61 }
 0x141   : > { %v2550_v6 = vpack.c.bf16 %v1336_v2, %v1335_v0  ;;  %v2710_v7 = vpack.c.bf16 %v1400_v3, %v1399_v1  ;;  %v2976_v9 = vpop.f32.mrb[36].mxu0  ;;  %v3040_v10 = vpop.f32.mrb[36].mxu1 }
 0x142   : > { %2803 = vst [vmem:[%s3314_s13 + $0x88] sm:$0xff] %v2555_v4   ;;  %2835 = vst [vmem:[%s3314_s13 + $0x188] sm:$0xff] %v2715_v5   ;;  %v945_v11 = vadd.f32 %v2976_v9, %v3299_v8  ;;  %v1201_v12 = vadd.f32 %v3040_v10, %v3299_v8  ;;  %v936_v13 = vpop.f32.mrb[37].mxu0  ;;  %v1192_v14 = vpop.f32.mrb[37].mxu1 }
 0x143   : > { %2802 = vst [vmem:[%s3314_s13 + $0x80] sm:$0xff] %v2550_v6   ;;  %2834 = vst [vmem:[%s3314_s13 + $0x180] sm:$0xff] %v2710_v7   ;;  %v937_v15 = vadd.f32 %v3299_v8, %v936_v13  ;;  %v1193_v16 = vadd.f32 %v3299_v8, %v1192_v14  ;;  %v2977_v17 = vpop.f32.mrb[38].mxu0  ;;  %v3041_v18 = vpop.f32.mrb[38].mxu1 }
 0x144   : > { %v948_v19 = vadd.f32 %v2977_v17, %v3299_v8  ;;  %v1204_v20 = vadd.f32 %v3041_v18, %v3299_v8  ;;  %v939_v21 = vpop.f32.mrb[39].mxu0  ;;  %v1195_v22 = vpop.f32.mrb[39].mxu1  ;;  %v1341_v25 = vmax.f32 %v945_v11, 0.0  ;;  %v1405_v26 = vmax.f32 %v1201_v12, 0.0 }
 0x145   : > { %v940_v23 = vadd.f32 %v3299_v8, %v939_v21  ;;  %v1196_v24 = vadd.f32 %v3299_v8, %v1195_v22  ;;  %v1339_v29 = vmax.f32 %v937_v15, 0.0  ;;  %v1403_v30 = vmax.f32 %v1193_v16, 0.0 }
 0x146   : > { %v1342_v27 = vmax.f32 %v948_v19, 0.0  ;;  %v1406_v28 = vmax.f32 %v1204_v20, 0.0 }
 0x147   : > { %v1340_v31 = vmax.f32 %v940_v23, 0.0  ;;  %v1404_v32 = vmax.f32 %v1196_v24, 0.0 }
 0x148   : > { %v2565_v33 = vpack.c.bf16 %v1342_v27, %v1341_v25  ;;  %v2725_v34 = vpack.c.bf16 %v1406_v28, %v1405_v26 }
 0x149   : > { %v2560_v35 = vpack.c.bf16 %v1340_v31, %v1339_v29  ;;  %v2720_v36 = vpack.c.bf16 %v1404_v32, %v1403_v30  ;;  %v2980_v37 = vpop.f32.mrb[40].mxu0  ;;  %v3044_v38 = vpop.f32.mrb[40].mxu1 }
 0x14a   : > { %2805 = vst [vmem:[%s3314_s13 + $0x98] sm:$0xff] %v2565_v33   ;;  %2837 = vst [vmem:[%s3314_s13 + $0x198] sm:$0xff] %v2725_v34   ;;  %v961_v39 = vadd.f32 %v2980_v37, %v3299_v8  ;;  %v1217_v40 = vadd.f32 %v3044_v38, %v3299_v8  ;;  %v952_v41 = vpop.f32.mrb[41].mxu0  ;;  %v1208_v42 = vpop.f32.mrb[41].mxu1 }
 0x14b   : > { %2804 = vst [vmem:[%s3314_s13 + $0x90] sm:$0xff] %v2560_v35   ;;  %2836 = vst [vmem:[%s3314_s13 + $0x190] sm:$0xff] %v2720_v36   ;;  %v953_v43 = vadd.f32 %v3299_v8, %v952_v41  ;;  %v1209_v44 = vadd.f32 %v3299_v8, %v1208_v42  ;;  %v2981_v45 = vpop.f32.mrb[42].mxu0  ;;  %v3045_v46 = vpop.f32.mrb[42].mxu1 }
 0x14c   : > { %v964_v47 = vadd.f32 %v2981_v45, %v3299_v8  ;;  %v1220_v48 = vadd.f32 %v3045_v46, %v3299_v8  ;;  %v955_v49 = vpop.f32.mrb[43].mxu0  ;;  %v1211_v50 = vpop.f32.mrb[43].mxu1  ;;  %v1345_v53 = vmax.f32 %v961_v39, 0.0  ;;  %v1409_v54 = vmax.f32 %v1217_v40, 0.0 }
 0x14d   : > { %v956_v51 = vadd.f32 %v3299_v8, %v955_v49  ;;  %v1212_v52 = vadd.f32 %v3299_v8, %v1211_v50  ;;  %v1343_v57 = vmax.f32 %v953_v43, 0.0  ;;  %v1407_v58 = vmax.f32 %v1209_v44, 0.0 }
 0x14e   : > { %v1346_v55 = vmax.f32 %v964_v47, 0.0  ;;  %v1410_v56 = vmax.f32 %v1220_v48, 0.0 }
 0x14f   : > { %v1344_v59 = vmax.f32 %v956_v51, 0.0  ;;  %v1408_v60 = vmax.f32 %v1212_v52, 0.0 }
 0x150   : > { %v2575_v61 = vpack.c.bf16 %v1346_v55, %v1345_v53  ;;  %v2735_v62 = vpack.c.bf16 %v1410_v56, %v1409_v54 }
 0x151   : > { %v2570_v63 = vpack.c.bf16 %v1344_v59, %v1343_v57  ;;  %v2730_v0 = vpack.c.bf16 %v1408_v60, %v1407_v58  ;;  %v2984_v1 = vpop.f32.mrb[44].mxu0  ;;  %v3048_v2 = vpop.f32.mrb[44].mxu1 }
 0x152   : > { %2807 = vst [vmem:[%s3314_s13 + $0xa8] sm:$0xff] %v2575_v61   ;;  %2839 = vst [vmem:[%s3314_s13 + $0x1a8] sm:$0xff] %v2735_v62   ;;  %v977_v3 = vadd.f32 %v2984_v1, %v3299_v8  ;;  %v1233_v4 = vadd.f32 %v3048_v2, %v3299_v8  ;;  %v968_v5 = vpop.f32.mrb[45].mxu0  ;;  %v1224_v6 = vpop.f32.mrb[45].mxu1 }
 0x153   : > { %2806 = vst [vmem:[%s3314_s13 + $0xa0] sm:$0xff] %v2570_v63   ;;  %2838 = vst [vmem:[%s3314_s13 + $0x1a0] sm:$0xff] %v2730_v0   ;;  %v969_v7 = vadd.f32 %v3299_v8, %v968_v5  ;;  %v1225_v9 = vadd.f32 %v3299_v8, %v1224_v6  ;;  %v2985_v10 = vpop.f32.mrb[46].mxu0  ;;  %v3049_v11 = vpop.f32.mrb[46].mxu1 }
 0x154   : > { %v980_v12 = vadd.f32 %v2985_v10, %v3299_v8  ;;  %v1236_v13 = vadd.f32 %v3049_v11, %v3299_v8  ;;  %v971_v14 = vpop.f32.mrb[47].mxu0  ;;  %v1227_v15 = vpop.f32.mrb[47].mxu1  ;;  %v1349_v18 = vmax.f32 %v977_v3, 0.0  ;;  %v1413_v19 = vmax.f32 %v1233_v4, 0.0 }
 0x155   : > { %v972_v16 = vadd.f32 %v3299_v8, %v971_v14  ;;  %v1228_v17 = vadd.f32 %v3299_v8, %v1227_v15  ;;  %v1347_v22 = vmax.f32 %v969_v7, 0.0  ;;  %v1411_v23 = vmax.f32 %v1225_v9, 0.0 }
 0x156   : > { %v1350_v20 = vmax.f32 %v980_v12, 0.0  ;;  %v1414_v21 = vmax.f32 %v1236_v13, 0.0 }
 0x157   : > { %v1348_v24 = vmax.f32 %v972_v16, 0.0  ;;  %v1412_v25 = vmax.f32 %v1228_v17, 0.0 }
 0x158   : > { %v2585_v26 = vpack.c.bf16 %v1350_v20, %v1349_v18  ;;  %v2745_v27 = vpack.c.bf16 %v1414_v21, %v1413_v19 }
 0x159   : > { %v2580_v28 = vpack.c.bf16 %v1348_v24, %v1347_v22  ;;  %v2740_v29 = vpack.c.bf16 %v1412_v25, %v1411_v23  ;;  %v2988_v30 = vpop.f32.mrb[48].mxu0  ;;  %v3052_v31 = vpop.f32.mrb[48].mxu1 }
 0x15a   : > { %2809 = vst [vmem:[%s3314_s13 + $0xb8] sm:$0xff] %v2585_v26   ;;  %2841 = vst [vmem:[%s3314_s13 + $0x1b8] sm:$0xff] %v2745_v27   ;;  %v993_v32 = vadd.f32 %v2988_v30, %v3299_v8  ;;  %v1249_v33 = vadd.f32 %v3052_v31, %v3299_v8  ;;  %v984_v34 = vpop.f32.mrb[49].mxu0  ;;  %v1240_v35 = vpop.f32.mrb[49].mxu1 }
 0x15b   : > { %2808 = vst [vmem:[%s3314_s13 + $0xb0] sm:$0xff] %v2580_v28   ;;  %2840 = vst [vmem:[%s3314_s13 + $0x1b0] sm:$0xff] %v2740_v29   ;;  %v985_v36 = vadd.f32 %v3299_v8, %v984_v34  ;;  %v1241_v37 = vadd.f32 %v3299_v8, %v1240_v35  ;;  %v2989_v38 = vpop.f32.mrb[50].mxu0  ;;  %v3053_v39 = vpop.f32.mrb[50].mxu1 }
 0x15c   : > { %v996_v40 = vadd.f32 %v2989_v38, %v3299_v8  ;;  %v1252_v41 = vadd.f32 %v3053_v39, %v3299_v8  ;;  %v987_v42 = vpop.f32.mrb[51].mxu0  ;;  %v1243_v43 = vpop.f32.mrb[51].mxu1  ;;  %v1353_v46 = vmax.f32 %v993_v32, 0.0  ;;  %v1417_v47 = vmax.f32 %v1249_v33, 0.0 }
 0x15d   : > { %v988_v44 = vadd.f32 %v3299_v8, %v987_v42  ;;  %v1244_v45 = vadd.f32 %v3299_v8, %v1243_v43  ;;  %v1351_v50 = vmax.f32 %v985_v36, 0.0  ;;  %v1415_v51 = vmax.f32 %v1241_v37, 0.0 }
 0x15e   : > { %v1354_v48 = vmax.f32 %v996_v40, 0.0  ;;  %v1418_v49 = vmax.f32 %v1252_v41, 0.0 }
 0x15f   : > { %v1352_v52 = vmax.f32 %v988_v44, 0.0  ;;  %v1416_v53 = vmax.f32 %v1244_v45, 0.0 }
 0x160   : > { %v2595_v54 = vpack.c.bf16 %v1354_v48, %v1353_v46  ;;  %v2755_v55 = vpack.c.bf16 %v1418_v49, %v1417_v47 }
 0x161   : > { %v2590_v56 = vpack.c.bf16 %v1352_v52, %v1351_v50  ;;  %v2750_v57 = vpack.c.bf16 %v1416_v53, %v1415_v51  ;;  %v2992_v58 = vpop.f32.mrb[52].mxu0  ;;  %v3056_v59 = vpop.f32.mrb[52].mxu1 }
 0x162   : > { %2811 = vst [vmem:[%s3314_s13 + $0xc8] sm:$0xff] %v2595_v54   ;;  %2843 = vst [vmem:[%s3314_s13 + $0x1c8] sm:$0xff] %v2755_v55   ;;  %v1009_v60 = vadd.f32 %v2992_v58, %v3299_v8  ;;  %v1265_v61 = vadd.f32 %v3056_v59, %v3299_v8  ;;  %v1000_v62 = vpop.f32.mrb[53].mxu0  ;;  %v1256_v63 = vpop.f32.mrb[53].mxu1 }
 0x163   : > { %2810 = vst [vmem:[%s3314_s13 + $0xc0] sm:$0xff] %v2590_v56   ;;  %2842 = vst [vmem:[%s3314_s13 + $0x1c0] sm:$0xff] %v2750_v57   ;;  %v1001_v0 = vadd.f32 %v3299_v8, %v1000_v62  ;;  %v1257_v1 = vadd.f32 %v3299_v8, %v1256_v63  ;;  %v2993_v2 = vpop.f32.mrb[54].mxu0  ;;  %v3057_v3 = vpop.f32.mrb[54].mxu1 }
 0x164   : > { %v1012_v4 = vadd.f32 %v2993_v2, %v3299_v8  ;;  %v1268_v5 = vadd.f32 %v3057_v3, %v3299_v8  ;;  %v1003_v6 = vpop.f32.mrb[55].mxu0  ;;  %v1259_v7 = vpop.f32.mrb[55].mxu1  ;;  %v1357_v11 = vmax.f32 %v1009_v60, 0.0  ;;  %v1421_v12 = vmax.f32 %v1265_v61, 0.0 }
 0x165   : > { %v1004_v9 = vadd.f32 %v3299_v8, %v1003_v6  ;;  %v1260_v10 = vadd.f32 %v3299_v8, %v1259_v7  ;;  %v1355_v15 = vmax.f32 %v1001_v0, 0.0  ;;  %v1419_v16 = vmax.f32 %v1257_v1, 0.0 }
 0x166   : > { %v1358_v13 = vmax.f32 %v1012_v4, 0.0  ;;  %v1422_v14 = vmax.f32 %v1268_v5, 0.0 }
 0x167   : > { %v1356_v17 = vmax.f32 %v1004_v9, 0.0  ;;  %v1420_v18 = vmax.f32 %v1260_v10, 0.0 }
 0x168   : > { %v2605_v19 = vpack.c.bf16 %v1358_v13, %v1357_v11  ;;  %v2765_v20 = vpack.c.bf16 %v1422_v14, %v1421_v12 }
 0x169   : > { %v2600_v21 = vpack.c.bf16 %v1356_v17, %v1355_v15  ;;  %v2760_v22 = vpack.c.bf16 %v1420_v18, %v1419_v16  ;;  %v2996_v23 = vpop.f32.mrb[56].mxu0  ;;  %v3060_v24 = vpop.f32.mrb[56].mxu1 }
 0x16a   : > { %2813 = vst [vmem:[%s3314_s13 + $0xd8] sm:$0xff] %v2605_v19   ;;  %2845 = vst [vmem:[%s3314_s13 + $0x1d8] sm:$0xff] %v2765_v20   ;;  %v1025_v25 = vadd.f32 %v2996_v23, %v3299_v8  ;;  %v1281_v26 = vadd.f32 %v3060_v24, %v3299_v8  ;;  %v1016_v27 = vpop.f32.mrb[57].mxu0  ;;  %v1272_v28 = vpop.f32.mrb[57].mxu1 }
 0x16b   : > { %2812 = vst [vmem:[%s3314_s13 + $0xd0] sm:$0xff] %v2600_v21   ;;  %2844 = vst [vmem:[%s3314_s13 + $0x1d0] sm:$0xff] %v2760_v22   ;;  %v1017_v29 = vadd.f32 %v3299_v8, %v1016_v27  ;;  %v1273_v30 = vadd.f32 %v3299_v8, %v1272_v28  ;;  %v2997_v31 = vpop.f32.mrb[58].mxu0  ;;  %v3061_v32 = vpop.f32.mrb[58].mxu1 }
 0x16c   : > { %v1028_v33 = vadd.f32 %v2997_v31, %v3299_v8  ;;  %v1284_v34 = vadd.f32 %v3061_v32, %v3299_v8  ;;  %v1019_v35 = vpop.f32.mrb[59].mxu0  ;;  %v1275_v36 = vpop.f32.mrb[59].mxu1  ;;  %v1361_v39 = vmax.f32 %v1025_v25, 0.0  ;;  %v1425_v40 = vmax.f32 %v1281_v26, 0.0 }
 0x16d   : > { %v1020_v37 = vadd.f32 %v3299_v8, %v1019_v35  ;;  %v1276_v38 = vadd.f32 %v3299_v8, %v1275_v36  ;;  %v1359_v43 = vmax.f32 %v1017_v29, 0.0  ;;  %v1423_v44 = vmax.f32 %v1273_v30, 0.0 }
 0x16e   : > { %v1362_v41 = vmax.f32 %v1028_v33, 0.0  ;;  %v1426_v42 = vmax.f32 %v1284_v34, 0.0 }
 0x16f   : > { %v1360_v45 = vmax.f32 %v1020_v37, 0.0  ;;  %v1424_v46 = vmax.f32 %v1276_v38, 0.0 }
 0x170   : > { %v2615_v47 = vpack.c.bf16 %v1362_v41, %v1361_v39  ;;  %v2775_v48 = vpack.c.bf16 %v1426_v42, %v1425_v40 }
 0x171   : > { %v2610_v49 = vpack.c.bf16 %v1360_v45, %v1359_v43  ;;  %v2770_v50 = vpack.c.bf16 %v1424_v46, %v1423_v44  ;;  %v3000_v51 = vpop.f32.mrb[60].mxu0  ;;  %v3064_v52 = vpop.f32.mrb[60].mxu1 }
 0x172   : > { %2815 = vst [vmem:[%s3314_s13 + $0xe8] sm:$0xff] %v2615_v47   ;;  %2847 = vst [vmem:[%s3314_s13 + $0x1e8] sm:$0xff] %v2775_v48   ;;  %v1041_v53 = vadd.f32 %v3000_v51, %v3299_v8  ;;  %v1297_v54 = vadd.f32 %v3064_v52, %v3299_v8  ;;  %v1032_v55 = vpop.f32.mrb[61].mxu0  ;;  %v1288_v56 = vpop.f32.mrb[61].mxu1 }
 0x173   : > { %2814 = vst [vmem:[%s3314_s13 + $0xe0] sm:$0xff] %v2610_v49   ;;  %2846 = vst [vmem:[%s3314_s13 + $0x1e0] sm:$0xff] %v2770_v50   ;;  %v1033_v57 = vadd.f32 %v3299_v8, %v1032_v55  ;;  %v1289_v58 = vadd.f32 %v3299_v8, %v1288_v56  ;;  %v3001_v59 = vpop.f32.mrb[62].mxu0  ;;  %v3065_v60 = vpop.f32.mrb[62].mxu1 }
 0x174   : > { %v1044_v61 = vadd.f32 %v3001_v59, %v3299_v8  ;;  %v1300_v62 = vadd.f32 %v3065_v60, %v3299_v8  ;;  %v1035_v63 = vpop.f32.mrb[63].mxu0  ;;  %v1291_v0 = vpop.f32.mrb[63].mxu1  ;;  %v1365_v3 = vmax.f32 %v1041_v53, 0.0  ;;  %v1429_v4 = vmax.f32 %v1297_v54, 0.0 }
 0x175   : > { %v1036_v1 = vadd.f32 %v3299_v8, %v1035_v63  ;;  %v1292_v2 = vadd.f32 %v3299_v8, %v1291_v0  ;;  %v1363_v7 = vmax.f32 %v1033_v57, 0.0  ;;  %v1427_v9 = vmax.f32 %v1289_v58, 0.0 }
 0x176   : > { %v1366_v5 = vmax.f32 %v1044_v61, 0.0  ;;  %v1430_v6 = vmax.f32 %v1300_v62, 0.0 }
 0x177   : > { %v1364_v10 = vmax.f32 %v1036_v1, 0.0  ;;  %v1428_v11 = vmax.f32 %v1292_v2, 0.0 }
 0x178   : > { %v2625_v12 = vpack.c.bf16 %v1366_v5, %v1365_v3  ;;  %v2785_v13 = vpack.c.bf16 %v1430_v6, %v1429_v4 }
 0x179   : > { %v2620_v14 = vpack.c.bf16 %v1364_v10, %v1363_v7  ;;  %v2780_v15 = vpack.c.bf16 %v1428_v11, %v1427_v9 }
 0x17a   : > { %2817 = vst [vmem:[%s3314_s13 + $0xf8] sm:$0xff] %v2625_v12   ;;  %2849 = vst [vmem:[%s3314_s13 + $0x1f8] sm:$0xff] %v2785_v13  }
 0x17b   : > { %2816 = vst [vmem:[%s3314_s13 + $0xf0] sm:$0xff] %v2620_v14   ;;  %2848 = vst [vmem:[%s3314_s13 + $0x1f0] sm:$0xff] %v2780_v15  }
 0x17c PF: > { %s13_s12 = sadd.s32 1, %s3168_s12  }
 0x17d   : > { %p10_p4 = scmp.ge.s32.totalorder %s13_s12, 4  }
 0x17f   :  { %12 = sbr.rel (!%p10_p4) target bundleno = 1 (0x1), region = 62 }

// kernel: feature_tunk_push.8
= control target key start
LH: loop header
LB: loop body
LE: loop exit
PB: predicated region body
PF: predicated region fallthrough
CT: control target
= control target key end

     0   :  { %v1756_v0 = vmov 0   ;;  %s2214_s1 = inlined_call_operand.vmem [shape: bf16[256,128], index: 1, kind: input, shape index: {}]   ;;  %s2215_s0 = inlined_call_operand.vmem [shape: bf16[512,256], index: 0, kind: input, shape index: {}]   ;;  %s2216_s2 = inlined_call_operand.vmem [shape: f32[1,128], index: 2, kind: input, shape index: {}]   ;;  %s2217_s3 = inlined_call_operand.vmem [shape: bf16[512,128], index: 3, kind: output, shape index: {}]  }
   0x1   :  { %534 = vmatprep.subr.bf16.mxu0 %v1756_v0  ;;  %1611 = vmatprep.subr.bf16.mxu1 %v1756_v0  ;;  %v1644_v1 = vld [vmem:[%s2214_s1] sm:$0xff]   ;;  %v1645_v2 = vld [vmem:[%s2214_s1 + $0x8] sm:$0xff]   ;;  %v1646_v3 = vld [vmem:[%s2214_s1 + $0x10] sm:$0xff]  }
   0x2   :  { %535 = vmatpush1.bf16.msra.mxu0 %v1644_v1  ;;  %1627 = vmatpush1.bf16.msra.mxu1 %v1644_v1  ;;  %v1647_v4 = vld [vmem:[%s2214_s1 + $0x18] sm:$0xff]   ;;  %v1648_v5 = vld [vmem:[%s2214_s1 + $0x20] sm:$0xff]   ;;  %v1649_v7 = vld [vmem:[%s2214_s1 + $0x28] sm:$0xff]  }
   0x3   :  { %536 = vmatprep.subr.bf16.mxu0 %v1756_v0  ;;  %1612 = vmatprep.subr.bf16.mxu1 %v1756_v0  ;;  %v1662_v6 = vld [vmem:[%s2215_s0 + $0x4] ss:$8 sps:$4 sm:$0xff]   ;;  %v1650_v9 = vld [vmem:[%s2214_s1 + $0x30] sm:$0xff]   ;;  %v1651_v10 = vld [vmem:[%s2214_s1 + $0x38] sm:$0xff]  }
   0x4   :  { %v1665_v8 = vld [vmem:[%s2215_s0 + $0x104] ss:$8 sps:$4 sm:$0xff]   ;;  %566 = vmatprep.mubr.bf16.mxu0 %v1662_v6  ;;  %v1654_v13 = vld [vmem:[%s2214_s1 + $0x50] sm:$0xff]   ;;  %v1655_v14 = vld [vmem:[%s2214_s1 + $0x58] sm:$0xff]  }
   0x5   :  { %694 = vmatprep.mubr.bf16.mxu1 %v1665_v8  ;;  %v1652_v11 = vld [vmem:[%s2214_s1 + $0x40] sm:$0xff]   ;;  %v1653_v12 = vld [vmem:[%s2214_s1 + $0x48] sm:$0xff]   ;;  %v1658_v17 = vld [vmem:[%s2214_s1 + $0x70] sm:$0xff]  }
   0x6   :  { %537 = vmatpush1.bf16.msra.mxu0 %v1645_v2  ;;  %1628 = vmatpush1.bf16.msra.mxu1 %v1645_v2  ;;  %v1656_v15 = vld [vmem:[%s2214_s1 + $0x60] sm:$0xff]   ;;  %v1657_v16 = vld [vmem:[%s2214_s1 + $0x68] sm:$0xff]   ;;  %v1659_v18 = vld [vmem:[%s2214_s1 + $0x78] sm:$0xff]  }
   0x7   :  { %538 = vmatprep.subr.bf16.mxu0 %v1756_v0  ;;  %1613 = vmatprep.subr.bf16.mxu1 %v1756_v0  ;;  %v1660_v19 = vld [vmem:[%s2215_s0] ss:$8 sps:$4 sm:$0xff]   ;;  %v1666_v21 = vld [vmem:[%s2215_s0 + $0x14] ss:$8 sps:$4 sm:$0xff]   ;;  %v1670_v23 = vld [vmem:[%s2215_s0 + $0x10] ss:$8 sps:$4 sm:$0xff]  }
   0x8   :  { %v1663_v20 = vld [vmem:[%s2215_s0 + $0x100] ss:$8 sps:$4 sm:$0xff]   ;;  %v1668_v22 = vld [vmem:[%s2215_s0 + $0x114] ss:$8 sps:$4 sm:$0xff]   ;;  %v1671_v24 = vld [vmem:[%s2215_s0 + $0x110] ss:$8 sps:$4 sm:$0xff]  }
   0x9   :  { %v1672_v25 = vld [vmem:[%s2215_s0 + $0x24] ss:$8 sps:$4 sm:$0xff]   ;;  %v1676_v27 = vld [vmem:[%s2215_s0 + $0x20] ss:$8 sps:$4 sm:$0xff]   ;;  %v1678_v29 = vld [vmem:[%s2215_s0 + $0x34] ss:$8 sps:$4 sm:$0xff]  }
   0xa   :  { %539 = vmatpush1.bf16.msra.mxu0 %v1646_v3  ;;  %1629 = vmatpush1.bf16.msra.mxu1 %v1646_v3  ;;  %v1674_v26 = vld [vmem:[%s2215_s0 + $0x124] ss:$8 sps:$4 sm:$0xff]   ;;  %v1677_v28 = vld [vmem:[%s2215_s0 + $0x120] ss:$8 sps:$4 sm:$0xff]   ;;  %v1680_v30 = vld [vmem:[%s2215_s0 + $0x134] ss:$8 sps:$4 sm:$0xff]  }
   0xb   :  { %540 = vmatprep.subr.bf16.mxu0 %v1756_v0  ;;  %1614 = vmatprep.subr.bf16.mxu1 %v1756_v0  ;;  %v1682_v31 = vld [vmem:[%s2215_s0 + $0x30] ss:$8 sps:$4 sm:$0xff]   ;;  %v1684_v33 = vld [vmem:[%s2215_s0 + $0x44] ss:$8 sps:$4 sm:$0xff]   ;;  %v1688_v35 = vld [vmem:[%s2215_s0 + $0x40] ss:$8 sps:$4 sm:$0xff]  }
   0xc   :  { %v1683_v32 = vld [vmem:[%s2215_s0 + $0x130] ss:$8 sps:$4 sm:$0xff]   ;;  %v1686_v34 = vld [vmem:[%s2215_s0 + $0x144] ss:$8 sps:$4 sm:$0xff]   ;;  %v1689_v36 = vld [vmem:[%s2215_s0 + $0x140] ss:$8 sps:$4 sm:$0xff]  }
   0xd   :  { %v1690_v37 = vld [vmem:[%s2215_s0 + $0x54] ss:$8 sps:$4 sm:$0xff]   ;;  %v1694_v39 = vld [vmem:[%s2215_s0 + $0x50] ss:$8 sps:$4 sm:$0xff]   ;;  %v1696_v41 = vld [vmem:[%s2215_s0 + $0x64] ss:$8 sps:$4 sm:$0xff]  }
   0xe   :  { %541 = vmatpush1.bf16.msra.mxu0 %v1647_v4  ;;  %1630 = vmatpush1.bf16.msra.mxu1 %v1647_v4  ;;  %v1692_v38 = vld [vmem:[%s2215_s0 + $0x154] ss:$8 sps:$4 sm:$0xff]   ;;  %v1695_v40 = vld [vmem:[%s2215_s0 + $0x150] ss:$8 sps:$4 sm:$0xff]   ;;  %v1698_v42 = vld [vmem:[%s2215_s0 + $0x164] ss:$8 sps:$4 sm:$0xff]  }
   0xf   :  { %542 = vmatprep.subr.bf16.mxu0 %v1756_v0  ;;  %1615 = vmatprep.subr.bf16.mxu1 %v1756_v0  ;;  %v1700_v43 = vld [vmem:[%s2215_s0 + $0x60] ss:$8 sps:$4 sm:$0xff]   ;;  %v1702_v45 = vld [vmem:[%s2215_s0 + $0x74] ss:$8 sps:$4 sm:$0xff]   ;;  %v1706_v47 = vld [vmem:[%s2215_s0 + $0x70] ss:$8 sps:$4 sm:$0xff]  }
  0x10   :  { %v1701_v44 = vld [vmem:[%s2215_s0 + $0x160] ss:$8 sps:$4 sm:$0xff]   ;;  %v1704_v46 = vld [vmem:[%s2215_s0 + $0x174] ss:$8 sps:$4 sm:$0xff]   ;;  %v1707_v48 = vld [vmem:[%s2215_s0 + $0x170] ss:$8 sps:$4 sm:$0xff]  }
  0x11   :  { %v1708_v49 = vld [vmem:[%s2215_s0 + $0x84] ss:$8 sps:$4 sm:$0xff]   ;;  %v1712_v51 = vld [vmem:[%s2215_s0 + $0x80] ss:$8 sps:$4 sm:$0xff]   ;;  %v1714_v53 = vld [vmem:[%s2215_s0 + $0x94] ss:$8 sps:$4 sm:$0xff]  }
  0x12   :  { %543 = vmatpush1.bf16.msra.mxu0 %v1648_v5  ;;  %1631 = vmatpush1.bf16.msra.mxu1 %v1648_v5  ;;  %v1710_v50 = vld [vmem:[%s2215_s0 + $0x184] ss:$8 sps:$4 sm:$0xff]   ;;  %v1713_v52 = vld [vmem:[%s2215_s0 + $0x180] ss:$8 sps:$4 sm:$0xff]   ;;  %v1716_v54 = vld [vmem:[%s2215_s0 + $0x194] ss:$8 sps:$4 sm:$0xff]  }
  0x13   :  { %544 = vmatprep.subr.bf16.mxu0 %v1756_v0  ;;  %1616 = vmatprep.subr.bf16.mxu1 %v1756_v0  ;;  %v1718_v55 = vld [vmem:[%s2215_s0 + $0x90] ss:$8 sps:$4 sm:$0xff]   ;;  %v1720_v57 = vld [vmem:[%s2215_s0 + $0xa4] ss:$8 sps:$4 sm:$0xff]   ;;  %v1724_v59 = vld [vmem:[%s2215_s0 + $0xa0] ss:$8 sps:$4 sm:$0xff]  }
  0x14   :  { %v1719_v56 = vld [vmem:[%s2215_s0 + $0x190] ss:$8 sps:$4 sm:$0xff]   ;;  %v1722_v58 = vld [vmem:[%s2215_s0 + $0x1a4] ss:$8 sps:$4 sm:$0xff]   ;;  %v1725_v60 = vld [vmem:[%s2215_s0 + $0x1a0] ss:$8 sps:$4 sm:$0xff]  }
  0x15   :  { %v1726_v61 = vld [vmem:[%s2215_s0 + $0xb4] ss:$8 sps:$4 sm:$0xff]   ;;  %v1730_v63 = vld [vmem:[%s2215_s0 + $0xb0] ss:$8 sps:$4 sm:$0xff]   ;;  %v1732_v1 = vld [vmem:[%s2215_s0 + $0xc4] ss:$8 sps:$4 sm:$0xff]  }
  0x16   :  { %545 = vmatpush1.bf16.msra.mxu0 %v1649_v7  ;;  %1632 = vmatpush1.bf16.msra.mxu1 %v1649_v7  ;;  %v1728_v62 = vld [vmem:[%s2215_s0 + $0x1b4] ss:$8 sps:$4 sm:$0xff]   ;;  %v1734_v2 = vld [vmem:[%s2215_s0 + $0x1c4] ss:$8 sps:$4 sm:$0xff]   ;;  %v1736_v3 = vld [vmem:[%s2215_s0 + $0xc0] ss:$8 sps:$4 sm:$0xff]  }
  0x17   :  { %546 = vmatprep.subr.bf16.mxu0 %v1756_v0  ;;  %1617 = vmatprep.subr.bf16.mxu1 %v1756_v0  ;;  %v1737_v4 = vld [vmem:[%s2215_s0 + $0x1c0] ss:$8 sps:$4 sm:$0xff]   ;;  %v1738_v5 = vld [vmem:[%s2215_s0 + $0xd4] ss:$8 sps:$4 sm:$0xff]   ;;  %v1742_v7 = vld [vmem:[%s2215_s0 + $0xd0] ss:$8 sps:$4 sm:$0xff]  }
  0x18   :  { %v1740_v6 = vld [vmem:[%s2215_s0 + $0x1d4] ss:$8 sps:$4 sm:$0xff]   ;;  %v1743_v8 = vld [vmem:[%s2215_s0 + $0x1d0] ss:$8 sps:$4 sm:$0xff]  }
  0x1a   :  { %547 = vmatpush1.bf16.msra.mxu0 %v1650_v9  ;;  %1633 = vmatpush1.bf16.msra.mxu1 %v1650_v9  ;;  %v1744_v9 = vld [vmem:[%s2215_s0 + $0xe4] ss:$8 sps:$4 sm:$0xff]  }
  0x1b   :  { %548 = vmatprep.subr.bf16.mxu0 %v1756_v0  ;;  %1618 = vmatprep.subr.bf16.mxu1 %v1756_v0 }
  0x1e   :  { %549 = vmatpush1.bf16.msra.mxu0 %v1651_v10  ;;  %1634 = vmatpush1.bf16.msra.mxu1 %v1651_v10  ;;  %v1746_v10 = vld [vmem:[%s2215_s0 + $0x1e4] ss:$8 sps:$4 sm:$0xff]  }
  0x1f   :  { %550 = vmatprep.subr.bf16.mxu0 %v1756_v0  ;;  %1619 = vmatprep.subr.bf16.mxu1 %v1756_v0 }
  0x22   :  { %551 = vmatpush1.bf16.msra.mxu0 %v1652_v11  ;;  %1635 = vmatpush1.bf16.msra.mxu1 %v1652_v11  ;;  %v1748_v11 = vld [vmem:[%s2215_s0 + $0xe0] ss:$8 sps:$4 sm:$0xff]  }
  0x23   :  { %552 = vmatprep.subr.bf16.mxu0 %v1756_v0  ;;  %1620 = vmatprep.subr.bf16.mxu1 %v1756_v0 }
  0x26   :  { %553 = vmatpush1.bf16.msra.mxu0 %v1653_v12  ;;  %1636 = vmatpush1.bf16.msra.mxu1 %v1653_v12  ;;  %v1749_v12 = vld [vmem:[%s2215_s0 + $0x1e0] ss:$8 sps:$4 sm:$0xff]  }
  0x27   :  { %554 = vmatprep.subr.bf16.mxu0 %v1756_v0  ;;  %1621 = vmatprep.subr.bf16.mxu1 %v1756_v0 }
  0x2a   :  { %555 = vmatpush1.bf16.msra.mxu0 %v1654_v13  ;;  %1637 = vmatpush1.bf16.msra.mxu1 %v1654_v13  ;;  %v1750_v13 = vld [vmem:[%s2215_s0 + $0xf4] ss:$8 sps:$4 sm:$0xff]  }
  0x2b   :  { %556 = vmatprep.subr.bf16.mxu0 %v1756_v0  ;;  %1622 = vmatprep.subr.bf16.mxu1 %v1756_v0 }
  0x2e   :  { %557 = vmatpush1.bf16.msra.mxu0 %v1655_v14  ;;  %1638 = vmatpush1.bf16.msra.mxu1 %v1655_v14  ;;  %v1752_v14 = vld [vmem:[%s2215_s0 + $0x1f4] ss:$8 sps:$4 sm:$0xff]  }
  0x2f   :  { %558 = vmatprep.subr.bf16.mxu0 %v1756_v0  ;;  %1623 = vmatprep.subr.bf16.mxu1 %v1756_v0 }
  0x32   :  { %559 = vmatpush1.bf16.msra.mxu0 %v1656_v15  ;;  %1639 = vmatpush1.bf16.msra.mxu1 %v1656_v15  ;;  %v1754_v15 = vld [vmem:[%s2215_s0 + $0xf0] ss:$8 sps:$4 sm:$0xff]  }
  0x33   :  { %560 = vmatprep.subr.bf16.mxu0 %v1756_v0  ;;  %1624 = vmatprep.subr.bf16.mxu1 %v1756_v0 }
  0x36   :  { %561 = vmatpush1.bf16.msra.mxu0 %v1657_v16  ;;  %1640 = vmatpush1.bf16.msra.mxu1 %v1657_v16  ;;  %v1755_v16 = vld [vmem:[%s2215_s0 + $0x1f0] ss:$8 sps:$4 sm:$0xff]  }
  0x37   :  { %562 = vmatprep.subr.bf16.mxu0 %v1756_v0  ;;  %1625 = vmatprep.subr.bf16.mxu1 %v1756_v0 }
  0x3a   :  { %563 = vmatpush1.bf16.msra.mxu0 %v1658_v17  ;;  %1641 = vmatpush1.bf16.msra.mxu1 %v1658_v17  ;;  %v2052_v17 = vld [vmem:[%s2216_s2] ss:$0 sm:$0xff] }
  0x3b   :  { %564 = vmatprep.subr.bf16.mxu0 %v1756_v0  ;;  %1626 = vmatprep.subr.bf16.mxu1 %v1756_v0  ;;  %v1731_v0 = vld [vmem:[%s2215_s0 + $0x1b0] ss:$8 sps:$4 sm:$0xff]  }
  0x3e   :  { %565 = vmatpush1.bf16.msra.mxu0 %v1659_v18  ;;  %1642 = vmatpush1.bf16.msra.mxu1 %v1659_v18 }
  0x41   :  { %567 = vmatmul.mubr.bf16.vlgmr.msra.gmra.mrb[0].mxu0 %v1660_v19  ;;  %695 = vmatmul.mubr.bf16.vlgmr.msra.gmra.mrb[0].mxu1 %v1663_v20 }
  0x42   :  { %574 = vmatprep.mubr.bf16.mxu0 %v1666_v21  ;;  %702 = vmatprep.mubr.bf16.mxu1 %v1668_v22 }
  0x49   :  { %575 = vmatmul.mubr.bf16.gmra.mrb[4].mxu0 %v1670_v23  ;;  %703 = vmatmul.mubr.bf16.gmra.mrb[4].mxu1 %v1671_v24 }
  0x4a   :  { %582 = vmatprep.mubr.bf16.mxu0 %v1672_v25  ;;  %710 = vmatprep.mubr.bf16.mxu1 %v1674_v26 }
  0x51   :  { %583 = vmatmul.mubr.bf16.gmra.mrb[8].mxu0 %v1676_v27  ;;  %711 = vmatmul.mubr.bf16.gmra.mrb[8].mxu1 %v1677_v28 }
  0x52   :  { %590 = vmatprep.mubr.bf16.mxu0 %v1678_v29  ;;  %718 = vmatprep.mubr.bf16.mxu1 %v1680_v30 }
  0x59   :  { %591 = vmatmul.mubr.bf16.gmra.mrb[12].mxu0 %v1682_v31  ;;  %719 = vmatmul.mubr.bf16.gmra.mrb[12].mxu1 %v1683_v32 }
  0x5a   :  { %598 = vmatprep.mubr.bf16.mxu0 %v1684_v33  ;;  %726 = vmatprep.mubr.bf16.mxu1 %v1686_v34 }
  0x61   :  { %599 = vmatmul.mubr.bf16.gmra.mrb[16].mxu0 %v1688_v35  ;;  %727 = vmatmul.mubr.bf16.gmra.mrb[16].mxu1 %v1689_v36 }
  0x62   :  { %606 = vmatprep.mubr.bf16.mxu0 %v1690_v37  ;;  %734 = vmatprep.mubr.bf16.mxu1 %v1692_v38 }
  0x69   :  { %607 = vmatmul.mubr.bf16.gmra.mrb[20].mxu0 %v1694_v39  ;;  %735 = vmatmul.mubr.bf16.gmra.mrb[20].mxu1 %v1695_v40 }
  0x6a   :  { %614 = vmatprep.mubr.bf16.mxu0 %v1696_v41  ;;  %742 = vmatprep.mubr.bf16.mxu1 %v1698_v42 }
  0x71   :  { %615 = vmatmul.mubr.bf16.gmra.mrb[24].mxu0 %v1700_v43  ;;  %743 = vmatmul.mubr.bf16.gmra.mrb[24].mxu1 %v1701_v44 }
  0x72   :  { %622 = vmatprep.mubr.bf16.mxu0 %v1702_v45  ;;  %750 = vmatprep.mubr.bf16.mxu1 %v1704_v46 }
  0x79   :  { %623 = vmatmul.mubr.bf16.gmra.mrb[28].mxu0 %v1706_v47  ;;  %751 = vmatmul.mubr.bf16.gmra.mrb[28].mxu1 %v1707_v48 }
  0x7a   :  { %630 = vmatprep.mubr.bf16.mxu0 %v1708_v49  ;;  %758 = vmatprep.mubr.bf16.mxu1 %v1710_v50 }
  0x81   :  { %631 = vmatmul.mubr.bf16.gmra.mrb[32].mxu0 %v1712_v51  ;;  %759 = vmatmul.mubr.bf16.gmra.mrb[32].mxu1 %v1713_v52 }
  0x82   :  { %638 = vmatprep.mubr.bf16.mxu0 %v1714_v53  ;;  %766 = vmatprep.mubr.bf16.mxu1 %v1716_v54 }
  0x89   :  { %639 = vmatmul.mubr.bf16.gmra.mrb[36].mxu0 %v1718_v55  ;;  %767 = vmatmul.mubr.bf16.gmra.mrb[36].mxu1 %v1719_v56 }
  0x8a   :  { %646 = vmatprep.mubr.bf16.mxu0 %v1720_v57  ;;  %774 = vmatprep.mubr.bf16.mxu1 %v1722_v58 }
  0x91   :  { %647 = vmatmul.mubr.bf16.gmra.mrb[40].mxu0 %v1724_v59  ;;  %775 = vmatmul.mubr.bf16.gmra.mrb[40].mxu1 %v1725_v60 }
  0x92   :  { %654 = vmatprep.mubr.bf16.mxu0 %v1726_v61  ;;  %782 = vmatprep.mubr.bf16.mxu1 %v1728_v62 }
  0x99   :  { %655 = vmatmul.mubr.bf16.gmra.mrb[44].mxu0 %v1730_v63  ;;  %783 = vmatmul.mubr.bf16.gmra.mrb[44].mxu1 %v1731_v0 }
  0x9a   :  { %662 = vmatprep.mubr.bf16.mxu0 %v1732_v1  ;;  %790 = vmatprep.mubr.bf16.mxu1 %v1734_v2 }
  0xa1   :  { %663 = vmatmul.mubr.bf16.gmra.mrb[48].mxu0 %v1736_v3  ;;  %791 = vmatmul.mubr.bf16.gmra.mrb[48].mxu1 %v1737_v4 }
  0xa2   :  { %670 = vmatprep.mubr.bf16.mxu0 %v1738_v5  ;;  %798 = vmatprep.mubr.bf16.mxu1 %v1740_v6 }
  0xa9   :  { %671 = vmatmul.mubr.bf16.gmra.mrb[52].mxu0 %v1742_v7  ;;  %799 = vmatmul.mubr.bf16.gmra.mrb[52].mxu1 %v1743_v8 }
  0xaa   :  { %678 = vmatprep.mubr.bf16.mxu0 %v1744_v9  ;;  %806 = vmatprep.mubr.bf16.mxu1 %v1746_v10 }
  0xb1   :  { %679 = vmatmul.mubr.bf16.gmra.mrb[56].mxu0 %v1748_v11  ;;  %807 = vmatmul.mubr.bf16.gmra.mrb[56].mxu1 %v1749_v12 }
  0xb2   :  { %686 = vmatprep.mubr.bf16.mxu0 %v1750_v13  ;;  %814 = vmatprep.mubr.bf16.mxu1 %v1752_v14 }
  0xb9   :  { %687 = vmatmul.mubr.bf16.gmra.mrb[60].mxu0 %v1754_v15  ;;  %815 = vmatmul.mubr.bf16.gmra.mrb[60].mxu1 %v1755_v16 }
 0x114   :  { %v568_v18 = vpop.f32.mrb[0].mxu0  ;;  %v696_v19 = vpop.f32.mrb[0].mxu1 }
 0x115   :  { %v569_v20 = vadd.f32 %v2052_v17, %v568_v18  ;;  %v697_v21 = vadd.f32 %v2052_v17, %v696_v19  ;;  %v570_v22 = vpop.f32.mrb[1].mxu0  ;;  %v698_v23 = vpop.f32.mrb[1].mxu1 }
 0x116   :  { %v571_v24 = vpop.f32.mrb[2].mxu0  ;;  %v699_v25 = vpop.f32.mrb[2].mxu1 }
 0x117   :  { %v572_v26 = vadd.f32 %v2052_v17, %v571_v24  ;;  %v700_v27 = vadd.f32 %v2052_v17, %v699_v25  ;;  %v573_v28 = vpop.f32.mrb[3].mxu0  ;;  %v701_v29 = vpop.f32.mrb[3].mxu1  ;;  %v823_v30 = vmax.f32 %v569_v20, 0.0  ;;  %v855_v31 = vmax.f32 %v697_v21, 0.0 }
 0x119   :  { %v824_v32 = vmax.f32 %v572_v26, 0.0  ;;  %v856_v33 = vmax.f32 %v700_v27, 0.0 }
 0x11b   :  { %v1423_v34 = vpack.c.bf16 %v824_v32, %v823_v30  ;;  %v1503_v35 = vpack.c.bf16 %v856_v33, %v855_v31 }
 0x11c   :  { %v576_v36 = vpop.f32.mrb[4].mxu0  ;;  %v704_v37 = vpop.f32.mrb[4].mxu1 }
 0x11d   :  { %1424 = vst [vmem:[%s2217_s3] sm:$0xff] %v1423_v34   ;;  %1595 = vst [vmem:[%s2217_s3 + $0x80] sm:$0xff] %v1503_v35   ;;  %v577_v38 = vadd.f32 %v2052_v17, %v576_v36  ;;  %v705_v39 = vadd.f32 %v2052_v17, %v704_v37  ;;  %v578_v40 = vpop.f32.mrb[5].mxu0  ;;  %v706_v41 = vpop.f32.mrb[5].mxu1 }
 0x11e   :  { %v579_v42 = vpop.f32.mrb[6].mxu0  ;;  %v707_v43 = vpop.f32.mrb[6].mxu1 }
 0x11f   :  { %v580_v44 = vadd.f32 %v2052_v17, %v579_v42  ;;  %v708_v45 = vadd.f32 %v2052_v17, %v707_v43  ;;  %v581_v46 = vpop.f32.mrb[7].mxu0  ;;  %v709_v47 = vpop.f32.mrb[7].mxu1  ;;  %v825_v48 = vmax.f32 %v577_v38, 0.0  ;;  %v857_v49 = vmax.f32 %v705_v39, 0.0 }
 0x121   :  { %v826_v50 = vmax.f32 %v580_v44, 0.0  ;;  %v858_v51 = vmax.f32 %v708_v45, 0.0 }
 0x123   :  { %v1428_v52 = vpack.c.bf16 %v826_v50, %v825_v48  ;;  %v1508_v53 = vpack.c.bf16 %v858_v51, %v857_v49 }
 0x124   :  { %v584_v54 = vpop.f32.mrb[8].mxu0  ;;  %v712_v55 = vpop.f32.mrb[8].mxu1 }
 0x125   :  { %1580 = vst [vmem:[%s2217_s3 + $0x8] sm:$0xff] %v1428_v52   ;;  %1596 = vst [vmem:[%s2217_s3 + $0x88] sm:$0xff] %v1508_v53   ;;  %v585_v56 = vadd.f32 %v2052_v17, %v584_v54  ;;  %v713_v57 = vadd.f32 %v2052_v17, %v712_v55  ;;  %v586_v58 = vpop.f32.mrb[9].mxu0  ;;  %v714_v59 = vpop.f32.mrb[9].mxu1 }
 0x126   :  { %v587_v60 = vpop.f32.mrb[10].mxu0  ;;  %v715_v61 = vpop.f32.mrb[10].mxu1 }
 0x127   :  { %v588_v62 = vadd.f32 %v2052_v17, %v587_v60  ;;  %v716_v63 = vadd.f32 %v2052_v17, %v715_v61  ;;  %v589_v0 = vpop.f32.mrb[11].mxu0  ;;  %v717_v1 = vpop.f32.mrb[11].mxu1  ;;  %v827_v2 = vmax.f32 %v585_v56, 0.0  ;;  %v859_v3 = vmax.f32 %v713_v57, 0.0 }
 0x129   :  { %v828_v4 = vmax.f32 %v588_v62, 0.0  ;;  %v860_v5 = vmax.f32 %v716_v63, 0.0 }
 0x12b   :  { %v1433_v6 = vpack.c.bf16 %v828_v4, %v827_v2  ;;  %v1513_v7 = vpack.c.bf16 %v860_v5, %v859_v3 }
 0x12c   :  { %v592_v8 = vpop.f32.mrb[12].mxu0  ;;  %v720_v9 = vpop.f32.mrb[12].mxu1 }
 0x12d   :  { %1581 = vst [vmem:[%s2217_s3 + $0x10] sm:$0xff] %v1433_v6   ;;  %1597 = vst [vmem:[%s2217_s3 + $0x90] sm:$0xff] %v1513_v7   ;;  %v593_v10 = vadd.f32 %v2052_v17, %v592_v8  ;;  %v721_v11 = vadd.f32 %v2052_v17, %v720_v9  ;;  %v594_v12 = vpop.f32.mrb[13].mxu0  ;;  %v722_v13 = vpop.f32.mrb[13].mxu1 }
 0x12e   :  { %v595_v14 = vpop.f32.mrb[14].mxu0  ;;  %v723_v15 = vpop.f32.mrb[14].mxu1 }
 0x12f   :  { %v596_v16 = vadd.f32 %v2052_v17, %v595_v14  ;;  %v724_v18 = vadd.f32 %v2052_v17, %v723_v15  ;;  %v597_v19 = vpop.f32.mrb[15].mxu0  ;;  %v725_v20 = vpop.f32.mrb[15].mxu1  ;;  %v829_v21 = vmax.f32 %v593_v10, 0.0  ;;  %v861_v22 = vmax.f32 %v721_v11, 0.0 }
 0x131   :  { %v830_v23 = vmax.f32 %v596_v16, 0.0  ;;  %v862_v24 = vmax.f32 %v724_v18, 0.0 }
 0x133   :  { %v1438_v25 = vpack.c.bf16 %v830_v23, %v829_v21  ;;  %v1518_v26 = vpack.c.bf16 %v862_v24, %v861_v22 }
 0x134   :  { %v600_v27 = vpop.f32.mrb[16].mxu0  ;;  %v728_v28 = vpop.f32.mrb[16].mxu1 }
 0x135   :  { %1582 = vst [vmem:[%s2217_s3 + $0x18] sm:$0xff] %v1438_v25   ;;  %1598 = vst [vmem:[%s2217_s3 + $0x98] sm:$0xff] %v1518_v26   ;;  %v601_v29 = vadd.f32 %v2052_v17, %v600_v27  ;;  %v729_v30 = vadd.f32 %v2052_v17, %v728_v28  ;;  %v602_v31 = vpop.f32.mrb[17].mxu0  ;;  %v730_v32 = vpop.f32.mrb[17].mxu1 }
 0x136   :  { %v603_v33 = vpop.f32.mrb[18].mxu0  ;;  %v731_v34 = vpop.f32.mrb[18].mxu1 }
 0x137   :  { %v604_v35 = vadd.f32 %v2052_v17, %v603_v33  ;;  %v732_v36 = vadd.f32 %v2052_v17, %v731_v34  ;;  %v605_v37 = vpop.f32.mrb[19].mxu0  ;;  %v733_v38 = vpop.f32.mrb[19].mxu1  ;;  %v831_v39 = vmax.f32 %v601_v29, 0.0  ;;  %v863_v40 = vmax.f32 %v729_v30, 0.0 }
 0x139   :  { %v832_v41 = vmax.f32 %v604_v35, 0.0  ;;  %v864_v42 = vmax.f32 %v732_v36, 0.0 }
 0x13b   :  { %v1443_v43 = vpack.c.bf16 %v832_v41, %v831_v39  ;;  %v1523_v44 = vpack.c.bf16 %v864_v42, %v863_v40 }
 0x13c   :  { %v608_v45 = vpop.f32.mrb[20].mxu0  ;;  %v736_v46 = vpop.f32.mrb[20].mxu1 }
 0x13d   :  { %1583 = vst [vmem:[%s2217_s3 + $0x20] sm:$0xff] %v1443_v43   ;;  %1599 = vst [vmem:[%s2217_s3 + $0xa0] sm:$0xff] %v1523_v44   ;;  %v609_v47 = vadd.f32 %v2052_v17, %v608_v45  ;;  %v737_v48 = vadd.f32 %v2052_v17, %v736_v46  ;;  %v610_v49 = vpop.f32.mrb[21].mxu0  ;;  %v738_v50 = vpop.f32.mrb[21].mxu1 }
 0x13e   :  { %v611_v51 = vpop.f32.mrb[22].mxu0  ;;  %v739_v52 = vpop.f32.mrb[22].mxu1 }
 0x13f   :  { %v612_v53 = vadd.f32 %v2052_v17, %v611_v51  ;;  %v740_v54 = vadd.f32 %v2052_v17, %v739_v52  ;;  %v613_v55 = vpop.f32.mrb[23].mxu0  ;;  %v741_v56 = vpop.f32.mrb[23].mxu1  ;;  %v833_v57 = vmax.f32 %v609_v47, 0.0  ;;  %v865_v58 = vmax.f32 %v737_v48, 0.0 }
 0x141   :  { %v834_v59 = vmax.f32 %v612_v53, 0.0  ;;  %v866_v60 = vmax.f32 %v740_v54, 0.0 }
 0x143   :  { %v1448_v61 = vpack.c.bf16 %v834_v59, %v833_v57  ;;  %v1528_v62 = vpack.c.bf16 %v866_v60, %v865_v58 }
 0x144   :  { %v616_v63 = vpop.f32.mrb[24].mxu0  ;;  %v744_v0 = vpop.f32.mrb[24].mxu1 }
 0x145   :  { %1584 = vst [vmem:[%s2217_s3 + $0x28] sm:$0xff] %v1448_v61   ;;  %1600 = vst [vmem:[%s2217_s3 + $0xa8] sm:$0xff] %v1528_v62   ;;  %v617_v1 = vadd.f32 %v2052_v17, %v616_v63  ;;  %v745_v2 = vadd.f32 %v2052_v17, %v744_v0  ;;  %v618_v3 = vpop.f32.mrb[25].mxu0  ;;  %v746_v4 = vpop.f32.mrb[25].mxu1 }
 0x146   :  { %v619_v5 = vpop.f32.mrb[26].mxu0  ;;  %v747_v6 = vpop.f32.mrb[26].mxu1 }
 0x147   :  { %v620_v7 = vadd.f32 %v2052_v17, %v619_v5  ;;  %v748_v8 = vadd.f32 %v2052_v17, %v747_v6  ;;  %v621_v9 = vpop.f32.mrb[27].mxu0  ;;  %v749_v10 = vpop.f32.mrb[27].mxu1  ;;  %v835_v11 = vmax.f32 %v617_v1, 0.0  ;;  %v867_v12 = vmax.f32 %v745_v2, 0.0 }
 0x149   :  { %v836_v13 = vmax.f32 %v620_v7, 0.0  ;;  %v868_v14 = vmax.f32 %v748_v8, 0.0 }
 0x14b   :  { %v1453_v15 = vpack.c.bf16 %v836_v13, %v835_v11  ;;  %v1533_v16 = vpack.c.bf16 %v868_v14, %v867_v12 }
 0x14c   :  { %v624_v18 = vpop.f32.mrb[28].mxu0  ;;  %v752_v19 = vpop.f32.mrb[28].mxu1 }
 0x14d   :  { %1585 = vst [vmem:[%s2217_s3 + $0x30] sm:$0xff] %v1453_v15   ;;  %1601 = vst [vmem:[%s2217_s3 + $0xb0] sm:$0xff] %v1533_v16   ;;  %v625_v20 = vadd.f32 %v2052_v17, %v624_v18  ;;  %v753_v21 = vadd.f32 %v2052_v17, %v752_v19  ;;  %v626_v22 = vpop.f32.mrb[29].mxu0  ;;  %v754_v23 = vpop.f32.mrb[29].mxu1 }
 0x14e   :  { %v627_v24 = vpop.f32.mrb[30].mxu0  ;;  %v755_v25 = vpop.f32.mrb[30].mxu1 }
 0x14f   :  { %v628_v26 = vadd.f32 %v2052_v17, %v627_v24  ;;  %v756_v27 = vadd.f32 %v2052_v17, %v755_v25  ;;  %v629_v28 = vpop.f32.mrb[31].mxu0  ;;  %v757_v29 = vpop.f32.mrb[31].mxu1  ;;  %v837_v30 = vmax.f32 %v625_v20, 0.0  ;;  %v869_v31 = vmax.f32 %v753_v21, 0.0 }
 0x151   :  { %v838_v32 = vmax.f32 %v628_v26, 0.0  ;;  %v870_v33 = vmax.f32 %v756_v27, 0.0 }
 0x153   :  { %v1458_v34 = vpack.c.bf16 %v838_v32, %v837_v30  ;;  %v1538_v35 = vpack.c.bf16 %v870_v33, %v869_v31 }
 0x154   :  { %v632_v36 = vpop.f32.mrb[32].mxu0  ;;  %v760_v37 = vpop.f32.mrb[32].mxu1 }
 0x155   :  { %1586 = vst [vmem:[%s2217_s3 + $0x38] sm:$0xff] %v1458_v34   ;;  %1602 = vst [vmem:[%s2217_s3 + $0xb8] sm:$0xff] %v1538_v35   ;;  %v633_v38 = vadd.f32 %v2052_v17, %v632_v36  ;;  %v761_v39 = vadd.f32 %v2052_v17, %v760_v37  ;;  %v634_v40 = vpop.f32.mrb[33].mxu0  ;;  %v762_v41 = vpop.f32.mrb[33].mxu1 }
 0x156   :  { %v635_v42 = vpop.f32.mrb[34].mxu0  ;;  %v763_v43 = vpop.f32.mrb[34].mxu1 }
 0x157   :  { %v636_v44 = vadd.f32 %v2052_v17, %v635_v42  ;;  %v764_v45 = vadd.f32 %v2052_v17, %v763_v43  ;;  %v637_v46 = vpop.f32.mrb[35].mxu0  ;;  %v765_v47 = vpop.f32.mrb[35].mxu1  ;;  %v839_v48 = vmax.f32 %v633_v38, 0.0  ;;  %v871_v49 = vmax.f32 %v761_v39, 0.0 }
 0x159   :  { %v840_v50 = vmax.f32 %v636_v44, 0.0  ;;  %v872_v51 = vmax.f32 %v764_v45, 0.0 }
 0x15b   :  { %v1463_v52 = vpack.c.bf16 %v840_v50, %v839_v48  ;;  %v1543_v53 = vpack.c.bf16 %v872_v51, %v871_v49 }
 0x15c   :  { %v640_v54 = vpop.f32.mrb[36].mxu0  ;;  %v768_v55 = vpop.f32.mrb[36].mxu1 }
 0x15d   :  { %1587 = vst [vmem:[%s2217_s3 + $0x40] sm:$0xff] %v1463_v52   ;;  %1603 = vst [vmem:[%s2217_s3 + $0xc0] sm:$0xff] %v1543_v53   ;;  %v641_v56 = vadd.f32 %v2052_v17, %v640_v54  ;;  %v769_v57 = vadd.f32 %v2052_v17, %v768_v55  ;;  %v642_v58 = vpop.f32.mrb[37].mxu0  ;;  %v770_v59 = vpop.f32.mrb[37].mxu1 }
 0x15e   :  { %v643_v60 = vpop.f32.mrb[38].mxu0  ;;  %v771_v61 = vpop.f32.mrb[38].mxu1 }
 0x15f   :  { %v644_v62 = vadd.f32 %v2052_v17, %v643_v60  ;;  %v772_v63 = vadd.f32 %v2052_v17, %v771_v61  ;;  %v645_v0 = vpop.f32.mrb[39].mxu0  ;;  %v773_v1 = vpop.f32.mrb[39].mxu1  ;;  %v841_v2 = vmax.f32 %v641_v56, 0.0  ;;  %v873_v3 = vmax.f32 %v769_v57, 0.0 }
 0x161   :  { %v842_v4 = vmax.f32 %v644_v62, 0.0  ;;  %v874_v5 = vmax.f32 %v772_v63, 0.0 }
 0x163   :  { %v1468_v6 = vpack.c.bf16 %v842_v4, %v841_v2  ;;  %v1548_v7 = vpack.c.bf16 %v874_v5, %v873_v3 }
 0x164   :  { %v648_v8 = vpop.f32.mrb[40].mxu0  ;;  %v776_v9 = vpop.f32.mrb[40].mxu1 }
 0x165   :  { %1588 = vst [vmem:[%s2217_s3 + $0x48] sm:$0xff] %v1468_v6   ;;  %1604 = vst [vmem:[%s2217_s3 + $0xc8] sm:$0xff] %v1548_v7   ;;  %v649_v10 = vadd.f32 %v2052_v17, %v648_v8  ;;  %v777_v11 = vadd.f32 %v2052_v17, %v776_v9  ;;  %v650_v12 = vpop.f32.mrb[41].mxu0  ;;  %v778_v13 = vpop.f32.mrb[41].mxu1 }
 0x166   :  { %v651_v14 = vpop.f32.mrb[42].mxu0  ;;  %v779_v15 = vpop.f32.mrb[42].mxu1 }
 0x167   :  { %v652_v16 = vadd.f32 %v2052_v17, %v651_v14  ;;  %v780_v18 = vadd.f32 %v2052_v17, %v779_v15  ;;  %v653_v19 = vpop.f32.mrb[43].mxu0  ;;  %v781_v20 = vpop.f32.mrb[43].mxu1  ;;  %v843_v21 = vmax.f32 %v649_v10, 0.0  ;;  %v875_v22 = vmax.f32 %v777_v11, 0.0 }
 0x169   :  { %v844_v23 = vmax.f32 %v652_v16, 0.0  ;;  %v876_v24 = vmax.f32 %v780_v18, 0.0 }
 0x16b   :  { %v1473_v25 = vpack.c.bf16 %v844_v23, %v843_v21  ;;  %v1553_v26 = vpack.c.bf16 %v876_v24, %v875_v22 }
 0x16c   :  { %v656_v27 = vpop.f32.mrb[44].mxu0  ;;  %v784_v28 = vpop.f32.mrb[44].mxu1 }
 0x16d   :  { %1589 = vst [vmem:[%s2217_s3 + $0x50] sm:$0xff] %v1473_v25   ;;  %1605 = vst [vmem:[%s2217_s3 + $0xd0] sm:$0xff] %v1553_v26   ;;  %v657_v29 = vadd.f32 %v2052_v17, %v656_v27  ;;  %v785_v30 = vadd.f32 %v2052_v17, %v784_v28  ;;  %v658_v31 = vpop.f32.mrb[45].mxu0  ;;  %v786_v32 = vpop.f32.mrb[45].mxu1 }
 0x16e   :  { %v659_v33 = vpop.f32.mrb[46].mxu0  ;;  %v787_v34 = vpop.f32.mrb[46].mxu1 }
 0x16f   :  { %v660_v35 = vadd.f32 %v2052_v17, %v659_v33  ;;  %v788_v36 = vadd.f32 %v2052_v17, %v787_v34  ;;  %v661_v37 = vpop.f32.mrb[47].mxu0  ;;  %v789_v38 = vpop.f32.mrb[47].mxu1  ;;  %v845_v39 = vmax.f32 %v657_v29, 0.0  ;;  %v877_v40 = vmax.f32 %v785_v30, 0.0 }
 0x171   :  { %v846_v41 = vmax.f32 %v660_v35, 0.0  ;;  %v878_v42 = vmax.f32 %v788_v36, 0.0 }
 0x173   :  { %v1478_v43 = vpack.c.bf16 %v846_v41, %v845_v39  ;;  %v1558_v44 = vpack.c.bf16 %v878_v42, %v877_v40 }
 0x174   :  { %v664_v45 = vpop.f32.mrb[48].mxu0  ;;  %v792_v46 = vpop.f32.mrb[48].mxu1 }
 0x175   :  { %1590 = vst [vmem:[%s2217_s3 + $0x58] sm:$0xff] %v1478_v43   ;;  %1606 = vst [vmem:[%s2217_s3 + $0xd8] sm:$0xff] %v1558_v44   ;;  %v665_v47 = vadd.f32 %v2052_v17, %v664_v45  ;;  %v793_v48 = vadd.f32 %v2052_v17, %v792_v46  ;;  %v666_v49 = vpop.f32.mrb[49].mxu0  ;;  %v794_v50 = vpop.f32.mrb[49].mxu1 }
 0x176   :  { %v667_v51 = vpop.f32.mrb[50].mxu0  ;;  %v795_v52 = vpop.f32.mrb[50].mxu1 }
 0x177   :  { %v668_v53 = vadd.f32 %v2052_v17, %v667_v51  ;;  %v796_v54 = vadd.f32 %v2052_v17, %v795_v52  ;;  %v669_v55 = vpop.f32.mrb[51].mxu0  ;;  %v797_v56 = vpop.f32.mrb[51].mxu1  ;;  %v847_v57 = vmax.f32 %v665_v47, 0.0  ;;  %v879_v58 = vmax.f32 %v793_v48, 0.0 }
 0x179   :  { %v848_v59 = vmax.f32 %v668_v53, 0.0  ;;  %v880_v60 = vmax.f32 %v796_v54, 0.0 }
 0x17b   :  { %v1483_v61 = vpack.c.bf16 %v848_v59, %v847_v57  ;;  %v1563_v62 = vpack.c.bf16 %v880_v60, %v879_v58 }
 0x17c   :  { %v672_v63 = vpop.f32.mrb[52].mxu0  ;;  %v800_v0 = vpop.f32.mrb[52].mxu1 }
 0x17d   :  { %1591 = vst [vmem:[%s2217_s3 + $0x60] sm:$0xff] %v1483_v61   ;;  %1607 = vst [vmem:[%s2217_s3 + $0xe0] sm:$0xff] %v1563_v62   ;;  %v673_v1 = vadd.f32 %v2052_v17, %v672_v63  ;;  %v801_v2 = vadd.f32 %v2052_v17, %v800_v0  ;;  %v674_v3 = vpop.f32.mrb[53].mxu0  ;;  %v802_v4 = vpop.f32.mrb[53].mxu1 }
 0x17e   :  { %v675_v5 = vpop.f32.mrb[54].mxu0  ;;  %v803_v6 = vpop.f32.mrb[54].mxu1 }
 0x17f   :  { %v676_v7 = vadd.f32 %v2052_v17, %v675_v5  ;;  %v804_v8 = vadd.f32 %v2052_v17, %v803_v6  ;;  %v677_v9 = vpop.f32.mrb[55].mxu0  ;;  %v805_v10 = vpop.f32.mrb[55].mxu1  ;;  %v849_v11 = vmax.f32 %v673_v1, 0.0  ;;  %v881_v12 = vmax.f32 %v801_v2, 0.0 }
 0x181   :  { %v850_v13 = vmax.f32 %v676_v7, 0.0  ;;  %v882_v14 = vmax.f32 %v804_v8, 0.0 }
 0x183   :  { %v1488_v15 = vpack.c.bf16 %v850_v13, %v849_v11  ;;  %v1568_v16 = vpack.c.bf16 %v882_v14, %v881_v12 }
 0x184   :  { %v680_v18 = vpop.f32.mrb[56].mxu0  ;;  %v808_v19 = vpop.f32.mrb[56].mxu1 }
 0x185   :  { %1592 = vst [vmem:[%s2217_s3 + $0x68] sm:$0xff] %v1488_v15   ;;  %1608 = vst [vmem:[%s2217_s3 + $0xe8] sm:$0xff] %v1568_v16   ;;  %v681_v20 = vadd.f32 %v2052_v17, %v680_v18  ;;  %v809_v21 = vadd.f32 %v2052_v17, %v808_v19  ;;  %v682_v22 = vpop.f32.mrb[57].mxu0  ;;  %v810_v23 = vpop.f32.mrb[57].mxu1 }
 0x186   :  { %v683_v24 = vpop.f32.mrb[58].mxu0  ;;  %v811_v25 = vpop.f32.mrb[58].mxu1 }
 0x187   :  { %v684_v26 = vadd.f32 %v2052_v17, %v683_v24  ;;  %v812_v27 = vadd.f32 %v2052_v17, %v811_v25  ;;  %v685_v28 = vpop.f32.mrb[59].mxu0  ;;  %v813_v29 = vpop.f32.mrb[59].mxu1  ;;  %v851_v30 = vmax.f32 %v681_v20, 0.0  ;;  %v883_v31 = vmax.f32 %v809_v21, 0.0 }
 0x189   :  { %v852_v32 = vmax.f32 %v684_v26, 0.0  ;;  %v884_v33 = vmax.f32 %v812_v27, 0.0 }
 0x18b   :  { %v1493_v34 = vpack.c.bf16 %v852_v32, %v851_v30  ;;  %v1573_v35 = vpack.c.bf16 %v884_v33, %v883_v31 }
 0x18c   :  { %v688_v36 = vpop.f32.mrb[60].mxu0  ;;  %v816_v37 = vpop.f32.mrb[60].mxu1 }
 0x18d   :  { %1593 = vst [vmem:[%s2217_s3 + $0x70] sm:$0xff] %v1493_v34   ;;  %1609 = vst [vmem:[%s2217_s3 + $0xf0] sm:$0xff] %v1573_v35   ;;  %v689_v38 = vadd.f32 %v2052_v17, %v688_v36  ;;  %v817_v39 = vadd.f32 %v2052_v17, %v816_v37  ;;  %v690_v40 = vpop.f32.mrb[61].mxu0  ;;  %v818_v41 = vpop.f32.mrb[61].mxu1 }
 0x18e   :  { %v691_v42 = vpop.f32.mrb[62].mxu0  ;;  %v819_v43 = vpop.f32.mrb[62].mxu1 }
 0x18f   :  { %v692_v44 = vadd.f32 %v2052_v17, %v691_v42  ;;  %v820_v45 = vadd.f32 %v2052_v17, %v819_v43  ;;  %v693_v46 = vpop.f32.mrb[63].mxu0  ;;  %v821_v47 = vpop.f32.mrb[63].mxu1  ;;  %v853_v48 = vmax.f32 %v689_v38, 0.0  ;;  %v885_v49 = vmax.f32 %v817_v39, 0.0 }
 0x191   :  { %v854_v50 = vmax.f32 %v692_v44, 0.0  ;;  %v886_v51 = vmax.f32 %v820_v45, 0.0 }
 0x193   :  { %v1498_v52 = vpack.c.bf16 %v854_v50, %v853_v48  ;;  %v1578_v53 = vpack.c.bf16 %v886_v51, %v885_v49 }
 0x195   :  { %1594 = vst [vmem:[%s2217_s3 + $0x78] sm:$0xff] %v1498_v52   ;;  %1610 = vst [vmem:[%s2217_s3 + $0xf8] sm:$0xff] %v1578_v53  }

// kernel: closed_call.52
= control target key start
LH: loop header
LB: loop body
LE: loop exit
PB: predicated region body
PF: predicated region fallthrough
CT: control target
= control target key end

     0   :  { %v71_v5 = vlaneseq  ;;  %s982_s1 = inlined_call_operand.vmem [shape: bf16[256,128], index: 1, kind: input, shape index: {}]   ;;  %s983_s0 = inlined_call_operand.vmem [shape: bf16[128,256], index: 0, kind: input, shape index: {}]   ;;  %s984_s2 = inlined_call_operand.vmem [shape: f32[1,256], index: 2, kind: input, shape index: {}]   ;;  %s985_s3 = inlined_call_operand.vmem [shape: f32[1,256], index: 3, kind: input, shape index: {}]   ;;  %s986_s4 = inlined_call_operand.vmem [shape: f32[1,128], index: 4, kind: input, shape index: {}]   ;;  %s987_s5 = inlined_call_operand.vmem [shape: bf16[128,128], index: 5, kind: output, shape index: {}]  }
   0x1   :  { %v713_v0 = vld [vmem:[%s982_s1 + $0x40] sm:$0xff]   ;;  %v715_v2 = vld [vmem:[%s982_s1 + $0x48] sm:$0xff]   ;;  %v717_v4 = vld [vmem:[%s982_s1 + $0x50] sm:$0xff]  }
   0x2   :  { %v714_v1 = vld [vmem:[%s982_s1] sm:$0xff]   ;;  %633 = vmatprep.subr.bf16.mxu0 %v713_v0  ;;  %697 = vmatprep.subr.bf16.mxu1 %v713_v0  ;;  %v716_v3 = vld [vmem:[%s982_s1 + $0x8] sm:$0xff]   ;;  %v718_v6 = vld [vmem:[%s982_s1 + $0x10] sm:$0xff]   ;;  %v72_v8 = vshrl.u32 %v71_v5, 7 }
   0x3   :  { %634 = vmatpush3.bf16.msra.mxu0 %v714_v1  ;;  %705 = vmatpush3.bf16.msra.mxu1 %v714_v1  ;;  %v719_v7 = vld [vmem:[%s982_s1 + $0x58] sm:$0xff]   ;;  %v721_v10 = vld [vmem:[%s982_s1 + $0x60] sm:$0xff]   ;;  %v723_v14 = vld [vmem:[%s982_s1 + $0x68] sm:$0xff]  }
   0x4   :  { %635 = vmatprep.subr.bf16.mxu0 %v715_v2  ;;  %698 = vmatprep.subr.bf16.mxu1 %v715_v2  ;;  %v720_v9 = vld [vmem:[%s982_s1 + $0x18] sm:$0xff]   ;;  %v73_v11 = vsub.s32 0, %v72_v8  ;;  %v722_v12 = vld [vmem:[%s982_s1 + $0x20] sm:$0xff]   ;;  %v77_v13 = vsub.s32 1, %v72_v8  ;;  %v22_v16 = vld [vmem:[%s983_s0 + $0x8] sm:$0xff] }
   0x5   :  { %v21_v15 = vld [vmem:[%s983_s0] sm:$0xff]  ;;  %v39_v20 = vunpack.c.l.bf16 %v22_v16  ;;  %v40_v21 = vunpack.c.h.bf16 %v22_v16  ;;  %v30_v24 = vld [vmem:[%s983_s0 + $0x48] sm:$0xff]  ;;  %v821_v29 = vld [vmem:[%s983_s0 + $0x10] sm:$0xff] }
   0x6   :  { %v69_v17 = vld [vmem:[%s984_s2] sm:$0x3]  ;;  %v37_v18 = vunpack.c.l.bf16 %v21_v15  ;;  %v38_v19 = vunpack.c.h.bf16 %v21_v15  ;;  %v724_v30 = vld [vmem:[%s982_s1 + $0x28] sm:$0xff]   ;;  %v55_v33 = vunpack.c.l.bf16 %v30_v24  ;;  %v56_v34 = vunpack.c.h.bf16 %v30_v24  ;;  %v725_v35 = vld [vmem:[%s982_s1 + $0x70] sm:$0xff]  }
   0x7   :  { %636 = vmatpush3.bf16.msra.mxu0 %v716_v3  ;;  %706 = vmatpush3.bf16.msra.mxu1 %v716_v3  ;;  %v113_v22 = vld [vmem:[%s985_s3] sm:$0x3]  ;;  %v810_v25 = vrot.slane %v69_v17, %v73_v11  ;;  %v812_v26 = vrot.slane %v69_v17, %v77_v13  ;;  %v24_v39 = vld [vmem:[%s983_s0 + $0x18] sm:$0xff]  ;;  %v42_v40 = vunpack.c.h.bf16 %v821_v29  ;;  %v726_v49 = vld [vmem:[%s982_s1 + $0x30] sm:$0xff]  }
   0x8   :  { %637 = vmatprep.subr.bf16.mxu0 %v717_v4  ;;  %699 = vmatprep.subr.bf16.mxu1 %v717_v4  ;;  %v29_v23 = vld [vmem:[%s983_s0 + $0x40] sm:$0xff]  ;;  %v814_v27 = vrot.slane %v113_v22, %v73_v11  ;;  %v816_v28 = vrot.slane %v113_v22, %v77_v13  ;;  %v44_v53 = vunpack.c.h.bf16 %v24_v39  ;;  %v727_v54 = vld [vmem:[%s982_s1 + $0x78] sm:$0xff]   ;;  %v31_v59 = vld [vmem:[%s983_s0 + $0x50] sm:$0xff]  ;;  %v41_v13 = vunpack.c.l.bf16 %v821_v29 }
   0x9   :  { %v53_v31 = vunpack.c.l.bf16 %v29_v23  ;;  %v54_v32 = vunpack.c.h.bf16 %v29_v23  ;;  %v82_v36 = vmul.f32 %v812_v26, %v38_v19  ;;  %v84_v37 = vmul.f32 %v812_v26, %v40_v21  ;;  %v32_v0 = vld [vmem:[%s983_s0 + $0x58] sm:$0xff] }
   0xa   :  { %v81_v38 = vmul.f32 %v810_v25, %v37_v18  ;;  %v100_v42 = vmul.f32 %v812_v26, %v56_v34  ;;  %v83_v43 = vmul.f32 %v810_v25, %v39_v20  ;;  %v99_v48 = vmul.f32 %v810_v25, %v55_v33  ;;  %v728_v5 = vld [vmem:[%s982_s1 + $0x38] sm:$0xff]   ;;  %v25_v18 = vld [vmem:[%s983_s0 + $0x20] sm:$0xff] }
   0xb   :  { %638 = vmatpush3.bf16.msra.mxu0 %v718_v6  ;;  %707 = vmatpush3.bf16.msra.mxu1 %v718_v6  ;;  %v98_v41 = vmul.f32 %v812_v26, %v54_v32  ;;  %v97_v44 = vmul.f32 %v810_v25, %v53_v31  ;;  %v126_v45 = vadd.f32 %v816_v28, %v82_v36  ;;  %v43_v16 = vunpack.c.l.bf16 %v24_v39  ;;  %v26_v31 = vld [vmem:[%s983_s0 + $0x28] sm:$0xff]  ;;  %v33_v36 = vld [vmem:[%s983_s0 + $0x60] sm:$0xff] }
   0xc   :  { %639 = vmatprep.subr.bf16.mxu0 %v719_v7  ;;  %700 = vmatprep.subr.bf16.mxu1 %v719_v7  ;;  %v128_v46 = vadd.f32 %v816_v28, %v84_v37  ;;  %v125_v47 = vadd.f32 %v814_v27, %v81_v38  ;;  %v144_v51 = vadd.f32 %v816_v28, %v100_v42  ;;  %v57_v17 = vunpack.c.l.bf16 %v31_v59 }
   0xd   :  { %v142_v50 = vadd.f32 %v816_v28, %v98_v41  ;;  %v127_v52 = vadd.f32 %v814_v27, %v83_v43  ;;  %v158_v55 = vmax.f32 %v126_v45, 0.0  ;;  %v141_v58 = vadd.f32 %v814_v27, %v97_v44  ;;  %v34_v41 = vld [vmem:[%s983_s0 + $0x68] sm:$0xff] }
   0xe   :  { %v160_v56 = vmax.f32 %v128_v46, 0.0  ;;  %v157_v57 = vmax.f32 %v125_v47, 0.0  ;;  %v176_v61 = vmax.f32 %v144_v51, 0.0  ;;  %v143_v63 = vadd.f32 %v814_v27, %v99_v48 }
   0xf   :  { %640 = vmatpush3.bf16.msra.mxu0 %v720_v9  ;;  %708 = vmatpush3.bf16.msra.mxu1 %v720_v9  ;;  %v174_v60 = vmax.f32 %v142_v50, 0.0  ;;  %v159_v62 = vmax.f32 %v127_v52, 0.0  ;;  %v173_v2 = vmax.f32 %v141_v58, 0.0  ;;  %v86_v3 = vmul.f32 %v812_v26, %v42_v40 }
  0x10   :  { %641 = vmatprep.subr.bf16.mxu0 %v721_v10  ;;  %701 = vmatprep.subr.bf16.mxu1 %v721_v10  ;;  %v190_v1 = vpack.c.bf16 %v160_v56, %v158_v55  ;;  %v88_v4 = vmul.f32 %v812_v26, %v44_v53  ;;  %v175_v8 = vmax.f32 %v143_v63, 0.0  ;;  %v58_v9 = vunpack.c.h.bf16 %v31_v59 }
  0x11   :  { %v198_v6 = vpack.c.bf16 %v176_v61, %v174_v60  ;;  %v189_v7 = vpack.c.bf16 %v159_v62, %v157_v57  ;;  %v130_v10 = vadd.f32 %v816_v28, %v86_v3  ;;  %v85_v22 = vmul.f32 %v810_v25, %v41_v13  ;;  %v27_v62 = vld [vmem:[%s983_s0 + $0x30] sm:$0xff] }
  0x12   :  { %v132_v11 = vadd.f32 %v816_v28, %v88_v4  ;;  %372 = vmatprep.mubr.bf16.mxu0 %v190_v1  ;;  %v102_v15 = vmul.f32 %v812_v26, %v58_v9  ;;  %v87_v24 = vmul.f32 %v810_v25, %v43_v16  ;;  %v59_v29 = vunpack.c.l.bf16 %v32_v0 }
  0x13   :  { %642 = vmatpush3.bf16.msra.mxu0 %v722_v12  ;;  %709 = vmatpush3.bf16.msra.mxu1 %v722_v12  ;;  %v60_v12 = vunpack.c.h.bf16 %v32_v0  ;;  %v162_v19 = vmax.f32 %v130_v10, 0.0  ;;  %v129_v34 = vadd.f32 %v814_v27, %v85_v22  ;;  %v48_v44 = vunpack.c.h.bf16 %v26_v31 }
  0x14   :  { %643 = vmatprep.subr.bf16.mxu0 %v723_v14  ;;  %702 = vmatprep.subr.bf16.mxu1 %v723_v14  ;;  %v197_v14 = vpack.c.bf16 %v175_v8, %v173_v2  ;;  %v164_v20 = vmax.f32 %v132_v11, 0.0  ;;  %v146_v23 = vadd.f32 %v816_v28, %v102_v15  ;;  %v131_v38 = vadd.f32 %v814_v27, %v87_v24 }
  0x15   :  { %404 = vmatprep.mubr.bf16.mxu1 %v198_v6  ;;  %v104_v21 = vmul.f32 %v812_v26, %v60_v12  ;;  %v103_v39 = vmul.f32 %v810_v25, %v59_v29  ;;  %v161_v43 = vmax.f32 %v129_v34, 0.0  ;;  %v92_v51 = vmul.f32 %v812_v26, %v48_v44  ;;  %v35_v12 = vld [vmem:[%s983_s0 + $0x70] sm:$0xff] }
  0x16   :  { %v192_v32 = vpack.c.bf16 %v164_v20, %v162_v19  ;;  %v178_v37 = vmax.f32 %v146_v23, 0.0  ;;  %v163_v46 = vmax.f32 %v131_v38, 0.0  ;;  %v64_v53 = vunpack.c.h.bf16 %v34_v41 }
  0x17   :  { %644 = vmatpush3.bf16.msra.mxu0 %v724_v30  ;;  %710 = vmatpush3.bf16.msra.mxu1 %v724_v30  ;;  %v101_v30 = vmul.f32 %v810_v25, %v57_v17  ;;  %v148_v33 = vadd.f32 %v816_v28, %v104_v21  ;;  %v147_v47 = vadd.f32 %v814_v27, %v103_v39  ;;  %v45_v57 = vunpack.c.l.bf16 %v25_v18  ;;  %v36_v17 = vld [vmem:[%s983_s0 + $0x78] sm:$0xff] }
  0x18   :  { %645 = vmatprep.subr.bf16.mxu0 %v725_v35  ;;  %703 = vmatprep.subr.bf16.mxu1 %v725_v35  ;;  %v46_v35 = vunpack.c.h.bf16 %v25_v18  ;;  %v136_v58 = vadd.f32 %v816_v28, %v92_v51  ;;  %v108_v60 = vmul.f32 %v812_v26, %v64_v53  ;;  %v47_v61 = vunpack.c.l.bf16 %v26_v31 }
  0x19   :  { %v145_v40 = vadd.f32 %v814_v27, %v101_v30  ;;  %v180_v42 = vmax.f32 %v148_v33, 0.0  ;;  %v179_v55 = vmax.f32 %v147_v47, 0.0  ;;  %v89_v1 = vmul.f32 %v810_v25, %v45_v57 }
  0x1a   :  { %v90_v45 = vmul.f32 %v812_v26, %v46_v35  ;;  %v61_v2 = vunpack.c.l.bf16 %v33_v36  ;;  %v168_v3 = vmax.f32 %v136_v58, 0.0  ;;  %v152_v4 = vadd.f32 %v816_v28, %v108_v60 }
  0x1b   :  { %646 = vmatpush3.bf16.msra.mxu0 %v726_v49  ;;  %711 = vmatpush3.bf16.msra.mxu1 %v726_v49  ;;  %v177_v48 = vmax.f32 %v145_v40, 0.0  ;;  %v62_v49 = vunpack.c.h.bf16 %v33_v36  ;;  %v200_v50 = vpack.c.bf16 %v180_v42, %v178_v37  ;;  %v63_v6 = vunpack.c.l.bf16 %v34_v41 }
  0x1c   :  { %647 = vmatprep.subr.bf16.mxu0 %v727_v54  ;;  %704 = vmatprep.subr.bf16.mxu1 %v727_v54  ;;  %v134_v52 = vadd.f32 %v816_v28, %v90_v45  ;;  %v191_v54 = vpack.c.bf16 %v163_v46, %v161_v43  ;;  %v133_v9 = vadd.f32 %v814_v27, %v89_v1  ;;  %v50_v11 = vunpack.c.h.bf16 %v27_v62 }
  0x1d   :  { %v106_v56 = vmul.f32 %v812_v26, %v62_v49  ;;  %v199_v63 = vpack.c.bf16 %v179_v55, %v177_v48  ;;  %v105_v10 = vmul.f32 %v810_v25, %v61_v2  ;;  %v107_v16 = vmul.f32 %v810_v25, %v63_v6 }
  0x1e   :  { %v166_v59 = vmax.f32 %v134_v52, 0.0  ;;  %v165_v18 = vmax.f32 %v133_v9, 0.0  ;;  %v94_v21 = vmul.f32 %v812_v26, %v50_v11  ;;  %v66_v29 = vunpack.c.h.bf16 %v35_v12 }
  0x1f   :  { %648 = vmatpush3.bf16.msra.mxu0 %v728_v5  ;;  %712 = vmatpush3.bf16.msra.mxu1 %v728_v5  ;;  %v150_v0 = vadd.f32 %v816_v28, %v106_v56  ;;  %v91_v5 = vmul.f32 %v810_v25, %v47_v61  ;;  %v149_v19 = vadd.f32 %v814_v27, %v105_v10  ;;  %v68_v33 = vunpack.c.h.bf16 %v36_v17 }
  0x20   :  { %v194_v13 = vpack.c.bf16 %v168_v3, %v166_v59  ;;  %v151_v24 = vadd.f32 %v814_v27, %v107_v16  ;;  %v110_v36 = vmul.f32 %v812_v26, %v66_v29  ;;  %v49_v37 = vunpack.c.l.bf16 %v27_v62 }
  0x21   :  { %v182_v8 = vmax.f32 %v150_v0, 0.0  ;;  %v135_v15 = vadd.f32 %v814_v27, %v91_v5  ;;  %v181_v30 = vmax.f32 %v149_v19, 0.0  ;;  %v112_v40 = vmul.f32 %v812_v26, %v68_v33 }
  0x22   :  { %373 = vmatmul.mubr.bf16.vlgmr.msra.gmra.mrb[0].mxu0 %v189_v7  ;;  %405 = vmatmul.mubr.bf16.vlgmr.msra.gmra.mrb[0].mxu1 %v197_v14  ;;  %v28_v7 = vld [vmem:[%s983_s0 + $0x38] sm:$0xff]  ;;  %v184_v14 = vmax.f32 %v152_v4, 0.0  ;;  %v183_v35 = vmax.f32 %v151_v24, 0.0  ;;  %v154_v43 = vadd.f32 %v816_v28, %v110_v36  ;;  %v93_v44 = vmul.f32 %v810_v25, %v49_v37 }
  0x23   :  { %380 = vmatprep.mubr.bf16.mxu0 %v192_v32  ;;  %412 = vmatprep.mubr.bf16.mxu1 %v200_v50  ;;  %v52_v20 = vunpack.c.h.bf16 %v28_v7  ;;  %v167_v23 = vmax.f32 %v135_v15, 0.0  ;;  %v138_v32 = vadd.f32 %v816_v28, %v94_v21  ;;  %v51_v41 = vunpack.c.l.bf16 %v28_v7 }
  0x24   :  { %v202_v22 = vpack.c.bf16 %v184_v14, %v182_v8  ;;  %v201_v42 = vpack.c.bf16 %v183_v35, %v181_v30  ;;  %v65_v45 = vunpack.c.l.bf16 %v35_v12  ;;  %v156_v47 = vadd.f32 %v816_v28, %v112_v40 }
  0x25   :  { %v96_v31 = vmul.f32 %v812_v26, %v52_v20  ;;  %v193_v34 = vpack.c.bf16 %v167_v23, %v165_v18  ;;  %v170_v39 = vmax.f32 %v138_v32, 0.0  ;;  %v95_v48 = vmul.f32 %v810_v25, %v51_v41 }
  0x26   :  { %v67_v49 = vunpack.c.l.bf16 %v36_v17  ;;  %v186_v50 = vmax.f32 %v154_v43, 0.0  ;;  %v137_v51 = vadd.f32 %v814_v27, %v93_v44  ;;  %v109_v26 = vmul.f32 %v810_v25, %v65_v45 }
  0x27   :  { %v140_v38 = vadd.f32 %v816_v28, %v96_v31  ;;  %v188_v53 = vmax.f32 %v156_v47, 0.0 }
  0x28   :  { %v111_v55 = vmul.f32 %v810_v25, %v67_v49  ;;  %v169_v56 = vmax.f32 %v137_v51, 0.0  ;;  %v153_v57 = vadd.f32 %v814_v27, %v109_v26  ;;  %v940_v25 = vld [vmem:[%s986_s4] ss:$0 sm:$0xff] }
  0x29   :  { %v172_v46 = vmax.f32 %v140_v38, 0.0  ;;  %v204_v28 = vpack.c.bf16 %v188_v53, %v186_v50 }
  0x2a   :  { %381 = vmatmul.mubr.bf16.gmra.mrb[4].mxu0 %v191_v54  ;;  %413 = vmatmul.mubr.bf16.gmra.mrb[4].mxu1 %v199_v63  ;;  %v139_v54 = vadd.f32 %v814_v27, %v95_v48  ;;  %v155_v59 = vadd.f32 %v814_v27, %v111_v55  ;;  %v185_v60 = vmax.f32 %v153_v57, 0.0 }
  0x2b   :  { %388 = vmatprep.mubr.bf16.mxu0 %v194_v13  ;;  %420 = vmatprep.mubr.bf16.mxu1 %v202_v22  ;;  %v196_v52 = vpack.c.bf16 %v172_v46, %v170_v39 }
  0x2c   :  { %v171_v58 = vmax.f32 %v139_v54, 0.0  ;;  %v187_v62 = vmax.f32 %v155_v59, 0.0 }
  0x2e   :  { %v195_v61 = vpack.c.bf16 %v171_v58, %v169_v56  ;;  %v203_v63 = vpack.c.bf16 %v187_v62, %v185_v60 }
  0x32   :  { %389 = vmatmul.mubr.bf16.gmra.mrb[8].mxu0 %v193_v34  ;;  %421 = vmatmul.mubr.bf16.gmra.mrb[8].mxu1 %v201_v42 }
  0x33   :  { %396 = vmatprep.mubr.bf16.mxu0 %v196_v52  ;;  %428 = vmatprep.mubr.bf16.mxu1 %v204_v28 }
  0x3a   :  { %397 = vmatmul.mubr.bf16.gmra.mrb[12].mxu0 %v195_v61  ;;  %429 = vmatmul.mubr.bf16.gmra.mrb[12].mxu1 %v203_v63 }
  0xf5   :  { %v649_v0 = vpop.f32.mrb[0].mxu0  ;;  %v673_v1 = vpop.f32.mrb[0].mxu1 }
  0xf6   :  { %v650_v2 = vpop.f32.mrb[1].mxu0  ;;  %v674_v3 = vpop.f32.mrb[1].mxu1 }
  0xf7   :  { %v651_v4 = vadd.f32 %v650_v2, %v649_v0  ;;  %v675_v5 = vadd.f32 %v674_v3, %v673_v1  ;;  %v652_v6 = vpop.f32.mrb[2].mxu0  ;;  %v676_v27 = vpop.f32.mrb[2].mxu1 }
  0xf8   :  { %v653_v7 = vpop.f32.mrb[3].mxu0  ;;  %v677_v8 = vpop.f32.mrb[3].mxu1 }
  0xf9   :  { %v375_v9 = vadd.f32 %v651_v4, %v940_v25  ;;  %v407_v10 = vadd.f32 %v675_v5, %v940_v25  ;;  %v654_v11 = vadd.f32 %v653_v7, %v652_v6  ;;  %v678_v12 = vadd.f32 %v677_v8, %v676_v27 }
  0xfb   :  { %v378_v13 = vadd.f32 %v654_v11, %v940_v25  ;;  %v410_v14 = vadd.f32 %v678_v12, %v940_v25  ;;  %v437_v15 = vmax.f32 %v375_v9, 0.0  ;;  %v445_v16 = vmax.f32 %v407_v10, 0.0 }
  0xfd   :  { %v438_v17 = vmax.f32 %v378_v13, 0.0  ;;  %v446_v18 = vmax.f32 %v410_v14, 0.0  ;;  %v655_v19 = vpop.f32.mrb[4].mxu0  ;;  %v679_v20 = vpop.f32.mrb[4].mxu1 }
  0xfe   :  { %v656_v21 = vpop.f32.mrb[5].mxu0  ;;  %v680_v22 = vpop.f32.mrb[5].mxu1 }
  0xff   :  { %v589_v23 = vpack.c.bf16 %v438_v17, %v437_v15  ;;  %v609_v24 = vpack.c.bf16 %v446_v18, %v445_v16  ;;  %v657_v29 = vadd.f32 %v656_v21, %v655_v19  ;;  %v681_v30 = vadd.f32 %v680_v22, %v679_v20  ;;  %v658_v31 = vpop.f32.mrb[6].mxu0  ;;  %v682_v32 = vpop.f32.mrb[6].mxu1 }
 0x100   :  { %v659_v33 = vpop.f32.mrb[7].mxu0  ;;  %v683_v34 = vpop.f32.mrb[7].mxu1 }
 0x101   :  { %590 = vst [vmem:[%s987_s5] sm:$0xff] %v589_v23   ;;  %629 = vst [vmem:[%s987_s5 + $0x20] sm:$0xff] %v609_v24   ;;  %v383_v35 = vadd.f32 %v657_v29, %v940_v25  ;;  %v415_v36 = vadd.f32 %v681_v30, %v940_v25  ;;  %v660_v37 = vadd.f32 %v659_v33, %v658_v31 }
 0x102   :  { %v684_v38 = vadd.f32 %v683_v34, %v682_v32 }
 0x103   :  { %v386_v39 = vadd.f32 %v660_v37, %v940_v25  ;;  %v439_v41 = vmax.f32 %v383_v35, 0.0  ;;  %v447_v42 = vmax.f32 %v415_v36, 0.0 }
 0x104   :  { %v418_v40 = vadd.f32 %v684_v38, %v940_v25 }
 0x105   :  { %v440_v43 = vmax.f32 %v386_v39, 0.0  ;;  %v661_v45 = vpop.f32.mrb[8].mxu0  ;;  %v685_v46 = vpop.f32.mrb[8].mxu1 }
 0x106   :  { %v448_v44 = vmax.f32 %v418_v40, 0.0  ;;  %v662_v47 = vpop.f32.mrb[9].mxu0  ;;  %v686_v48 = vpop.f32.mrb[9].mxu1 }
 0x107   :  { %v594_v49 = vpack.c.bf16 %v440_v43, %v439_v41  ;;  %v663_v51 = vadd.f32 %v662_v47, %v661_v45  ;;  %v687_v26 = vadd.f32 %v686_v48, %v685_v46  ;;  %v664_v52 = vpop.f32.mrb[10].mxu0  ;;  %v688_v53 = vpop.f32.mrb[10].mxu1 }
 0x108   :  { %v614_v50 = vpack.c.bf16 %v448_v44, %v447_v42  ;;  %v665_v54 = vpop.f32.mrb[11].mxu0  ;;  %v689_v55 = vpop.f32.mrb[11].mxu1 }
 0x109   :  { %626 = vst [vmem:[%s987_s5 + $0x8] sm:$0xff] %v594_v49   ;;  %v391_v56 = vadd.f32 %v663_v51, %v940_v25  ;;  %v423_v57 = vadd.f32 %v687_v26, %v940_v25  ;;  %v666_v28 = vadd.f32 %v665_v54, %v664_v52  ;;  %v690_v58 = vadd.f32 %v689_v55, %v688_v53 }
 0x10a   :  { %630 = vst [vmem:[%s987_s5 + $0x28] sm:$0xff] %v614_v50  }
 0x10b   :  { %v394_v59 = vadd.f32 %v666_v28, %v940_v25  ;;  %v426_v60 = vadd.f32 %v690_v58, %v940_v25  ;;  %v441_v61 = vmax.f32 %v391_v56, 0.0  ;;  %v449_v62 = vmax.f32 %v423_v57, 0.0 }
 0x10d   :  { %v442_v63 = vmax.f32 %v394_v59, 0.0  ;;  %v450_v0 = vmax.f32 %v426_v60, 0.0  ;;  %v667_v1 = vpop.f32.mrb[12].mxu0  ;;  %v691_v2 = vpop.f32.mrb[12].mxu1 }
 0x10e   :  { %v668_v3 = vpop.f32.mrb[13].mxu0  ;;  %v692_v27 = vpop.f32.mrb[13].mxu1 }
 0x10f   :  { %v599_v4 = vpack.c.bf16 %v442_v63, %v441_v61  ;;  %v619_v5 = vpack.c.bf16 %v450_v0, %v449_v62  ;;  %v669_v6 = vadd.f32 %v668_v3, %v667_v1  ;;  %v670_v7 = vpop.f32.mrb[14].mxu0  ;;  %v693_v8 = vadd.f32 %v692_v27, %v691_v2  ;;  %v694_v9 = vpop.f32.mrb[14].mxu1 }
 0x110   :  { %v671_v10 = vpop.f32.mrb[15].mxu0  ;;  %v695_v13 = vpop.f32.mrb[15].mxu1 }
 0x111   :  { %627 = vst [vmem:[%s987_s5 + $0x10] sm:$0xff] %v599_v4   ;;  %631 = vst [vmem:[%s987_s5 + $0x30] sm:$0xff] %v619_v5   ;;  %v399_v11 = vadd.f32 %v669_v6, %v940_v25  ;;  %v672_v12 = vadd.f32 %v671_v10, %v670_v7  ;;  %v431_v14 = vadd.f32 %v693_v8, %v940_v25 }
 0x112   :  { %v696_v15 = vadd.f32 %v695_v13, %v694_v9 }
 0x113   :  { %v402_v16 = vadd.f32 %v672_v12, %v940_v25  ;;  %v443_v18 = vmax.f32 %v399_v11, 0.0  ;;  %v451_v20 = vmax.f32 %v431_v14, 0.0 }
 0x114   :  { %v434_v17 = vadd.f32 %v696_v15, %v940_v25 }
 0x115   :  { %v444_v19 = vmax.f32 %v402_v16, 0.0 }
 0x116   :  { %v452_v21 = vmax.f32 %v434_v17, 0.0 }
 0x117   :  { %v604_v22 = vpack.c.bf16 %v444_v19, %v443_v18 }
 0x118   :  { %v624_v23 = vpack.c.bf16 %v452_v21, %v451_v20 }
 0x119   :  { %628 = vst [vmem:[%s987_s5 + $0x18] sm:$0xff] %v604_v22  }
 0x11a   :  { %632 = vst [vmem:[%s987_s5 + $0x38] sm:$0xff] %v624_v23  }

// kernel: feature_tunk_push.9
= control target key start
LH: loop header
LB: loop body
LE: loop exit
PB: predicated region body
PF: predicated region fallthrough
CT: control target
= control target key end

     0   :  { %v71_v5 = vlaneseq  ;;  %s966_s1 = inlined_call_operand.vmem [shape: bf16[256,128], index: 1, kind: input, shape index: {}]   ;;  %s967_s0 = inlined_call_operand.vmem [shape: bf16[128,256], index: 0, kind: input, shape index: {}]   ;;  %s968_s2 = inlined_call_operand.vmem [shape: f32[1,256], index: 2, kind: input, shape index: {}]   ;;  %s969_s3 = inlined_call_operand.vmem [shape: f32[1,256], index: 3, kind: input, shape index: {}]   ;;  %s970_s4 = inlined_call_operand.vmem [shape: f32[1,128], index: 4, kind: input, shape index: {}]   ;;  %s971_s5 = inlined_call_operand.vmem [shape: bf16[128,128], index: 5, kind: output, shape index: {}]  }
   0x1   :  { %v697_v0 = vld [vmem:[%s966_s1 + $0x40] sm:$0xff]   ;;  %v699_v2 = vld [vmem:[%s966_s1 + $0x48] sm:$0xff]   ;;  %v701_v4 = vld [vmem:[%s966_s1 + $0x50] sm:$0xff]  }
   0x2   :  { %v698_v1 = vld [vmem:[%s966_s1] sm:$0xff]   ;;  %617 = vmatprep.subr.bf16.mxu0 %v697_v0  ;;  %681 = vmatprep.subr.bf16.mxu1 %v697_v0  ;;  %v700_v3 = vld [vmem:[%s966_s1 + $0x8] sm:$0xff]   ;;  %v702_v6 = vld [vmem:[%s966_s1 + $0x10] sm:$0xff]   ;;  %v72_v8 = vshrl.u32 %v71_v5, 7 }
   0x3   :  { %618 = vmatpush3.bf16.msra.mxu0 %v698_v1  ;;  %689 = vmatpush3.bf16.msra.mxu1 %v698_v1  ;;  %v703_v7 = vld [vmem:[%s966_s1 + $0x58] sm:$0xff]   ;;  %v705_v10 = vld [vmem:[%s966_s1 + $0x60] sm:$0xff]   ;;  %v707_v14 = vld [vmem:[%s966_s1 + $0x68] sm:$0xff]  }
   0x4   :  { %619 = vmatprep.subr.bf16.mxu0 %v699_v2  ;;  %682 = vmatprep.subr.bf16.mxu1 %v699_v2  ;;  %v704_v9 = vld [vmem:[%s966_s1 + $0x18] sm:$0xff]   ;;  %v73_v11 = vsub.s32 0, %v72_v8  ;;  %v706_v12 = vld [vmem:[%s966_s1 + $0x20] sm:$0xff]   ;;  %v77_v13 = vsub.s32 1, %v72_v8  ;;  %v22_v16 = vld [vmem:[%s967_s0 + $0x8] sm:$0xff] }
   0x5   :  { %v21_v15 = vld [vmem:[%s967_s0] sm:$0xff]  ;;  %v39_v20 = vunpack.c.l.bf16 %v22_v16  ;;  %v40_v21 = vunpack.c.h.bf16 %v22_v16  ;;  %v30_v24 = vld [vmem:[%s967_s0 + $0x48] sm:$0xff]  ;;  %v805_v29 = vld [vmem:[%s967_s0 + $0x10] sm:$0xff] }
   0x6   :  { %v69_v17 = vld [vmem:[%s968_s2] sm:$0x3]  ;;  %v37_v18 = vunpack.c.l.bf16 %v21_v15  ;;  %v38_v19 = vunpack.c.h.bf16 %v21_v15  ;;  %v708_v30 = vld [vmem:[%s966_s1 + $0x28] sm:$0xff]   ;;  %v55_v33 = vunpack.c.l.bf16 %v30_v24  ;;  %v56_v34 = vunpack.c.h.bf16 %v30_v24  ;;  %v709_v35 = vld [vmem:[%s966_s1 + $0x70] sm:$0xff]  }
   0x7   :  { %620 = vmatpush3.bf16.msra.mxu0 %v700_v3  ;;  %690 = vmatpush3.bf16.msra.mxu1 %v700_v3  ;;  %v113_v22 = vld [vmem:[%s969_s3] sm:$0x3]  ;;  %v794_v25 = vrot.slane %v69_v17, %v73_v11  ;;  %v796_v26 = vrot.slane %v69_v17, %v77_v13  ;;  %v24_v39 = vld [vmem:[%s967_s0 + $0x18] sm:$0xff]  ;;  %v42_v40 = vunpack.c.h.bf16 %v805_v29  ;;  %v710_v49 = vld [vmem:[%s966_s1 + $0x30] sm:$0xff]  }
   0x8   :  { %621 = vmatprep.subr.bf16.mxu0 %v701_v4  ;;  %683 = vmatprep.subr.bf16.mxu1 %v701_v4  ;;  %v29_v23 = vld [vmem:[%s967_s0 + $0x40] sm:$0xff]  ;;  %v798_v27 = vrot.slane %v113_v22, %v73_v11  ;;  %v800_v28 = vrot.slane %v113_v22, %v77_v13  ;;  %v44_v53 = vunpack.c.h.bf16 %v24_v39  ;;  %v711_v54 = vld [vmem:[%s966_s1 + $0x78] sm:$0xff]   ;;  %v31_v59 = vld [vmem:[%s967_s0 + $0x50] sm:$0xff]  ;;  %v41_v13 = vunpack.c.l.bf16 %v805_v29 }
   0x9   :  { %v53_v31 = vunpack.c.l.bf16 %v29_v23  ;;  %v54_v32 = vunpack.c.h.bf16 %v29_v23  ;;  %v82_v36 = vmul.f32 %v796_v26, %v38_v19  ;;  %v84_v37 = vmul.f32 %v796_v26, %v40_v21  ;;  %v32_v0 = vld [vmem:[%s967_s0 + $0x58] sm:$0xff] }
   0xa   :  { %v81_v38 = vmul.f32 %v794_v25, %v37_v18  ;;  %v100_v42 = vmul.f32 %v796_v26, %v56_v34  ;;  %v83_v43 = vmul.f32 %v794_v25, %v39_v20  ;;  %v99_v48 = vmul.f32 %v794_v25, %v55_v33  ;;  %v712_v5 = vld [vmem:[%s966_s1 + $0x38] sm:$0xff]   ;;  %v25_v18 = vld [vmem:[%s967_s0 + $0x20] sm:$0xff] }
   0xb   :  { %622 = vmatpush3.bf16.msra.mxu0 %v702_v6  ;;  %691 = vmatpush3.bf16.msra.mxu1 %v702_v6  ;;  %v98_v41 = vmul.f32 %v796_v26, %v54_v32  ;;  %v97_v44 = vmul.f32 %v794_v25, %v53_v31  ;;  %v126_v45 = vadd.f32 %v800_v28, %v82_v36  ;;  %v43_v16 = vunpack.c.l.bf16 %v24_v39  ;;  %v26_v31 = vld [vmem:[%s967_s0 + $0x28] sm:$0xff]  ;;  %v33_v36 = vld [vmem:[%s967_s0 + $0x60] sm:$0xff] }
   0xc   :  { %623 = vmatprep.subr.bf16.mxu0 %v703_v7  ;;  %684 = vmatprep.subr.bf16.mxu1 %v703_v7  ;;  %v128_v46 = vadd.f32 %v800_v28, %v84_v37  ;;  %v125_v47 = vadd.f32 %v798_v27, %v81_v38  ;;  %v144_v51 = vadd.f32 %v800_v28, %v100_v42  ;;  %v57_v17 = vunpack.c.l.bf16 %v31_v59 }
   0xd   :  { %v142_v50 = vadd.f32 %v800_v28, %v98_v41  ;;  %v127_v52 = vadd.f32 %v798_v27, %v83_v43  ;;  %v158_v55 = vmax.f32 %v126_v45, 0.0  ;;  %v141_v58 = vadd.f32 %v798_v27, %v97_v44  ;;  %v34_v41 = vld [vmem:[%s967_s0 + $0x68] sm:$0xff] }
   0xe   :  { %v160_v56 = vmax.f32 %v128_v46, 0.0  ;;  %v157_v57 = vmax.f32 %v125_v47, 0.0  ;;  %v176_v61 = vmax.f32 %v144_v51, 0.0  ;;  %v143_v63 = vadd.f32 %v798_v27, %v99_v48 }
   0xf   :  { %624 = vmatpush3.bf16.msra.mxu0 %v704_v9  ;;  %692 = vmatpush3.bf16.msra.mxu1 %v704_v9  ;;  %v174_v60 = vmax.f32 %v142_v50, 0.0  ;;  %v159_v62 = vmax.f32 %v127_v52, 0.0  ;;  %v173_v2 = vmax.f32 %v141_v58, 0.0  ;;  %v86_v3 = vmul.f32 %v796_v26, %v42_v40 }
  0x10   :  { %625 = vmatprep.subr.bf16.mxu0 %v705_v10  ;;  %685 = vmatprep.subr.bf16.mxu1 %v705_v10  ;;  %v190_v1 = vpack.c.bf16 %v160_v56, %v158_v55  ;;  %v88_v4 = vmul.f32 %v796_v26, %v44_v53  ;;  %v175_v8 = vmax.f32 %v143_v63, 0.0  ;;  %v58_v9 = vunpack.c.h.bf16 %v31_v59 }
  0x11   :  { %v198_v6 = vpack.c.bf16 %v176_v61, %v174_v60  ;;  %v189_v7 = vpack.c.bf16 %v159_v62, %v157_v57  ;;  %v130_v10 = vadd.f32 %v800_v28, %v86_v3  ;;  %v85_v22 = vmul.f32 %v794_v25, %v41_v13  ;;  %v27_v62 = vld [vmem:[%s967_s0 + $0x30] sm:$0xff] }
  0x12   :  { %v132_v11 = vadd.f32 %v800_v28, %v88_v4  ;;  %372 = vmatprep.mubr.bf16.mxu0 %v190_v1  ;;  %v102_v15 = vmul.f32 %v796_v26, %v58_v9  ;;  %v87_v24 = vmul.f32 %v794_v25, %v43_v16  ;;  %v59_v29 = vunpack.c.l.bf16 %v32_v0 }
  0x13   :  { %626 = vmatpush3.bf16.msra.mxu0 %v706_v12  ;;  %693 = vmatpush3.bf16.msra.mxu1 %v706_v12  ;;  %v60_v12 = vunpack.c.h.bf16 %v32_v0  ;;  %v162_v19 = vmax.f32 %v130_v10, 0.0  ;;  %v129_v34 = vadd.f32 %v798_v27, %v85_v22  ;;  %v48_v44 = vunpack.c.h.bf16 %v26_v31 }
  0x14   :  { %627 = vmatprep.subr.bf16.mxu0 %v707_v14  ;;  %686 = vmatprep.subr.bf16.mxu1 %v707_v14  ;;  %v197_v14 = vpack.c.bf16 %v175_v8, %v173_v2  ;;  %v164_v20 = vmax.f32 %v132_v11, 0.0  ;;  %v146_v23 = vadd.f32 %v800_v28, %v102_v15  ;;  %v131_v38 = vadd.f32 %v798_v27, %v87_v24 }
  0x15   :  { %404 = vmatprep.mubr.bf16.mxu1 %v198_v6  ;;  %v104_v21 = vmul.f32 %v796_v26, %v60_v12  ;;  %v103_v39 = vmul.f32 %v794_v25, %v59_v29  ;;  %v161_v43 = vmax.f32 %v129_v34, 0.0  ;;  %v92_v51 = vmul.f32 %v796_v26, %v48_v44  ;;  %v35_v12 = vld [vmem:[%s967_s0 + $0x70] sm:$0xff] }
  0x16   :  { %v192_v32 = vpack.c.bf16 %v164_v20, %v162_v19  ;;  %v178_v37 = vmax.f32 %v146_v23, 0.0  ;;  %v163_v46 = vmax.f32 %v131_v38, 0.0  ;;  %v64_v53 = vunpack.c.h.bf16 %v34_v41 }
  0x17   :  { %628 = vmatpush3.bf16.msra.mxu0 %v708_v30  ;;  %694 = vmatpush3.bf16.msra.mxu1 %v708_v30  ;;  %v101_v30 = vmul.f32 %v794_v25, %v57_v17  ;;  %v148_v33 = vadd.f32 %v800_v28, %v104_v21  ;;  %v147_v47 = vadd.f32 %v798_v27, %v103_v39  ;;  %v45_v57 = vunpack.c.l.bf16 %v25_v18  ;;  %v36_v17 = vld [vmem:[%s967_s0 + $0x78] sm:$0xff] }
  0x18   :  { %629 = vmatprep.subr.bf16.mxu0 %v709_v35  ;;  %687 = vmatprep.subr.bf16.mxu1 %v709_v35  ;;  %v46_v35 = vunpack.c.h.bf16 %v25_v18  ;;  %v136_v58 = vadd.f32 %v800_v28, %v92_v51  ;;  %v108_v60 = vmul.f32 %v796_v26, %v64_v53  ;;  %v47_v61 = vunpack.c.l.bf16 %v26_v31 }
  0x19   :  { %v145_v40 = vadd.f32 %v798_v27, %v101_v30  ;;  %v180_v42 = vmax.f32 %v148_v33, 0.0  ;;  %v179_v55 = vmax.f32 %v147_v47, 0.0  ;;  %v89_v1 = vmul.f32 %v794_v25, %v45_v57 }
  0x1a   :  { %v90_v45 = vmul.f32 %v796_v26, %v46_v35  ;;  %v61_v2 = vunpack.c.l.bf16 %v33_v36  ;;  %v168_v3 = vmax.f32 %v136_v58, 0.0  ;;  %v152_v4 = vadd.f32 %v800_v28, %v108_v60 }
  0x1b   :  { %630 = vmatpush3.bf16.msra.mxu0 %v710_v49  ;;  %695 = vmatpush3.bf16.msra.mxu1 %v710_v49  ;;  %v177_v48 = vmax.f32 %v145_v40, 0.0  ;;  %v62_v49 = vunpack.c.h.bf16 %v33_v36  ;;  %v200_v50 = vpack.c.bf16 %v180_v42, %v178_v37  ;;  %v63_v6 = vunpack.c.l.bf16 %v34_v41 }
  0x1c   :  { %631 = vmatprep.subr.bf16.mxu0 %v711_v54  ;;  %688 = vmatprep.subr.bf16.mxu1 %v711_v54  ;;  %v134_v52 = vadd.f32 %v800_v28, %v90_v45  ;;  %v191_v54 = vpack.c.bf16 %v163_v46, %v161_v43  ;;  %v133_v9 = vadd.f32 %v798_v27, %v89_v1  ;;  %v50_v11 = vunpack.c.h.bf16 %v27_v62 }
  0x1d   :  { %v106_v56 = vmul.f32 %v796_v26, %v62_v49  ;;  %v199_v63 = vpack.c.bf16 %v179_v55, %v177_v48  ;;  %v105_v10 = vmul.f32 %v794_v25, %v61_v2  ;;  %v107_v16 = vmul.f32 %v794_v25, %v63_v6 }
  0x1e   :  { %v166_v59 = vmax.f32 %v134_v52, 0.0  ;;  %v165_v18 = vmax.f32 %v133_v9, 0.0  ;;  %v94_v21 = vmul.f32 %v796_v26, %v50_v11  ;;  %v66_v29 = vunpack.c.h.bf16 %v35_v12 }
  0x1f   :  { %632 = vmatpush3.bf16.msra.mxu0 %v712_v5  ;;  %696 = vmatpush3.bf16.msra.mxu1 %v712_v5  ;;  %v150_v0 = vadd.f32 %v800_v28, %v106_v56  ;;  %v91_v5 = vmul.f32 %v794_v25, %v47_v61  ;;  %v149_v19 = vadd.f32 %v798_v27, %v105_v10  ;;  %v68_v33 = vunpack.c.h.bf16 %v36_v17 }
  0x20   :  { %v194_v13 = vpack.c.bf16 %v168_v3, %v166_v59  ;;  %v151_v24 = vadd.f32 %v798_v27, %v107_v16  ;;  %v110_v36 = vmul.f32 %v796_v26, %v66_v29  ;;  %v49_v37 = vunpack.c.l.bf16 %v27_v62 }
  0x21   :  { %v182_v8 = vmax.f32 %v150_v0, 0.0  ;;  %v135_v15 = vadd.f32 %v798_v27, %v91_v5  ;;  %v181_v30 = vmax.f32 %v149_v19, 0.0  ;;  %v112_v40 = vmul.f32 %v796_v26, %v68_v33 }
  0x22   :  { %373 = vmatmul.mubr.bf16.vlgmr.msra.gmra.mrb[0].mxu0 %v189_v7  ;;  %405 = vmatmul.mubr.bf16.vlgmr.msra.gmra.mrb[0].mxu1 %v197_v14  ;;  %v28_v7 = vld [vmem:[%s967_s0 + $0x38] sm:$0xff]  ;;  %v184_v14 = vmax.f32 %v152_v4, 0.0  ;;  %v183_v35 = vmax.f32 %v151_v24, 0.0  ;;  %v154_v43 = vadd.f32 %v800_v28, %v110_v36  ;;  %v93_v44 = vmul.f32 %v794_v25, %v49_v37 }
  0x23   :  { %380 = vmatprep.mubr.bf16.mxu0 %v192_v32  ;;  %412 = vmatprep.mubr.bf16.mxu1 %v200_v50  ;;  %v52_v20 = vunpack.c.h.bf16 %v28_v7  ;;  %v167_v23 = vmax.f32 %v135_v15, 0.0  ;;  %v138_v32 = vadd.f32 %v800_v28, %v94_v21  ;;  %v51_v41 = vunpack.c.l.bf16 %v28_v7  ;;  %v924_v7 = vld [vmem:[%s970_s4] ss:$0 sm:$0xff] }
  0x24   :  { %v202_v22 = vpack.c.bf16 %v184_v14, %v182_v8  ;;  %v201_v42 = vpack.c.bf16 %v183_v35, %v181_v30  ;;  %v65_v45 = vunpack.c.l.bf16 %v35_v12  ;;  %v156_v47 = vadd.f32 %v800_v28, %v112_v40 }
  0x25   :  { %v96_v31 = vmul.f32 %v796_v26, %v52_v20  ;;  %v193_v34 = vpack.c.bf16 %v167_v23, %v165_v18  ;;  %v170_v39 = vmax.f32 %v138_v32, 0.0  ;;  %v95_v48 = vmul.f32 %v794_v25, %v51_v41 }
  0x26   :  { %v67_v49 = vunpack.c.l.bf16 %v36_v17  ;;  %v186_v50 = vmax.f32 %v154_v43, 0.0  ;;  %v137_v51 = vadd.f32 %v798_v27, %v93_v44  ;;  %v109_v26 = vmul.f32 %v794_v25, %v65_v45 }
  0x27   :  { %v140_v38 = vadd.f32 %v800_v28, %v96_v31  ;;  %v188_v53 = vmax.f32 %v156_v47, 0.0 }
  0x28   :  { %v111_v55 = vmul.f32 %v794_v25, %v67_v49  ;;  %v169_v56 = vmax.f32 %v137_v51, 0.0  ;;  %v153_v57 = vadd.f32 %v798_v27, %v109_v26 }
  0x29   :  { %v172_v46 = vmax.f32 %v140_v38, 0.0  ;;  %v204_v28 = vpack.c.bf16 %v188_v53, %v186_v50 }
  0x2a   :  { %381 = vmatmul.mubr.bf16.gmra.mrb[4].mxu0 %v191_v54  ;;  %413 = vmatmul.mubr.bf16.gmra.mrb[4].mxu1 %v199_v63  ;;  %v139_v54 = vadd.f32 %v798_v27, %v95_v48  ;;  %v155_v59 = vadd.f32 %v798_v27, %v111_v55  ;;  %v185_v60 = vmax.f32 %v153_v57, 0.0 }
  0x2b   :  { %388 = vmatprep.mubr.bf16.mxu0 %v194_v13  ;;  %420 = vmatprep.mubr.bf16.mxu1 %v202_v22  ;;  %v196_v52 = vpack.c.bf16 %v172_v46, %v170_v39 }
  0x2c   :  { %v171_v58 = vmax.f32 %v139_v54, 0.0  ;;  %v187_v62 = vmax.f32 %v155_v59, 0.0 }
  0x2e   :  { %v195_v61 = vpack.c.bf16 %v171_v58, %v169_v56  ;;  %v203_v63 = vpack.c.bf16 %v187_v62, %v185_v60 }
  0x32   :  { %389 = vmatmul.mubr.bf16.gmra.mrb[8].mxu0 %v193_v34  ;;  %421 = vmatmul.mubr.bf16.gmra.mrb[8].mxu1 %v201_v42 }
  0x33   :  { %396 = vmatprep.mubr.bf16.mxu0 %v196_v52  ;;  %428 = vmatprep.mubr.bf16.mxu1 %v204_v28 }
  0x3a   :  { %397 = vmatmul.mubr.bf16.gmra.mrb[12].mxu0 %v195_v61  ;;  %429 = vmatmul.mubr.bf16.gmra.mrb[12].mxu1 %v203_v63 }
  0xf5   :  { %v633_v0 = vpop.f32.mrb[0].mxu0  ;;  %v657_v1 = vpop.f32.mrb[0].mxu1 }
  0xf6   :  { %v634_v2 = vpop.f32.mrb[1].mxu0  ;;  %v658_v3 = vpop.f32.mrb[1].mxu1 }
  0xf7   :  { %v635_v25 = vadd.f32 %v634_v2, %v633_v0  ;;  %v659_v4 = vadd.f32 %v658_v3, %v657_v1  ;;  %v636_v5 = vpop.f32.mrb[2].mxu0  ;;  %v660_v6 = vpop.f32.mrb[2].mxu1 }
  0xf8   :  { %v637_v27 = vpop.f32.mrb[3].mxu0  ;;  %v661_v8 = vpop.f32.mrb[3].mxu1 }
  0xf9   :  { %v638_v9 = vadd.f32 %v637_v27, %v636_v5  ;;  %v662_v10 = vadd.f32 %v661_v8, %v660_v6  ;;  %v375_v11 = vadd.f32 %v635_v25, %v924_v7  ;;  %v407_v12 = vadd.f32 %v659_v4, %v924_v7 }
  0xfb   :  { %v378_v13 = vadd.f32 %v638_v9, %v924_v7  ;;  %v410_v14 = vadd.f32 %v662_v10, %v924_v7 }
  0xfd   :  { %v573_v15 = vpack.c.bf16 %v378_v13, %v375_v11  ;;  %v593_v16 = vpack.c.bf16 %v410_v14, %v407_v12  ;;  %v639_v17 = vpop.f32.mrb[4].mxu0  ;;  %v663_v18 = vpop.f32.mrb[4].mxu1 }
  0xfe   :  { %v640_v19 = vpop.f32.mrb[5].mxu0  ;;  %v664_v20 = vpop.f32.mrb[5].mxu1 }
  0xff   :  { %574 = vst [vmem:[%s971_s5] sm:$0xff] %v573_v15   ;;  %613 = vst [vmem:[%s971_s5 + $0x20] sm:$0xff] %v593_v16   ;;  %v641_v21 = vadd.f32 %v640_v19, %v639_v17  ;;  %v665_v22 = vadd.f32 %v664_v20, %v663_v18  ;;  %v642_v23 = vpop.f32.mrb[6].mxu0  ;;  %v666_v24 = vpop.f32.mrb[6].mxu1 }
 0x100   :  { %v643_v29 = vpop.f32.mrb[7].mxu0  ;;  %v667_v30 = vpop.f32.mrb[7].mxu1 }
 0x101   :  { %v644_v31 = vadd.f32 %v643_v29, %v642_v23  ;;  %v668_v32 = vadd.f32 %v667_v30, %v666_v24  ;;  %v383_v33 = vadd.f32 %v641_v21, %v924_v7  ;;  %v415_v34 = vadd.f32 %v665_v22, %v924_v7 }
 0x103   :  { %v386_v35 = vadd.f32 %v644_v31, %v924_v7  ;;  %v418_v36 = vadd.f32 %v668_v32, %v924_v7 }
 0x105   :  { %v578_v37 = vpack.c.bf16 %v386_v35, %v383_v33  ;;  %v598_v38 = vpack.c.bf16 %v418_v36, %v415_v34  ;;  %v645_v39 = vpop.f32.mrb[8].mxu0  ;;  %v669_v40 = vpop.f32.mrb[8].mxu1 }
 0x106   :  { %v646_v41 = vpop.f32.mrb[9].mxu0  ;;  %v670_v42 = vpop.f32.mrb[9].mxu1 }
 0x107   :  { %610 = vst [vmem:[%s971_s5 + $0x8] sm:$0xff] %v578_v37   ;;  %614 = vst [vmem:[%s971_s5 + $0x28] sm:$0xff] %v598_v38   ;;  %v647_v43 = vadd.f32 %v646_v41, %v645_v39  ;;  %v671_v44 = vadd.f32 %v670_v42, %v669_v40  ;;  %v648_v45 = vpop.f32.mrb[10].mxu0  ;;  %v672_v46 = vpop.f32.mrb[10].mxu1 }
 0x108   :  { %v649_v47 = vpop.f32.mrb[11].mxu0  ;;  %v673_v48 = vpop.f32.mrb[11].mxu1 }
 0x109   :  { %v650_v49 = vadd.f32 %v649_v47, %v648_v45  ;;  %v674_v50 = vadd.f32 %v673_v48, %v672_v46  ;;  %v391_v51 = vadd.f32 %v647_v43, %v924_v7  ;;  %v423_v26 = vadd.f32 %v671_v44, %v924_v7 }
 0x10b   :  { %v394_v52 = vadd.f32 %v650_v49, %v924_v7  ;;  %v426_v53 = vadd.f32 %v674_v50, %v924_v7 }
 0x10d   :  { %v583_v54 = vpack.c.bf16 %v394_v52, %v391_v51  ;;  %v603_v55 = vpack.c.bf16 %v426_v53, %v423_v26  ;;  %v651_v56 = vpop.f32.mrb[12].mxu0  ;;  %v675_v57 = vpop.f32.mrb[12].mxu1 }
 0x10e   :  { %v652_v28 = vpop.f32.mrb[13].mxu0  ;;  %v676_v59 = vpop.f32.mrb[13].mxu1 }
 0x10f   :  { %611 = vst [vmem:[%s971_s5 + $0x10] sm:$0xff] %v583_v54   ;;  %615 = vst [vmem:[%s971_s5 + $0x30] sm:$0xff] %v603_v55   ;;  %v653_v58 = vadd.f32 %v652_v28, %v651_v56  ;;  %v654_v60 = vpop.f32.mrb[14].mxu0  ;;  %v677_v61 = vadd.f32 %v676_v59, %v675_v57  ;;  %v678_v62 = vpop.f32.mrb[14].mxu1 }
 0x110   :  { %v655_v63 = vpop.f32.mrb[15].mxu0  ;;  %v679_v1 = vpop.f32.mrb[15].mxu1 }
 0x111   :  { %v656_v0 = vadd.f32 %v655_v63, %v654_v60  ;;  %v680_v2 = vadd.f32 %v679_v1, %v678_v62  ;;  %v399_v3 = vadd.f32 %v653_v58, %v924_v7  ;;  %v431_v4 = vadd.f32 %v677_v61, %v924_v7 }
 0x113   :  { %v402_v25 = vadd.f32 %v656_v0, %v924_v7  ;;  %v434_v5 = vadd.f32 %v680_v2, %v924_v7 }
 0x115   :  { %v588_v6 = vpack.c.bf16 %v402_v25, %v399_v3  ;;  %v608_v27 = vpack.c.bf16 %v434_v5, %v431_v4 }
 0x117   :  { %612 = vst [vmem:[%s971_s5 + $0x18] sm:$0xff] %v588_v6   ;;  %616 = vst [vmem:[%s971_s5 + $0x38] sm:$0xff] %v608_v27  }

// kernel: closed_call.53
= control target key start
LH: loop header
LB: loop body
LE: loop exit
PB: predicated region body
PF: predicated region fallthrough
CT: control target
= control target key end

     0   :  { %s2907_s1 = inlined_call_operand.vmem [shape: bf16[1152,128], index: 1, kind: input, shape index: {}]   ;;  %s2908_s0 = inlined_call_operand.vmem [shape: bf16[128,1152], index: 0, kind: input, shape index: {}]   ;;  %s2909_s2 = inlined_call_operand.vmem [shape: f32[1,128], index: 2, kind: input, shape index: {}]   ;;  %s2910_s3 = inlined_call_operand.vmem [shape: bf16[128,128], index: 3, kind: output, shape index: {}]  }
   0x1   :  { %v2159_v0 = vld [vmem:[%s2907_s1 + $0x40] sm:$0xff]   ;;  %v2163_v4 = vld [vmem:[%s2907_s1 + $0x48] sm:$0xff]   ;;  %v2167_v8 = vld [vmem:[%s2907_s1 + $0x50] sm:$0xff]  }
   0x2   :  { %v2160_v1 = vld [vmem:[%s2907_s1 + $0xc0] sm:$0xff]   ;;  %1839 = vmatprep.subr.bf16.mxu0 %v2159_v0  ;;  %v2164_v5 = vld [vmem:[%s2907_s1 + $0xc8] sm:$0xff]   ;;  %v2168_v9 = vld [vmem:[%s2907_s1 + $0xd0] sm:$0xff]  }
   0x3   :  { %v2161_v2 = vld [vmem:[%s2907_s1] sm:$0xff]   ;;  %1903 = vmatprep.subr.bf16.mxu1 %v2160_v1  ;;  %v2165_v6 = vld [vmem:[%s2907_s1 + $0x8] sm:$0xff]   ;;  %v2169_v10 = vld [vmem:[%s2907_s1 + $0x10] sm:$0xff]  }
   0x4   :  { %v2162_v3 = vld [vmem:[%s2907_s1 + $0x80] sm:$0xff]   ;;  %1840 = vmatpush3.bf16.msra.mxu0 %v2161_v2  ;;  %v2166_v7 = vld [vmem:[%s2907_s1 + $0x88] sm:$0xff]   ;;  %v2170_v11 = vld [vmem:[%s2907_s1 + $0x90] sm:$0xff]  }
   0x5   :  { %1904 = vmatpush3.bf16.msra.mxu1 %v2162_v3  ;;  %1841 = vmatprep.subr.bf16.mxu0 %v2163_v4  ;;  %v2171_v12 = vld [vmem:[%s2907_s1 + $0x58] sm:$0xff]   ;;  %v2175_v16 = vld [vmem:[%s2907_s1 + $0x60] sm:$0xff]   ;;  %v2179_v20 = vld [vmem:[%s2907_s1 + $0x68] sm:$0xff]  }
   0x6   :  { %1905 = vmatprep.subr.bf16.mxu1 %v2164_v5  ;;  %v2172_v13 = vld [vmem:[%s2907_s1 + $0xd8] sm:$0xff]   ;;  %v2176_v17 = vld [vmem:[%s2907_s1 + $0xe0] sm:$0xff]   ;;  %v2180_v21 = vld [vmem:[%s2907_s1 + $0xe8] sm:$0xff]  }
   0x7   :  { %v2173_v14 = vld [vmem:[%s2907_s1 + $0x18] sm:$0xff]   ;;  %v2177_v18 = vld [vmem:[%s2907_s1 + $0x20] sm:$0xff]   ;;  %v2181_v22 = vld [vmem:[%s2907_s1 + $0x28] sm:$0xff]  }
   0x8   :  { %1842 = vmatpush3.bf16.msra.mxu0 %v2165_v6  ;;  %v2174_v15 = vld [vmem:[%s2907_s1 + $0x98] sm:$0xff]   ;;  %v2178_v19 = vld [vmem:[%s2907_s1 + $0xa0] sm:$0xff]   ;;  %v2182_v23 = vld [vmem:[%s2907_s1 + $0xa8] sm:$0xff]  }
   0x9   :  { %1906 = vmatpush3.bf16.msra.mxu1 %v2166_v7  ;;  %1843 = vmatprep.subr.bf16.mxu0 %v2167_v8  ;;  %v2183_v24 = vld [vmem:[%s2907_s1 + $0x70] sm:$0xff]   ;;  %v2187_v28 = vld [vmem:[%s2907_s1 + $0x78] sm:$0xff]   ;;  %v2191_v32 = vld [vmem:[%s2908_s0] ss:$36 sps:$4 sm:$0xff]  }
   0xa   :  { %1907 = vmatprep.subr.bf16.mxu1 %v2168_v9  ;;  %v2184_v25 = vld [vmem:[%s2907_s1 + $0xf0] sm:$0xff]   ;;  %v2188_v29 = vld [vmem:[%s2907_s1 + $0xf8] sm:$0xff]   ;;  %v2193_v33 = vld [vmem:[%s2908_s0 + $0x4] ss:$36 sps:$4 sm:$0xff]  }
   0xb   :  { %v2185_v26 = vld [vmem:[%s2907_s1 + $0x30] sm:$0xff]   ;;  %v2189_v30 = vld [vmem:[%s2907_s1 + $0x38] sm:$0xff]   ;;  %v2194_v34 = vld [vmem:[%s2908_s0 + $0x8] ss:$36 sps:$4 sm:$0xff]   ;;  %1078 = vmatprep.mubr.bf16.mxu0 %v2193_v33 }
   0xc   :  { %1844 = vmatpush3.bf16.msra.mxu0 %v2169_v10  ;;  %v2186_v27 = vld [vmem:[%s2907_s1 + $0xb0] sm:$0xff]   ;;  %v2190_v31 = vld [vmem:[%s2907_s1 + $0xb8] sm:$0xff]   ;;  %v2197_v36 = vld [vmem:[%s2907_s1 + $0x140] sm:$0xff]  }
   0xd   :  { %1908 = vmatpush3.bf16.msra.mxu1 %v2170_v11  ;;  %1845 = vmatprep.subr.bf16.mxu0 %v2171_v12  ;;  %v2196_v35 = vld [vmem:[%s2908_s0 + $0xc] ss:$36 sps:$4 sm:$0xff]   ;;  %v2198_v37 = vld [vmem:[%s2907_s1 + $0x1c0] sm:$0xff]   ;;  %v2203_v41 = vld [vmem:[%s2908_s0 + $0x54] ss:$36 sps:$4 sm:$0xff]  }
   0xe   :  { %1909 = vmatprep.subr.bf16.mxu1 %v2172_v13  ;;  %1175 = vmatprep.mubr.bf16.mxu1 %v2196_v35  ;;  %v2199_v38 = vld [vmem:[%s2907_s1 + $0x100] sm:$0xff]   ;;  %v2201_v40 = vld [vmem:[%s2908_s0 + $0x4c] ss:$36 sps:$4 sm:$0xff]   ;;  %v2211_v48 = vld [vmem:[%s2908_s0 + $0x94] ss:$36 sps:$4 sm:$0xff]  }
   0xf   :  { %v2200_v39 = vld [vmem:[%s2907_s1 + $0x180] sm:$0xff]   ;;  %v2205_v42 = vld [vmem:[%s2908_s0 + $0x48] ss:$36 sps:$4 sm:$0xff]   ;;  %v2206_v43 = vld [vmem:[%s2908_s0 + $0x50] ss:$36 sps:$4 sm:$0xff]  }
  0x10   :  { %1846 = vmatpush3.bf16.msra.mxu0 %v2173_v14  ;;  %v2207_v44 = vld [vmem:[%s2907_s1 + $0x148] sm:$0xff]   ;;  %v2213_v49 = vld [vmem:[%s2908_s0 + $0x9c] ss:$36 sps:$4 sm:$0xff]   ;;  %v2215_v50 = vld [vmem:[%s2908_s0 + $0x90] ss:$36 sps:$4 sm:$0xff]  }
  0x11   :  { %1910 = vmatpush3.bf16.msra.mxu1 %v2174_v15  ;;  %1847 = vmatprep.subr.bf16.mxu0 %v2175_v16  ;;  %v2208_v45 = vld [vmem:[%s2907_s1 + $0x1c8] sm:$0xff]   ;;  %v2216_v51 = vld [vmem:[%s2908_s0 + $0x98] ss:$36 sps:$4 sm:$0xff]   ;;  %v2217_v52 = vld [vmem:[%s2907_s1 + $0x150] sm:$0xff]  }
  0x12   :  { %1911 = vmatprep.subr.bf16.mxu1 %v2176_v17  ;;  %v2209_v46 = vld [vmem:[%s2907_s1 + $0x108] sm:$0xff]   ;;  %v2218_v53 = vld [vmem:[%s2907_s1 + $0x1d0] sm:$0xff]   ;;  %v2221_v56 = vld [vmem:[%s2908_s0 + $0xdc] ss:$36 sps:$4 sm:$0xff]  }
  0x13   :  { %v2210_v47 = vld [vmem:[%s2907_s1 + $0x188] sm:$0xff]   ;;  %v2219_v54 = vld [vmem:[%s2907_s1 + $0x110] sm:$0xff]   ;;  %v2225_v58 = vld [vmem:[%s2908_s0 + $0xd8] ss:$36 sps:$4 sm:$0xff]  }
  0x14   :  { %1848 = vmatpush3.bf16.msra.mxu0 %v2177_v18  ;;  %v2220_v55 = vld [vmem:[%s2907_s1 + $0x190] sm:$0xff]   ;;  %v2223_v57 = vld [vmem:[%s2908_s0 + $0xe4] ss:$36 sps:$4 sm:$0xff]   ;;  %v2227_v60 = vld [vmem:[%s2907_s1 + $0x158] sm:$0xff]  }
  0x15   :  { %1912 = vmatpush3.bf16.msra.mxu1 %v2178_v19  ;;  %1849 = vmatprep.subr.bf16.mxu0 %v2179_v20  ;;  %v2226_v59 = vld [vmem:[%s2908_s0 + $0xe0] ss:$36 sps:$4 sm:$0xff]   ;;  %v2228_v61 = vld [vmem:[%s2907_s1 + $0x1d8] sm:$0xff]   ;;  %v2233_v1 = vld [vmem:[%s2908_s0 + $0x12c] ss:$36 sps:$4 sm:$0xff]  }
  0x16   :  { %1913 = vmatprep.subr.bf16.mxu1 %v2180_v21  ;;  %v2229_v62 = vld [vmem:[%s2907_s1 + $0x118] sm:$0xff]   ;;  %v2231_v0 = vld [vmem:[%s2908_s0 + $0x124] ss:$36 sps:$4 sm:$0xff]   ;;  %v2241_v8 = vld [vmem:[%s2908_s0 + $0x16c] ss:$36 sps:$4 sm:$0xff]  }
  0x17   :  { %v2230_v63 = vld [vmem:[%s2907_s1 + $0x198] sm:$0xff]   ;;  %v2235_v2 = vld [vmem:[%s2908_s0 + $0x120] ss:$36 sps:$4 sm:$0xff]   ;;  %v2236_v4 = vld [vmem:[%s2908_s0 + $0x128] ss:$36 sps:$4 sm:$0xff]  }
  0x18   :  { %1850 = vmatpush3.bf16.msra.mxu0 %v2181_v22  ;;  %v2237_v3 = vld [vmem:[%s2907_s1 + $0x160] sm:$0xff]   ;;  %v2243_v9 = vld [vmem:[%s2908_s0 + $0x174] ss:$36 sps:$4 sm:$0xff]   ;;  %v2247_v10 = vld [vmem:[%s2907_s1 + $0x168] sm:$0xff]  }
  0x19   :  { %1914 = vmatpush3.bf16.msra.mxu1 %v2182_v23  ;;  %1851 = vmatprep.subr.bf16.mxu0 %v2183_v24  ;;  %v2238_v5 = vld [vmem:[%s2907_s1 + $0x1e0] sm:$0xff]   ;;  %v2248_v11 = vld [vmem:[%s2907_s1 + $0x1e8] sm:$0xff]   ;;  %v2246_v15 = vld [vmem:[%s2908_s0 + $0x170] ss:$36 sps:$4 sm:$0xff]  }
  0x1a   :  { %1915 = vmatprep.subr.bf16.mxu1 %v2184_v25  ;;  %v2239_v6 = vld [vmem:[%s2907_s1 + $0x120] sm:$0xff]   ;;  %v2245_v12 = vld [vmem:[%s2908_s0 + $0x168] ss:$36 sps:$4 sm:$0xff]   ;;  %v2251_v16 = vld [vmem:[%s2908_s0 + $0x1b4] ss:$36 sps:$4 sm:$0xff]  }
  0x1b   :  { %v2240_v7 = vld [vmem:[%s2907_s1 + $0x1a0] sm:$0xff]   ;;  %v2249_v13 = vld [vmem:[%s2907_s1 + $0x128] sm:$0xff]   ;;  %v2257_v18 = vld [vmem:[%s2907_s1 + $0x170] sm:$0xff]  }
  0x1c   :  { %1852 = vmatpush3.bf16.msra.mxu0 %v2185_v26  ;;  %v2250_v14 = vld [vmem:[%s2907_s1 + $0x1a8] sm:$0xff]   ;;  %v2253_v17 = vld [vmem:[%s2908_s0 + $0x1bc] ss:$36 sps:$4 sm:$0xff]   ;;  %v2258_v19 = vld [vmem:[%s2907_s1 + $0x1f0] sm:$0xff]  }
  0x1d   :  { %1916 = vmatpush3.bf16.msra.mxu1 %v2186_v27  ;;  %1853 = vmatprep.subr.bf16.mxu0 %v2187_v28  ;;  %v2259_v20 = vld [vmem:[%s2907_s1 + $0x130] sm:$0xff]   ;;  %v2256_v23 = vld [vmem:[%s2908_s0 + $0x1b8] ss:$36 sps:$4 sm:$0xff]   ;;  %v2263_v25 = vld [vmem:[%s2908_s0 + $0x204] ss:$36 sps:$4 sm:$0xff]  }
  0x1e   :  { %1917 = vmatprep.subr.bf16.mxu1 %v2188_v29  ;;  %v2260_v21 = vld [vmem:[%s2907_s1 + $0x1b0] sm:$0xff]   ;;  %v2261_v24 = vld [vmem:[%s2908_s0 + $0x1fc] ss:$36 sps:$4 sm:$0xff]  }
  0x1f   :  { %v2255_v22 = vld [vmem:[%s2908_s0 + $0x1b0] ss:$36 sps:$4 sm:$0xff]   ;;  %v2267_v26 = vld [vmem:[%s2907_s1 + $0x178] sm:$0xff]  }
  0x20   :  { %1854 = vmatpush3.bf16.msra.mxu0 %v2189_v30  ;;  %v2268_v27 = vld [vmem:[%s2907_s1 + $0x1f8] sm:$0xff]   ;;  %v2271_v35 = vld [vmem:[%s2908_s0 + $0x10] ss:$36 sps:$4 sm:$0xff]  }
  0x21   :  { %1918 = vmatpush3.bf16.msra.mxu1 %v2190_v31  ;;  %1967 = vmatprep.subr.bf16.mxu0 %v2197_v36  ;;  %v2269_v28 = vld [vmem:[%s2907_s1 + $0x138] sm:$0xff]   ;;  %v2266_v31 = vld [vmem:[%s2908_s0 + $0x200] ss:$36 sps:$4 sm:$0xff]  }
  0x22   :  { %2031 = vmatprep.subr.bf16.mxu1 %v2198_v37  ;;  %v2270_v29 = vld [vmem:[%s2907_s1 + $0x1b8] sm:$0xff]  }
  0x23   :  { %1079 = vmatmul.mubr.bf16.vlgmr.msra.gmra.mrb[0].mxu0 %v2191_v32  ;;  %v2265_v30 = vld [vmem:[%s2908_s0 + $0x1f8] ss:$36 sps:$4 sm:$0xff]   ;;  %v2277_v32 = vld [vmem:[%s2907_s1 + $0x200] sm:$0xff]  }
  0x24   :  { %1176 = vmatmul.mubr.bf16.vlgmr.msra.gmra.mrb[0].mxu1 %v2194_v34  ;;  %1968 = vmatpush3.bf16.msra.mxu0 %v2199_v38  ;;  %v2273_v33 = vld [vmem:[%s2908_s0 + $0x14] ss:$36 sps:$4 sm:$0xff]   ;;  %v2276_v34 = vld [vmem:[%s2908_s0 + $0x1c] ss:$36 sps:$4 sm:$0xff]   ;;  %v2280_v38 = vld [vmem:[%s2908_s0 + $0x64] ss:$36 sps:$4 sm:$0xff]  }
  0x25   :  { %2032 = vmatpush3.bf16.msra.mxu1 %v2200_v39  ;;  %1086 = vmatprep.mubr.bf16.mxu0 %v2201_v40  ;;  %v2274_v36 = vld [vmem:[%s2908_s0 + $0x18] ss:$36 sps:$4 sm:$0xff]   ;;  %v2284_v39 = vld [vmem:[%s2907_s1 + $0x208] sm:$0xff]   ;;  %v2291_v40 = vld [vmem:[%s2907_s1 + $0x210] sm:$0xff]  }
  0x26   :  { %1183 = vmatprep.mubr.bf16.mxu1 %v2203_v41  ;;  %1969 = vmatprep.subr.bf16.mxu0 %v2207_v44  ;;  %v2278_v37 = vld [vmem:[%s2908_s0 + $0x5c] ss:$36 sps:$4 sm:$0xff]   ;;  %v2287_v44 = vld [vmem:[%s2908_s0 + $0xac] ss:$36 sps:$4 sm:$0xff]  }
  0x27   :  { %2033 = vmatprep.subr.bf16.mxu1 %v2208_v45  ;;  %v2282_v41 = vld [vmem:[%s2908_s0 + $0x58] ss:$36 sps:$4 sm:$0xff]  }
  0x28   :  { %1970 = vmatpush3.bf16.msra.mxu0 %v2209_v46  ;;  %v2298_v45 = vld [vmem:[%s2907_s1 + $0x218] sm:$0xff]   ;;  %v2305_v46 = vld [vmem:[%s2907_s1 + $0x220] sm:$0xff]  }
  0x29   :  { %2034 = vmatpush3.bf16.msra.mxu1 %v2210_v47  ;;  %1971 = vmatprep.subr.bf16.mxu0 %v2217_v52  ;;  %v2289_v47 = vld [vmem:[%s2908_s0 + $0xa0] ss:$36 sps:$4 sm:$0xff]   ;;  %v2296_v52 = vld [vmem:[%s2908_s0 + $0xe8] ss:$36 sps:$4 sm:$0xff]  }
  0x2a   :  { %2035 = vmatprep.subr.bf16.mxu1 %v2218_v53  ;;  %v2319_v53 = vld [vmem:[%s2907_s1 + $0x230] sm:$0xff]  }
  0x2b   :  { %1087 = vmatmul.mubr.bf16.gmra.mrb[4].mxu0 %v2205_v42  ;;  %v2283_v42 = vld [vmem:[%s2908_s0 + $0x60] ss:$36 sps:$4 sm:$0xff]  }
  0x2c   :  { %1184 = vmatmul.mubr.bf16.gmra.mrb[4].mxu1 %v2206_v43  ;;  %1094 = vmatprep.mubr.bf16.mxu0 %v2211_v48  ;;  %v2285_v43 = vld [vmem:[%s2908_s0 + $0xa4] ss:$36 sps:$4 sm:$0xff]  }
  0x2d   :  { %1191 = vmatprep.mubr.bf16.mxu1 %v2213_v49  ;;  %1972 = vmatpush3.bf16.msra.mxu0 %v2219_v54  ;;  %v2290_v48 = vld [vmem:[%s2908_s0 + $0xa8] ss:$36 sps:$4 sm:$0xff]   ;;  %v2297_v54 = vld [vmem:[%s2908_s0 + $0xf0] ss:$36 sps:$4 sm:$0xff]  }
  0x2e   :  { %2036 = vmatpush3.bf16.msra.mxu1 %v2220_v55  ;;  %1973 = vmatprep.subr.bf16.mxu0 %v2227_v60  ;;  %v2292_v49 = vld [vmem:[%s2908_s0 + $0xec] ss:$36 sps:$4 sm:$0xff]   ;;  %v2299_v55 = vld [vmem:[%s2908_s0 + $0x134] ss:$36 sps:$4 sm:$0xff]   ;;  %v2306_v60 = vld [vmem:[%s2908_s0 + $0x17c] ss:$36 sps:$4 sm:$0xff]  }
  0x2f   :  { %2037 = vmatprep.subr.bf16.mxu1 %v2228_v61  ;;  %v2308_v61 = vld [vmem:[%s2908_s0 + $0x184] ss:$36 sps:$4 sm:$0xff]  }
  0x31   :  { %1974 = vmatpush3.bf16.msra.mxu0 %v2229_v62  ;;  %v2310_v62 = vld [vmem:[%s2908_s0 + $0x178] ss:$36 sps:$4 sm:$0xff]  }
  0x32   :  { %2038 = vmatpush3.bf16.msra.mxu1 %v2230_v63  ;;  %1975 = vmatprep.subr.bf16.mxu0 %v2237_v3  ;;  %v2311_v63 = vld [vmem:[%s2908_s0 + $0x180] ss:$36 sps:$4 sm:$0xff]   ;;  %v2318_v3 = vld [vmem:[%s2908_s0 + $0x1c8] ss:$36 sps:$4 sm:$0xff]  }
  0x33   :  { %1095 = vmatmul.mubr.bf16.gmra.mrb[8].mxu0 %v2215_v50  ;;  %2039 = vmatprep.subr.bf16.mxu1 %v2238_v5  ;;  %v2294_v50 = vld [vmem:[%s2908_s0 + $0xf4] ss:$36 sps:$4 sm:$0xff]  }
  0x34   :  { %1192 = vmatmul.mubr.bf16.gmra.mrb[8].mxu1 %v2216_v51  ;;  %1102 = vmatprep.mubr.bf16.mxu0 %v2221_v56  ;;  %v2312_v51 = vld [vmem:[%s2907_s1 + $0x228] sm:$0xff]   ;;  %v2301_v56 = vld [vmem:[%s2908_s0 + $0x13c] ss:$36 sps:$4 sm:$0xff]   ;;  %v2322_v5 = vld [vmem:[%s2908_s0 + $0x214] ss:$36 sps:$4 sm:$0xff]  }
  0x35   :  { %1199 = vmatprep.mubr.bf16.mxu1 %v2223_v57  ;;  %1976 = vmatpush3.bf16.msra.mxu0 %v2239_v6  ;;  %v2326_v57 = vld [vmem:[%s2907_s1 + $0x238] sm:$0xff]   ;;  %v2324_v6 = vld [vmem:[%s2908_s0 + $0x208] ss:$36 sps:$4 sm:$0xff]  }
  0x36   :  { %2040 = vmatpush3.bf16.msra.mxu1 %v2240_v7  ;;  %1977 = vmatprep.subr.bf16.mxu0 %v2247_v10  ;;  %v2325_v7 = vld [vmem:[%s2908_s0 + $0x210] ss:$36 sps:$4 sm:$0xff]   ;;  %v2329_v10 = vld [vmem:[%s2908_s0 + $0x68] ss:$36 sps:$4 sm:$0xff]  }
  0x37   :  { %2041 = vmatprep.subr.bf16.mxu1 %v2248_v11  ;;  %v2330_v11 = vld [vmem:[%s2908_s0 + $0x188] ss:$36 sps:$4 sm:$0xff]  }
  0x39   :  { %1978 = vmatpush3.bf16.msra.mxu0 %v2249_v13  ;;  %v2332_v13 = vld [vmem:[%s2908_s0 + $0x1d0] ss:$36 sps:$4 sm:$0xff]  }
  0x3a   :  { %2042 = vmatpush3.bf16.msra.mxu1 %v2250_v14  ;;  %1979 = vmatprep.subr.bf16.mxu0 %v2257_v18  ;;  %v2333_v14 = vld [vmem:[%s2908_s0 + $0xf8] ss:$36 sps:$4 sm:$0xff]   ;;  %v2790_v18 = vld [vmem:[%s2909_s2] ss:$0 sm:$0xff] }
  0x3b   :  { %1103 = vmatmul.mubr.bf16.gmra.mrb[12].mxu0 %v2225_v58  ;;  %2043 = vmatprep.subr.bf16.mxu1 %v2258_v19  ;;  %v2303_v58 = vld [vmem:[%s2908_s0 + $0x130] ss:$36 sps:$4 sm:$0xff]  }
  0x3c   :  { %1200 = vmatmul.mubr.bf16.gmra.mrb[12].mxu1 %v2226_v59  ;;  %1110 = vmatprep.mubr.bf16.mxu0 %v2231_v0  ;;  %v2304_v59 = vld [vmem:[%s2908_s0 + $0x138] ss:$36 sps:$4 sm:$0xff]   ;;  %v2313_v0 = vld [vmem:[%s2908_s0 + $0x1c4] ss:$36 sps:$4 sm:$0xff]  }
  0x3d   :  { %1207 = vmatprep.mubr.bf16.mxu1 %v2233_v1  ;;  %1980 = vmatpush3.bf16.msra.mxu0 %v2259_v20  ;;  %v2315_v1 = vld [vmem:[%s2908_s0 + $0x1cc] ss:$36 sps:$4 sm:$0xff]  }
  0x3e   :  { %2044 = vmatpush3.bf16.msra.mxu1 %v2260_v21  ;;  %1981 = vmatprep.subr.bf16.mxu0 %v2267_v26 }
  0x3f   :  { %2045 = vmatprep.subr.bf16.mxu1 %v2268_v27 }
  0x41   :  { %1982 = vmatpush3.bf16.msra.mxu0 %v2269_v28 }
  0x42   :  { %2046 = vmatpush3.bf16.msra.mxu1 %v2270_v29  ;;  %2111 = vmatprep.subr.bf16.mxu0 %v2277_v32 }
  0x43   :  { %1111 = vmatmul.mubr.bf16.gmra.mrb[16].mxu0 %v2235_v2  ;;  %2143 = vmatprep.subr.bf16.mxu1 %v2277_v32  ;;  %v2317_v2 = vld [vmem:[%s2908_s0 + $0x1c0] ss:$36 sps:$4 sm:$0xff]  }
  0x44   :  { %1208 = vmatmul.mubr.bf16.gmra.mrb[16].mxu1 %v2236_v4  ;;  %1118 = vmatprep.mubr.bf16.mxu0 %v2241_v8  ;;  %v2320_v4 = vld [vmem:[%s2908_s0 + $0x20c] ss:$36 sps:$4 sm:$0xff]   ;;  %v2327_v8 = vld [vmem:[%s2908_s0 + $0x20] ss:$36 sps:$4 sm:$0xff]  }
  0x45   :  { %1215 = vmatprep.mubr.bf16.mxu1 %v2243_v9  ;;  %v2328_v9 = vld [vmem:[%s2908_s0 + $0x140] ss:$36 sps:$4 sm:$0xff]  }
  0x4b   :  { %1119 = vmatmul.mubr.bf16.gmra.mrb[20].mxu0 %v2245_v12  ;;  %v2331_v12 = vld [vmem:[%s2908_s0 + $0xb0] ss:$36 sps:$4 sm:$0xff]  }
  0x4c   :  { %1216 = vmatmul.mubr.bf16.gmra.mrb[20].mxu1 %v2246_v15  ;;  %1126 = vmatprep.mubr.bf16.mxu0 %v2251_v16  ;;  %v2334_v15 = vld [vmem:[%s2908_s0 + $0x218] ss:$36 sps:$4 sm:$0xff]  }
  0x4d   :  { %1223 = vmatprep.mubr.bf16.mxu1 %v2253_v17 }
  0x53   :  { %1127 = vmatmul.mubr.bf16.gmra.mrb[24].mxu0 %v2255_v22 }
  0x54   :  { %1224 = vmatmul.mubr.bf16.gmra.mrb[24].mxu1 %v2256_v23  ;;  %1134 = vmatprep.mubr.bf16.mxu0 %v2261_v24 }
  0x55   :  { %1231 = vmatprep.mubr.bf16.mxu1 %v2263_v25 }
  0x5b   :  { %1135 = vmatmul.mubr.bf16.gmra.mrb[28].mxu0 %v2265_v30 }
  0x5c   :  { %1232 = vmatmul.mubr.bf16.gmra.mrb[28].mxu1 %v2266_v31  ;;  %1272 = vmatprep.mubr.bf16.mxu0 %v2273_v33 }
  0x5d   :  { %1369 = vmatprep.mubr.bf16.mxu1 %v2276_v34 }
  0x63   :  { %1273 = vmatmul.mubr.bf16.vlgmr.msra.gmra.mrb[32].mxu0 %v2271_v35 }
  0x64   :  { %1370 = vmatmul.mubr.bf16.vlgmr.msra.gmra.mrb[32].mxu1 %v2274_v36  ;;  %2112 = vmatpush3.bf16.msra.mxu0 %v2277_v32 }
  0x65   :  { %2151 = vmatpush3.bf16.msra.mxu1 %v2277_v32  ;;  %1280 = vmatprep.mubr.bf16.mxu0 %v2278_v37 }
  0x66   :  { %1377 = vmatprep.mubr.bf16.mxu1 %v2280_v38  ;;  %2113 = vmatprep.subr.bf16.mxu0 %v2284_v39 }
  0x67   :  { %2144 = vmatprep.subr.bf16.mxu1 %v2284_v39 }
  0x68   :  { %2114 = vmatpush3.bf16.msra.mxu0 %v2284_v39 }
  0x69   :  { %2152 = vmatpush3.bf16.msra.mxu1 %v2284_v39  ;;  %2115 = vmatprep.subr.bf16.mxu0 %v2291_v40 }
  0x6a   :  { %2145 = vmatprep.subr.bf16.mxu1 %v2291_v40 }
  0x6b   :  { %1281 = vmatmul.mubr.bf16.gmra.mrb[36].mxu0 %v2282_v41 }
  0x6c   :  { %1378 = vmatmul.mubr.bf16.gmra.mrb[36].mxu1 %v2283_v42  ;;  %1288 = vmatprep.mubr.bf16.mxu0 %v2285_v43 }
  0x6d   :  { %1385 = vmatprep.mubr.bf16.mxu1 %v2287_v44  ;;  %2116 = vmatpush3.bf16.msra.mxu0 %v2291_v40 }
  0x6e   :  { %2153 = vmatpush3.bf16.msra.mxu1 %v2291_v40  ;;  %2117 = vmatprep.subr.bf16.mxu0 %v2298_v45 }
  0x6f   :  { %2146 = vmatprep.subr.bf16.mxu1 %v2298_v45 }
  0x71   :  { %2118 = vmatpush3.bf16.msra.mxu0 %v2298_v45 }
  0x72   :  { %2154 = vmatpush3.bf16.msra.mxu1 %v2298_v45  ;;  %2119 = vmatprep.subr.bf16.mxu0 %v2305_v46 }
  0x73   :  { %1289 = vmatmul.mubr.bf16.gmra.mrb[40].mxu0 %v2289_v47  ;;  %2147 = vmatprep.subr.bf16.mxu1 %v2305_v46 }
  0x74   :  { %1386 = vmatmul.mubr.bf16.gmra.mrb[40].mxu1 %v2290_v48  ;;  %1296 = vmatprep.mubr.bf16.mxu0 %v2292_v49 }
  0x75   :  { %1393 = vmatprep.mubr.bf16.mxu1 %v2294_v50  ;;  %2120 = vmatpush3.bf16.msra.mxu0 %v2305_v46 }
  0x76   :  { %2155 = vmatpush3.bf16.msra.mxu1 %v2305_v46  ;;  %2121 = vmatprep.subr.bf16.mxu0 %v2312_v51 }
  0x77   :  { %2148 = vmatprep.subr.bf16.mxu1 %v2312_v51 }
  0x79   :  { %2122 = vmatpush3.bf16.msra.mxu0 %v2312_v51 }
  0x7a   :  { %2156 = vmatpush3.bf16.msra.mxu1 %v2312_v51  ;;  %2123 = vmatprep.subr.bf16.mxu0 %v2319_v53 }
  0x7b   :  { %1297 = vmatmul.mubr.bf16.gmra.mrb[44].mxu0 %v2296_v52  ;;  %2149 = vmatprep.subr.bf16.mxu1 %v2319_v53 }
  0x7c   :  { %1394 = vmatmul.mubr.bf16.gmra.mrb[44].mxu1 %v2297_v54  ;;  %1304 = vmatprep.mubr.bf16.mxu0 %v2299_v55 }
  0x7d   :  { %1401 = vmatprep.mubr.bf16.mxu1 %v2301_v56  ;;  %2124 = vmatpush3.bf16.msra.mxu0 %v2319_v53 }
  0x7e   :  { %2157 = vmatpush3.bf16.msra.mxu1 %v2319_v53  ;;  %2125 = vmatprep.subr.bf16.mxu0 %v2326_v57 }
  0x7f   :  { %2150 = vmatprep.subr.bf16.mxu1 %v2326_v57 }
  0x81   :  { %2126 = vmatpush3.bf16.msra.mxu0 %v2326_v57 }
  0x82   :  { %2158 = vmatpush3.bf16.msra.mxu1 %v2326_v57 }
  0x83   :  { %1305 = vmatmul.mubr.bf16.gmra.mrb[48].mxu0 %v2303_v58 }
  0x84   :  { %1402 = vmatmul.mubr.bf16.gmra.mrb[48].mxu1 %v2304_v59  ;;  %1312 = vmatprep.mubr.bf16.mxu0 %v2306_v60 }
  0x85   :  { %1409 = vmatprep.mubr.bf16.mxu1 %v2308_v61 }
  0x8b   :  { %1313 = vmatmul.mubr.bf16.gmra.mrb[52].mxu0 %v2310_v62 }
  0x8c   :  { %1410 = vmatmul.mubr.bf16.gmra.mrb[52].mxu1 %v2311_v63  ;;  %1320 = vmatprep.mubr.bf16.mxu0 %v2313_v0 }
  0x8d   :  { %1417 = vmatprep.mubr.bf16.mxu1 %v2315_v1 }
  0x93   :  { %1321 = vmatmul.mubr.bf16.gmra.mrb[56].mxu0 %v2317_v2 }
  0x94   :  { %1418 = vmatmul.mubr.bf16.gmra.mrb[56].mxu1 %v2318_v3  ;;  %1328 = vmatprep.mubr.bf16.mxu0 %v2320_v4 }
  0x95   :  { %1425 = vmatprep.mubr.bf16.mxu1 %v2322_v5 }
  0x9b   :  { %1329 = vmatmul.mubr.bf16.gmra.mrb[60].mxu0 %v2324_v6 }
  0x9c   :  { %1426 = vmatmul.mubr.bf16.gmra.mrb[60].mxu1 %v2325_v7  ;;  %2127 = vmatprep.mubr.bf16.mxu0 %v2327_v8 }
  0x9d   :  { %2135 = vmatprep.mubr.bf16.mxu1 %v2328_v9 }
  0xa3   :  { %2128 = vmatmul.mubr.bf16.vlgmr.msra.gmra.mrb[64].mxu0 %v2329_v10 }
  0xa4   :  { %2136 = vmatmul.mubr.bf16.vlgmr.msra.gmra.mrb[64].mxu1 %v2330_v11  ;;  %2131 = vmatprep.mubr.bf16.mxu0 %v2331_v12 }
  0xa5   :  { %2139 = vmatprep.mubr.bf16.mxu1 %v2332_v13 }
  0xab   :  { %2132 = vmatmul.mubr.bf16.gmra.mrb[68].mxu0 %v2333_v14 }
  0xac   :  { %2140 = vmatmul.mubr.bf16.gmra.mrb[68].mxu1 %v2334_v15 }
  0xf6   :  { %v1855_v16 = vpop.f32.mrb[0].mxu0 }
  0xf7   :  { %v1919_v17 = vpop.f32.mrb[0].mxu1  ;;  %v1856_v19 = vpop.f32.mrb[1].mxu0 }
  0xf8   :  { %v1857_v20 = vadd.f32 %v1856_v19, %v1855_v16  ;;  %v1920_v21 = vpop.f32.mrb[1].mxu1  ;;  %v1858_v22 = vpop.f32.mrb[2].mxu0 }
  0xf9   :  { %v1921_v23 = vadd.f32 %v1920_v21, %v1919_v17  ;;  %v1922_v24 = vpop.f32.mrb[2].mxu1  ;;  %v1859_v25 = vpop.f32.mrb[3].mxu0 }
  0xfa   :  { %v1081_v26 = vadd.f32 %v1857_v20, %v2790_v18  ;;  %v1860_v27 = vadd.f32 %v1859_v25, %v1858_v22  ;;  %v1923_v28 = vpop.f32.mrb[3].mxu1 }
  0xfb   :  { %v1924_v29 = vadd.f32 %v1923_v28, %v1922_v24 }
  0xfc   :  { %v2793_v30 = vadd.f32 %v1921_v23, %v1081_v26  ;;  %v1084_v31 = vadd.f32 %v1860_v27, %v2790_v18 }
  0xfe   :  { %v2796_v32 = vadd.f32 %v1924_v29, %v1084_v31  ;;  %v1861_v33 = vpop.f32.mrb[4].mxu0 }
  0xff   :  { %v1925_v34 = vpop.f32.mrb[4].mxu1  ;;  %v1862_v35 = vpop.f32.mrb[5].mxu0 }
 0x100   :  { %v1863_v36 = vadd.f32 %v1862_v35, %v1861_v33  ;;  %v1926_v37 = vpop.f32.mrb[5].mxu1  ;;  %v1864_v38 = vpop.f32.mrb[6].mxu0 }
 0x101   :  { %v1927_v39 = vadd.f32 %v1926_v37, %v1925_v34  ;;  %v1928_v40 = vpop.f32.mrb[6].mxu1  ;;  %v1865_v41 = vpop.f32.mrb[7].mxu0 }
 0x102   :  { %v1089_v42 = vadd.f32 %v1863_v36, %v2790_v18  ;;  %v1866_v43 = vadd.f32 %v1865_v41, %v1864_v38  ;;  %v1929_v44 = vpop.f32.mrb[7].mxu1 }
 0x103   :  { %v1930_v45 = vadd.f32 %v1929_v44, %v1928_v40 }
 0x104   :  { %v2799_v46 = vadd.f32 %v1927_v39, %v1089_v42  ;;  %v1092_v47 = vadd.f32 %v1866_v43, %v2790_v18 }
 0x106   :  { %v2802_v48 = vadd.f32 %v1930_v45, %v1092_v47  ;;  %v1867_v49 = vpop.f32.mrb[8].mxu0 }
 0x107   :  { %v1931_v50 = vpop.f32.mrb[8].mxu1  ;;  %v1868_v51 = vpop.f32.mrb[9].mxu0 }
 0x108   :  { %v1869_v52 = vadd.f32 %v1868_v51, %v1867_v49  ;;  %v1932_v53 = vpop.f32.mrb[9].mxu1  ;;  %v1870_v54 = vpop.f32.mrb[10].mxu0 }
 0x109   :  { %v1933_v55 = vadd.f32 %v1932_v53, %v1931_v50  ;;  %v1934_v56 = vpop.f32.mrb[10].mxu1  ;;  %v1871_v57 = vpop.f32.mrb[11].mxu0 }
 0x10a   :  { %v1097_v58 = vadd.f32 %v1869_v52, %v2790_v18  ;;  %v1872_v59 = vadd.f32 %v1871_v57, %v1870_v54  ;;  %v1935_v60 = vpop.f32.mrb[11].mxu1 }
 0x10b   :  { %v1936_v61 = vadd.f32 %v1935_v60, %v1934_v56 }
 0x10c   :  { %v2805_v62 = vadd.f32 %v1933_v55, %v1097_v58  ;;  %v1100_v63 = vadd.f32 %v1872_v59, %v2790_v18 }
 0x10e   :  { %v2808_v0 = vadd.f32 %v1936_v61, %v1100_v63  ;;  %v1873_v1 = vpop.f32.mrb[12].mxu0 }
 0x10f   :  { %v1937_v2 = vpop.f32.mrb[12].mxu1  ;;  %v1874_v3 = vpop.f32.mrb[13].mxu0 }
 0x110   :  { %v1875_v4 = vadd.f32 %v1874_v3, %v1873_v1  ;;  %v1938_v5 = vpop.f32.mrb[13].mxu1  ;;  %v1876_v6 = vpop.f32.mrb[14].mxu0 }
 0x111   :  { %v1939_v7 = vadd.f32 %v1938_v5, %v1937_v2  ;;  %v1940_v8 = vpop.f32.mrb[14].mxu1  ;;  %v1877_v9 = vpop.f32.mrb[15].mxu0 }
 0x112   :  { %v1105_v10 = vadd.f32 %v1875_v4, %v2790_v18  ;;  %v1878_v11 = vadd.f32 %v1877_v9, %v1876_v6  ;;  %v1941_v12 = vpop.f32.mrb[15].mxu1 }
 0x113   :  { %v1942_v13 = vadd.f32 %v1941_v12, %v1940_v8 }
 0x114   :  { %v2811_v14 = vadd.f32 %v1939_v7, %v1105_v10  ;;  %v1108_v15 = vadd.f32 %v1878_v11, %v2790_v18 }
 0x116   :  { %v2814_v16 = vadd.f32 %v1942_v13, %v1108_v15  ;;  %v1879_v17 = vpop.f32.mrb[16].mxu0 }
 0x117   :  { %v1943_v19 = vpop.f32.mrb[16].mxu1  ;;  %v1880_v20 = vpop.f32.mrb[17].mxu0 }
 0x118   :  { %v1881_v21 = vadd.f32 %v1880_v20, %v1879_v17  ;;  %v1944_v22 = vpop.f32.mrb[17].mxu1  ;;  %v1882_v23 = vpop.f32.mrb[18].mxu0 }
 0x119   :  { %v1945_v24 = vadd.f32 %v1944_v22, %v1943_v19  ;;  %v1946_v25 = vpop.f32.mrb[18].mxu1  ;;  %v1883_v26 = vpop.f32.mrb[19].mxu0 }
 0x11a   :  { %v1113_v27 = vadd.f32 %v1881_v21, %v2790_v18  ;;  %v1884_v28 = vadd.f32 %v1883_v26, %v1882_v23  ;;  %v1947_v29 = vpop.f32.mrb[19].mxu1 }
 0x11b   :  { %v1948_v31 = vadd.f32 %v1947_v29, %v1946_v25 }
 0x11c   :  { %v2817_v33 = vadd.f32 %v1945_v24, %v1113_v27  ;;  %v1116_v34 = vadd.f32 %v1884_v28, %v2790_v18 }
 0x11e   :  { %v2820_v35 = vadd.f32 %v1948_v31, %v1116_v34  ;;  %v1885_v36 = vpop.f32.mrb[20].mxu0 }
 0x11f   :  { %v1949_v37 = vpop.f32.mrb[20].mxu1  ;;  %v1886_v38 = vpop.f32.mrb[21].mxu0 }
 0x120   :  { %v1887_v39 = vadd.f32 %v1886_v38, %v1885_v36  ;;  %v1950_v40 = vpop.f32.mrb[21].mxu1  ;;  %v1888_v41 = vpop.f32.mrb[22].mxu0 }
 0x121   :  { %v1951_v42 = vadd.f32 %v1950_v40, %v1949_v37  ;;  %v1952_v43 = vpop.f32.mrb[22].mxu1  ;;  %v1889_v44 = vpop.f32.mrb[23].mxu0 }
 0x122   :  { %v1121_v45 = vadd.f32 %v1887_v39, %v2790_v18  ;;  %v1890_v47 = vadd.f32 %v1889_v44, %v1888_v41  ;;  %v1953_v49 = vpop.f32.mrb[23].mxu1 }
 0x123   :  { %v1954_v50 = vadd.f32 %v1953_v49, %v1952_v43 }
 0x124   :  { %v2823_v51 = vadd.f32 %v1951_v42, %v1121_v45  ;;  %v1124_v52 = vadd.f32 %v1890_v47, %v2790_v18 }
 0x126   :  { %v2826_v53 = vadd.f32 %v1954_v50, %v1124_v52  ;;  %v1891_v54 = vpop.f32.mrb[24].mxu0 }
 0x127   :  { %v1955_v55 = vpop.f32.mrb[24].mxu1  ;;  %v1892_v56 = vpop.f32.mrb[25].mxu0 }
 0x128   :  { %v1893_v57 = vadd.f32 %v1892_v56, %v1891_v54  ;;  %v1956_v58 = vpop.f32.mrb[25].mxu1  ;;  %v1894_v59 = vpop.f32.mrb[26].mxu0 }
 0x129   :  { %v1957_v60 = vadd.f32 %v1956_v58, %v1955_v55  ;;  %v1958_v61 = vpop.f32.mrb[26].mxu1  ;;  %v1895_v63 = vpop.f32.mrb[27].mxu0 }
 0x12a   :  { %v1129_v1 = vadd.f32 %v1893_v57, %v2790_v18  ;;  %v1896_v2 = vadd.f32 %v1895_v63, %v1894_v59  ;;  %v1959_v3 = vpop.f32.mrb[27].mxu1 }
 0x12b   :  { %v1960_v4 = vadd.f32 %v1959_v3, %v1958_v61 }
 0x12c   :  { %v2829_v5 = vadd.f32 %v1957_v60, %v1129_v1  ;;  %v1132_v6 = vadd.f32 %v1896_v2, %v2790_v18 }
 0x12e   :  { %v2832_v7 = vadd.f32 %v1960_v4, %v1132_v6  ;;  %v1897_v8 = vpop.f32.mrb[28].mxu0 }
 0x12f   :  { %v1961_v9 = vpop.f32.mrb[28].mxu1  ;;  %v1898_v10 = vpop.f32.mrb[29].mxu0 }
 0x130   :  { %v1899_v11 = vadd.f32 %v1898_v10, %v1897_v8  ;;  %v1962_v12 = vpop.f32.mrb[29].mxu1  ;;  %v1900_v13 = vpop.f32.mrb[30].mxu0 }
 0x131   :  { %v1963_v15 = vadd.f32 %v1962_v12, %v1961_v9  ;;  %v1964_v17 = vpop.f32.mrb[30].mxu1  ;;  %v1901_v19 = vpop.f32.mrb[31].mxu0 }
 0x132   :  { %v1137_v20 = vadd.f32 %v1899_v11, %v2790_v18  ;;  %v1902_v21 = vadd.f32 %v1901_v19, %v1900_v13  ;;  %v1965_v22 = vpop.f32.mrb[31].mxu1 }
 0x133   :  { %v1966_v23 = vadd.f32 %v1965_v22, %v1964_v17 }
 0x134   :  { %v2835_v24 = vadd.f32 %v1963_v15, %v1137_v20  ;;  %v1140_v25 = vadd.f32 %v1902_v21, %v2790_v18 }
 0x136   :  { %v2838_v26 = vadd.f32 %v1966_v23, %v1140_v25  ;;  %v1983_v27 = vpop.f32.mrb[32].mxu0 }
 0x137   :  { %v2047_v28 = vpop.f32.mrb[32].mxu1  ;;  %v1984_v29 = vpop.f32.mrb[33].mxu0 }
 0x138   :  { %v1985_v31 = vadd.f32 %v1984_v29, %v1983_v27  ;;  %v2048_v34 = vpop.f32.mrb[33].mxu1  ;;  %v1986_v36 = vpop.f32.mrb[34].mxu0 }
 0x139   :  { %v2049_v37 = vadd.f32 %v2048_v34, %v2047_v28  ;;  %v2050_v38 = vpop.f32.mrb[34].mxu1  ;;  %v1987_v39 = vpop.f32.mrb[35].mxu0 }
 0x13a   :  { %v1275_v40 = vadd.f32 %v1985_v31, %v2793_v30  ;;  %v1988_v41 = vadd.f32 %v1987_v39, %v1986_v36  ;;  %v2051_v42 = vpop.f32.mrb[35].mxu1 }
 0x13b   :  { %v2052_v43 = vadd.f32 %v2051_v42, %v2050_v38 }
 0x13c   :  { %v1278_v44 = vadd.f32 %v1988_v41, %v2796_v32  ;;  %v2842_v45 = vadd.f32 %v2049_v37, %v1275_v40 }
 0x13e   :  { %v1989_v18 = vpop.f32.mrb[36].mxu0  ;;  %v2844_v47 = vadd.f32 %v2052_v43, %v1278_v44 }
 0x13f   :  { %v2053_v49 = vpop.f32.mrb[36].mxu1  ;;  %v1990_v50 = vpop.f32.mrb[37].mxu0 }
 0x140   :  { %v1991_v52 = vadd.f32 %v1990_v50, %v1989_v18  ;;  %v2054_v54 = vpop.f32.mrb[37].mxu1  ;;  %v1992_v55 = vpop.f32.mrb[38].mxu0 }
 0x141   :  { %v2055_v56 = vadd.f32 %v2054_v54, %v2053_v49  ;;  %v2056_v57 = vpop.f32.mrb[38].mxu1  ;;  %v1993_v58 = vpop.f32.mrb[39].mxu0 }
 0x142   :  { %v1283_v30 = vadd.f32 %v1991_v52, %v2799_v46  ;;  %v1994_v59 = vadd.f32 %v1993_v58, %v1992_v55  ;;  %v2057_v60 = vpop.f32.mrb[39].mxu1 }
 0x143   :  { %v2058_v61 = vadd.f32 %v2057_v60, %v2056_v57 }
 0x144   :  { %v1286_v32 = vadd.f32 %v1994_v59, %v2802_v48  ;;  %v2848_v63 = vadd.f32 %v2055_v56, %v1283_v30 }
 0x146   :  { %v1995_v1 = vpop.f32.mrb[40].mxu0  ;;  %v2850_v2 = vadd.f32 %v2058_v61, %v1286_v32 }
 0x147   :  { %v2059_v3 = vpop.f32.mrb[40].mxu1  ;;  %v1996_v4 = vpop.f32.mrb[41].mxu0 }
 0x148   :  { %v1997_v6 = vadd.f32 %v1996_v4, %v1995_v1  ;;  %v2060_v8 = vpop.f32.mrb[41].mxu1  ;;  %v1998_v9 = vpop.f32.mrb[42].mxu0 }
 0x149   :  { %v2061_v10 = vadd.f32 %v2060_v8, %v2059_v3  ;;  %v2062_v11 = vpop.f32.mrb[42].mxu1  ;;  %v1999_v12 = vpop.f32.mrb[43].mxu0 }
 0x14a   :  { %v1291_v46 = vadd.f32 %v1997_v6, %v2805_v62  ;;  %v2000_v13 = vadd.f32 %v1999_v12, %v1998_v9  ;;  %v2063_v15 = vpop.f32.mrb[43].mxu1 }
 0x14b   :  { %v2064_v17 = vadd.f32 %v2063_v15, %v2062_v11 }
 0x14c   :  { %v1294_v48 = vadd.f32 %v2000_v13, %v2808_v0  ;;  %v2854_v19 = vadd.f32 %v2061_v10, %v1291_v46 }
 0x14e   :  { %v2001_v20 = vpop.f32.mrb[44].mxu0  ;;  %v2856_v21 = vadd.f32 %v2064_v17, %v1294_v48 }
 0x14f   :  { %v2065_v22 = vpop.f32.mrb[44].mxu1  ;;  %v2002_v23 = vpop.f32.mrb[45].mxu0 }
 0x150   :  { %v2003_v25 = vadd.f32 %v2002_v23, %v2001_v20  ;;  %v2066_v27 = vpop.f32.mrb[45].mxu1  ;;  %v2004_v28 = vpop.f32.mrb[46].mxu0 }
 0x151   :  { %v2067_v29 = vadd.f32 %v2066_v27, %v2065_v22  ;;  %v2068_v31 = vpop.f32.mrb[46].mxu1  ;;  %v2005_v34 = vpop.f32.mrb[47].mxu0 }
 0x152   :  { %v1299_v62 = vadd.f32 %v2003_v25, %v2811_v14  ;;  %v2006_v36 = vadd.f32 %v2005_v34, %v2004_v28  ;;  %v2069_v37 = vpop.f32.mrb[47].mxu1 }
 0x153   :  { %v2070_v38 = vadd.f32 %v2069_v37, %v2068_v31 }
 0x154   :  { %v1302_v0 = vadd.f32 %v2006_v36, %v2814_v16  ;;  %v2860_v39 = vadd.f32 %v2067_v29, %v1299_v62 }
 0x156   :  { %v2007_v40 = vpop.f32.mrb[48].mxu0  ;;  %v2862_v41 = vadd.f32 %v2070_v38, %v1302_v0 }
 0x157   :  { %v2071_v42 = vpop.f32.mrb[48].mxu1  ;;  %v2008_v43 = vpop.f32.mrb[49].mxu0 }
 0x158   :  { %v2009_v44 = vadd.f32 %v2008_v43, %v2007_v40  ;;  %v2072_v18 = vpop.f32.mrb[49].mxu1  ;;  %v2010_v49 = vpop.f32.mrb[50].mxu0 }
 0x159   :  { %v2073_v50 = vadd.f32 %v2072_v18, %v2071_v42  ;;  %v2074_v52 = vpop.f32.mrb[50].mxu1  ;;  %v2011_v54 = vpop.f32.mrb[51].mxu0 }
 0x15a   :  { %v1307_v14 = vadd.f32 %v2009_v44, %v2817_v33  ;;  %v2012_v55 = vadd.f32 %v2011_v54, %v2010_v49  ;;  %v2075_v56 = vpop.f32.mrb[51].mxu1 }
 0x15b   :  { %v2076_v57 = vadd.f32 %v2075_v56, %v2074_v52 }
 0x15c   :  { %v1310_v16 = vadd.f32 %v2012_v55, %v2820_v35  ;;  %v1404_v58 = vadd.f32 %v2073_v50, %v1307_v14 }
 0x15e   :  { %v2013_v30 = vpop.f32.mrb[52].mxu0  ;;  %v2866_v59 = vadd.f32 %v2076_v57, %v1310_v16 }
 0x15f   :  { %v2077_v60 = vpop.f32.mrb[52].mxu1  ;;  %v2014_v61 = vpop.f32.mrb[53].mxu0 }
 0x160   :  { %v2015_v32 = vadd.f32 %v2014_v61, %v2013_v30  ;;  %v2078_v1 = vpop.f32.mrb[53].mxu1  ;;  %v2016_v3 = vpop.f32.mrb[54].mxu0 }
 0x161   :  { %v2079_v4 = vadd.f32 %v2078_v1, %v2077_v60  ;;  %v2080_v6 = vpop.f32.mrb[54].mxu1  ;;  %v2017_v8 = vpop.f32.mrb[55].mxu0 }
 0x162   :  { %v1315_v9 = vadd.f32 %v2015_v32, %v2823_v51  ;;  %v2018_v33 = vadd.f32 %v2017_v8, %v2016_v3  ;;  %v2081_v10 = vpop.f32.mrb[55].mxu1 }
 0x163   :  { %v2082_v11 = vadd.f32 %v2081_v10, %v2080_v6 }
 0x164   :  { %v1318_v12 = vadd.f32 %v2018_v33, %v2826_v53  ;;  %v1412_v35 = vadd.f32 %v2079_v4, %v1315_v9 }
 0x166   :  { %v2019_v46 = vpop.f32.mrb[56].mxu0  ;;  %v1415_v13 = vadd.f32 %v2082_v11, %v1318_v12 }
 0x167   :  { %v2083_v15 = vpop.f32.mrb[56].mxu1  ;;  %v2020_v17 = vpop.f32.mrb[57].mxu0 }
 0x168   :  { %v2021_v48 = vadd.f32 %v2020_v17, %v2019_v46  ;;  %v2084_v20 = vpop.f32.mrb[57].mxu1  ;;  %v2022_v22 = vpop.f32.mrb[58].mxu0 }
 0x169   :  { %v2085_v23 = vadd.f32 %v2084_v20, %v2083_v15  ;;  %v2086_v25 = vpop.f32.mrb[58].mxu1  ;;  %v2023_v27 = vpop.f32.mrb[59].mxu0 }
 0x16a   :  { %v1323_v28 = vadd.f32 %v2021_v48, %v2829_v5  ;;  %v2024_v29 = vadd.f32 %v2023_v27, %v2022_v22  ;;  %v2087_v51 = vpop.f32.mrb[59].mxu1 }
 0x16b   :  { %v2088_v31 = vadd.f32 %v2087_v51, %v2086_v25 }
 0x16c   :  { %v1326_v34 = vadd.f32 %v2024_v29, %v2832_v7  ;;  %v1420_v62 = vadd.f32 %v2085_v23, %v1323_v28 }
 0x16e   :  { %v2025_v53 = vpop.f32.mrb[60].mxu0  ;;  %v1423_v36 = vadd.f32 %v2088_v31, %v1326_v34 }
 0x16f   :  { %v2089_v37 = vpop.f32.mrb[60].mxu1  ;;  %v2026_v38 = vpop.f32.mrb[61].mxu0 }
 0x170   :  { %v2027_v0 = vadd.f32 %v2026_v38, %v2025_v53  ;;  %v2090_v40 = vpop.f32.mrb[61].mxu1  ;;  %v2028_v42 = vpop.f32.mrb[62].mxu0 }
 0x171   :  { %v2091_v43 = vadd.f32 %v2090_v40, %v2089_v37  ;;  %v2092_v44 = vpop.f32.mrb[62].mxu1  ;;  %v2029_v18 = vpop.f32.mrb[63].mxu0 }
 0x172   :  { %v1331_v49 = vadd.f32 %v2027_v0, %v2835_v24  ;;  %v2030_v50 = vadd.f32 %v2029_v18, %v2028_v42  ;;  %v2093_v5 = vpop.f32.mrb[63].mxu1 }
 0x173   :  { %v2094_v52 = vadd.f32 %v2093_v5, %v2092_v44 }
 0x174   :  { %v1334_v54 = vadd.f32 %v2030_v50, %v2838_v26  ;;  %v1428_v14 = vadd.f32 %v2091_v43, %v1331_v49 }
 0x176   :  { %v2129_v7 = vpop.f32.mrb[64].mxu0  ;;  %v1431_v55 = vadd.f32 %v2094_v52, %v1334_v54 }
 0x177   :  { %v1477_v56 = vadd.f32 %v2129_v7, %v2848_v63  ;;  %v2137_v57 = vpop.f32.mrb[64].mxu1  ;;  %v1468_v16 = vpop.f32.mrb[65].mxu0 }
 0x178   :  { %v1509_v30 = vadd.f32 %v2137_v57, %v1412_v35  ;;  %v1469_v60 = vadd.f32 %v1468_v16, %v2842_v45  ;;  %v1500_v61 = vpop.f32.mrb[65].mxu1  ;;  %v2130_v32 = vpop.f32.mrb[66].mxu0 }
 0x179   :  { %v1501_v1 = vadd.f32 %v1500_v61, %v1404_v58  ;;  %v1480_v24 = vadd.f32 %v2130_v32, %v2850_v2  ;;  %v2138_v3 = vpop.f32.mrb[66].mxu1  ;;  %v1471_v4 = vpop.f32.mrb[67].mxu0 }
 0x17a   :  { %v1512_v6 = vadd.f32 %v2138_v3, %v1415_v13  ;;  %v1472_v26 = vadd.f32 %v1471_v4, %v2844_v47  ;;  %v1503_v8 = vpop.f32.mrb[67].mxu1 }
 0x17b   :  { %v1800_v9 = vpack.c.bf16 %v1480_v24, %v1477_v56  ;;  %v1504_v33 = vadd.f32 %v1503_v8, %v2866_v59 }
 0x17c   :  { %v1820_v63 = vpack.c.bf16 %v1512_v6, %v1509_v30  ;;  %v1795_v10 = vpack.c.bf16 %v1472_v26, %v1469_v60 }
 0x17d   :  { %1832 = vst [vmem:[%s2910_s3 + $0x8] sm:$0xff] %v1800_v9   ;;  %v1815_v45 = vpack.c.bf16 %v1504_v33, %v1501_v1 }
 0x17e   :  { %1836 = vst [vmem:[%s2910_s3 + $0x28] sm:$0xff] %v1820_v63   ;;  %1796 = vst [vmem:[%s2910_s3] sm:$0xff] %v1795_v10   ;;  %v2133_v47 = vpop.f32.mrb[68].mxu0 }
 0x17f   :  { %1835 = vst [vmem:[%s2910_s3 + $0x20] sm:$0xff] %v1815_v45   ;;  %v1493_v2 = vadd.f32 %v2133_v47, %v2860_v39  ;;  %v2141_v58 = vpop.f32.mrb[68].mxu1  ;;  %v1484_v59 = vpop.f32.mrb[69].mxu0 }
 0x180   :  { %v1525_v11 = vadd.f32 %v2141_v58, %v1428_v14  ;;  %v1485_v12 = vadd.f32 %v1484_v59, %v2854_v19  ;;  %v1516_v35 = vpop.f32.mrb[69].mxu1  ;;  %v2134_v46 = vpop.f32.mrb[70].mxu0 }
 0x181   :  { %v1517_v13 = vadd.f32 %v1516_v35, %v1420_v62  ;;  %v1496_v15 = vadd.f32 %v2134_v46, %v2862_v41  ;;  %v2142_v17 = vpop.f32.mrb[70].mxu1  ;;  %v1487_v48 = vpop.f32.mrb[71].mxu0 }
 0x182   :  { %v1528_v20 = vadd.f32 %v2142_v17, %v1431_v55  ;;  %v1488_v22 = vadd.f32 %v1487_v48, %v2856_v21  ;;  %v1519_v23 = vpop.f32.mrb[71].mxu1 }
 0x183   :  { %v1810_v25 = vpack.c.bf16 %v1496_v15, %v1493_v2  ;;  %v1520_v27 = vadd.f32 %v1519_v23, %v1423_v36 }
 0x184   :  { %v1830_v28 = vpack.c.bf16 %v1528_v20, %v1525_v11  ;;  %v1805_v39 = vpack.c.bf16 %v1488_v22, %v1485_v12 }
 0x185   :  { %1834 = vst [vmem:[%s2910_s3 + $0x18] sm:$0xff] %v1810_v25   ;;  %v1825_v19 = vpack.c.bf16 %v1520_v27, %v1517_v13 }
 0x186   :  { %1838 = vst [vmem:[%s2910_s3 + $0x38] sm:$0xff] %v1830_v28   ;;  %1833 = vst [vmem:[%s2910_s3 + $0x10] sm:$0xff] %v1805_v39  }
 0x187   :  { %1837 = vst [vmem:[%s2910_s3 + $0x30] sm:$0xff] %v1825_v19  }

// kernel: closed_call.54
= control target key start
LH: loop header
LB: loop body
LE: loop exit
PB: predicated region body
PF: predicated region fallthrough
CT: control target
= control target key end

     0   :  { %v47_v23 = vlaneseq  ;;  %s845_s1 = inlined_call_operand.vmem [shape: bf16[512,128], index: 1, kind: input, shape index: {}]   ;;  %s846_s0 = inlined_call_operand.vmem [shape: bf16[32,512], index: 0, kind: input, shape index: {}]   ;;  %s847_s2 = inlined_call_operand.vmem [shape: f32[1,512], index: 2, kind: input, shape index: {}]   ;;  %s848_s3 = inlined_call_operand.vmem [shape: f32[1,512], index: 3, kind: input, shape index: {}]   ;;  %s849_s4 = inlined_call_operand.vmem [shape: f32[1,128], index: 4, kind: input, shape index: {}]   ;;  %s850_s5 = inlined_call_operand.vmem [shape: bf16[32,128], index: 5, kind: output, shape index: {}]  }
   0x1   :  { %v642_v0 = vld [vmem:[%s845_s1 + $0x40] sm:$0xff]   ;;  %v646_v4 = vld [vmem:[%s845_s1 + $0x48] sm:$0xff]   ;;  %v650_v8 = vld [vmem:[%s845_s1 + $0x50] sm:$0xff]  }
   0x2   :  { %v643_v1 = vld [vmem:[%s845_s1 + $0xc0] sm:$0xff]   ;;  %586 = vmatprep.subr.bf16.mxu0 %v642_v0  ;;  %v647_v5 = vld [vmem:[%s845_s1 + $0xc8] sm:$0xff]   ;;  %v651_v9 = vld [vmem:[%s845_s1 + $0xd0] sm:$0xff]   ;;  %v48_v28 = vshrl.u32 %v47_v23, 7 }
   0x3   :  { %v644_v2 = vld [vmem:[%s845_s1] sm:$0xff]   ;;  %614 = vmatprep.subr.bf16.mxu1 %v643_v1  ;;  %v648_v6 = vld [vmem:[%s845_s1 + $0x8] sm:$0xff]   ;;  %v652_v10 = vld [vmem:[%s845_s1 + $0x10] sm:$0xff]  }
   0x4   :  { %v645_v3 = vld [vmem:[%s845_s1 + $0x80] sm:$0xff]   ;;  %587 = vmatpush3.bf16.msra.mxu0 %v644_v2  ;;  %v649_v7 = vld [vmem:[%s845_s1 + $0x88] sm:$0xff]   ;;  %v653_v11 = vld [vmem:[%s845_s1 + $0x90] sm:$0xff]   ;;  %v53_v33 = vsub.s32 1, %v48_v28  ;;  %v61_v35 = vsub.s32 3, %v48_v28  ;;  %v49_v39 = vsub.s32 0, %v48_v28 }
   0x5   :  { %615 = vmatpush3.bf16.msra.mxu1 %v645_v3  ;;  %588 = vmatprep.subr.bf16.mxu0 %v646_v4  ;;  %v654_v12 = vld [vmem:[%s845_s1 + $0x58] sm:$0xff]   ;;  %v658_v16 = vld [vmem:[%s845_s1 + $0x60] sm:$0xff]   ;;  %v662_v20 = vld [vmem:[%s845_s1 + $0x68] sm:$0xff]   ;;  %v57_v40 = vsub.s32 2, %v48_v28 }
   0x6   :  { %616 = vmatprep.subr.bf16.mxu1 %v647_v5  ;;  %v655_v13 = vld [vmem:[%s845_s1 + $0xd8] sm:$0xff]   ;;  %v659_v17 = vld [vmem:[%s845_s1 + $0xe0] sm:$0xff]   ;;  %v663_v21 = vld [vmem:[%s845_s1 + $0xe8] sm:$0xff]  }
   0x7   :  { %v656_v14 = vld [vmem:[%s845_s1 + $0x18] sm:$0xff]   ;;  %v660_v18 = vld [vmem:[%s845_s1 + $0x20] sm:$0xff]   ;;  %v664_v22 = vld [vmem:[%s845_s1 + $0x28] sm:$0xff]  }
   0x8   :  { %589 = vmatpush3.bf16.msra.mxu0 %v648_v6  ;;  %v657_v15 = vld [vmem:[%s845_s1 + $0x98] sm:$0xff]   ;;  %v661_v19 = vld [vmem:[%s845_s1 + $0xa0] sm:$0xff]   ;;  %v665_v24 = vld [vmem:[%s845_s1 + $0xa8] sm:$0xff]  }
   0x9   :  { %617 = vmatpush3.bf16.msra.mxu1 %v649_v7  ;;  %590 = vmatprep.subr.bf16.mxu0 %v650_v8  ;;  %v666_v25 = vld [vmem:[%s845_s1 + $0x70] sm:$0xff]   ;;  %v670_v30 = vld [vmem:[%s845_s1 + $0x78] sm:$0xff]   ;;  %v21_v36 = vld [vmem:[%s846_s0] sm:$0xff] }
   0xa   :  { %618 = vmatprep.subr.bf16.mxu1 %v651_v9  ;;  %v667_v26 = vld [vmem:[%s845_s1 + $0xf0] sm:$0xff]   ;;  %v671_v31 = vld [vmem:[%s845_s1 + $0xf8] sm:$0xff]   ;;  %v45_v38 = vld [vmem:[%s847_s2] sm:$0xf]  ;;  %v29_v41 = vunpack.c.l.bf16 %v21_v36  ;;  %v30_v42 = vunpack.c.h.bf16 %v21_v36 }
   0xb   :  { %v668_v27 = vld [vmem:[%s845_s1 + $0x30] sm:$0xff]   ;;  %v672_v32 = vld [vmem:[%s845_s1 + $0x38] sm:$0xff]   ;;  %v83_v45 = vld [vmem:[%s848_s3] sm:$0xf]  ;;  %v54_v48 = vrot.slane %v45_v38, %v53_v33  ;;  %v62_v54 = vrot.slane %v45_v38, %v61_v35  ;;  %v50_v58 = vrot.slane %v45_v38, %v49_v39  ;;  %v58_v62 = vrot.slane %v45_v38, %v57_v40 }
   0xc   :  { %591 = vmatpush3.bf16.msra.mxu0 %v652_v10  ;;  %v669_v29 = vld [vmem:[%s845_s1 + $0xb0] sm:$0xff]   ;;  %v673_v34 = vld [vmem:[%s845_s1 + $0xb8] sm:$0xff]   ;;  %v22_v46 = vld [vmem:[%s846_s0 + $0x8] sm:$0xff]  ;;  %v92_v49 = vrot.slane %v83_v45, %v53_v33  ;;  %v100_v55 = vrot.slane %v83_v45, %v61_v35  ;;  %v88_v59 = vrot.slane %v83_v45, %v49_v39  ;;  %v818_v63 = vrot.slane %v83_v45, %v57_v40 }
   0xd   :  { %619 = vmatpush3.bf16.msra.mxu1 %v653_v11  ;;  %592 = vmatprep.subr.bf16.mxu0 %v654_v12  ;;  %v23_v37 = vld [vmem:[%s846_s0 + $0x10] sm:$0xff]  ;;  %v24_v47 = vld [vmem:[%s846_s0 + $0x18] sm:$0xff]  ;;  %v31_v50 = vunpack.c.l.bf16 %v22_v46  ;;  %v32_v51 = vunpack.c.h.bf16 %v22_v46  ;;  %v68_v56 = vmul.f32 %v54_v48, %v30_v42  ;;  %v67_v2 = vmul.f32 %v50_v58, %v29_v41  ;;  %v25_v8 = vld [vmem:[%s846_s0 + $0x20] sm:$0xff] }
   0xe   :  { %620 = vmatprep.subr.bf16.mxu1 %v655_v13  ;;  %v33_v43 = vunpack.c.l.bf16 %v23_v37  ;;  %v34_v44 = vunpack.c.h.bf16 %v23_v37  ;;  %v35_v52 = vunpack.c.l.bf16 %v24_v47  ;;  %v36_v53 = vunpack.c.h.bf16 %v24_v47  ;;  %v27_v13 = vld [vmem:[%s846_s0 + $0x30] sm:$0xff] }
   0xf   :  { %v70_v60 = vmul.f32 %v62_v54, %v32_v51  ;;  %v106_v0 = vadd.f32 %v92_v49, %v68_v56  ;;  %v69_v6 = vmul.f32 %v58_v62, %v31_v50  ;;  %v105_v11 = vadd.f32 %v88_v59, %v67_v2 }
  0x10   :  { %593 = vmatpush3.bf16.msra.mxu0 %v656_v14  ;;  %v72_v57 = vmul.f32 %v54_v48, %v34_v44  ;;  %v74_v61 = vmul.f32 %v62_v54, %v36_v53  ;;  %v71_v3 = vmul.f32 %v50_v58, %v33_v43  ;;  %v73_v7 = vmul.f32 %v58_v62, %v35_v52 }
  0x11   :  { %621 = vmatpush3.bf16.msra.mxu1 %v657_v15  ;;  %594 = vmatprep.subr.bf16.mxu0 %v658_v16  ;;  %v108_v4 = vadd.f32 %v100_v55, %v70_v60  ;;  %v122_v9 = vmax.f32 %v106_v0, 0.0  ;;  %v107_v16 = vadd.f32 %v818_v63, %v69_v6  ;;  %v38_v23 = vunpack.c.h.bf16 %v25_v8 }
  0x12   :  { %622 = vmatprep.subr.bf16.mxu1 %v659_v17  ;;  %v110_v1 = vadd.f32 %v92_v49, %v72_v57  ;;  %v112_v5 = vadd.f32 %v100_v55, %v74_v61  ;;  %v109_v12 = vadd.f32 %v88_v59, %v71_v3  ;;  %v111_v17 = vadd.f32 %v818_v63, %v73_v7  ;;  %v534_v3 = vld [vmem:[%s849_s4] ss:$0 sm:$0xff] }
  0x13   :  { %v124_v14 = vmax.f32 %v108_v4, 0.0  ;;  %v41_v35 = vunpack.c.l.bf16 %v27_v13 }
  0x14   :  { %595 = vmatpush3.bf16.msra.mxu0 %v660_v18  ;;  %v126_v10 = vmax.f32 %v110_v1, 0.0  ;;  %v128_v15 = vmax.f32 %v112_v5, 0.0  ;;  %v26_v18 = vld [vmem:[%s846_s0 + $0x28] sm:$0xff] }
  0x15   :  { %623 = vmatpush3.bf16.msra.mxu1 %v661_v19  ;;  %596 = vmatprep.subr.bf16.mxu0 %v662_v20  ;;  %v28_v19 = vld [vmem:[%s846_s0 + $0x38] sm:$0xff]  ;;  %v39_v39 = vunpack.c.l.bf16 %v26_v18  ;;  %v79_v42 = vmul.f32 %v50_v58, %v41_v35 }
  0x16   :  { %624 = vmatprep.subr.bf16.mxu1 %v663_v21  ;;  %v138_v20 = vpack.c.bf16 %v126_v10, %v122_v9  ;;  %v121_v21 = vmax.f32 %v105_v11, 0.0  ;;  %v43_v43 = vunpack.c.l.bf16 %v28_v19 }
  0x17   :  { %v77_v47 = vmul.f32 %v58_v62, %v39_v39  ;;  %v117_v52 = vadd.f32 %v88_v59, %v79_v42 }
  0x18   :  { %597 = vmatpush3.bf16.msra.mxu0 %v664_v22  ;;  %v125_v22 = vmax.f32 %v109_v12, 0.0  ;;  %440 = vmatprep.mubr.bf16.mxu0 %v138_v20 }
  0x19   :  { %625 = vmatpush3.bf16.msra.mxu1 %v665_v24  ;;  %598 = vmatprep.subr.bf16.mxu0 %v666_v25  ;;  %v140_v24 = vpack.c.bf16 %v128_v15, %v124_v14  ;;  %v123_v25 = vmax.f32 %v107_v16, 0.0  ;;  %v115_v57 = vadd.f32 %v818_v63, %v77_v47  ;;  %v133_v61 = vmax.f32 %v117_v52, 0.0 }
  0x1a   :  { %626 = vmatprep.subr.bf16.mxu1 %v667_v26  ;;  %v127_v26 = vmax.f32 %v111_v17, 0.0  ;;  %v137_v28 = vpack.c.bf16 %v125_v22, %v121_v21 }
  0x1b   :  { %489 = vmatprep.mubr.bf16.mxu1 %v140_v24 }
  0x1c   :  { %599 = vmatpush3.bf16.msra.mxu0 %v668_v27  ;;  %v42_v27 = vunpack.c.h.bf16 %v27_v13 }
  0x1d   :  { %627 = vmatpush3.bf16.msra.mxu1 %v669_v29  ;;  %600 = vmatprep.subr.bf16.mxu0 %v670_v30  ;;  %v76_v29 = vmul.f32 %v54_v48, %v38_v23  ;;  %v40_v30 = vunpack.c.h.bf16 %v26_v18 }
  0x1e   :  { %628 = vmatprep.subr.bf16.mxu1 %v671_v31  ;;  %v44_v31 = vunpack.c.h.bf16 %v28_v19  ;;  %v80_v33 = vmul.f32 %v54_v48, %v42_v27  ;;  %v81_v48 = vmul.f32 %v58_v62, %v43_v43 }
  0x1f   :  { %v114_v36 = vadd.f32 %v92_v49, %v76_v29  ;;  %v78_v37 = vmul.f32 %v62_v54, %v40_v30 }
  0x20   :  { %601 = vmatpush3.bf16.msra.mxu0 %v672_v32  ;;  %v139_v32 = vpack.c.bf16 %v127_v26, %v123_v25  ;;  %v82_v38 = vmul.f32 %v62_v54, %v44_v31  ;;  %v118_v40 = vadd.f32 %v92_v49, %v80_v33  ;;  %v119_v49 = vadd.f32 %v818_v63, %v81_v48 }
  0x21   :  { %629 = vmatpush3.bf16.msra.mxu1 %v673_v34  ;;  %v37_v34 = vunpack.c.l.bf16 %v25_v8  ;;  %v130_v44 = vmax.f32 %v114_v36, 0.0  ;;  %v116_v45 = vadd.f32 %v100_v55, %v78_v37 }
  0x22   :  { %v120_v46 = vadd.f32 %v100_v55, %v82_v38  ;;  %v134_v50 = vmax.f32 %v118_v40, 0.0  ;;  %v135_v2 = vmax.f32 %v119_v49, 0.0 }
  0x23   :  { %441 = vmatmul.mubr.bf16.vlgmr.msra.gmra.mrb[0].mxu0 %v137_v28  ;;  %v75_v41 = vmul.f32 %v50_v58, %v37_v34  ;;  %v132_v53 = vmax.f32 %v116_v45, 0.0  ;;  %v131_v58 = vmax.f32 %v115_v57, 0.0 }
  0x24   :  { %490 = vmatmul.mubr.bf16.vlgmr.msra.gmra.mrb[0].mxu1 %v139_v32  ;;  %v136_v56 = vmax.f32 %v120_v46, 0.0  ;;  %v142_v60 = vpack.c.bf16 %v134_v50, %v130_v44 }
  0x25   :  { %v113_v51 = vadd.f32 %v88_v59, %v75_v41  ;;  %v143_v55 = vpack.c.bf16 %v135_v2, %v131_v58 }
  0x26   :  { %v144_v0 = vpack.c.bf16 %v136_v56, %v132_v53  ;;  %448 = vmatprep.mubr.bf16.mxu0 %v142_v60 }
  0x27   :  { %v129_v54 = vmax.f32 %v113_v51, 0.0 }
  0x28   :  { %497 = vmatprep.mubr.bf16.mxu1 %v144_v0 }
  0x29   :  { %v141_v1 = vpack.c.bf16 %v133_v61, %v129_v54 }
  0x2b   :  { %449 = vmatmul.mubr.bf16.gmra.mrb[4].mxu0 %v141_v1 }
  0x2c   :  { %498 = vmatmul.mubr.bf16.gmra.mrb[4].mxu1 %v143_v55 }
  0xf6   :  { %v602_v59 = vpop.f32.mrb[0].mxu0 }
  0xf7   :  { %v630_v62 = vpop.f32.mrb[0].mxu1  ;;  %v603_v4 = vpop.f32.mrb[1].mxu0 }
  0xf8   :  { %v604_v5 = vadd.f32 %v603_v4, %v602_v59  ;;  %v631_v6 = vpop.f32.mrb[1].mxu1  ;;  %v605_v7 = vpop.f32.mrb[2].mxu0 }
  0xf9   :  { %v632_v63 = vadd.f32 %v631_v6, %v630_v62  ;;  %v633_v8 = vpop.f32.mrb[2].mxu1  ;;  %v606_v9 = vpop.f32.mrb[3].mxu0 }
  0xfa   :  { %v443_v10 = vadd.f32 %v604_v5, %v534_v3  ;;  %v607_v11 = vadd.f32 %v606_v9, %v605_v7  ;;  %v634_v12 = vpop.f32.mrb[3].mxu1 }
  0xfb   :  { %v635_v13 = vadd.f32 %v634_v12, %v633_v8 }
  0xfc   :  { %v492_v14 = vadd.f32 %v632_v63, %v443_v10  ;;  %v446_v15 = vadd.f32 %v607_v11, %v534_v3 }
  0xfe   :  { %v495_v16 = vadd.f32 %v635_v13, %v446_v15  ;;  %v608_v17 = vpop.f32.mrb[4].mxu0  ;;  %v506_v18 = vmax.f32 %v492_v14, 0.0 }
  0xff   :  { %v609_v20 = vpop.f32.mrb[5].mxu0  ;;  %v636_v21 = vpop.f32.mrb[4].mxu1 }
 0x100   :  { %v507_v19 = vmax.f32 %v495_v16, 0.0  ;;  %v610_v22 = vadd.f32 %v609_v20, %v608_v17  ;;  %v611_v23 = vpop.f32.mrb[6].mxu0  ;;  %v637_v25 = vpop.f32.mrb[5].mxu1 }
 0x101   :  { %v612_v26 = vpop.f32.mrb[7].mxu0  ;;  %v638_v28 = vadd.f32 %v637_v25, %v636_v21  ;;  %v639_v29 = vpop.f32.mrb[6].mxu1 }
 0x102   :  { %v578_v24 = vpack.c.bf16 %v507_v19, %v506_v18  ;;  %v451_v27 = vadd.f32 %v610_v22, %v534_v3  ;;  %v613_v30 = vadd.f32 %v612_v26, %v611_v23  ;;  %v640_v31 = vpop.f32.mrb[7].mxu1 }
 0x103   :  { %v641_v34 = vadd.f32 %v640_v31, %v639_v29 }
 0x104   :  { %579 = vst [vmem:[%s850_s5] sm:$0xff] %v578_v24   ;;  %v500_v32 = vadd.f32 %v638_v28, %v451_v27  ;;  %v454_v33 = vadd.f32 %v613_v30, %v534_v3 }
 0x106   :  { %v503_v35 = vadd.f32 %v641_v34, %v454_v33  ;;  %v508_v36 = vmax.f32 %v500_v32, 0.0 }
 0x108   :  { %v509_v37 = vmax.f32 %v503_v35, 0.0 }
 0x10a   :  { %v583_v38 = vpack.c.bf16 %v509_v37, %v508_v36 }
 0x10c   :  { %585 = vst [vmem:[%s850_s5 + $0x8] sm:$0xff] %v583_v38  }

// kernel: feature_tunk_push.10
= control target key start
LH: loop header
LB: loop body
LE: loop exit
PB: predicated region body
PF: predicated region fallthrough
CT: control target
= control target key end

     0   :  { %v46_v37 = vlaneseq  ;;  %s1195_s1 = inlined_call_operand.vmem [shape: bf16[512,256], index: 1, kind: input, shape index: {}]   ;;  %s1196_s0 = inlined_call_operand.vmem [shape: bf16[32,512], index: 0, kind: input, shape index: {}]   ;;  %s1197_s2 = inlined_call_operand.vmem [shape: f32[1,512], index: 2, kind: input, shape index: {}]   ;;  %s1198_s3 = inlined_call_operand.vmem [shape: f32[1,512], index: 3, kind: input, shape index: {}]   ;;  %s1199_s4 = inlined_call_operand.vmem [shape: f32[1,256], index: 4, kind: input, shape index: {}]   ;;  %s1200_s5 = inlined_call_operand.vmem [shape: bf16[32,256], index: 5, kind: output, shape index: {}]  }
   0x1   :  { %v766_v0 = vld [vmem:[%s1195_s1 + $0x4] ss:$8 sps:$4 sm:$0xff]   ;;  %v770_v2 = vld [vmem:[%s1195_s1] ss:$8 sps:$4 sm:$0xff]   ;;  %v772_v4 = vld [vmem:[%s1195_s1 + $0x14] ss:$8 sps:$4 sm:$0xff]  }
   0x2   :  { %v768_v1 = vld [vmem:[%s1195_s1 + $0x104] ss:$8 sps:$4 sm:$0xff]   ;;  %540 = vmatprep.subr.bf16.mxu1 %v766_v0  ;;  %v771_v3 = vld [vmem:[%s1195_s1 + $0x100] ss:$8 sps:$4 sm:$0xff]   ;;  %v774_v5 = vld [vmem:[%s1195_s1 + $0x114] ss:$8 sps:$4 sm:$0xff]  }
   0x3   :  { %593 = vmatprep.subr.bf16.mxu0 %v768_v1  ;;  %541 = vmatpush1.bf16.msra.mxu1 %v770_v2  ;;  %v776_v6 = vld [vmem:[%s1195_s1 + $0x10] ss:$8 sps:$4 sm:$0xff]   ;;  %v778_v8 = vld [vmem:[%s1195_s1 + $0x24] ss:$8 sps:$4 sm:$0xff]   ;;  %v782_v10 = vld [vmem:[%s1195_s1 + $0x20] ss:$8 sps:$4 sm:$0xff]  }
   0x4   :  { %594 = vmatpush1.bf16.msra.mxu0 %v771_v3  ;;  %542 = vmatprep.subr.bf16.mxu1 %v772_v4  ;;  %v777_v7 = vld [vmem:[%s1195_s1 + $0x110] ss:$8 sps:$4 sm:$0xff]   ;;  %v780_v9 = vld [vmem:[%s1195_s1 + $0x124] ss:$8 sps:$4 sm:$0xff]   ;;  %v783_v11 = vld [vmem:[%s1195_s1 + $0x120] ss:$8 sps:$4 sm:$0xff]  }
   0x5   :  { %595 = vmatprep.subr.bf16.mxu0 %v774_v5  ;;  %v784_v12 = vld [vmem:[%s1195_s1 + $0x34] ss:$8 sps:$4 sm:$0xff]   ;;  %v788_v14 = vld [vmem:[%s1195_s1 + $0x30] ss:$8 sps:$4 sm:$0xff]   ;;  %v790_v16 = vld [vmem:[%s1195_s1 + $0x44] ss:$8 sps:$4 sm:$0xff]  }
   0x6   :  { %v786_v13 = vld [vmem:[%s1195_s1 + $0x134] ss:$8 sps:$4 sm:$0xff]   ;;  %v789_v15 = vld [vmem:[%s1195_s1 + $0x130] ss:$8 sps:$4 sm:$0xff]   ;;  %v792_v17 = vld [vmem:[%s1195_s1 + $0x144] ss:$8 sps:$4 sm:$0xff]  }
   0x7   :  { %543 = vmatpush1.bf16.msra.mxu1 %v776_v6  ;;  %v794_v18 = vld [vmem:[%s1195_s1 + $0x40] ss:$8 sps:$4 sm:$0xff]   ;;  %v796_v20 = vld [vmem:[%s1195_s1 + $0x54] ss:$8 sps:$4 sm:$0xff]   ;;  %v800_v22 = vld [vmem:[%s1195_s1 + $0x50] ss:$8 sps:$4 sm:$0xff]  }
   0x8   :  { %596 = vmatpush1.bf16.msra.mxu0 %v777_v7  ;;  %544 = vmatprep.subr.bf16.mxu1 %v778_v8  ;;  %v795_v19 = vld [vmem:[%s1195_s1 + $0x140] ss:$8 sps:$4 sm:$0xff]   ;;  %v798_v21 = vld [vmem:[%s1195_s1 + $0x154] ss:$8 sps:$4 sm:$0xff]   ;;  %v801_v23 = vld [vmem:[%s1195_s1 + $0x150] ss:$8 sps:$4 sm:$0xff]  }
   0x9   :  { %597 = vmatprep.subr.bf16.mxu0 %v780_v9  ;;  %v802_v24 = vld [vmem:[%s1195_s1 + $0x64] ss:$8 sps:$4 sm:$0xff]   ;;  %v806_v26 = vld [vmem:[%s1195_s1 + $0x60] ss:$8 sps:$4 sm:$0xff]   ;;  %v808_v28 = vld [vmem:[%s1195_s1 + $0x74] ss:$8 sps:$4 sm:$0xff]  }
   0xa   :  { %v804_v25 = vld [vmem:[%s1195_s1 + $0x164] ss:$8 sps:$4 sm:$0xff]   ;;  %v807_v27 = vld [vmem:[%s1195_s1 + $0x160] ss:$8 sps:$4 sm:$0xff]   ;;  %v810_v29 = vld [vmem:[%s1195_s1 + $0x174] ss:$8 sps:$4 sm:$0xff]  }
   0xb   :  { %545 = vmatpush1.bf16.msra.mxu1 %v782_v10  ;;  %v812_v30 = vld [vmem:[%s1195_s1 + $0x70] ss:$8 sps:$4 sm:$0xff]   ;;  %v814_v32 = vld [vmem:[%s1195_s1 + $0x84] ss:$8 sps:$4 sm:$0xff]   ;;  %v818_v34 = vld [vmem:[%s1195_s1 + $0x80] ss:$8 sps:$4 sm:$0xff]  }
   0xc   :  { %598 = vmatpush1.bf16.msra.mxu0 %v783_v11  ;;  %546 = vmatprep.subr.bf16.mxu1 %v784_v12  ;;  %v813_v31 = vld [vmem:[%s1195_s1 + $0x170] ss:$8 sps:$4 sm:$0xff]   ;;  %v816_v33 = vld [vmem:[%s1195_s1 + $0x184] ss:$8 sps:$4 sm:$0xff]   ;;  %v819_v35 = vld [vmem:[%s1195_s1 + $0x180] ss:$8 sps:$4 sm:$0xff]  }
   0xd   :  { %599 = vmatprep.subr.bf16.mxu0 %v786_v13  ;;  %v820_v36 = vld [vmem:[%s1195_s1 + $0x94] ss:$8 sps:$4 sm:$0xff]   ;;  %v824_v39 = vld [vmem:[%s1195_s1 + $0x90] ss:$8 sps:$4 sm:$0xff]   ;;  %v826_v41 = vld [vmem:[%s1195_s1 + $0xa4] ss:$8 sps:$4 sm:$0xff]  }
   0xe   :  { %v822_v38 = vld [vmem:[%s1195_s1 + $0x194] ss:$8 sps:$4 sm:$0xff]   ;;  %v825_v40 = vld [vmem:[%s1195_s1 + $0x190] ss:$8 sps:$4 sm:$0xff]   ;;  %v47_v42 = vshrl.u32 %v46_v37, 7  ;;  %v20_v50 = vld [vmem:[%s1196_s0] sm:$0xff] }
   0xf   :  { %547 = vmatpush1.bf16.msra.mxu1 %v788_v14  ;;  %v828_v43 = vld [vmem:[%s1195_s1 + $0x1a4] ss:$8 sps:$4 sm:$0xff]   ;;  %v830_v44 = vld [vmem:[%s1195_s1 + $0xa0] ss:$8 sps:$4 sm:$0xff]   ;;  %v832_v46 = vld [vmem:[%s1195_s1 + $0xb4] ss:$8 sps:$4 sm:$0xff]   ;;  %v28_v54 = vunpack.c.l.bf16 %v20_v50  ;;  %v29_v55 = vunpack.c.h.bf16 %v20_v50 }
  0x10   :  { %600 = vmatpush1.bf16.msra.mxu0 %v789_v15  ;;  %548 = vmatprep.subr.bf16.mxu1 %v790_v16  ;;  %v831_v45 = vld [vmem:[%s1195_s1 + $0x1a0] ss:$8 sps:$4 sm:$0xff]   ;;  %v1027_v47 = vsub.s32 1, %v47_v42  ;;  %v834_v48 = vld [vmem:[%s1195_s1 + $0x1b4] ss:$8 sps:$4 sm:$0xff]   ;;  %v60_v51 = vsub.s32 3, %v47_v42 }
  0x11   :  { %601 = vmatprep.subr.bf16.mxu0 %v792_v17  ;;  %v836_v49 = vld [vmem:[%s1195_s1 + $0xb0] ss:$8 sps:$4 sm:$0xff]   ;;  %v1038_v52 = vsub.s32 0, %v47_v42  ;;  %v44_v56 = vld [vmem:[%s1197_s2] sm:$0xf]  ;;  %v56_v58 = vsub.s32 2, %v47_v42 }
  0x12   :  { %v22_v53 = vld [vmem:[%s1196_s0 + $0x10] sm:$0xff]  ;;  %v82_v57 = vld [vmem:[%s1198_s3] sm:$0xf]  ;;  %v1053_v62 = vrot.slane %v44_v56, %v1027_v47  ;;  %v21_v0 = vld [vmem:[%s1196_s0 + $0x8] sm:$0xff]  ;;  %v1077_v11 = vrot.slane %v44_v56, %v60_v51 }
  0x13   :  { %549 = vmatpush1.bf16.msra.mxu1 %v794_v18  ;;  %v837_v59 = vld [vmem:[%s1195_s1 + $0x1b0] ss:$8 sps:$4 sm:$0xff]   ;;  %v32_v60 = vunpack.c.l.bf16 %v22_v53  ;;  %v33_v61 = vunpack.c.h.bf16 %v22_v53  ;;  %v1056_v63 = vrot.slane %v82_v57, %v1027_v47  ;;  %v838_v2 = vld [vmem:[%s1195_s1 + $0xc4] ss:$8 sps:$4 sm:$0xff]   ;;  %v30_v4 = vunpack.c.l.bf16 %v21_v0  ;;  %v842_v18 = vld [vmem:[%s1195_s1 + $0xc0] ss:$8 sps:$4 sm:$0xff]  }
  0x14   :  { %602 = vmatpush1.bf16.msra.mxu0 %v795_v19  ;;  %550 = vmatprep.subr.bf16.mxu1 %v796_v20  ;;  %v23_v1 = vld [vmem:[%s1196_s0 + $0x18] sm:$0xff]  ;;  %v840_v3 = vld [vmem:[%s1195_s1 + $0x1c4] ss:$8 sps:$4 sm:$0xff]   ;;  %v31_v5 = vunpack.c.h.bf16 %v21_v0  ;;  %v67_v9 = vmul.f32 %v1053_v62, %v29_v55  ;;  %v1079_v12 = vrot.slane %v82_v57, %v60_v51  ;;  %v1084_v13 = vld [vmem:[%s1196_s0 + $0x30] sm:$0xff]  ;;  %v1087_v14 = vrot.slane %v44_v56, %v1038_v52 }
  0x15   :  { %603 = vmatprep.subr.bf16.mxu0 %v798_v21  ;;  %v34_v6 = vunpack.c.l.bf16 %v23_v1  ;;  %v35_v7 = vunpack.c.h.bf16 %v23_v1  ;;  %v1073_v8 = vld [vmem:[%s1196_s0 + $0x20] sm:$0xff]  ;;  %v71_v10 = vmul.f32 %v1053_v62, %v33_v61  ;;  %v1090_v15 = vrot.slane %v82_v57, %v1038_v52  ;;  %v25_v37 = vld [vmem:[%s1196_s0 + $0x28] sm:$0xff]  ;;  %v856_v0 = vld [vmem:[%s1195_s1 + $0xf4] ss:$8 sps:$4 sm:$0xff]  }
  0x16   :  { %v1092_v16 = vrot.slane %v44_v56, %v56_v58  ;;  %v1094_v17 = vrot.slane %v82_v57, %v56_v58  ;;  %v843_v19 = vld [vmem:[%s1195_s1 + $0x1c0] ss:$8 sps:$4 sm:$0xff]   ;;  %v105_v20 = vadd.f32 %v1056_v63, %v67_v9  ;;  %v39_v53 = vunpack.c.h.bf16 %v25_v37  ;;  %v858_v1 = vld [vmem:[%s1195_s1 + $0x1f4] ss:$8 sps:$4 sm:$0xff]   ;;  %v860_v9 = vld [vmem:[%s1195_s1 + $0xf0] ss:$8 sps:$4 sm:$0xff]  }
  0x17   :  { %551 = vmatpush1.bf16.msra.mxu1 %v800_v22  ;;  %v109_v21 = vadd.f32 %v1056_v63, %v71_v10  ;;  %v69_v22 = vmul.f32 %v1077_v11, %v31_v5  ;;  %v854_v57 = vld [vmem:[%s1195_s1 + $0xe0] ss:$8 sps:$4 sm:$0xff]  }
  0x18   :  { %604 = vmatpush1.bf16.msra.mxu0 %v801_v23  ;;  %552 = vmatprep.subr.bf16.mxu1 %v802_v24  ;;  %v37_v23 = vunpack.c.h.bf16 %v1073_v8  ;;  %v844_v24 = vld [vmem:[%s1195_s1 + $0xd4] ss:$8 sps:$4 sm:$0xff]   ;;  %v855_v58 = vld [vmem:[%s1195_s1 + $0x1e0] ss:$8 sps:$4 sm:$0xff]   ;;  %v77_v61 = vmul.f32 %v1077_v11, %v39_v53 }
  0x19   :  { %605 = vmatprep.subr.bf16.mxu0 %v804_v25  ;;  %v846_v25 = vld [vmem:[%s1195_s1 + $0x1d4] ss:$8 sps:$4 sm:$0xff]  }
  0x1a   :  { %v75_v42 = vmul.f32 %v1053_v62, %v37_v23 }
  0x1b   :  { %553 = vmatpush1.bf16.msra.mxu1 %v806_v26  ;;  %v73_v26 = vmul.f32 %v1077_v11, %v35_v7  ;;  %v115_v7 = vadd.f32 %v1079_v12, %v77_v61 }
  0x1c   :  { %606 = vmatpush1.bf16.msra.mxu0 %v807_v27  ;;  %554 = vmatprep.subr.bf16.mxu1 %v808_v28  ;;  %v66_v27 = vmul.f32 %v1087_v14, %v28_v54  ;;  %v70_v28 = vmul.f32 %v1087_v14, %v32_v60 }
  0x1d   :  { %607 = vmatprep.subr.bf16.mxu0 %v810_v29  ;;  %v41_v29 = vunpack.c.h.bf16 %v1084_v13 }
  0x1f   :  { %555 = vmatpush1.bf16.msra.mxu1 %v812_v30  ;;  %v121_v30 = vmax.f32 %v105_v20, 0.0  ;;  %v79_v51 = vmul.f32 %v1053_v62, %v41_v29  ;;  %v36_v62 = vunpack.c.l.bf16 %v1073_v8 }
  0x20   :  { %608 = vmatpush1.bf16.msra.mxu0 %v813_v31  ;;  %556 = vmatprep.subr.bf16.mxu1 %v814_v32  ;;  %v125_v31 = vmax.f32 %v109_v21, 0.0  ;;  %v107_v32 = vadd.f32 %v1079_v12, %v69_v22  ;;  %v131_v22 = vmax.f32 %v115_v7, 0.0 }
  0x21   :  { %609 = vmatprep.subr.bf16.mxu0 %v816_v33  ;;  %v68_v33 = vmul.f32 %v1092_v16, %v30_v4  ;;  %v117_v60 = vadd.f32 %v1056_v63, %v79_v51  ;;  %v40_v4 = vunpack.c.l.bf16 %v1084_v13  ;;  %v861_v13 = vld [vmem:[%s1195_s1 + $0x1f0] ss:$8 sps:$4 sm:$0xff]  }
  0x23   :  { %557 = vmatpush1.bf16.msra.mxu1 %v818_v34  ;;  %v111_v34 = vadd.f32 %v1079_v12, %v73_v26  ;;  %v133_v21 = vmax.f32 %v117_v60, 0.0 }
  0x24   :  { %610 = vmatpush1.bf16.msra.mxu0 %v819_v35  ;;  %558 = vmatprep.subr.bf16.mxu1 %v820_v36  ;;  %v104_v35 = vadd.f32 %v1090_v15, %v66_v27  ;;  %v72_v36 = vmul.f32 %v1092_v16, %v34_v6 }
  0x25   :  { %611 = vmatprep.subr.bf16.mxu0 %v822_v38  ;;  %v848_v38 = vld [vmem:[%s1195_s1 + $0xd0] ss:$8 sps:$4 sm:$0xff]  }
  0x26   :  { %v110_v50 = vadd.f32 %v1094_v17, %v72_v36  ;;  %v120_v55 = vmax.f32 %v104_v35, 0.0 }
  0x27   :  { %559 = vmatpush1.bf16.msra.mxu1 %v824_v39  ;;  %v849_v39 = vld [vmem:[%s1195_s1 + $0x1d0] ss:$8 sps:$4 sm:$0xff]  }
  0x28   :  { %612 = vmatpush1.bf16.msra.mxu0 %v825_v40  ;;  %560 = vmatprep.subr.bf16.mxu1 %v826_v41  ;;  %v137_v40 = vpack.c.bf16 %v125_v31, %v121_v30  ;;  %v123_v41 = vmax.f32 %v107_v32, 0.0  ;;  %v126_v6 = vmax.f32 %v110_v50, 0.0 }
  0x29   :  { %613 = vmatprep.subr.bf16.mxu0 %v828_v43  ;;  %v27_v43 = vld [vmem:[%s1196_s0 + $0x38] sm:$0xff] }
  0x2a   :  { %572 = vmatprep.mubr.bf16.mxu1 %v137_v40  ;;  %v43_v56 = vunpack.c.h.bf16 %v27_v43  ;;  %v42_v8 = vunpack.c.l.bf16 %v27_v43 }
  0x2b   :  { %561 = vmatpush1.bf16.msra.mxu1 %v830_v44  ;;  %v850_v44 = vld [vmem:[%s1195_s1 + $0xe4] ss:$8 sps:$4 sm:$0xff]  }
  0x2c   :  { %614 = vmatpush1.bf16.msra.mxu0 %v831_v45  ;;  %562 = vmatprep.subr.bf16.mxu1 %v832_v46  ;;  %v852_v45 = vld [vmem:[%s1195_s1 + $0x1e4] ss:$8 sps:$4 sm:$0xff]   ;;  %v127_v46 = vmax.f32 %v111_v34, 0.0  ;;  %v80_v23 = vmul.f32 %v1092_v16, %v42_v8 }
  0x2d   :  { %615 = vmatprep.subr.bf16.mxu0 %v834_v48  ;;  %v108_v48 = vadd.f32 %v1090_v15, %v70_v28 }
  0x2e   :  { %v139_v54 = vpack.c.bf16 %v127_v46, %v123_v41  ;;  %v118_v28 = vadd.f32 %v1094_v17, %v80_v23 }
  0x2f   :  { %563 = vmatpush1.bf16.msra.mxu1 %v836_v49  ;;  %v106_v49 = vadd.f32 %v1094_v17, %v68_v33 }
  0x30   :  { %616 = vmatpush1.bf16.msra.mxu0 %v837_v59  ;;  %564 = vmatprep.subr.bf16.mxu1 %v838_v2  ;;  %v113_v59 = vadd.f32 %v1056_v63, %v75_v42  ;;  %v124_v2 = vmax.f32 %v108_v48, 0.0  ;;  %v38_v63 = vunpack.c.l.bf16 %v25_v37  ;;  %v134_v33 = vmax.f32 %v118_v28, 0.0 }
  0x31   :  { %617 = vmatprep.subr.bf16.mxu0 %v840_v3  ;;  %v81_v3 = vmul.f32 %v1077_v11, %v43_v56  ;;  %625 = vmatprep.mubr.bf16.mxu0 %v139_v54  ;;  %v122_v5 = vmax.f32 %v106_v49, 0.0 }
  0x32   :  { %v76_v11 = vmul.f32 %v1092_v16, %v38_v63  ;;  %v129_v20 = vmax.f32 %v113_v59, 0.0 }
  0x33   :  { %565 = vmatpush1.bf16.msra.mxu1 %v842_v18  ;;  %v119_v10 = vadd.f32 %v1079_v12, %v81_v3  ;;  %v74_v18 = vmul.f32 %v1087_v14, %v36_v62 }
  0x34   :  { %618 = vmatpush1.bf16.msra.mxu0 %v843_v19  ;;  %566 = vmatprep.subr.bf16.mxu1 %v844_v24  ;;  %v78_v19 = vmul.f32 %v1087_v14, %v40_v4  ;;  %v136_v24 = vpack.c.bf16 %v124_v2, %v120_v55  ;;  %v114_v27 = vadd.f32 %v1094_v17, %v76_v11 }
  0x35   :  { %619 = vmatprep.subr.bf16.mxu0 %v846_v25  ;;  %v135_v12 = vmax.f32 %v119_v10, 0.0  ;;  %v138_v25 = vpack.c.bf16 %v126_v6, %v122_v5  ;;  %v112_v14 = vadd.f32 %v1090_v15, %v74_v18  ;;  %v141_v29 = vpack.c.bf16 %v133_v21, %v129_v20 }
  0x36   :  { %v116_v26 = vadd.f32 %v1090_v15, %v78_v19  ;;  %v130_v32 = vmax.f32 %v114_v27, 0.0  ;;  %v208_v15 = vld [vmem:[%s1199_s4] sm:$0x3] }
  0x37   :  { %567 = vmatpush1.bf16.msra.mxu1 %v848_v38  ;;  %v143_v30 = vpack.c.bf16 %v135_v12, %v131_v22  ;;  %v128_v16 = vmax.f32 %v112_v14, 0.0  ;;  %v213_v17 = vrot.slane %v208_v15, %v1038_v52  ;;  %v217_v36 = vrot.slane %v208_v15, %v1027_v47 }
  0x38   :  { %620 = vmatpush1.bf16.msra.mxu0 %v849_v39  ;;  %568 = vmatprep.subr.bf16.mxu1 %v850_v44  ;;  %v132_v31 = vmax.f32 %v116_v26, 0.0  ;;  %v142_v35 = vpack.c.bf16 %v134_v33, %v130_v32 }
  0x39   :  { %621 = vmatprep.subr.bf16.mxu0 %v852_v45 }
  0x3a   :  { %v140_v34 = vpack.c.bf16 %v132_v31, %v128_v16 }
  0x3b   :  { %569 = vmatpush1.bf16.msra.mxu1 %v854_v57 }
  0x3c   :  { %622 = vmatpush1.bf16.msra.mxu0 %v855_v58  ;;  %570 = vmatprep.subr.bf16.mxu1 %v856_v0 }
  0x3d   :  { %623 = vmatprep.subr.bf16.mxu0 %v858_v1 }
  0x3f   :  { %571 = vmatpush1.bf16.msra.mxu1 %v860_v9 }
  0x40   :  { %624 = vmatpush1.bf16.msra.mxu0 %v861_v13 }
  0x42   :  { %573 = vmatmul.mubr.bf16.vlgmr.msra.gmra.mrb[0].mxu1 %v136_v24 }
  0x43   :  { %626 = vmatmul.mubr.bf16.vlgmr.msra.gmra.mrb[0].mxu0 %v138_v25  ;;  %582 = vmatprep.mubr.bf16.mxu1 %v141_v29 }
  0x44   :  { %635 = vmatprep.mubr.bf16.mxu0 %v143_v30 }
  0x4a   :  { %583 = vmatmul.mubr.bf16.gmra.mrb[4].mxu1 %v140_v34 }
  0x4b   :  { %636 = vmatmul.mubr.bf16.gmra.mrb[4].mxu0 %v142_v35 }
 0x115   :  { %v574_v37 = vpop.f32.mrb[0].mxu1 }
 0x116   :  { %v627_v38 = vpop.f32.mrb[0].mxu0  ;;  %v575_v39 = vadd.f32 %v574_v37, %v213_v17  ;;  %v576_v40 = vpop.f32.mrb[1].mxu1 }
 0x117   :  { %v629_v41 = vpop.f32.mrb[1].mxu0  ;;  %v577_v42 = vadd.f32 %v576_v40, %v217_v36  ;;  %v578_v43 = vpop.f32.mrb[2].mxu1 }
 0x118   :  { %v631_v44 = vpop.f32.mrb[2].mxu0  ;;  %v628_v45 = vadd.f32 %v627_v38, %v575_v39  ;;  %v579_v46 = vadd.f32 %v578_v43, %v213_v17  ;;  %v580_v48 = vpop.f32.mrb[3].mxu1 }
 0x119   :  { %v633_v49 = vpop.f32.mrb[3].mxu0  ;;  %v630_v50 = vadd.f32 %v629_v41, %v577_v42  ;;  %v581_v51 = vadd.f32 %v580_v48, %v217_v36 }
 0x11a   :  { %v632_v53 = vadd.f32 %v631_v44, %v579_v46 }
 0x11b   :  { %v746_v54 = vpack.c.bf16 %v630_v50, %v628_v45  ;;  %v634_v55 = vadd.f32 %v633_v49, %v581_v51 }
 0x11d   :  { %670 = vst [vmem:[%s1200_s5] sm:$0xff] %v746_v54  ;;  %v747_v47 = vpack.c.bf16 %v634_v55, %v632_v53  ;;  %v584_v52 = vpop.f32.mrb[4].mxu1 }
 0x11e   :  { %v637_v56 = vpop.f32.mrb[4].mxu0  ;;  %v585_v57 = vadd.f32 %v584_v52, %v213_v17  ;;  %v586_v58 = vpop.f32.mrb[5].mxu1 }
 0x11f   :  { %v639_v59 = vpop.f32.mrb[5].mxu0  ;;  %671 = vst [vmem:[%s1200_s5 + $0x8] sm:$0xff] %v747_v47  ;;  %v587_v60 = vadd.f32 %v586_v58, %v217_v36  ;;  %v588_v61 = vpop.f32.mrb[6].mxu1 }
 0x120   :  { %v641_v62 = vpop.f32.mrb[6].mxu0  ;;  %v638_v0 = vadd.f32 %v637_v56, %v585_v57  ;;  %v589_v1 = vadd.f32 %v588_v61, %v213_v17  ;;  %v590_v2 = vpop.f32.mrb[7].mxu1 }
 0x121   :  { %v643_v3 = vpop.f32.mrb[7].mxu0  ;;  %v640_v4 = vadd.f32 %v639_v59, %v587_v60  ;;  %v591_v63 = vadd.f32 %v590_v2, %v217_v36 }
 0x122   :  { %v642_v5 = vadd.f32 %v641_v62, %v589_v1 }
 0x123   :  { %v748_v6 = vpack.c.bf16 %v640_v4, %v638_v0  ;;  %v644_v7 = vadd.f32 %v643_v3, %v591_v63 }
 0x125   :  { %672 = vst [vmem:[%s1200_s5 + $0x10] sm:$0xff] %v748_v6  ;;  %v749_v8 = vpack.c.bf16 %v644_v7, %v642_v5 }
 0x127   :  { %673 = vst [vmem:[%s1200_s5 + $0x18] sm:$0xff] %v749_v8 }

// kernel: closed_call.55
= control target key start
LH: loop header
LB: loop body
LE: loop exit
PB: predicated region body
PF: predicated region fallthrough
CT: control target
= control target key end

     0   :  { %s1628_s1 = inlined_call_operand.vmem [shape: bf16[1152,128], index: 1, kind: input, shape index: {}]   ;;  %s1629_s0 = inlined_call_operand.vmem [shape: bf16[32,1152], index: 0, kind: input, shape index: {}]   ;;  %s1630_s2 = inlined_call_operand.vmem [shape: f32[1,128], index: 2, kind: input, shape index: {}]   ;;  %s1631_s3 = inlined_call_operand.vmem [shape: bf16[32,128], index: 3, kind: output, shape index: {}]  }
   0x1   :  { %v1231_v0 = vld [vmem:[%s1628_s1 + $0x40] sm:$0xff]   ;;  %v1235_v4 = vld [vmem:[%s1628_s1 + $0x48] sm:$0xff]   ;;  %v1239_v8 = vld [vmem:[%s1628_s1 + $0x50] sm:$0xff]  }
   0x2   :  { %v1232_v1 = vld [vmem:[%s1628_s1] sm:$0xff]   ;;  %1089 = vmatprep.subr.bf16.mxu0 %v1231_v0  ;;  %v1236_v5 = vld [vmem:[%s1628_s1 + $0x8] sm:$0xff]   ;;  %v1240_v9 = vld [vmem:[%s1628_s1 + $0x10] sm:$0xff]  }
   0x3   :  { %v1233_v2 = vld [vmem:[%s1628_s1 + $0xc0] sm:$0xff]   ;;  %1090 = vmatpush3.bf16.msra.mxu0 %v1232_v1  ;;  %v1237_v6 = vld [vmem:[%s1628_s1 + $0xc8] sm:$0xff]   ;;  %v1241_v10 = vld [vmem:[%s1628_s1 + $0xd0] sm:$0xff]  }
   0x4   :  { %v1234_v3 = vld [vmem:[%s1628_s1 + $0x80] sm:$0xff]   ;;  %1117 = vmatprep.subr.bf16.mxu1 %v1233_v2  ;;  %1091 = vmatprep.subr.bf16.mxu0 %v1235_v4  ;;  %v1238_v7 = vld [vmem:[%s1628_s1 + $0x88] sm:$0xff]   ;;  %v1242_v11 = vld [vmem:[%s1628_s1 + $0x90] sm:$0xff]  }
   0x5   :  { %1118 = vmatpush3.bf16.msra.mxu1 %v1234_v3  ;;  %v1243_v12 = vld [vmem:[%s1628_s1 + $0x58] sm:$0xff]   ;;  %v1247_v16 = vld [vmem:[%s1628_s1 + $0x60] sm:$0xff]   ;;  %v1251_v20 = vld [vmem:[%s1628_s1 + $0x68] sm:$0xff]  }
   0x6   :  { %1119 = vmatprep.subr.bf16.mxu1 %v1237_v6  ;;  %v1244_v13 = vld [vmem:[%s1628_s1 + $0x18] sm:$0xff]   ;;  %v1248_v17 = vld [vmem:[%s1628_s1 + $0x20] sm:$0xff]   ;;  %v1252_v21 = vld [vmem:[%s1628_s1 + $0x28] sm:$0xff]  }
   0x7   :  { %1092 = vmatpush3.bf16.msra.mxu0 %v1236_v5  ;;  %v1245_v14 = vld [vmem:[%s1628_s1 + $0xd8] sm:$0xff]   ;;  %v1249_v18 = vld [vmem:[%s1628_s1 + $0xe0] sm:$0xff]   ;;  %v1253_v22 = vld [vmem:[%s1628_s1 + $0xe8] sm:$0xff]  }
   0x8   :  { %1093 = vmatprep.subr.bf16.mxu0 %v1239_v8  ;;  %v1246_v15 = vld [vmem:[%s1628_s1 + $0x98] sm:$0xff]   ;;  %v1250_v19 = vld [vmem:[%s1628_s1 + $0xa0] sm:$0xff]   ;;  %v1254_v23 = vld [vmem:[%s1628_s1 + $0xa8] sm:$0xff]  }
   0x9   :  { %1120 = vmatpush3.bf16.msra.mxu1 %v1238_v7  ;;  %v1255_v24 = vld [vmem:[%s1628_s1 + $0x70] sm:$0xff]   ;;  %v1259_v28 = vld [vmem:[%s1628_s1 + $0x78] sm:$0xff]   ;;  %v1262_v31 = vld [vmem:[%s1629_s0] ss:$36 sps:$4 sm:$0xff]  }
   0xa   :  { %1121 = vmatprep.subr.bf16.mxu1 %v1241_v10  ;;  %v1256_v25 = vld [vmem:[%s1628_s1 + $0x30] sm:$0xff]   ;;  %v1260_v29 = vld [vmem:[%s1628_s1 + $0x38] sm:$0xff]   ;;  %v1264_v32 = vld [vmem:[%s1629_s0 + $0x4] ss:$36 sps:$4 sm:$0xff]  }
   0xb   :  { %1094 = vmatpush3.bf16.msra.mxu0 %v1240_v9  ;;  %v1257_v26 = vld [vmem:[%s1628_s1 + $0xf0] sm:$0xff]   ;;  %v1261_v30 = vld [vmem:[%s1628_s1 + $0xf8] sm:$0xff]   ;;  %742 = vmatprep.mubr.bf16.mxu0 %v1264_v32  ;;  %v1266_v34 = vld [vmem:[%s1628_s1 + $0x140] sm:$0xff]  }
   0xc   :  { %1095 = vmatprep.subr.bf16.mxu0 %v1243_v12  ;;  %v1258_v27 = vld [vmem:[%s1628_s1 + $0xb0] sm:$0xff]   ;;  %v1265_v33 = vld [vmem:[%s1628_s1 + $0xb8] sm:$0xff]   ;;  %v1267_v35 = vld [vmem:[%s1629_s0 + $0x8] ss:$36 sps:$4 sm:$0xff]  }
   0xd   :  { %1122 = vmatpush3.bf16.msra.mxu1 %v1242_v11  ;;  %v1269_v36 = vld [vmem:[%s1629_s0 + $0xc] ss:$36 sps:$4 sm:$0xff]   ;;  %v1270_v37 = vld [vmem:[%s1628_s1 + $0x100] sm:$0xff]   ;;  %v1281_v48 = vld [vmem:[%s1628_s1 + $0x158] sm:$0xff]  }
   0xe   :  { %1123 = vmatprep.subr.bf16.mxu1 %v1245_v14  ;;  %791 = vmatprep.mubr.bf16.mxu1 %v1269_v36  ;;  %v1271_v38 = vld [vmem:[%s1628_s1 + $0x1c0] sm:$0xff]   ;;  %v1273_v40 = vld [vmem:[%s1628_s1 + $0x148] sm:$0xff]   ;;  %v1277_v44 = vld [vmem:[%s1628_s1 + $0x150] sm:$0xff]  }
   0xf   :  { %1096 = vmatpush3.bf16.msra.mxu0 %v1244_v13  ;;  %v1272_v39 = vld [vmem:[%s1628_s1 + $0x180] sm:$0xff]   ;;  %v1274_v41 = vld [vmem:[%s1628_s1 + $0x108] sm:$0xff]   ;;  %v1278_v45 = vld [vmem:[%s1628_s1 + $0x110] sm:$0xff]  }
  0x10   :  { %1097 = vmatprep.subr.bf16.mxu0 %v1247_v16  ;;  %v1275_v42 = vld [vmem:[%s1628_s1 + $0x1c8] sm:$0xff]   ;;  %v1279_v46 = vld [vmem:[%s1628_s1 + $0x1d0] sm:$0xff]   ;;  %v1282_v49 = vld [vmem:[%s1628_s1 + $0x118] sm:$0xff]  }
  0x11   :  { %1124 = vmatpush3.bf16.msra.mxu1 %v1246_v15  ;;  %v1276_v43 = vld [vmem:[%s1628_s1 + $0x188] sm:$0xff]   ;;  %v1280_v47 = vld [vmem:[%s1628_s1 + $0x190] sm:$0xff]   ;;  %v1283_v50 = vld [vmem:[%s1628_s1 + $0x1d8] sm:$0xff]  }
  0x12   :  { %1125 = vmatprep.subr.bf16.mxu1 %v1249_v18  ;;  %v1284_v51 = vld [vmem:[%s1628_s1 + $0x198] sm:$0xff]   ;;  %v1285_v52 = vld [vmem:[%s1628_s1 + $0x160] sm:$0xff]   ;;  %v1289_v56 = vld [vmem:[%s1628_s1 + $0x168] sm:$0xff]  }
  0x13   :  { %1098 = vmatpush3.bf16.msra.mxu0 %v1248_v17  ;;  %v1286_v53 = vld [vmem:[%s1628_s1 + $0x120] sm:$0xff]   ;;  %v1290_v57 = vld [vmem:[%s1629_s0 + $0x4c] ss:$36 sps:$4 sm:$0xff]   ;;  %v1295_v61 = vld [vmem:[%s1629_s0 + $0x54] ss:$36 sps:$4 sm:$0xff]  }
  0x14   :  { %1099 = vmatprep.subr.bf16.mxu0 %v1251_v20  ;;  %v1287_v54 = vld [vmem:[%s1628_s1 + $0x1e0] sm:$0xff]   ;;  %v1292_v58 = vld [vmem:[%s1628_s1 + $0x128] sm:$0xff]   ;;  %v1298_v63 = vld [vmem:[%s1629_s0 + $0x50] ss:$36 sps:$4 sm:$0xff]  }
  0x15   :  { %1126 = vmatpush3.bf16.msra.mxu1 %v1250_v19  ;;  %v1288_v55 = vld [vmem:[%s1628_s1 + $0x1a0] sm:$0xff]   ;;  %v1293_v59 = vld [vmem:[%s1629_s0 + $0x48] ss:$36 sps:$4 sm:$0xff]   ;;  %v1299_v0 = vld [vmem:[%s1628_s1 + $0x170] sm:$0xff]  }
  0x16   :  { %1127 = vmatprep.subr.bf16.mxu1 %v1253_v22  ;;  %v1294_v60 = vld [vmem:[%s1628_s1 + $0x1e8] sm:$0xff]   ;;  %v1300_v1 = vld [vmem:[%s1628_s1 + $0x130] sm:$0xff]   ;;  %v1303_v4 = vld [vmem:[%s1628_s1 + $0x178] sm:$0xff]  }
  0x17   :  { %1100 = vmatpush3.bf16.msra.mxu0 %v1252_v21  ;;  %v1297_v62 = vld [vmem:[%s1628_s1 + $0x1a8] sm:$0xff]   ;;  %v1301_v2 = vld [vmem:[%s1628_s1 + $0x1f0] sm:$0xff]   ;;  %v1304_v5 = vld [vmem:[%s1628_s1 + $0x138] sm:$0xff]  }
  0x18   :  { %1101 = vmatprep.subr.bf16.mxu0 %v1255_v24  ;;  %v1302_v3 = vld [vmem:[%s1628_s1 + $0x1b0] sm:$0xff]   ;;  %v1305_v6 = vld [vmem:[%s1628_s1 + $0x1f8] sm:$0xff]   ;;  %v1310_v10 = vld [vmem:[%s1628_s1 + $0x200] sm:$0xff]  }
  0x19   :  { %1128 = vmatpush3.bf16.msra.mxu1 %v1254_v23  ;;  %v1306_v7 = vld [vmem:[%s1629_s0 + $0x10] ss:$36 sps:$4 sm:$0xff]   ;;  %v1309_v9 = vld [vmem:[%s1628_s1 + $0x1b8] sm:$0xff]   ;;  %v1314_v13 = vld [vmem:[%s1628_s1 + $0x208] sm:$0xff]  }
  0x1a   :  { %1129 = vmatprep.subr.bf16.mxu1 %v1257_v26  ;;  %v1308_v8 = vld [vmem:[%s1629_s0 + $0x14] ss:$36 sps:$4 sm:$0xff]   ;;  %v1313_v12 = vld [vmem:[%s1629_s0 + $0x1c] ss:$36 sps:$4 sm:$0xff]   ;;  %v1319_v17 = vld [vmem:[%s1629_s0 + $0x64] ss:$36 sps:$4 sm:$0xff]  }
  0x1b   :  { %1102 = vmatpush3.bf16.msra.mxu0 %v1256_v25  ;;  %v1311_v11 = vld [vmem:[%s1629_s0 + $0x18] ss:$36 sps:$4 sm:$0xff]   ;;  %v1318_v16 = vld [vmem:[%s1628_s1 + $0x210] sm:$0xff]   ;;  %v1321_v18 = vld [vmem:[%s1629_s0 + $0x60] ss:$36 sps:$4 sm:$0xff]  }
  0x1c   :  { %1103 = vmatprep.subr.bf16.mxu0 %v1259_v28  ;;  %v1315_v14 = vld [vmem:[%s1629_s0 + $0x5c] ss:$36 sps:$4 sm:$0xff]   ;;  %v1324_v22 = vld [vmem:[%s1628_s1 + $0x228] sm:$0xff]   ;;  %v1325_v23 = vld [vmem:[%s1628_s1 + $0x230] sm:$0xff]  }
  0x1d   :  { %1130 = vmatpush3.bf16.msra.mxu1 %v1258_v27  ;;  %v1317_v15 = vld [vmem:[%s1629_s0 + $0x58] ss:$36 sps:$4 sm:$0xff]   ;;  %v1323_v20 = vld [vmem:[%s1628_s1 + $0x220] sm:$0xff]   ;;  %v1328_v25 = vld [vmem:[%s1629_s0 + $0x68] ss:$36 sps:$4 sm:$0xff]  }
  0x1e   :  { %1131 = vmatprep.subr.bf16.mxu1 %v1261_v30  ;;  %v1322_v19 = vld [vmem:[%s1628_s1 + $0x218] sm:$0xff]   ;;  %v1327_v21 = vld [vmem:[%s1629_s0 + $0x20] ss:$36 sps:$4 sm:$0xff]  }
  0x1f   :  { %1104 = vmatpush3.bf16.msra.mxu0 %v1260_v29  ;;  %v1326_v24 = vld [vmem:[%s1628_s1 + $0x238] sm:$0xff]   ;;  %v979_v27 = vld [vmem:[%s1630_s2] ss:$0 sm:$0xff] }
  0x20   :  { %1145 = vmatprep.subr.bf16.mxu0 %v1266_v34 }
  0x21   :  { %1132 = vmatpush3.bf16.msra.mxu1 %v1265_v33 }
  0x22   :  { %743 = vmatmul.mubr.bf16.vlgmr.msra.gmra.mrb[0].mxu0 %v1262_v31  ;;  %1173 = vmatprep.subr.bf16.mxu1 %v1271_v38 }
  0x23   :  { %1146 = vmatpush3.bf16.msra.mxu0 %v1270_v37  ;;  %750 = vmatprep.mubr.bf16.mxu0 %v1290_v57 }
  0x24   :  { %792 = vmatmul.mubr.bf16.vlgmr.msra.gmra.mrb[0].mxu1 %v1267_v35  ;;  %1147 = vmatprep.subr.bf16.mxu0 %v1273_v40 }
  0x25   :  { %1174 = vmatpush3.bf16.msra.mxu1 %v1272_v39  ;;  %799 = vmatprep.mubr.bf16.mxu1 %v1295_v61 }
  0x26   :  { %1175 = vmatprep.subr.bf16.mxu1 %v1275_v42 }
  0x27   :  { %1148 = vmatpush3.bf16.msra.mxu0 %v1274_v41 }
  0x28   :  { %1149 = vmatprep.subr.bf16.mxu0 %v1277_v44 }
  0x29   :  { %1176 = vmatpush3.bf16.msra.mxu1 %v1276_v43 }
  0x2a   :  { %1177 = vmatprep.subr.bf16.mxu1 %v1279_v46  ;;  %751 = vmatmul.mubr.bf16.gmra.mrb[4].mxu0 %v1293_v59 }
  0x2b   :  { %1150 = vmatpush3.bf16.msra.mxu0 %v1278_v45  ;;  %840 = vmatprep.mubr.bf16.mxu0 %v1308_v8 }
  0x2c   :  { %1151 = vmatprep.subr.bf16.mxu0 %v1281_v48  ;;  %800 = vmatmul.mubr.bf16.gmra.mrb[4].mxu1 %v1298_v63 }
  0x2d   :  { %1178 = vmatpush3.bf16.msra.mxu1 %v1280_v47  ;;  %889 = vmatprep.mubr.bf16.mxu1 %v1313_v12 }
  0x2e   :  { %1179 = vmatprep.subr.bf16.mxu1 %v1283_v50 }
  0x2f   :  { %1152 = vmatpush3.bf16.msra.mxu0 %v1282_v49 }
  0x30   :  { %1153 = vmatprep.subr.bf16.mxu0 %v1285_v52 }
  0x31   :  { %1180 = vmatpush3.bf16.msra.mxu1 %v1284_v51 }
  0x32   :  { %1181 = vmatprep.subr.bf16.mxu1 %v1287_v54 }
  0x33   :  { %1154 = vmatpush3.bf16.msra.mxu0 %v1286_v53 }
  0x34   :  { %1155 = vmatprep.subr.bf16.mxu0 %v1289_v56 }
  0x35   :  { %1182 = vmatpush3.bf16.msra.mxu1 %v1288_v55 }
  0x36   :  { %1183 = vmatprep.subr.bf16.mxu1 %v1294_v60 }
  0x37   :  { %1156 = vmatpush3.bf16.msra.mxu0 %v1292_v58 }
  0x38   :  { %1157 = vmatprep.subr.bf16.mxu0 %v1299_v0 }
  0x39   :  { %1184 = vmatpush3.bf16.msra.mxu1 %v1297_v62 }
  0x3a   :  { %1185 = vmatprep.subr.bf16.mxu1 %v1301_v2 }
  0x3b   :  { %1158 = vmatpush3.bf16.msra.mxu0 %v1300_v1 }
  0x3c   :  { %1159 = vmatprep.subr.bf16.mxu0 %v1303_v4 }
  0x3d   :  { %1186 = vmatpush3.bf16.msra.mxu1 %v1302_v3 }
  0x3e   :  { %1187 = vmatprep.subr.bf16.mxu1 %v1305_v6 }
  0x3f   :  { %1160 = vmatpush3.bf16.msra.mxu0 %v1304_v5 }
  0x40   :  { %1211 = vmatprep.subr.bf16.mxu0 %v1310_v10 }
  0x41   :  { %1188 = vmatpush3.bf16.msra.mxu1 %v1309_v9 }
  0x42   :  { %841 = vmatmul.mubr.bf16.vlgmr.msra.gmra.mrb[8].mxu0 %v1306_v7 }
  0x43   :  { %1212 = vmatpush3.bf16.msra.mxu0 %v1310_v10  ;;  %848 = vmatprep.mubr.bf16.mxu0 %v1315_v14 }
  0x44   :  { %890 = vmatmul.mubr.bf16.vlgmr.msra.gmra.mrb[8].mxu1 %v1311_v11  ;;  %1213 = vmatprep.subr.bf16.mxu0 %v1314_v13 }
  0x45   :  { %897 = vmatprep.mubr.bf16.mxu1 %v1319_v17 }
  0x47   :  { %1214 = vmatpush3.bf16.msra.mxu0 %v1314_v13 }
  0x48   :  { %1215 = vmatprep.subr.bf16.mxu0 %v1318_v16 }
  0x4a   :  { %849 = vmatmul.mubr.bf16.gmra.mrb[12].mxu0 %v1317_v15 }
  0x4b   :  { %1216 = vmatpush3.bf16.msra.mxu0 %v1318_v16  ;;  %1227 = vmatprep.mubr.bf16.mxu0 %v1327_v21 }
  0x4c   :  { %898 = vmatmul.mubr.bf16.gmra.mrb[12].mxu1 %v1321_v18  ;;  %1217 = vmatprep.subr.bf16.mxu0 %v1322_v19 }
  0x4f   :  { %1218 = vmatpush3.bf16.msra.mxu0 %v1322_v19 }
  0x50   :  { %1219 = vmatprep.subr.bf16.mxu0 %v1323_v20 }
  0x53   :  { %1220 = vmatpush3.bf16.msra.mxu0 %v1323_v20 }
  0x54   :  { %1221 = vmatprep.subr.bf16.mxu0 %v1324_v22 }
  0x57   :  { %1222 = vmatpush3.bf16.msra.mxu0 %v1324_v22 }
  0x58   :  { %1223 = vmatprep.subr.bf16.mxu0 %v1325_v23 }
  0x5b   :  { %1224 = vmatpush3.bf16.msra.mxu0 %v1325_v23 }
  0x5c   :  { %1225 = vmatprep.subr.bf16.mxu0 %v1326_v24 }
  0x5f   :  { %1226 = vmatpush3.bf16.msra.mxu0 %v1326_v24 }
  0x62   :  { %1228 = vmatmul.mubr.bf16.vlgmr.msra.gmra.mrb[16].mxu0 %v1328_v25 }
  0xf5   :  { %v1105_v26 = vpop.f32.mrb[0].mxu0 }
  0xf6   :  { %v1106_v28 = vpop.f32.mrb[1].mxu0 }
  0xf7   :  { %v1107_v29 = vadd.f32 %v1106_v28, %v1105_v26  ;;  %v1108_v30 = vpop.f32.mrb[2].mxu0  ;;  %v1133_v31 = vpop.f32.mrb[0].mxu1 }
  0xf8   :  { %v1109_v32 = vpop.f32.mrb[3].mxu0  ;;  %v1134_v35 = vpop.f32.mrb[1].mxu1 }
  0xf9   :  { %v745_v33 = vadd.f32 %v1107_v29, %v979_v27  ;;  %v1110_v34 = vadd.f32 %v1109_v32, %v1108_v30  ;;  %v1135_v36 = vadd.f32 %v1134_v35, %v1133_v31  ;;  %v1136_v37 = vpop.f32.mrb[2].mxu1 }
  0xfa   :  { %v1137_v39 = vpop.f32.mrb[3].mxu1 }
  0xfb   :  { %v748_v38 = vadd.f32 %v1110_v34, %v979_v27  ;;  %v794_v40 = vadd.f32 %v1135_v36, %v745_v33  ;;  %v1138_v41 = vadd.f32 %v1137_v39, %v1136_v37 }
  0xfd   :  { %v797_v42 = vadd.f32 %v1138_v41, %v748_v38  ;;  %v1111_v43 = vpop.f32.mrb[4].mxu0 }
  0xfe   :  { %v1112_v44 = vpop.f32.mrb[5].mxu0 }
  0xff   :  { %v1113_v45 = vadd.f32 %v1112_v44, %v1111_v43  ;;  %v1114_v46 = vpop.f32.mrb[6].mxu0  ;;  %v1139_v47 = vpop.f32.mrb[4].mxu1 }
 0x100   :  { %v1115_v48 = vpop.f32.mrb[7].mxu0  ;;  %v1140_v51 = vpop.f32.mrb[5].mxu1 }
 0x101   :  { %v753_v49 = vadd.f32 %v1113_v45, %v979_v27  ;;  %v1116_v50 = vadd.f32 %v1115_v48, %v1114_v46  ;;  %v1141_v52 = vadd.f32 %v1140_v51, %v1139_v47  ;;  %v1142_v53 = vpop.f32.mrb[6].mxu1 }
 0x102   :  { %v1143_v55 = vpop.f32.mrb[7].mxu1 }
 0x103   :  { %v756_v54 = vadd.f32 %v1116_v50, %v979_v27  ;;  %v802_v56 = vadd.f32 %v1141_v52, %v753_v49  ;;  %v1144_v57 = vadd.f32 %v1143_v55, %v1142_v53 }
 0x105   :  { %v805_v58 = vadd.f32 %v1144_v57, %v756_v54 }
 0x115   :  { %v1161_v59 = vpop.f32.mrb[8].mxu0 }
 0x116   :  { %v1162_v60 = vpop.f32.mrb[9].mxu0 }
 0x117   :  { %v1163_v61 = vadd.f32 %v1162_v60, %v1161_v59  ;;  %v1164_v62 = vpop.f32.mrb[10].mxu0  ;;  %v1189_v63 = vpop.f32.mrb[8].mxu1 }
 0x118   :  { %v1165_v0 = vpop.f32.mrb[11].mxu0  ;;  %v1190_v3 = vpop.f32.mrb[9].mxu1 }
 0x119   :  { %v843_v1 = vadd.f32 %v1163_v61, %v794_v40  ;;  %v1166_v2 = vadd.f32 %v1165_v0, %v1164_v62  ;;  %v1191_v4 = vadd.f32 %v1190_v3, %v1189_v63  ;;  %v1192_v5 = vpop.f32.mrb[10].mxu1 }
 0x11a   :  { %v1193_v7 = vpop.f32.mrb[11].mxu1 }
 0x11b   :  { %v846_v6 = vadd.f32 %v1166_v2, %v797_v42  ;;  %v1194_v8 = vadd.f32 %v1193_v7, %v1192_v5  ;;  %v892_v9 = vadd.f32 %v1191_v4, %v843_v1 }
 0x11d   :  { %v1167_v10 = vpop.f32.mrb[12].mxu0  ;;  %v895_v12 = vadd.f32 %v1194_v8, %v846_v6 }
 0x11e   :  { %v1168_v11 = vpop.f32.mrb[13].mxu0 }
 0x11f   :  { %v1169_v13 = vadd.f32 %v1168_v11, %v1167_v10  ;;  %v1170_v14 = vpop.f32.mrb[14].mxu0  ;;  %v1195_v15 = vpop.f32.mrb[12].mxu1 }
 0x120   :  { %v1171_v16 = vpop.f32.mrb[15].mxu0  ;;  %v1196_v19 = vpop.f32.mrb[13].mxu1 }
 0x121   :  { %v851_v17 = vadd.f32 %v1169_v13, %v802_v56  ;;  %v1172_v18 = vadd.f32 %v1171_v16, %v1170_v14  ;;  %v1197_v20 = vadd.f32 %v1196_v19, %v1195_v15  ;;  %v1198_v21 = vpop.f32.mrb[14].mxu1 }
 0x122   :  { %v1199_v23 = vpop.f32.mrb[15].mxu1 }
 0x123   :  { %v854_v22 = vadd.f32 %v1172_v18, %v805_v58  ;;  %v1200_v24 = vadd.f32 %v1199_v23, %v1198_v21  ;;  %v900_v25 = vadd.f32 %v1197_v20, %v851_v17 }
 0x125   :  { %v903_v26 = vadd.f32 %v1200_v24, %v854_v22 }
 0x135   :  { %v1229_v27 = vpop.f32.mrb[16].mxu0 }
 0x136   :  { %v949_v28 = vadd.f32 %v1229_v27, %v900_v25  ;;  %v940_v29 = vpop.f32.mrb[17].mxu0 }
 0x137   :  { %v941_v30 = vadd.f32 %v940_v29, %v892_v9  ;;  %v1230_v31 = vpop.f32.mrb[18].mxu0 }
 0x138   :  { %v952_v32 = vadd.f32 %v1230_v31, %v903_v26  ;;  %v943_v33 = vpop.f32.mrb[19].mxu0 }
 0x139   :  { %v944_v34 = vadd.f32 %v943_v33, %v895_v12 }
 0x13a   :  { %v1086_v35 = vpack.c.bf16 %v952_v32, %v949_v28 }
 0x13b   :  { %v1081_v36 = vpack.c.bf16 %v944_v34, %v941_v30 }
 0x13c   :  { %1088 = vst [vmem:[%s1631_s3 + $0x8] sm:$0xff] %v1086_v35  }
 0x13d   :  { %1082 = vst [vmem:[%s1631_s3] sm:$0xff] %v1081_v36  }

// kernel: closed_call.56
= control target key start
LH: loop header
LB: loop body
LE: loop exit
PB: predicated region body
PF: predicated region fallthrough
CT: control target
= control target key end

     0   :  { %v47_v23 = vlaneseq  ;;  %s1398_s1 = inlined_call_operand.vmem [shape: bf16[1024,128], index: 1, kind: input, shape index: {}]   ;;  %s1399_s0 = inlined_call_operand.vmem [shape: bf16[16,1024], index: 0, kind: input, shape index: {}]   ;;  %s1400_s2 = inlined_call_operand.vmem [shape: f32[1,1024], index: 2, kind: input, shape index: {}]   ;;  %s1401_s3 = inlined_call_operand.vmem [shape: f32[1,1024], index: 3, kind: input, shape index: {}]   ;;  %s1402_s4 = inlined_call_operand.vmem [shape: f32[1,128], index: 4, kind: input, shape index: {}]   ;;  %s1403_s5 = inlined_call_operand.vmem [shape: bf16[16,128], index: 5, kind: output, shape index: {}]  }
   0x1   :  { %v1046_v0 = vld [vmem:[%s1398_s1 + $0x40] sm:$0xff]   ;;  %v1050_v4 = vld [vmem:[%s1398_s1 + $0x48] sm:$0xff]   ;;  %v1054_v8 = vld [vmem:[%s1398_s1 + $0x50] sm:$0xff]  }
   0x2   :  { %v1047_v1 = vld [vmem:[%s1398_s1 + $0xc0] sm:$0xff]   ;;  %958 = vmatprep.subr.bf16.mxu0 %v1046_v0  ;;  %v1051_v5 = vld [vmem:[%s1398_s1 + $0xc8] sm:$0xff]   ;;  %v1055_v9 = vld [vmem:[%s1398_s1 + $0xd0] sm:$0xff]   ;;  %v1221_v28 = vshrl.u32 %v47_v23, 7 }
   0x3   :  { %v1048_v2 = vld [vmem:[%s1398_s1] sm:$0xff]   ;;  %980 = vmatprep.subr.bf16.mxu1 %v1047_v1  ;;  %v1052_v6 = vld [vmem:[%s1398_s1 + $0x8] sm:$0xff]   ;;  %v1056_v10 = vld [vmem:[%s1398_s1 + $0x10] sm:$0xff]  }
   0x4   :  { %v1049_v3 = vld [vmem:[%s1398_s1 + $0x80] sm:$0xff]   ;;  %959 = vmatpush3.bf16.msra.mxu0 %v1048_v2  ;;  %v1053_v7 = vld [vmem:[%s1398_s1 + $0x88] sm:$0xff]   ;;  %v1057_v11 = vld [vmem:[%s1398_s1 + $0x90] sm:$0xff]   ;;  %v53_v33 = vsub.s32 1, %v1221_v28  ;;  %v61_v35 = vsub.s32 3, %v1221_v28  ;;  %v49_v39 = vsub.s32 0, %v1221_v28 }
   0x5   :  { %981 = vmatpush3.bf16.msra.mxu1 %v1049_v3  ;;  %960 = vmatprep.subr.bf16.mxu0 %v1050_v4  ;;  %v1058_v12 = vld [vmem:[%s1398_s1 + $0x58] sm:$0xff]   ;;  %v1062_v16 = vld [vmem:[%s1398_s1 + $0x60] sm:$0xff]   ;;  %v1066_v20 = vld [vmem:[%s1398_s1 + $0x68] sm:$0xff]   ;;  %v57_v40 = vsub.s32 2, %v1221_v28 }
   0x6   :  { %982 = vmatprep.subr.bf16.mxu1 %v1051_v5  ;;  %v1059_v13 = vld [vmem:[%s1398_s1 + $0xd8] sm:$0xff]   ;;  %v1063_v17 = vld [vmem:[%s1398_s1 + $0xe0] sm:$0xff]   ;;  %v1067_v21 = vld [vmem:[%s1398_s1 + $0xe8] sm:$0xff]  }
   0x7   :  { %v1060_v14 = vld [vmem:[%s1398_s1 + $0x18] sm:$0xff]   ;;  %v1064_v18 = vld [vmem:[%s1398_s1 + $0x20] sm:$0xff]   ;;  %v1068_v22 = vld [vmem:[%s1398_s1 + $0x28] sm:$0xff]  }
   0x8   :  { %961 = vmatpush3.bf16.msra.mxu0 %v1052_v6  ;;  %v1061_v15 = vld [vmem:[%s1398_s1 + $0x98] sm:$0xff]   ;;  %v1065_v19 = vld [vmem:[%s1398_s1 + $0xa0] sm:$0xff]   ;;  %v1069_v24 = vld [vmem:[%s1398_s1 + $0xa8] sm:$0xff]  }
   0x9   :  { %983 = vmatpush3.bf16.msra.mxu1 %v1053_v7  ;;  %962 = vmatprep.subr.bf16.mxu0 %v1054_v8  ;;  %v1070_v25 = vld [vmem:[%s1398_s1 + $0x70] sm:$0xff]   ;;  %v1074_v30 = vld [vmem:[%s1398_s1 + $0x78] sm:$0xff]   ;;  %v21_v36 = vld [vmem:[%s1399_s0] sm:$0xff] }
   0xa   :  { %984 = vmatprep.subr.bf16.mxu1 %v1055_v9  ;;  %v1071_v26 = vld [vmem:[%s1398_s1 + $0xf0] sm:$0xff]   ;;  %v1075_v31 = vld [vmem:[%s1398_s1 + $0xf8] sm:$0xff]   ;;  %v25_v37 = vld [vmem:[%s1399_s0 + $0x20] sm:$0xff]  ;;  %v29_v41 = vunpack.c.l.bf16 %v21_v36  ;;  %v30_v42 = vunpack.c.h.bf16 %v21_v36 }
   0xb   :  { %v1072_v27 = vld [vmem:[%s1398_s1 + $0x30] sm:$0xff]   ;;  %v1076_v32 = vld [vmem:[%s1398_s1 + $0x38] sm:$0xff]   ;;  %v1249_v38 = vld [vmem:[%s1400_s2] sm:$0xff]  ;;  %v37_v43 = vunpack.c.l.bf16 %v25_v37  ;;  %v38_v44 = vunpack.c.h.bf16 %v25_v37 }
   0xc   :  { %963 = vmatpush3.bf16.msra.mxu0 %v1056_v10  ;;  %v1073_v29 = vld [vmem:[%s1398_s1 + $0xb0] sm:$0xff]   ;;  %v1077_v34 = vld [vmem:[%s1398_s1 + $0xb8] sm:$0xff]   ;;  %v1256_v45 = vld [vmem:[%s1401_s3] sm:$0xff]  ;;  %v54_v48 = vrot.slane %v1249_v38, %v53_v33  ;;  %v62_v55 = vrot.slane %v1249_v38, %v61_v35  ;;  %v50_v60 = vrot.slane %v1249_v38, %v49_v39  ;;  %v58_v0 = vrot.slane %v1249_v38, %v57_v40 }
   0xd   :  { %985 = vmatpush3.bf16.msra.mxu1 %v1057_v11  ;;  %964 = vmatprep.subr.bf16.mxu0 %v1058_v12  ;;  %v22_v46 = vld [vmem:[%s1399_s0 + $0x8] sm:$0xff]  ;;  %v112_v49 = vrot.slane %v1256_v45, %v53_v33  ;;  %v1078_v52 = vld [vmem:[%s1398_s1 + $0x140] sm:$0xff]   ;;  %v120_v56 = vrot.slane %v1256_v45, %v61_v35  ;;  %v108_v61 = vrot.slane %v1256_v45, %v49_v39  ;;  %v1086_v33 = vld [vmem:[%s1398_s1 + $0x150] sm:$0xff]  }
   0xe   :  { %986 = vmatprep.subr.bf16.mxu1 %v1059_v13  ;;  %v26_v47 = vld [vmem:[%s1399_s0 + $0x28] sm:$0xff]  ;;  %v31_v50 = vunpack.c.l.bf16 %v22_v46  ;;  %v32_v51 = vunpack.c.h.bf16 %v22_v46  ;;  %v1079_v57 = vld [vmem:[%s1398_s1 + $0x1c0] sm:$0xff]   ;;  %v88_v58 = vmul.f32 %v54_v48, %v30_v42  ;;  %v96_v59 = vmul.f32 %v54_v48, %v38_v44  ;;  %v1088_v35 = vld [vmem:[%s1398_s1 + $0x110] sm:$0xff]  }
   0xf   :  { %v39_v53 = vunpack.c.l.bf16 %v26_v47  ;;  %v40_v54 = vunpack.c.h.bf16 %v26_v47  ;;  %v116_v1 = vrot.slane %v1256_v45, %v57_v40  ;;  %v87_v4 = vmul.f32 %v50_v60, %v29_v41  ;;  %v1089_v36 = vld [vmem:[%s1398_s1 + $0x190] sm:$0xff]   ;;  %v1090_v37 = vld [vmem:[%s1398_s1 + $0x158] sm:$0xff]   ;;  %v1094_v42 = vld [vmem:[%s1398_s1 + $0x160] sm:$0xff]  }
  0x10   :  { %965 = vmatpush3.bf16.msra.mxu0 %v1060_v14  ;;  %v90_v62 = vmul.f32 %v62_v55, %v32_v51  ;;  %v146_v2 = vadd.f32 %v112_v49, %v88_v58  ;;  %v154_v3 = vadd.f32 %v112_v49, %v96_v59  ;;  %v95_v5 = vmul.f32 %v50_v60, %v37_v43  ;;  %v1091_v39 = vld [vmem:[%s1398_s1 + $0x1d8] sm:$0xff]   ;;  %v1095_v43 = vld [vmem:[%s1398_s1 + $0x1e0] sm:$0xff]   ;;  %v1098_v48 = vld [vmem:[%s1398_s1 + $0x168] sm:$0xff]  }
  0x11   :  { %987 = vmatpush3.bf16.msra.mxu1 %v1061_v15  ;;  %966 = vmatprep.subr.bf16.mxu0 %v1062_v16  ;;  %v98_v63 = vmul.f32 %v62_v55, %v40_v54  ;;  %v89_v8 = vmul.f32 %v58_v0, %v31_v50  ;;  %v97_v9 = vmul.f32 %v58_v0, %v39_v53  ;;  %v1092_v40 = vld [vmem:[%s1398_s1 + $0x118] sm:$0xff]   ;;  %v1096_v44 = vld [vmem:[%s1398_s1 + $0x120] sm:$0xff]   ;;  %v69_v47 = vsub.s32 5, %v1221_v28  ;;  %v1099_v50 = vld [vmem:[%s1398_s1 + $0x1e8] sm:$0xff]  }
  0x12   :  { %988 = vmatprep.subr.bf16.mxu1 %v1063_v17  ;;  %v148_v6 = vadd.f32 %v120_v56, %v90_v62  ;;  %v162_v10 = vmax.f32 %v146_v2, 0.0  ;;  %v170_v11 = vmax.f32 %v154_v3, 0.0  ;;  %v145_v12 = vadd.f32 %v108_v61, %v87_v4  ;;  %v1093_v41 = vld [vmem:[%s1398_s1 + $0x198] sm:$0xff]   ;;  %v1097_v46 = vld [vmem:[%s1398_s1 + $0x1a0] sm:$0xff]   ;;  %v1101_v54 = vld [vmem:[%s1398_s1 + $0x1a8] sm:$0xff]  }
  0x13   :  { %v156_v7 = vadd.f32 %v120_v56, %v98_v63  ;;  %v153_v13 = vadd.f32 %v108_v61, %v95_v5  ;;  %v147_v16 = vadd.f32 %v116_v1, %v89_v8  ;;  %v155_v17 = vadd.f32 %v116_v1, %v97_v9  ;;  %v1102_v55 = vld [vmem:[%s1398_s1 + $0x170] sm:$0xff]   ;;  %v24_v3 = vld [vmem:[%s1399_s0 + $0x18] sm:$0xff] }
  0x14   :  { %967 = vmatpush3.bf16.msra.mxu0 %v1064_v18  ;;  %v164_v14 = vmax.f32 %v148_v6, 0.0  ;;  %v1080_v18 = vld [vmem:[%s1398_s1 + $0x100] sm:$0xff]   ;;  %v77_v49 = vsub.s32 7, %v1221_v28  ;;  %v65_v51 = vsub.s32 4, %v1221_v28  ;;  %v73_v53 = vsub.s32 6, %v1221_v28  ;;  %v1103_v56 = vld [vmem:[%s1398_s1 + $0x1f0] sm:$0xff]  }
  0x15   :  { %989 = vmatpush3.bf16.msra.mxu1 %v1065_v19  ;;  %968 = vmatprep.subr.bf16.mxu0 %v1066_v20  ;;  %v172_v15 = vmax.f32 %v156_v7, 0.0  ;;  %v178_v19 = vpack.c.bf16 %v170_v11, %v162_v10  ;;  %v161_v20 = vmax.f32 %v145_v12, 0.0  ;;  %v163_v23 = vmax.f32 %v147_v16, 0.0  ;;  %v1104_v58 = vld [vmem:[%s1398_s1 + $0x130] sm:$0xff]   ;;  %v28_v4 = vld [vmem:[%s1399_s0 + $0x38] sm:$0xff] }
  0x16   :  { %990 = vmatprep.subr.bf16.mxu1 %v1067_v21  ;;  %v169_v21 = vmax.f32 %v153_v13, 0.0  ;;  %v66_v28 = vrot.slane %v1249_v38, %v65_v51  ;;  %v23_v59 = vld [vmem:[%s1399_s0 + $0x10] sm:$0xff]  ;;  %v128_v60 = vrot.slane %v1256_v45, %v69_v47  ;;  %v78_v61 = vrot.slane %v1249_v38, %v77_v49  ;;  %v1106_v7 = vld [vmem:[%s1398_s1 + $0x178] sm:$0xff]  }
  0x17   :  { %736 = vmatprep.mubr.bf16.mxu0 %v178_v19  ;;  %v136_v62 = vrot.slane %v1256_v45, %v77_v49  ;;  %v74_v63 = vrot.slane %v1249_v38, %v73_v53  ;;  %v27_v0 = vld [vmem:[%s1399_s0 + $0x30] sm:$0xff]  ;;  %v33_v1 = vunpack.c.l.bf16 %v23_v59  ;;  %v34_v2 = vunpack.c.h.bf16 %v23_v59  ;;  %v1107_v12 = vld [vmem:[%s1398_s1 + $0x1f8] sm:$0xff]   ;;  %v884_v49 = vld [vmem:[%s1402_s4] ss:$0 sm:$0xff] }
  0x18   :  { %969 = vmatpush3.bf16.msra.mxu0 %v1068_v22  ;;  %v180_v22 = vpack.c.bf16 %v172_v15, %v164_v14  ;;  %v124_v5 = vrot.slane %v1256_v45, %v65_v51  ;;  %v132_v6 = vrot.slane %v1256_v45, %v73_v53  ;;  %v41_v8 = vunpack.c.l.bf16 %v27_v0 }
  0x19   :  { %991 = vmatpush3.bf16.msra.mxu1 %v1069_v24  ;;  %970 = vmatprep.subr.bf16.mxu0 %v1070_v25  ;;  %v171_v24 = vmax.f32 %v155_v17, 0.0  ;;  %v1081_v25 = vld [vmem:[%s1398_s1 + $0x180] sm:$0xff]   ;;  %v42_v9 = vunpack.c.h.bf16 %v27_v0  ;;  %v35_v10 = vunpack.c.l.bf16 %v24_v3  ;;  %v36_v11 = vunpack.c.h.bf16 %v24_v3 }
  0x1a   :  { %992 = vmatprep.subr.bf16.mxu1 %v1071_v26  ;;  %v1082_v26 = vld [vmem:[%s1398_s1 + $0x148] sm:$0xff]   ;;  %777 = vmatprep.mubr.bf16.mxu1 %v180_v22  ;;  %v43_v13 = vunpack.c.l.bf16 %v28_v4  ;;  %v44_v14 = vunpack.c.h.bf16 %v28_v4  ;;  %v91_v15 = vmul.f32 %v66_v28, %v33_v1 }
  0x1b   :  { %v94_v17 = vmul.f32 %v78_v61, %v36_v11  ;;  %v93_v19 = vmul.f32 %v74_v63, %v35_v10 }
  0x1c   :  { %971 = vmatpush3.bf16.msra.mxu0 %v1072_v27  ;;  %v177_v27 = vpack.c.bf16 %v169_v21, %v161_v20  ;;  %v1108_v20 = vld [vmem:[%s1398_s1 + $0x138] sm:$0xff]   ;;  %v102_v22 = vmul.f32 %v78_v61, %v44_v14 }
  0x1d   :  { %993 = vmatpush3.bf16.msra.mxu1 %v1073_v29  ;;  %972 = vmatprep.subr.bf16.mxu0 %v1074_v30  ;;  %v179_v29 = vpack.c.bf16 %v171_v24, %v163_v23  ;;  %v1083_v30 = vld [vmem:[%s1398_s1 + $0x1c8] sm:$0xff]   ;;  %v149_v23 = vadd.f32 %v124_v5, %v91_v15  ;;  %v101_v24 = vmul.f32 %v74_v63, %v43_v13 }
  0x1e   :  { %994 = vmatprep.subr.bf16.mxu1 %v1075_v31  ;;  %v1084_v31 = vld [vmem:[%s1398_s1 + $0x108] sm:$0xff]  }
  0x20   :  { %973 = vmatpush3.bf16.msra.mxu0 %v1076_v32  ;;  %v1085_v32 = vld [vmem:[%s1398_s1 + $0x188] sm:$0xff]  }
  0x21   :  { %995 = vmatpush3.bf16.msra.mxu1 %v1077_v34  ;;  %1002 = vmatprep.subr.bf16.mxu0 %v1078_v52  ;;  %v1087_v34 = vld [vmem:[%s1398_s1 + $0x1d0] sm:$0xff]   ;;  %v1100_v52 = vld [vmem:[%s1398_s1 + $0x128] sm:$0xff]  }
  0x22   :  { %1024 = vmatprep.subr.bf16.mxu1 %v1079_v57  ;;  %v70_v57 = vrot.slane %v1249_v38, %v69_v47  ;;  %v1105_v38 = vld [vmem:[%s1398_s1 + $0x1b0] sm:$0xff]  }
  0x23   :  { %737 = vmatmul.mubr.bf16.vlgmr.msra.gmra.mrb[0].mxu0 %v177_v27  ;;  %v152_v27 = vadd.f32 %v136_v62, %v94_v17 }
  0x24   :  { %778 = vmatmul.mubr.bf16.vlgmr.msra.gmra.mrb[0].mxu1 %v179_v29  ;;  %1003 = vmatpush3.bf16.msra.mxu0 %v1080_v18  ;;  %v92_v45 = vmul.f32 %v70_v57, %v34_v2  ;;  %v100_v16 = vmul.f32 %v70_v57, %v42_v9  ;;  %v99_v18 = vmul.f32 %v66_v28, %v41_v8 }
  0x25   :  { %1025 = vmatpush3.bf16.msra.mxu1 %v1081_v25  ;;  %1004 = vmatprep.subr.bf16.mxu0 %v1082_v26  ;;  %v1109_v25 = vld [vmem:[%s1398_s1 + $0x1b8] sm:$0xff]  }
  0x26   :  { %1026 = vmatprep.subr.bf16.mxu1 %v1083_v30  ;;  %v150_v21 = vadd.f32 %v128_v60, %v92_v45  ;;  %v158_v26 = vadd.f32 %v128_v60, %v100_v16  ;;  %v157_v29 = vadd.f32 %v124_v5, %v99_v18 }
  0x28   :  { %1005 = vmatpush3.bf16.msra.mxu0 %v1084_v31  ;;  %v166_v30 = vmax.f32 %v150_v21, 0.0  ;;  %v160_v31 = vadd.f32 %v136_v62, %v102_v22 }
  0x29   :  { %1027 = vmatpush3.bf16.msra.mxu1 %v1085_v32  ;;  %1006 = vmatprep.subr.bf16.mxu0 %v1086_v33  ;;  %v165_v32 = vmax.f32 %v149_v23, 0.0  ;;  %v151_v33 = vadd.f32 %v132_v6, %v93_v19 }
  0x2a   :  { %1028 = vmatprep.subr.bf16.mxu1 %v1087_v34  ;;  %v174_v34 = vmax.f32 %v158_v26, 0.0 }
  0x2c   :  { %1007 = vmatpush3.bf16.msra.mxu0 %v1088_v35  ;;  %v168_v35 = vmax.f32 %v152_v27, 0.0 }
  0x2d   :  { %1029 = vmatpush3.bf16.msra.mxu1 %v1089_v36  ;;  %1008 = vmatprep.subr.bf16.mxu0 %v1090_v37  ;;  %v173_v36 = vmax.f32 %v157_v29, 0.0  ;;  %v159_v37 = vadd.f32 %v132_v6, %v101_v24 }
  0x2e   :  { %1030 = vmatprep.subr.bf16.mxu1 %v1091_v39  ;;  %v176_v39 = vmax.f32 %v160_v31, 0.0 }
  0x30   :  { %1009 = vmatpush3.bf16.msra.mxu0 %v1092_v40  ;;  %v167_v40 = vmax.f32 %v151_v33, 0.0 }
  0x31   :  { %1031 = vmatpush3.bf16.msra.mxu1 %v1093_v41  ;;  %1010 = vmatprep.subr.bf16.mxu0 %v1094_v42  ;;  %v182_v41 = vpack.c.bf16 %v174_v34, %v166_v30  ;;  %v181_v42 = vpack.c.bf16 %v173_v36, %v165_v32 }
  0x32   :  { %1032 = vmatprep.subr.bf16.mxu1 %v1095_v43  ;;  %v175_v43 = vmax.f32 %v159_v37, 0.0 }
  0x33   :  { %818 = vmatprep.mubr.bf16.mxu0 %v182_v41 }
  0x34   :  { %1011 = vmatpush3.bf16.msra.mxu0 %v1096_v44  ;;  %v184_v44 = vpack.c.bf16 %v176_v39, %v168_v35 }
  0x35   :  { %1033 = vmatpush3.bf16.msra.mxu1 %v1097_v46  ;;  %1012 = vmatprep.subr.bf16.mxu0 %v1098_v48  ;;  %v183_v46 = vpack.c.bf16 %v175_v43, %v167_v40 }
  0x36   :  { %1034 = vmatprep.subr.bf16.mxu1 %v1099_v50  ;;  %859 = vmatprep.mubr.bf16.mxu1 %v184_v44 }
  0x38   :  { %1013 = vmatpush3.bf16.msra.mxu0 %v1100_v52 }
  0x39   :  { %1035 = vmatpush3.bf16.msra.mxu1 %v1101_v54  ;;  %1014 = vmatprep.subr.bf16.mxu0 %v1102_v55 }
  0x3a   :  { %1036 = vmatprep.subr.bf16.mxu1 %v1103_v56 }
  0x3c   :  { %1015 = vmatpush3.bf16.msra.mxu0 %v1104_v58 }
  0x3d   :  { %1037 = vmatpush3.bf16.msra.mxu1 %v1105_v38  ;;  %1016 = vmatprep.subr.bf16.mxu0 %v1106_v7 }
  0x3e   :  { %1038 = vmatprep.subr.bf16.mxu1 %v1107_v12 }
  0x40   :  { %1017 = vmatpush3.bf16.msra.mxu0 %v1108_v20 }
  0x41   :  { %1039 = vmatpush3.bf16.msra.mxu1 %v1109_v25 }
  0x43   :  { %819 = vmatmul.mubr.bf16.vlgmr.msra.gmra.mrb[4].mxu0 %v181_v42 }
  0x44   :  { %860 = vmatmul.mubr.bf16.vlgmr.msra.gmra.mrb[4].mxu1 %v183_v46 }
  0xf6   :  { %v974_v47 = vpop.f32.mrb[0].mxu0 }
  0xf7   :  { %v996_v48 = vpop.f32.mrb[0].mxu1  ;;  %v975_v50 = vpop.f32.mrb[1].mxu0 }
  0xf8   :  { %v976_v51 = vadd.f32 %v975_v50, %v974_v47  ;;  %v997_v52 = vpop.f32.mrb[1].mxu1  ;;  %v977_v53 = vpop.f32.mrb[2].mxu0 }
  0xf9   :  { %v998_v54 = vadd.f32 %v997_v52, %v996_v48  ;;  %v999_v55 = vpop.f32.mrb[2].mxu1  ;;  %v978_v56 = vpop.f32.mrb[3].mxu0 }
  0xfa   :  { %v739_v57 = vadd.f32 %v976_v51, %v884_v49  ;;  %v979_v28 = vadd.f32 %v978_v56, %v977_v53  ;;  %v1000_v58 = vpop.f32.mrb[3].mxu1 }
  0xfb   :  { %v1001_v59 = vadd.f32 %v1000_v58, %v999_v55 }
  0xfc   :  { %v780_v60 = vadd.f32 %v998_v54, %v739_v57  ;;  %v742_v61 = vadd.f32 %v979_v28, %v884_v49 }
  0xfe   :  { %v783_v62 = vadd.f32 %v1001_v59, %v742_v61 }
 0x116   :  { %v1018_v63 = vpop.f32.mrb[4].mxu0 }
 0x117   :  { %v1040_v0 = vpop.f32.mrb[4].mxu1  ;;  %v1019_v1 = vpop.f32.mrb[5].mxu0 }
 0x118   :  { %v1020_v2 = vadd.f32 %v1019_v1, %v1018_v63  ;;  %v1041_v3 = vpop.f32.mrb[5].mxu1  ;;  %v1021_v4 = vpop.f32.mrb[6].mxu0 }
 0x119   :  { %v1042_v5 = vadd.f32 %v1041_v3, %v1040_v0  ;;  %v1043_v6 = vpop.f32.mrb[6].mxu1  ;;  %v1022_v38 = vpop.f32.mrb[7].mxu0 }
 0x11a   :  { %v821_v7 = vadd.f32 %v1020_v2, %v780_v60  ;;  %v1023_v8 = vadd.f32 %v1022_v38, %v1021_v4  ;;  %v1044_v9 = vpop.f32.mrb[7].mxu1 }
 0x11b   :  { %v1045_v10 = vadd.f32 %v1044_v9, %v1043_v6 }
 0x11c   :  { %v862_v11 = vadd.f32 %v1042_v5, %v821_v7  ;;  %v824_v12 = vadd.f32 %v1023_v8, %v783_v62 }
 0x11e   :  { %v865_v45 = vadd.f32 %v1045_v10, %v824_v12  ;;  %v868_v13 = vmax.f32 %v862_v11, 0.0 }
 0x120   :  { %v869_v14 = vmax.f32 %v865_v45, 0.0 }
 0x122   :  { %v956_v15 = vpack.c.bf16 %v869_v14, %v868_v13 }
 0x124   :  { %957 = vst [vmem:[%s1403_s5] sm:$0xff] %v956_v15  }

// kernel: closed_call.57
= control target key start
LH: loop header
LB: loop body
LE: loop exit
PB: predicated region body
PF: predicated region fallthrough
CT: control target
= control target key end

     0   :  { %vm1169_vm0 = vmmov 0   ;;  %s1439_s1 = inlined_call_operand.vmem [shape: bf16[1152,128], index: 1, kind: input, shape index: {}]   ;;  %s1440_s0 = inlined_call_operand.vmem [shape: bf16[16,1152], index: 0, kind: input, shape index: {}]   ;;  %s1441_s2 = inlined_call_operand.vmem [shape: f32[1,128], index: 2, kind: input, shape index: {}]   ;;  %s1442_s3 = inlined_call_operand.vmem [shape: bf16[16,128], index: 3, kind: output, shape index: {}]  }
   0x1   :  { %v1083_v0 = vld [vmem:[%s1439_s1 + $0x40] sm:$0xff]   ;;  %v1087_v4 = vld [vmem:[%s1439_s1 + $0x48] sm:$0xff]   ;;  %v1091_v8 = vld [vmem:[%s1439_s1 + $0x50] sm:$0xff]  }
   0x2   :  { %v1084_v1 = vld [vmem:[%s1439_s1] sm:$0xff]   ;;  %964 = vmatprep.subr.bf16.mxu0 %v1083_v0  ;;  %v1088_v5 = vld [vmem:[%s1439_s1 + $0x8] sm:$0xff]   ;;  %v1092_v9 = vld [vmem:[%s1439_s1 + $0x10] sm:$0xff]  }
   0x3   :  { %v1085_v2 = vld [vmem:[%s1439_s1 + $0xc0] sm:$0xff]   ;;  %965 = vmatpush3.bf16.msra.mxu0 %v1084_v1  ;;  %v1089_v6 = vld [vmem:[%s1439_s1 + $0xc8] sm:$0xff]   ;;  %v1093_v10 = vld [vmem:[%s1439_s1 + $0xd0] sm:$0xff]  }
   0x4   :  { %v1086_v3 = vld [vmem:[%s1439_s1 + $0x80] sm:$0xff]   ;;  %986 = vmatprep.subr.bf16.mxu1 %v1085_v2  ;;  %966 = vmatprep.subr.bf16.mxu0 %v1087_v4  ;;  %v1090_v7 = vld [vmem:[%s1439_s1 + $0x88] sm:$0xff]   ;;  %v1094_v11 = vld [vmem:[%s1439_s1 + $0x90] sm:$0xff]  }
   0x5   :  { %987 = vmatpush3.bf16.msra.mxu1 %v1086_v3  ;;  %v1095_v12 = vld [vmem:[%s1439_s1 + $0x58] sm:$0xff]   ;;  %v1099_v16 = vld [vmem:[%s1439_s1 + $0x60] sm:$0xff]   ;;  %v1103_v20 = vld [vmem:[%s1439_s1 + $0x68] sm:$0xff]  }
   0x6   :  { %988 = vmatprep.subr.bf16.mxu1 %v1089_v6  ;;  %v1096_v13 = vld [vmem:[%s1439_s1 + $0x18] sm:$0xff]   ;;  %v1100_v17 = vld [vmem:[%s1439_s1 + $0x20] sm:$0xff]   ;;  %v1104_v21 = vld [vmem:[%s1439_s1 + $0x28] sm:$0xff]   ;;  %v1168_v6 = vmov 0.0  }
   0x7   :  { %967 = vmatpush3.bf16.msra.mxu0 %v1088_v5  ;;  %v1097_v14 = vld [vmem:[%s1439_s1 + $0xd8] sm:$0xff]   ;;  %v1101_v18 = vld [vmem:[%s1439_s1 + $0xe0] sm:$0xff]   ;;  %v1105_v22 = vld [vmem:[%s1439_s1 + $0xe8] sm:$0xff]  }
   0x8   :  { %968 = vmatprep.subr.bf16.mxu0 %v1091_v8  ;;  %v1098_v15 = vld [vmem:[%s1439_s1 + $0x98] sm:$0xff]   ;;  %v1102_v19 = vld [vmem:[%s1439_s1 + $0xa0] sm:$0xff]   ;;  %v1106_v23 = vld [vmem:[%s1439_s1 + $0xa8] sm:$0xff]  }
   0x9   :  { %989 = vmatpush3.bf16.msra.mxu1 %v1090_v7  ;;  %v1107_v24 = vld [vmem:[%s1439_s1 + $0x70] sm:$0xff]   ;;  %v1111_v28 = vld [vmem:[%s1439_s1 + $0x78] sm:$0xff]   ;;  %v1114_v31 = vld [vmem:[%s1440_s0] ss:$36 sps:$4 sm:$0xff]  }
   0xa   :  { %990 = vmatprep.subr.bf16.mxu1 %v1093_v10  ;;  %v1108_v25 = vld [vmem:[%s1439_s1 + $0x30] sm:$0xff]   ;;  %v1112_v29 = vld [vmem:[%s1439_s1 + $0x38] sm:$0xff]   ;;  %v1116_v32 = vld [vmem:[%s1440_s0 + $0x4] ss:$36 sps:$4 sm:$0xff]  }
   0xb   :  { %969 = vmatpush3.bf16.msra.mxu0 %v1092_v9  ;;  %v1109_v26 = vld [vmem:[%s1439_s1 + $0xf0] sm:$0xff]   ;;  %v1113_v30 = vld [vmem:[%s1439_s1 + $0xf8] sm:$0xff]   ;;  %686 = vmatprep.mubr.bf16.mxu0 %v1116_v32  ;;  %v1118_v34 = vld [vmem:[%s1439_s1 + $0x140] sm:$0xff]  }
   0xc   :  { %970 = vmatprep.subr.bf16.mxu0 %v1095_v12  ;;  %v1110_v27 = vld [vmem:[%s1439_s1 + $0xb0] sm:$0xff]   ;;  %v1117_v33 = vld [vmem:[%s1439_s1 + $0xb8] sm:$0xff]   ;;  %v1119_v35 = vld [vmem:[%s1440_s0 + $0x8] ss:$36 sps:$4 sm:$0xff]  }
   0xd   :  { %991 = vmatpush3.bf16.msra.mxu1 %v1094_v11  ;;  %v1121_v36 = vld [vmem:[%s1440_s0 + $0xc] ss:$36 sps:$4 sm:$0xff]   ;;  %v1122_v37 = vld [vmem:[%s1439_s1 + $0x100] sm:$0xff]   ;;  %v1133_v48 = vld [vmem:[%s1439_s1 + $0x158] sm:$0xff]  }
   0xe   :  { %992 = vmatprep.subr.bf16.mxu1 %v1097_v14  ;;  %727 = vmatprep.mubr.bf16.mxu1 %v1121_v36  ;;  %v1123_v38 = vld [vmem:[%s1439_s1 + $0x1c0] sm:$0xff]   ;;  %v1125_v40 = vld [vmem:[%s1439_s1 + $0x148] sm:$0xff]   ;;  %v1129_v44 = vld [vmem:[%s1439_s1 + $0x150] sm:$0xff]  }
   0xf   :  { %971 = vmatpush3.bf16.msra.mxu0 %v1096_v13  ;;  %v1124_v39 = vld [vmem:[%s1439_s1 + $0x180] sm:$0xff]   ;;  %v1126_v41 = vld [vmem:[%s1439_s1 + $0x108] sm:$0xff]   ;;  %v1130_v45 = vld [vmem:[%s1439_s1 + $0x110] sm:$0xff]  }
  0x10   :  { %972 = vmatprep.subr.bf16.mxu0 %v1099_v16  ;;  %v1127_v42 = vld [vmem:[%s1439_s1 + $0x1c8] sm:$0xff]   ;;  %v1131_v46 = vld [vmem:[%s1439_s1 + $0x1d0] sm:$0xff]   ;;  %v1134_v49 = vld [vmem:[%s1439_s1 + $0x118] sm:$0xff]  }
  0x11   :  { %993 = vmatpush3.bf16.msra.mxu1 %v1098_v15  ;;  %v1128_v43 = vld [vmem:[%s1439_s1 + $0x188] sm:$0xff]   ;;  %v1132_v47 = vld [vmem:[%s1439_s1 + $0x190] sm:$0xff]   ;;  %v1135_v50 = vld [vmem:[%s1439_s1 + $0x1d8] sm:$0xff]  }
  0x12   :  { %994 = vmatprep.subr.bf16.mxu1 %v1101_v18  ;;  %v1136_v51 = vld [vmem:[%s1439_s1 + $0x198] sm:$0xff]   ;;  %v1137_v52 = vld [vmem:[%s1439_s1 + $0x160] sm:$0xff]   ;;  %v1141_v56 = vld [vmem:[%s1439_s1 + $0x168] sm:$0xff]  }
  0x13   :  { %973 = vmatpush3.bf16.msra.mxu0 %v1100_v17  ;;  %v1138_v53 = vld [vmem:[%s1439_s1 + $0x120] sm:$0xff]   ;;  %v1142_v57 = vld [vmem:[%s1439_s1 + $0x128] sm:$0xff]   ;;  %v1145_v60 = vld [vmem:[%s1439_s1 + $0x170] sm:$0xff]  }
  0x14   :  { %974 = vmatprep.subr.bf16.mxu0 %v1103_v20  ;;  %v1139_v54 = vld [vmem:[%s1439_s1 + $0x1e0] sm:$0xff]   ;;  %v1143_v58 = vld [vmem:[%s1439_s1 + $0x1e8] sm:$0xff]   ;;  %v1146_v61 = vld [vmem:[%s1439_s1 + $0x130] sm:$0xff]  }
  0x15   :  { %995 = vmatpush3.bf16.msra.mxu1 %v1102_v19  ;;  %v1140_v55 = vld [vmem:[%s1439_s1 + $0x1a0] sm:$0xff]   ;;  %v1144_v59 = vld [vmem:[%s1439_s1 + $0x1a8] sm:$0xff]   ;;  %v1147_v62 = vld [vmem:[%s1439_s1 + $0x1f0] sm:$0xff]  }
  0x16   :  { %996 = vmatprep.subr.bf16.mxu1 %v1105_v22  ;;  %v1148_v63 = vld [vmem:[%s1439_s1 + $0x1b0] sm:$0xff]   ;;  %v1149_v0 = vld [vmem:[%s1439_s1 + $0x178] sm:$0xff]   ;;  %v1159_v9 = vld [vmem:[%s1439_s1 + $0x200] sm:$0xff]  }
  0x17   :  { %975 = vmatpush3.bf16.msra.mxu0 %v1104_v21  ;;  %v1150_v1 = vld [vmem:[%s1439_s1 + $0x138] sm:$0xff]   ;;  %v1152_v3 = vld [vmem:[%s1440_s0 + $0x10] ss:$36 sps:$4 sm:$0xff]   ;;  %v1160_v10 = vld [vmem:[%s1439_s1 + $0x208] sm:$0xff]  }
  0x18   :  { %976 = vmatprep.subr.bf16.mxu0 %v1107_v24  ;;  %v1151_v2 = vld [vmem:[%s1439_s1 + $0x1f8] sm:$0xff]   ;;  %v1161_v11 = vld [vmem:[%s1439_s1 + $0x210] sm:$0xff]   ;;  %v1163_v13 = vld [vmem:[%s1439_s1 + $0x220] sm:$0xff]  }
  0x19   :  { %997 = vmatpush3.bf16.msra.mxu1 %v1106_v23  ;;  %v1154_v4 = vld [vmem:[%s1440_s0 + $0x14] ss:$36 sps:$4 sm:$0xff]   ;;  %v1158_v8 = vld [vmem:[%s1440_s0 + $0x1c] ss:$36 sps:$4 sm:$0xff]   ;;  %v1164_v14 = vld [vmem:[%s1439_s1 + $0x228] sm:$0xff]  }
  0x1a   :  { %998 = vmatprep.subr.bf16.mxu1 %v1109_v26  ;;  %v1155_v5 = vld [vmem:[%s1439_s1 + $0x1b8] sm:$0xff]   ;;  %v1165_v15 = vld [vmem:[%s1439_s1 + $0x230] sm:$0xff]   ;;  %v1167_v17 = vld [vmem:[%s1440_s0 + $0x20] ss:$36 sps:$4 sm:$0xff]  }
  0x1b   :  { %977 = vmatpush3.bf16.msra.mxu0 %v1108_v25  ;;  %v1156_v7 = vld [vmem:[%s1440_s0 + $0x18] ss:$36 sps:$4 sm:$0xff]   ;;  %v873_v19 = vld [vmem:[%s1441_s2] ss:$0 sm:$0xff] }
  0x1c   :  { %978 = vmatprep.subr.bf16.mxu0 %v1111_v28  ;;  %v1162_v12 = vld [vmem:[%s1439_s1 + $0x218] sm:$0xff]  }
  0x1d   :  { %999 = vmatpush3.bf16.msra.mxu1 %v1110_v27  ;;  %v1166_v16 = vld [vmem:[%s1439_s1 + $0x238] sm:$0xff]  }
  0x1e   :  { %1000 = vmatprep.subr.bf16.mxu1 %v1113_v30 }
  0x1f   :  { %979 = vmatpush3.bf16.msra.mxu0 %v1112_v29 }
  0x20   :  { %1008 = vmatprep.subr.bf16.mxu0 %v1118_v34 }
  0x21   :  { %1001 = vmatpush3.bf16.msra.mxu1 %v1117_v33 }
  0x22   :  { %687 = vmatmul.mubr.bf16.vlgmr.msra.gmra.mrb[0].mxu0 %v1114_v31  ;;  %1030 = vmatprep.subr.bf16.mxu1 %v1123_v38 }
  0x23   :  { %1009 = vmatpush3.bf16.msra.mxu0 %v1122_v37  ;;  %768 = vmatprep.mubr.bf16.mxu0 %v1154_v4 }
  0x24   :  { %728 = vmatmul.mubr.bf16.vlgmr.msra.gmra.mrb[0].mxu1 %v1119_v35  ;;  %1010 = vmatprep.subr.bf16.mxu0 %v1125_v40 }
  0x25   :  { %1031 = vmatpush3.bf16.msra.mxu1 %v1124_v39  ;;  %809 = vmatprep.mubr.bf16.mxu1 %v1158_v8 }
  0x26   :  { %1032 = vmatprep.subr.bf16.mxu1 %v1127_v42 }
  0x27   :  { %1011 = vmatpush3.bf16.msra.mxu0 %v1126_v41 }
  0x28   :  { %1012 = vmatprep.subr.bf16.mxu0 %v1129_v44 }
  0x29   :  { %1033 = vmatpush3.bf16.msra.mxu1 %v1128_v43 }
  0x2a   :  { %1034 = vmatprep.subr.bf16.mxu1 %v1131_v46 }
  0x2b   :  { %1013 = vmatpush3.bf16.msra.mxu0 %v1130_v45 }
  0x2c   :  { %1014 = vmatprep.subr.bf16.mxu0 %v1133_v48 }
  0x2d   :  { %1035 = vmatpush3.bf16.msra.mxu1 %v1132_v47 }
  0x2e   :  { %1036 = vmatprep.subr.bf16.mxu1 %v1135_v50 }
  0x2f   :  { %1015 = vmatpush3.bf16.msra.mxu0 %v1134_v49 }
  0x30   :  { %1016 = vmatprep.subr.bf16.mxu0 %v1137_v52 }
  0x31   :  { %1037 = vmatpush3.bf16.msra.mxu1 %v1136_v51 }
  0x32   :  { %1038 = vmatprep.subr.bf16.mxu1 %v1139_v54 }
  0x33   :  { %1017 = vmatpush3.bf16.msra.mxu0 %v1138_v53 }
  0x34   :  { %1018 = vmatprep.subr.bf16.mxu0 %v1141_v56 }
  0x35   :  { %1039 = vmatpush3.bf16.msra.mxu1 %v1140_v55 }
  0x36   :  { %1040 = vmatprep.subr.bf16.mxu1 %v1143_v58 }
  0x37   :  { %1019 = vmatpush3.bf16.msra.mxu0 %v1142_v57 }
  0x38   :  { %1020 = vmatprep.subr.bf16.mxu0 %v1145_v60 }
  0x39   :  { %1041 = vmatpush3.bf16.msra.mxu1 %v1144_v59 }
  0x3a   :  { %1042 = vmatprep.subr.bf16.mxu1 %v1147_v62 }
  0x3b   :  { %1021 = vmatpush3.bf16.msra.mxu0 %v1146_v61 }
  0x3c   :  { %1022 = vmatprep.subr.bf16.mxu0 %v1149_v0 }
  0x3d   :  { %1043 = vmatpush3.bf16.msra.mxu1 %v1148_v63 }
  0x3e   :  { %1044 = vmatprep.subr.bf16.mxu1 %v1151_v2 }
  0x3f   :  { %1023 = vmatpush3.bf16.msra.mxu0 %v1150_v1 }
  0x40   :  { %1061 = vmatprep.subr.bf16.mxu0 %v1168_v6 }
  0x41   :  { %1045 = vmatpush3.bf16.msra.mxu1 %v1155_v5 }
  0x42   :  { %769 = vmatmul.mubr.bf16.vlgmr.msra.gmra.mrb[4].mxu0 %v1152_v3 }
  0x43   :  { %1077 = vmatprep.mubr.msk.bf16.mxu0 %vm1169_vm0, %v1168_v6  ;;  %1062 = vmatpush3.bf16.msra.mxu0 %v1159_v9 }
  0x44   :  { %810 = vmatmul.mubr.bf16.vlgmr.msra.gmra.mrb[4].mxu1 %v1156_v7  ;;  %1063 = vmatprep.subr.bf16.mxu0 %v1168_v6 }
  0x47   :  { %1064 = vmatpush3.bf16.msra.mxu0 %v1160_v10 }
  0x48   :  { %1065 = vmatprep.subr.bf16.mxu0 %v1168_v6 }
  0x4b   :  { %1066 = vmatpush3.bf16.msra.mxu0 %v1161_v11 }
  0x4c   :  { %1067 = vmatprep.subr.bf16.mxu0 %v1168_v6 }
  0x4f   :  { %1068 = vmatpush3.bf16.msra.mxu0 %v1162_v12 }
  0x50   :  { %1069 = vmatprep.subr.bf16.mxu0 %v1168_v6 }
  0x53   :  { %1070 = vmatpush3.bf16.msra.mxu0 %v1163_v13 }
  0x54   :  { %1071 = vmatprep.subr.bf16.mxu0 %v1168_v6 }
  0x57   :  { %1072 = vmatpush3.bf16.msra.mxu0 %v1164_v14 }
  0x58   :  { %1073 = vmatprep.subr.bf16.mxu0 %v1168_v6 }
  0x5b   :  { %1074 = vmatpush3.bf16.msra.mxu0 %v1165_v15 }
  0x5c   :  { %1075 = vmatprep.subr.bf16.mxu0 %v1168_v6 }
  0x5f   :  { %1076 = vmatpush3.bf16.msra.mxu0 %v1166_v16 }
  0x62   :  { %1078 = vmatmul.mubr.bf16.vlgmr.msra.gmra.mrb[8].mxu0 %v1167_v17 }
  0xf5   :  { %v980_v18 = vpop.f32.mrb[0].mxu0 }
  0xf6   :  { %v981_v20 = vpop.f32.mrb[1].mxu0 }
  0xf7   :  { %v982_v21 = vadd.f32 %v981_v20, %v980_v18  ;;  %v983_v22 = vpop.f32.mrb[2].mxu0  ;;  %v1002_v23 = vpop.f32.mrb[0].mxu1 }
  0xf8   :  { %v984_v24 = vpop.f32.mrb[3].mxu0  ;;  %v1003_v27 = vpop.f32.mrb[1].mxu1 }
  0xf9   :  { %v689_v25 = vadd.f32 %v982_v21, %v873_v19  ;;  %v985_v26 = vadd.f32 %v984_v24, %v983_v22  ;;  %v1004_v28 = vadd.f32 %v1003_v27, %v1002_v23  ;;  %v1005_v29 = vpop.f32.mrb[2].mxu1 }
  0xfa   :  { %v1006_v31 = vpop.f32.mrb[3].mxu1 }
  0xfb   :  { %v692_v30 = vadd.f32 %v985_v26, %v873_v19  ;;  %v730_v32 = vadd.f32 %v1004_v28, %v689_v25  ;;  %v1007_v33 = vadd.f32 %v1006_v31, %v1005_v29 }
  0xfd   :  { %v733_v34 = vadd.f32 %v1007_v33, %v692_v30 }
 0x115   :  { %v1024_v35 = vpop.f32.mrb[4].mxu0 }
 0x116   :  { %v1025_v36 = vpop.f32.mrb[5].mxu0 }
 0x117   :  { %v1026_v37 = vadd.f32 %v1025_v36, %v1024_v35  ;;  %v1027_v38 = vpop.f32.mrb[6].mxu0  ;;  %v1046_v39 = vpop.f32.mrb[4].mxu1 }
 0x118   :  { %v1028_v40 = vpop.f32.mrb[7].mxu0  ;;  %v1047_v43 = vpop.f32.mrb[5].mxu1 }
 0x119   :  { %v771_v41 = vadd.f32 %v1026_v37, %v730_v32  ;;  %v1029_v42 = vadd.f32 %v1028_v40, %v1027_v38  ;;  %v1048_v44 = vadd.f32 %v1047_v43, %v1046_v39  ;;  %v1049_v45 = vpop.f32.mrb[6].mxu1 }
 0x11a   :  { %v1050_v47 = vpop.f32.mrb[7].mxu1 }
 0x11b   :  { %v774_v46 = vadd.f32 %v1029_v42, %v733_v34  ;;  %v1051_v48 = vadd.f32 %v1050_v47, %v1049_v45  ;;  %v812_v49 = vadd.f32 %v1048_v44, %v771_v41 }
 0x11d   :  { %v815_v50 = vadd.f32 %v1051_v48, %v774_v46 }
 0x135   :  { %v852_v51 = vpop.f32.mrb[8].mxu0 }
 0x136   :  { %v853_v52 = vadd.f32 %v852_v51, %v812_v49  ;;  %v1079_v53 = vpop.f32.mrb[9].mxu0 }
 0x137   :  { %v855_v54 = vpop.f32.mrb[10].mxu0 }
 0x138   :  { %v856_v55 = vadd.f32 %v855_v54, %v815_v50  ;;  %v1080_v56 = vpop.f32.mrb[11].mxu0 }
 0x13a   :  { %v962_v57 = vpack.c.bf16 %v856_v55, %v853_v52 }
 0x13c   :  { %963 = vst [vmem:[%s1442_s3] sm:$0xff] %v962_v57  }

// kernel: feature_tunk_push.11
= control target key start
LH: loop header
LB: loop body
LE: loop exit
PB: predicated region body
PF: predicated region fallthrough
CT: control target
= control target key end

     0   :  { %v46_v37 = vlaneseq  ;;  %s3727_s1 = inlined_call_operand.vmem [shape: bf16[1024,512], index: 1, kind: input, shape index: {}]   ;;  %s3728_s0 = inlined_call_operand.vmem [shape: bf16[16,1024], index: 0, kind: input, shape index: {}]   ;;  %s3729_s2 = inlined_call_operand.vmem [shape: f32[1,1024], index: 2, kind: input, shape index: {}]   ;;  %s3730_s3 = inlined_call_operand.vmem [shape: f32[1,1024], index: 3, kind: input, shape index: {}]   ;;  %s3731_s4 = inlined_call_operand.vmem [shape: f32[1,512], index: 4, kind: input, shape index: {}]   ;;  %s3732_s5 = inlined_call_operand.vmem [shape: bf16[16,512], index: 5, kind: output, shape index: {}]  }
   0x1   :  { %v2414_v0 = vld [vmem:[%s3727_s1 + $0x4] ss:$16 sps:$4 sm:$0xff]   ;;  %v2416_v1 = vld [vmem:[%s3727_s1 + $0xc] ss:$16 sps:$4 sm:$0xff]   ;;  %v2418_v2 = vld [vmem:[%s3727_s1] ss:$16 sps:$4 sm:$0xff]  }
   0x2   :  { %1742 = vmatprep.subr.bf16.mxu0 %v2414_v0  ;;  %v2419_v3 = vld [vmem:[%s3727_s1 + $0x8] ss:$16 sps:$4 sm:$0xff]   ;;  %1914 = vmatprep.subr.bf16.mxu1 %v2416_v1  ;;  %v2420_v4 = vld [vmem:[%s3727_s1 + $0x24] ss:$16 sps:$4 sm:$0xff]   ;;  %v2422_v5 = vld [vmem:[%s3727_s1 + $0x2c] ss:$16 sps:$4 sm:$0xff]  }
   0x3   :  { %1743 = vmatpush1.bf16.msra.mxu0 %v2418_v2  ;;  %1915 = vmatpush1.bf16.msra.mxu1 %v2419_v3  ;;  %v2424_v6 = vld [vmem:[%s3727_s1 + $0x20] ss:$16 sps:$4 sm:$0xff]   ;;  %v2425_v7 = vld [vmem:[%s3727_s1 + $0x28] ss:$16 sps:$4 sm:$0xff]   ;;  %v2426_v8 = vld [vmem:[%s3727_s1 + $0x44] ss:$16 sps:$4 sm:$0xff]  }
   0x4   :  { %1744 = vmatprep.subr.bf16.mxu0 %v2420_v4  ;;  %1916 = vmatprep.subr.bf16.mxu1 %v2422_v5  ;;  %v2428_v9 = vld [vmem:[%s3727_s1 + $0x4c] ss:$16 sps:$4 sm:$0xff]   ;;  %v2430_v10 = vld [vmem:[%s3727_s1 + $0x40] ss:$16 sps:$4 sm:$0xff]   ;;  %v2431_v11 = vld [vmem:[%s3727_s1 + $0x48] ss:$16 sps:$4 sm:$0xff]  }
   0x5   :  { %v2432_v12 = vld [vmem:[%s3727_s1 + $0x64] ss:$16 sps:$4 sm:$0xff]   ;;  %v2434_v13 = vld [vmem:[%s3727_s1 + $0x6c] ss:$16 sps:$4 sm:$0xff]   ;;  %v2436_v14 = vld [vmem:[%s3727_s1 + $0x60] ss:$16 sps:$4 sm:$0xff]  }
   0x6   :  { %v2437_v15 = vld [vmem:[%s3727_s1 + $0x68] ss:$16 sps:$4 sm:$0xff]   ;;  %v2438_v16 = vld [vmem:[%s3727_s1 + $0x84] ss:$16 sps:$4 sm:$0xff]   ;;  %v2440_v17 = vld [vmem:[%s3727_s1 + $0x8c] ss:$16 sps:$4 sm:$0xff]  }
   0x7   :  { %1745 = vmatpush1.bf16.msra.mxu0 %v2424_v6  ;;  %1917 = vmatpush1.bf16.msra.mxu1 %v2425_v7  ;;  %v2442_v18 = vld [vmem:[%s3727_s1 + $0x80] ss:$16 sps:$4 sm:$0xff]   ;;  %v2443_v19 = vld [vmem:[%s3727_s1 + $0x88] ss:$16 sps:$4 sm:$0xff]   ;;  %v2444_v20 = vld [vmem:[%s3727_s1 + $0xa4] ss:$16 sps:$4 sm:$0xff]  }
   0x8   :  { %1746 = vmatprep.subr.bf16.mxu0 %v2426_v8  ;;  %1918 = vmatprep.subr.bf16.mxu1 %v2428_v9  ;;  %v2446_v21 = vld [vmem:[%s3727_s1 + $0xac] ss:$16 sps:$4 sm:$0xff]   ;;  %v2448_v22 = vld [vmem:[%s3727_s1 + $0xa0] ss:$16 sps:$4 sm:$0xff]   ;;  %v2449_v23 = vld [vmem:[%s3727_s1 + $0xa8] ss:$16 sps:$4 sm:$0xff]  }
   0x9   :  { %v2450_v24 = vld [vmem:[%s3727_s1 + $0xc4] ss:$16 sps:$4 sm:$0xff]   ;;  %v2452_v25 = vld [vmem:[%s3727_s1 + $0xcc] ss:$16 sps:$4 sm:$0xff]   ;;  %v2454_v26 = vld [vmem:[%s3727_s1 + $0xc0] ss:$16 sps:$4 sm:$0xff]  }
   0xa   :  { %v2455_v27 = vld [vmem:[%s3727_s1 + $0xc8] ss:$16 sps:$4 sm:$0xff]   ;;  %v2456_v28 = vld [vmem:[%s3727_s1 + $0xe4] ss:$16 sps:$4 sm:$0xff]   ;;  %v2458_v29 = vld [vmem:[%s3727_s1 + $0xec] ss:$16 sps:$4 sm:$0xff]  }
   0xb   :  { %1747 = vmatpush1.bf16.msra.mxu0 %v2430_v10  ;;  %1919 = vmatpush1.bf16.msra.mxu1 %v2431_v11  ;;  %v2460_v30 = vld [vmem:[%s3727_s1 + $0xe0] ss:$16 sps:$4 sm:$0xff]   ;;  %v2461_v31 = vld [vmem:[%s3727_s1 + $0xe8] ss:$16 sps:$4 sm:$0xff]   ;;  %v2462_v32 = vld [vmem:[%s3727_s1 + $0x104] ss:$16 sps:$4 sm:$0xff]  }
   0xc   :  { %1748 = vmatprep.subr.bf16.mxu0 %v2432_v12  ;;  %1920 = vmatprep.subr.bf16.mxu1 %v2434_v13  ;;  %v2464_v33 = vld [vmem:[%s3727_s1 + $0x10c] ss:$16 sps:$4 sm:$0xff]   ;;  %v2466_v34 = vld [vmem:[%s3727_s1 + $0x100] ss:$16 sps:$4 sm:$0xff]   ;;  %v2467_v35 = vld [vmem:[%s3727_s1 + $0x108] ss:$16 sps:$4 sm:$0xff]  }
   0xd   :  { %v2468_v36 = vld [vmem:[%s3727_s1 + $0x124] ss:$16 sps:$4 sm:$0xff]   ;;  %v2470_v38 = vld [vmem:[%s3727_s1 + $0x12c] ss:$16 sps:$4 sm:$0xff]   ;;  %v2472_v39 = vld [vmem:[%s3727_s1 + $0x120] ss:$16 sps:$4 sm:$0xff]  }
   0xe   :  { %v2473_v40 = vld [vmem:[%s3727_s1 + $0x128] ss:$16 sps:$4 sm:$0xff]   ;;  %v2474_v41 = vld [vmem:[%s3727_s1 + $0x144] ss:$16 sps:$4 sm:$0xff]   ;;  %v2953_v42 = vshrl.u32 %v46_v37, 7 }
   0xf   :  { %1749 = vmatpush1.bf16.msra.mxu0 %v2436_v14  ;;  %1921 = vmatpush1.bf16.msra.mxu1 %v2437_v15  ;;  %v2476_v43 = vld [vmem:[%s3727_s1 + $0x14c] ss:$16 sps:$4 sm:$0xff]   ;;  %v2478_v44 = vld [vmem:[%s3727_s1 + $0x140] ss:$16 sps:$4 sm:$0xff]   ;;  %v2479_v45 = vld [vmem:[%s3727_s1 + $0x148] ss:$16 sps:$4 sm:$0xff]  }
  0x10   :  { %1750 = vmatprep.subr.bf16.mxu0 %v2438_v16  ;;  %1922 = vmatprep.subr.bf16.mxu1 %v2440_v17  ;;  %v2480_v46 = vld [vmem:[%s3727_s1 + $0x164] ss:$16 sps:$4 sm:$0xff]   ;;  %v2968_v47 = vsub.s32 1, %v2953_v42  ;;  %v2482_v48 = vld [vmem:[%s3727_s1 + $0x16c] ss:$16 sps:$4 sm:$0xff]   ;;  %v2996_v56 = vsub.s32 0, %v2953_v42 }
  0x11   :  { %v2484_v49 = vld [vmem:[%s3727_s1 + $0x160] ss:$16 sps:$4 sm:$0xff]   ;;  %v2485_v50 = vld [vmem:[%s3727_s1 + $0x168] ss:$16 sps:$4 sm:$0xff]   ;;  %v2486_v57 = vld [vmem:[%s3727_s1 + $0x184] ss:$16 sps:$4 sm:$0xff]  }
  0x12   :  { %v20_v51 = vld [vmem:[%s3728_s0] sm:$0xff]  ;;  %v2488_v61 = vld [vmem:[%s3727_s1 + $0x18c] ss:$16 sps:$4 sm:$0xff]   ;;  %v2491_v1 = vld [vmem:[%s3727_s1 + $0x188] ss:$16 sps:$4 sm:$0xff]  }
  0x13   :  { %1751 = vmatpush1.bf16.msra.mxu0 %v2442_v18  ;;  %1923 = vmatpush1.bf16.msra.mxu1 %v2443_v19  ;;  %v24_v52 = vld [vmem:[%s3728_s0 + $0x20] sm:$0xff]  ;;  %v29_v53 = vunpack.c.h.bf16 %v20_v51  ;;  %v28_v2 = vunpack.c.l.bf16 %v20_v51  ;;  %v2494_v8 = vld [vmem:[%s3727_s1 + $0x1ac] ss:$16 sps:$4 sm:$0xff]   ;;  %v2497_v15 = vld [vmem:[%s3727_s1 + $0x1a8] ss:$16 sps:$4 sm:$0xff]  }
  0x14   :  { %1752 = vmatprep.subr.bf16.mxu0 %v2444_v20  ;;  %1924 = vmatprep.subr.bf16.mxu1 %v2446_v21  ;;  %v2988_v54 = vld [vmem:[%s3729_s2] sm:$0xff]  ;;  %v37_v58 = vunpack.c.h.bf16 %v24_v52  ;;  %v36_v3 = vunpack.c.l.bf16 %v24_v52  ;;  %v2500_v18 = vld [vmem:[%s3727_s1 + $0x1cc] ss:$16 sps:$4 sm:$0xff]   ;;  %v2519_v37 = vld [vmem:[%s3727_s1 + $0x228] ss:$16 sps:$4 sm:$0xff]  }
  0x15   :  { %v2993_v55 = vld [vmem:[%s3730_s3] sm:$0xff]  ;;  %v53_v59 = vrot.slane %v2988_v54, %v2968_v47  ;;  %v49_v4 = vrot.slane %v2988_v54, %v2996_v56  ;;  %v2537_v51 = vld [vmem:[%s3727_s1 + $0x288] ss:$16 sps:$4 sm:$0xff]  }
  0x16   :  { %v111_v60 = vrot.slane %v2993_v55, %v2968_v47  ;;  %v2490_v0 = vld [vmem:[%s3727_s1 + $0x180] ss:$16 sps:$4 sm:$0xff]   ;;  %v2492_v5 = vld [vmem:[%s3727_s1 + $0x1a4] ss:$16 sps:$4 sm:$0xff]   ;;  %v107_v14 = vrot.slane %v2993_v55, %v2996_v56 }
  0x17   :  { %1753 = vmatpush1.bf16.msra.mxu0 %v2448_v22  ;;  %1925 = vmatpush1.bf16.msra.mxu1 %v2449_v23  ;;  %v87_v62 = vmul.f32 %v53_v59, %v29_v53  ;;  %v95_v63 = vmul.f32 %v53_v59, %v37_v58  ;;  %v2496_v11 = vld [vmem:[%s3727_s1 + $0x1a0] ss:$16 sps:$4 sm:$0xff]   ;;  %v86_v12 = vmul.f32 %v49_v4, %v28_v2  ;;  %v2498_v17 = vld [vmem:[%s3727_s1 + $0x1c4] ss:$16 sps:$4 sm:$0xff]   ;;  %v2503_v22 = vld [vmem:[%s3727_s1 + $0x1c8] ss:$16 sps:$4 sm:$0xff]  }
  0x18   :  { %1754 = vmatprep.subr.bf16.mxu0 %v2450_v24  ;;  %1926 = vmatprep.subr.bf16.mxu1 %v2452_v25  ;;  %v94_v13 = vmul.f32 %v49_v4, %v36_v3  ;;  %v2502_v19 = vld [vmem:[%s3727_s1 + $0x1c0] ss:$16 sps:$4 sm:$0xff]   ;;  %v2504_v23 = vld [vmem:[%s3727_s1 + $0x1e4] ss:$16 sps:$4 sm:$0xff]   ;;  %v2506_v24 = vld [vmem:[%s3727_s1 + $0x1ec] ss:$16 sps:$4 sm:$0xff]  }
  0x19   :  { %v145_v6 = vadd.f32 %v111_v60, %v87_v62  ;;  %v153_v7 = vadd.f32 %v111_v60, %v95_v63  ;;  %v144_v20 = vadd.f32 %v107_v14, %v86_v12  ;;  %v2508_v25 = vld [vmem:[%s3727_s1 + $0x1e0] ss:$16 sps:$4 sm:$0xff]   ;;  %v2542_v52 = vld [vmem:[%s3727_s1 + $0x2a4] ss:$16 sps:$4 sm:$0xff]   ;;  %v2545_v53 = vld [vmem:[%s3727_s1 + $0x2ac] ss:$16 sps:$4 sm:$0xff]  }
  0x1a   :  { %v152_v21 = vadd.f32 %v107_v14, %v94_v13  ;;  %v2540_v58 = vld [vmem:[%s3727_s1 + $0x2a0] ss:$16 sps:$4 sm:$0xff]   ;;  %v2543_v59 = vld [vmem:[%s3727_s1 + $0x2a8] ss:$16 sps:$4 sm:$0xff]   ;;  %v2548_v60 = vld [vmem:[%s3727_s1 + $0x2c4] ss:$16 sps:$4 sm:$0xff]  }
  0x1b   :  { %1755 = vmatpush1.bf16.msra.mxu0 %v2454_v26  ;;  %1927 = vmatpush1.bf16.msra.mxu1 %v2455_v27  ;;  %v161_v9 = vmax.f32 %v145_v6, 0.0  ;;  %v169_v10 = vmax.f32 %v153_v7, 0.0  ;;  %v160_v26 = vmax.f32 %v144_v20, 0.0  ;;  %v2546_v62 = vld [vmem:[%s3727_s1 + $0x2c0] ss:$16 sps:$4 sm:$0xff]  }
  0x1c   :  { %1756 = vmatprep.subr.bf16.mxu0 %v2456_v28  ;;  %1928 = vmatprep.subr.bf16.mxu1 %v2458_v29  ;;  %v168_v27 = vmax.f32 %v152_v21, 0.0  ;;  %v2509_v28 = vld [vmem:[%s3727_s1 + $0x1e8] ss:$16 sps:$4 sm:$0xff]   ;;  %v2512_v29 = vld [vmem:[%s3727_s1 + $0x204] ss:$16 sps:$4 sm:$0xff]  }
  0x1d   :  { %v177_v16 = vpack.c.bf16 %v169_v10, %v161_v9  ;;  %v2549_v2 = vld [vmem:[%s3727_s1 + $0x2c8] ss:$16 sps:$4 sm:$0xff]   ;;  %v2554_v3 = vld [vmem:[%s3727_s1 + $0x2e4] ss:$16 sps:$4 sm:$0xff]   ;;  %v2557_v7 = vld [vmem:[%s3727_s1 + $0x2ec] ss:$16 sps:$4 sm:$0xff]  }
  0x1e   :  { %v2552_v10 = vld [vmem:[%s3727_s1 + $0x2e0] ss:$16 sps:$4 sm:$0xff]   ;;  %v2560_v12 = vld [vmem:[%s3727_s1 + $0x304] ss:$16 sps:$4 sm:$0xff]  }
  0x1f   :  { %1757 = vmatpush1.bf16.msra.mxu0 %v2460_v30  ;;  %1929 = vmatpush1.bf16.msra.mxu1 %v2461_v31  ;;  %v2515_v30 = vld [vmem:[%s3727_s1 + $0x20c] ss:$16 sps:$4 sm:$0xff]   ;;  %v2510_v31 = vld [vmem:[%s3727_s1 + $0x200] ss:$16 sps:$4 sm:$0xff]   ;;  %v2566_v20 = vld [vmem:[%s3727_s1 + $0x324] ss:$16 sps:$4 sm:$0xff]  }
  0x20   :  { %1758 = vmatprep.subr.bf16.mxu0 %v2462_v32  ;;  %1930 = vmatprep.subr.bf16.mxu1 %v2464_v33  ;;  %v176_v32 = vpack.c.bf16 %v168_v27, %v160_v26  ;;  %v2513_v33 = vld [vmem:[%s3727_s1 + $0x208] ss:$16 sps:$4 sm:$0xff]   ;;  %v2575_v26 = vld [vmem:[%s3727_s1 + $0x34c] ss:$16 sps:$4 sm:$0xff]   ;;  %v2570_v27 = vld [vmem:[%s3727_s1 + $0x340] ss:$16 sps:$4 sm:$0xff]  }
  0x21   :  { %1774 = vmatprep.mubr.bf16.mxu0 %v177_v16  ;;  %1946 = vmatprep.mubr.bf16.mxu1 %v177_v16 }
  0x23   :  { %1759 = vmatpush1.bf16.msra.mxu0 %v2466_v34  ;;  %1931 = vmatpush1.bf16.msra.mxu1 %v2467_v35  ;;  %v2518_v34 = vld [vmem:[%s3727_s1 + $0x224] ss:$16 sps:$4 sm:$0xff]   ;;  %v2521_v35 = vld [vmem:[%s3727_s1 + $0x22c] ss:$16 sps:$4 sm:$0xff]  }
  0x24   :  { %1760 = vmatprep.subr.bf16.mxu0 %v2468_v36  ;;  %1932 = vmatprep.subr.bf16.mxu1 %v2470_v38  ;;  %v2516_v36 = vld [vmem:[%s3727_s1 + $0x220] ss:$16 sps:$4 sm:$0xff]   ;;  %v2524_v38 = vld [vmem:[%s3727_s1 + $0x244] ss:$16 sps:$4 sm:$0xff]  }
  0x27   :  { %1761 = vmatpush1.bf16.msra.mxu0 %v2472_v39  ;;  %1933 = vmatpush1.bf16.msra.mxu1 %v2473_v40  ;;  %v2527_v39 = vld [vmem:[%s3727_s1 + $0x24c] ss:$16 sps:$4 sm:$0xff]   ;;  %v2522_v40 = vld [vmem:[%s3727_s1 + $0x240] ss:$16 sps:$4 sm:$0xff]  }
  0x28   :  { %1762 = vmatprep.subr.bf16.mxu0 %v2474_v41  ;;  %1934 = vmatprep.subr.bf16.mxu1 %v2476_v43  ;;  %v2525_v41 = vld [vmem:[%s3727_s1 + $0x248] ss:$16 sps:$4 sm:$0xff]   ;;  %v2530_v43 = vld [vmem:[%s3727_s1 + $0x264] ss:$16 sps:$4 sm:$0xff]  }
  0x2b   :  { %1763 = vmatpush1.bf16.msra.mxu0 %v2478_v44  ;;  %1935 = vmatpush1.bf16.msra.mxu1 %v2479_v45  ;;  %v2533_v44 = vld [vmem:[%s3727_s1 + $0x26c] ss:$16 sps:$4 sm:$0xff]   ;;  %v2528_v45 = vld [vmem:[%s3727_s1 + $0x260] ss:$16 sps:$4 sm:$0xff]  }
  0x2c   :  { %1764 = vmatprep.subr.bf16.mxu0 %v2480_v46  ;;  %1936 = vmatprep.subr.bf16.mxu1 %v2482_v48  ;;  %v2531_v46 = vld [vmem:[%s3727_s1 + $0x268] ss:$16 sps:$4 sm:$0xff]   ;;  %v2536_v48 = vld [vmem:[%s3727_s1 + $0x284] ss:$16 sps:$4 sm:$0xff]  }
  0x2f   :  { %1765 = vmatpush1.bf16.msra.mxu0 %v2484_v49  ;;  %1937 = vmatpush1.bf16.msra.mxu1 %v2485_v50  ;;  %v2539_v49 = vld [vmem:[%s3727_s1 + $0x28c] ss:$16 sps:$4 sm:$0xff]   ;;  %v2534_v50 = vld [vmem:[%s3727_s1 + $0x280] ss:$16 sps:$4 sm:$0xff]  }
  0x30   :  { %1766 = vmatprep.subr.bf16.mxu0 %v2486_v57  ;;  %1938 = vmatprep.subr.bf16.mxu1 %v2488_v61  ;;  %v3121_v57 = vsub.s32 3, %v2953_v42  ;;  %v2551_v61 = vld [vmem:[%s3727_s1 + $0x2cc] ss:$16 sps:$4 sm:$0xff]  }
  0x32   :  { %v61_v63 = vrot.slane %v2988_v54, %v3121_v57  ;;  %v119_v6 = vrot.slane %v2993_v55, %v3121_v57 }
  0x33   :  { %1767 = vmatpush1.bf16.msra.mxu0 %v2490_v0  ;;  %1939 = vmatpush1.bf16.msra.mxu1 %v2491_v1  ;;  %v3143_v0 = vld [vmem:[%s3728_s0 + $0x8] sm:$0xff] }
  0x34   :  { %1768 = vmatprep.subr.bf16.mxu0 %v2492_v5  ;;  %1940 = vmatprep.subr.bf16.mxu1 %v2494_v8  ;;  %v3148_v1 = vld [vmem:[%s3728_s0 + $0x28] sm:$0xff]  ;;  %v31_v4 = vunpack.c.h.bf16 %v3143_v0 }
  0x35   :  { %v39_v5 = vunpack.c.h.bf16 %v3148_v1 }
  0x36   :  { %v89_v8 = vmul.f32 %v61_v63, %v31_v4  ;;  %v68_v4 = vsub.s32 5, %v2953_v42 }
  0x37   :  { %1769 = vmatpush1.bf16.msra.mxu0 %v2496_v11  ;;  %1941 = vmatpush1.bf16.msra.mxu1 %v2497_v15  ;;  %v97_v9 = vmul.f32 %v61_v63, %v39_v5  ;;  %v2555_v11 = vld [vmem:[%s3727_s1 + $0x2e8] ss:$16 sps:$4 sm:$0xff]   ;;  %v2563_v15 = vld [vmem:[%s3727_s1 + $0x30c] ss:$16 sps:$4 sm:$0xff]   ;;  %v2606_v5 = vld [vmem:[%s3727_s1 + $0x400] ss:$16 sps:$4 sm:$0xff]  }
  0x38   :  { %1770 = vmatprep.subr.bf16.mxu0 %v2498_v17  ;;  %1942 = vmatprep.subr.bf16.mxu1 %v2500_v18  ;;  %v147_v13 = vadd.f32 %v119_v6, %v89_v8  ;;  %v2558_v18 = vld [vmem:[%s3727_s1 + $0x300] ss:$16 sps:$4 sm:$0xff]   ;;  %v2603_v63 = vld [vmem:[%s3727_s1 + $0x3e8] ss:$16 sps:$4 sm:$0xff]   ;;  %v2614_v8 = vld [vmem:[%s3727_s1 + $0x424] ss:$16 sps:$4 sm:$0xff]  }
  0x39   :  { %v155_v14 = vadd.f32 %v119_v6, %v97_v9  ;;  %v2609_v6 = vld [vmem:[%s3727_s1 + $0x408] ss:$16 sps:$4 sm:$0xff]   ;;  %v2617_v9 = vld [vmem:[%s3727_s1 + $0x42c] ss:$16 sps:$4 sm:$0xff]  }
  0x3a   :  { %v163_v16 = vmax.f32 %v147_v13, 0.0 }
  0x3b   :  { %1771 = vmatpush1.bf16.msra.mxu0 %v2502_v19  ;;  %1943 = vmatpush1.bf16.msra.mxu1 %v2503_v22  ;;  %v171_v17 = vmax.f32 %v155_v14, 0.0  ;;  %v2561_v19 = vld [vmem:[%s3727_s1 + $0x308] ss:$16 sps:$4 sm:$0xff]   ;;  %v2569_v22 = vld [vmem:[%s3727_s1 + $0x32c] ss:$16 sps:$4 sm:$0xff]   ;;  %v127_v14 = vrot.slane %v2993_v55, %v68_v4 }
  0x3c   :  { %1772 = vmatprep.subr.bf16.mxu0 %v2504_v23  ;;  %1944 = vmatprep.subr.bf16.mxu1 %v2506_v24  ;;  %v2564_v23 = vld [vmem:[%s3727_s1 + $0x320] ss:$16 sps:$4 sm:$0xff]   ;;  %v2567_v24 = vld [vmem:[%s3727_s1 + $0x328] ss:$16 sps:$4 sm:$0xff]  }
  0x3d   :  { %v179_v21 = vpack.c.bf16 %v171_v17, %v163_v16  ;;  %v2620_v17 = vld [vmem:[%s3727_s1 + $0x444] ss:$16 sps:$4 sm:$0xff]  }
  0x3f   :  { %1773 = vmatpush1.bf16.msra.mxu0 %v2508_v25  ;;  %1945 = vmatpush1.bf16.msra.mxu1 %v2509_v28  ;;  %v2572_v25 = vld [vmem:[%s3727_s1 + $0x344] ss:$16 sps:$4 sm:$0xff]   ;;  %v2573_v28 = vld [vmem:[%s3727_s1 + $0x348] ss:$16 sps:$4 sm:$0xff]  }
  0x40   :  { %1785 = vmatprep.subr.bf16.mxu0 %v2512_v29  ;;  %1957 = vmatprep.subr.bf16.mxu1 %v2515_v30  ;;  %v2578_v29 = vld [vmem:[%s3727_s1 + $0x364] ss:$16 sps:$4 sm:$0xff]   ;;  %v2581_v30 = vld [vmem:[%s3727_s1 + $0x36c] ss:$16 sps:$4 sm:$0xff]  }
  0x42   :  { %1775 = vmatmul.mubr.bf16.vlgmr.msra.gmra.mrb[0].mxu0 %v176_v32  ;;  %1947 = vmatmul.mubr.bf16.vlgmr.msra.gmra.mrb[0].mxu1 %v176_v32  ;;  %v2579_v32 = vld [vmem:[%s3727_s1 + $0x368] ss:$16 sps:$4 sm:$0xff]  }
  0x43   :  { %1786 = vmatpush1.bf16.msra.mxu0 %v2510_v31  ;;  %1958 = vmatpush1.bf16.msra.mxu1 %v2513_v33  ;;  %v2576_v31 = vld [vmem:[%s3727_s1 + $0x360] ss:$16 sps:$4 sm:$0xff]   ;;  %v3218_v33 = vsub.s32 2, %v2953_v42 }
  0x44   :  { %1787 = vmatprep.subr.bf16.mxu0 %v2518_v34  ;;  %1959 = vmatprep.subr.bf16.mxu1 %v2521_v35  ;;  %v2584_v34 = vld [vmem:[%s3727_s1 + $0x384] ss:$16 sps:$4 sm:$0xff]   ;;  %v2587_v35 = vld [vmem:[%s3727_s1 + $0x38c] ss:$16 sps:$4 sm:$0xff]  }
  0x45   :  { %1817 = vmatprep.mubr.bf16.mxu0 %v179_v21  ;;  %1989 = vmatprep.mubr.bf16.mxu1 %v179_v21 }
  0x47   :  { %1788 = vmatpush1.bf16.msra.mxu0 %v2516_v36  ;;  %1960 = vmatpush1.bf16.msra.mxu1 %v2519_v37  ;;  %v2582_v36 = vld [vmem:[%s3727_s1 + $0x380] ss:$16 sps:$4 sm:$0xff]   ;;  %v2585_v37 = vld [vmem:[%s3727_s1 + $0x388] ss:$16 sps:$4 sm:$0xff]  }
  0x48   :  { %1789 = vmatprep.subr.bf16.mxu0 %v2524_v38  ;;  %1961 = vmatprep.subr.bf16.mxu1 %v2527_v39  ;;  %v30_v38 = vunpack.c.l.bf16 %v3143_v0  ;;  %v38_v39 = vunpack.c.l.bf16 %v3148_v1 }
  0x4b   :  { %1790 = vmatpush1.bf16.msra.mxu0 %v2522_v40  ;;  %1962 = vmatpush1.bf16.msra.mxu1 %v2525_v41  ;;  %v57_v40 = vrot.slane %v2988_v54, %v3218_v33  ;;  %v2590_v41 = vld [vmem:[%s3727_s1 + $0x3a4] ss:$16 sps:$4 sm:$0xff]  }
  0x4c   :  { %1791 = vmatprep.subr.bf16.mxu0 %v2530_v43  ;;  %1963 = vmatprep.subr.bf16.mxu1 %v2533_v44  ;;  %v2593_v43 = vld [vmem:[%s3727_s1 + $0x3ac] ss:$16 sps:$4 sm:$0xff]   ;;  %v2588_v44 = vld [vmem:[%s3727_s1 + $0x3a0] ss:$16 sps:$4 sm:$0xff]  }
  0x4f   :  { %1792 = vmatpush1.bf16.msra.mxu0 %v2528_v45  ;;  %1964 = vmatpush1.bf16.msra.mxu1 %v2531_v46  ;;  %v2591_v45 = vld [vmem:[%s3727_s1 + $0x3a8] ss:$16 sps:$4 sm:$0xff]   ;;  %v88_v46 = vmul.f32 %v57_v40, %v30_v38  ;;  %v2636_v38 = vld [vmem:[%s3727_s1 + $0x4a0] ss:$16 sps:$4 sm:$0xff]  }
  0x50   :  { %1793 = vmatprep.subr.bf16.mxu0 %v2536_v48  ;;  %1965 = vmatprep.subr.bf16.mxu1 %v2539_v49  ;;  %v96_v48 = vmul.f32 %v57_v40, %v38_v39  ;;  %v115_v49 = vrot.slane %v2993_v55, %v3218_v33  ;;  %v2623_v55 = vld [vmem:[%s3727_s1 + $0x44c] ss:$16 sps:$4 sm:$0xff]   ;;  %v2639_v39 = vld [vmem:[%s3727_s1 + $0x4a8] ss:$16 sps:$4 sm:$0xff]   ;;  %v2644_v40 = vld [vmem:[%s3727_s1 + $0x4c4] ss:$16 sps:$4 sm:$0xff]  }
  0x53   :  { %1794 = vmatpush1.bf16.msra.mxu0 %v2534_v50  ;;  %1966 = vmatpush1.bf16.msra.mxu1 %v2537_v51  ;;  %v2596_v50 = vld [vmem:[%s3727_s1 + $0x3c4] ss:$16 sps:$4 sm:$0xff]   ;;  %v2599_v51 = vld [vmem:[%s3727_s1 + $0x3cc] ss:$16 sps:$4 sm:$0xff]  }
  0x54   :  { %1795 = vmatprep.subr.bf16.mxu0 %v2542_v52  ;;  %1967 = vmatprep.subr.bf16.mxu1 %v2545_v53  ;;  %v2594_v52 = vld [vmem:[%s3727_s1 + $0x3c0] ss:$16 sps:$4 sm:$0xff]   ;;  %v2597_v53 = vld [vmem:[%s3727_s1 + $0x3c8] ss:$16 sps:$4 sm:$0xff]  }
  0x57   :  { %1796 = vmatpush1.bf16.msra.mxu0 %v2540_v58  ;;  %1968 = vmatpush1.bf16.msra.mxu1 %v2543_v59  ;;  %v146_v58 = vadd.f32 %v115_v49, %v88_v46  ;;  %v154_v59 = vadd.f32 %v115_v49, %v96_v48  ;;  %v2653_v46 = vld [vmem:[%s3727_s1 + $0x4ec] ss:$16 sps:$4 sm:$0xff]   ;;  %v2648_v48 = vld [vmem:[%s3727_s1 + $0x4e0] ss:$16 sps:$4 sm:$0xff]   ;;  %v2651_v49 = vld [vmem:[%s3727_s1 + $0x4e8] ss:$16 sps:$4 sm:$0xff]  }
  0x58   :  { %1797 = vmatprep.subr.bf16.mxu0 %v2548_v60  ;;  %1969 = vmatprep.subr.bf16.mxu1 %v2551_v61  ;;  %v2602_v60 = vld [vmem:[%s3727_s1 + $0x3e4] ss:$16 sps:$4 sm:$0xff]   ;;  %v2605_v61 = vld [vmem:[%s3727_s1 + $0x3ec] ss:$16 sps:$4 sm:$0xff]  }
  0x59   :  { %v162_v0 = vmax.f32 %v146_v58, 0.0  ;;  %v170_v1 = vmax.f32 %v154_v59, 0.0  ;;  %v2662_v58 = vld [vmem:[%s3727_s1 + $0x524] ss:$16 sps:$4 sm:$0xff]   ;;  %v2665_v59 = vld [vmem:[%s3727_s1 + $0x52c] ss:$16 sps:$4 sm:$0xff]  }
  0x5b   :  { %1798 = vmatpush1.bf16.msra.mxu0 %v2546_v62  ;;  %1970 = vmatpush1.bf16.msra.mxu1 %v2549_v2  ;;  %v2600_v62 = vld [vmem:[%s3727_s1 + $0x3e0] ss:$16 sps:$4 sm:$0xff]   ;;  %v2608_v2 = vld [vmem:[%s3727_s1 + $0x404] ss:$16 sps:$4 sm:$0xff]  }
  0x5c   :  { %1799 = vmatprep.subr.bf16.mxu0 %v2554_v3  ;;  %1971 = vmatprep.subr.bf16.mxu1 %v2557_v7  ;;  %v2611_v3 = vld [vmem:[%s3727_s1 + $0x40c] ss:$16 sps:$4 sm:$0xff]   ;;  %v178_v7 = vpack.c.bf16 %v170_v1, %v162_v0  ;;  %v2666_v0 = vld [vmem:[%s3727_s1 + $0x540] ss:$16 sps:$4 sm:$0xff]   ;;  %v2669_v1 = vld [vmem:[%s3727_s1 + $0x548] ss:$16 sps:$4 sm:$0xff]  }
  0x5f   :  { %1800 = vmatpush1.bf16.msra.mxu0 %v2552_v10  ;;  %1972 = vmatpush1.bf16.msra.mxu1 %v2555_v11  ;;  %v69_v10 = vrot.slane %v2988_v54, %v68_v4  ;;  %v3297_v11 = vld [vmem:[%s3728_s0 + $0x10] sm:$0xff]  ;;  %v64_v4 = vsub.s32 4, %v2953_v42 }
  0x60   :  { %1801 = vmatprep.subr.bf16.mxu0 %v2560_v12  ;;  %1973 = vmatprep.subr.bf16.mxu1 %v2563_v15  ;;  %v3302_v12 = vld [vmem:[%s3728_s0 + $0x30] sm:$0xff]  ;;  %v33_v13 = vunpack.c.h.bf16 %v3297_v11  ;;  %v2615_v15 = vld [vmem:[%s3727_s1 + $0x428] ss:$16 sps:$4 sm:$0xff]  }
  0x61   :  { %v2612_v54 = vld [vmem:[%s3727_s1 + $0x420] ss:$16 sps:$4 sm:$0xff]   ;;  %v41_v16 = vunpack.c.h.bf16 %v3302_v12 }
  0x63   :  { %1802 = vmatpush1.bf16.msra.mxu0 %v2558_v18  ;;  %1974 = vmatpush1.bf16.msra.mxu1 %v2561_v19  ;;  %v91_v18 = vmul.f32 %v69_v10, %v33_v13  ;;  %v99_v19 = vmul.f32 %v69_v10, %v41_v16  ;;  %v32_v10 = vunpack.c.l.bf16 %v3297_v11  ;;  %v40_v13 = vunpack.c.l.bf16 %v3302_v12  ;;  %v3457_v16 = vld [vmem:[%s3728_s0 + $0x38] sm:$0xff]  ;;  %v2678_v11 = vld [vmem:[%s3727_s1 + $0x580] ss:$16 sps:$4 sm:$0xff]  }
  0x64   :  { %1803 = vmatprep.subr.bf16.mxu0 %v2566_v20  ;;  %1975 = vmatprep.subr.bf16.mxu1 %v2569_v22  ;;  %v2618_v20 = vld [vmem:[%s3727_s1 + $0x440] ss:$16 sps:$4 sm:$0xff]   ;;  %v2621_v22 = vld [vmem:[%s3727_s1 + $0x448] ss:$16 sps:$4 sm:$0xff]  }
  0x65   :  { %v149_v21 = vadd.f32 %v127_v14, %v91_v18  ;;  %v2681_v12 = vld [vmem:[%s3727_s1 + $0x588] ss:$16 sps:$4 sm:$0xff]  }
  0x67   :  { %1804 = vmatpush1.bf16.msra.mxu0 %v2564_v23  ;;  %1976 = vmatpush1.bf16.msra.mxu1 %v2567_v24  ;;  %v2626_v23 = vld [vmem:[%s3727_s1 + $0x464] ss:$16 sps:$4 sm:$0xff]   ;;  %v157_v24 = vadd.f32 %v127_v14, %v99_v19  ;;  %v43_v19 = vunpack.c.h.bf16 %v3457_v16 }
  0x68   :  { %1805 = vmatprep.subr.bf16.mxu0 %v2572_v25  ;;  %1977 = vmatprep.subr.bf16.mxu1 %v2575_v26  ;;  %v2629_v25 = vld [vmem:[%s3727_s1 + $0x46c] ss:$16 sps:$4 sm:$0xff]   ;;  %v165_v26 = vmax.f32 %v149_v21, 0.0  ;;  %v3446_v14 = vld [vmem:[%s3729_s2] sm:$0xff] }
  0x6b   :  { %1806 = vmatpush1.bf16.msra.mxu0 %v2570_v27  ;;  %1978 = vmatpush1.bf16.msra.mxu1 %v2573_v28  ;;  %v173_v27 = vmax.f32 %v157_v24, 0.0  ;;  %v2624_v28 = vld [vmem:[%s3727_s1 + $0x460] ss:$16 sps:$4 sm:$0xff]  }
  0x6c   :  { %1807 = vmatprep.subr.bf16.mxu0 %v2578_v29  ;;  %1979 = vmatprep.subr.bf16.mxu1 %v2581_v30  ;;  %v2627_v29 = vld [vmem:[%s3727_s1 + $0x468] ss:$16 sps:$4 sm:$0xff]  }
  0x6d   :  { %v181_v30 = vpack.c.bf16 %v173_v27, %v165_v26  ;;  %v2687_v26 = vld [vmem:[%s3727_s1 + $0x5a8] ss:$16 sps:$4 sm:$0xff]   ;;  %v2692_v27 = vld [vmem:[%s3727_s1 + $0x5c4] ss:$16 sps:$4 sm:$0xff]  }
  0x6f   :  { %1808 = vmatpush1.bf16.msra.mxu0 %v2576_v31  ;;  %1980 = vmatpush1.bf16.msra.mxu1 %v2579_v32  ;;  %v2632_v31 = vld [vmem:[%s3727_s1 + $0x484] ss:$16 sps:$4 sm:$0xff]   ;;  %v2635_v32 = vld [vmem:[%s3727_s1 + $0x48c] ss:$16 sps:$4 sm:$0xff]  }
  0x70   :  { %1809 = vmatprep.subr.bf16.mxu0 %v2584_v34  ;;  %1981 = vmatprep.subr.bf16.mxu1 %v2587_v35  ;;  %v2630_v34 = vld [vmem:[%s3727_s1 + $0x480] ss:$16 sps:$4 sm:$0xff]   ;;  %v2633_v35 = vld [vmem:[%s3727_s1 + $0x488] ss:$16 sps:$4 sm:$0xff]  }
  0x73   :  { %1810 = vmatpush1.bf16.msra.mxu0 %v2582_v36  ;;  %1982 = vmatpush1.bf16.msra.mxu1 %v2585_v37  ;;  %v2638_v36 = vld [vmem:[%s3727_s1 + $0x4a4] ss:$16 sps:$4 sm:$0xff]   ;;  %v2641_v37 = vld [vmem:[%s3727_s1 + $0x4ac] ss:$16 sps:$4 sm:$0xff]  }
  0x74   :  { %1811 = vmatprep.subr.bf16.mxu0 %v2590_v41  ;;  %1983 = vmatprep.subr.bf16.mxu1 %v2593_v43  ;;  %v2647_v41 = vld [vmem:[%s3727_s1 + $0x4cc] ss:$16 sps:$4 sm:$0xff]   ;;  %v2642_v43 = vld [vmem:[%s3727_s1 + $0x4c0] ss:$16 sps:$4 sm:$0xff]  }
  0x77   :  { %1812 = vmatpush1.bf16.msra.mxu0 %v2588_v44  ;;  %1984 = vmatpush1.bf16.msra.mxu1 %v2591_v45  ;;  %v2645_v44 = vld [vmem:[%s3727_s1 + $0x4c8] ss:$16 sps:$4 sm:$0xff]   ;;  %v2650_v45 = vld [vmem:[%s3727_s1 + $0x4e4] ss:$16 sps:$4 sm:$0xff]  }
  0x78   :  { %1813 = vmatprep.subr.bf16.mxu0 %v2596_v50  ;;  %1985 = vmatprep.subr.bf16.mxu1 %v2599_v51  ;;  %v2656_v50 = vld [vmem:[%s3727_s1 + $0x504] ss:$16 sps:$4 sm:$0xff]   ;;  %v2659_v51 = vld [vmem:[%s3727_s1 + $0x50c] ss:$16 sps:$4 sm:$0xff]  }
  0x7b   :  { %1814 = vmatpush1.bf16.msra.mxu0 %v2594_v52  ;;  %1986 = vmatpush1.bf16.msra.mxu1 %v2597_v53  ;;  %v2654_v52 = vld [vmem:[%s3727_s1 + $0x500] ss:$16 sps:$4 sm:$0xff]   ;;  %v2657_v53 = vld [vmem:[%s3727_s1 + $0x508] ss:$16 sps:$4 sm:$0xff]  }
  0x7c   :  { %1815 = vmatprep.subr.bf16.mxu0 %v2602_v60  ;;  %1987 = vmatprep.subr.bf16.mxu1 %v2605_v61  ;;  %v2660_v60 = vld [vmem:[%s3727_s1 + $0x520] ss:$16 sps:$4 sm:$0xff]   ;;  %v2663_v61 = vld [vmem:[%s3727_s1 + $0x528] ss:$16 sps:$4 sm:$0xff]  }
  0x7f   :  { %1816 = vmatpush1.bf16.msra.mxu0 %v2600_v62  ;;  %1988 = vmatpush1.bf16.msra.mxu1 %v2603_v63  ;;  %v2668_v62 = vld [vmem:[%s3727_s1 + $0x544] ss:$16 sps:$4 sm:$0xff]   ;;  %v2671_v63 = vld [vmem:[%s3727_s1 + $0x54c] ss:$16 sps:$4 sm:$0xff]  }
  0x80   :  { %1828 = vmatprep.subr.bf16.mxu0 %v2608_v2  ;;  %2000 = vmatprep.subr.bf16.mxu1 %v2611_v3  ;;  %v2674_v2 = vld [vmem:[%s3727_s1 + $0x564] ss:$16 sps:$4 sm:$0xff]   ;;  %v2677_v3 = vld [vmem:[%s3727_s1 + $0x56c] ss:$16 sps:$4 sm:$0xff]  }
  0x82   :  { %1818 = vmatmul.mubr.bf16.vlgmr.msra.gmra.mrb[0].mxu0 %v178_v7  ;;  %1990 = vmatmul.mubr.bf16.vlgmr.msra.gmra.mrb[0].mxu1 %v178_v7  ;;  %v2680_v7 = vld [vmem:[%s3727_s1 + $0x584] ss:$16 sps:$4 sm:$0xff]  }
  0x83   :  { %1829 = vmatpush1.bf16.msra.mxu0 %v2606_v5  ;;  %2001 = vmatpush1.bf16.msra.mxu1 %v2609_v6  ;;  %v2672_v5 = vld [vmem:[%s3727_s1 + $0x560] ss:$16 sps:$4 sm:$0xff]   ;;  %v2675_v6 = vld [vmem:[%s3727_s1 + $0x568] ss:$16 sps:$4 sm:$0xff]  }
  0x84   :  { %1830 = vmatprep.subr.bf16.mxu0 %v2614_v8  ;;  %2002 = vmatprep.subr.bf16.mxu1 %v2617_v9  ;;  %v2683_v8 = vld [vmem:[%s3727_s1 + $0x58c] ss:$16 sps:$4 sm:$0xff]   ;;  %v76_v9 = vsub.s32 7, %v2953_v42 }
  0x85   :  { %1860 = vmatprep.mubr.bf16.mxu0 %v181_v30  ;;  %2032 = vmatprep.mubr.bf16.mxu1 %v181_v30 }
  0x87   :  { %1831 = vmatpush1.bf16.msra.mxu0 %v2612_v54  ;;  %2003 = vmatpush1.bf16.msra.mxu1 %v2615_v15  ;;  %v65_v54 = vrot.slane %v3446_v14, %v64_v4  ;;  %v3452_v15 = vld [vmem:[%s3728_s0 + $0x18] sm:$0xff] }
  0x88   :  { %1832 = vmatprep.subr.bf16.mxu0 %v2620_v17  ;;  %2004 = vmatprep.subr.bf16.mxu1 %v2623_v55  ;;  %v2686_v17 = vld [vmem:[%s3727_s1 + $0x5a4] ss:$16 sps:$4 sm:$0xff]   ;;  %v2689_v55 = vld [vmem:[%s3727_s1 + $0x5ac] ss:$16 sps:$4 sm:$0xff]   ;;  %v35_v18 = vunpack.c.h.bf16 %v3452_v15 }
  0x89   :  { %v90_v21 = vmul.f32 %v65_v54, %v32_v10  ;;  %v2729_v10 = vld [vmem:[%s3727_s1 + $0x688] ss:$16 sps:$4 sm:$0xff]  }
  0x8b   :  { %1833 = vmatpush1.bf16.msra.mxu0 %v2618_v20  ;;  %2005 = vmatpush1.bf16.msra.mxu1 %v2621_v22  ;;  %v77_v20 = vrot.slane %v3446_v14, %v76_v9  ;;  %v98_v22 = vmul.f32 %v65_v54, %v40_v13  ;;  %v2734_v13 = vld [vmem:[%s3727_s1 + $0x6a4] ss:$16 sps:$4 sm:$0xff]   ;;  %v2737_v54 = vld [vmem:[%s3727_s1 + $0x6ac] ss:$16 sps:$4 sm:$0xff]  }
  0x8c   :  { %1834 = vmatprep.subr.bf16.mxu0 %v2626_v23  ;;  %2006 = vmatprep.subr.bf16.mxu1 %v2629_v25  ;;  %v3477_v23 = vld [vmem:[%s3730_s3] sm:$0xff] }
  0x8d   :  { %v123_v24 = vrot.slane %v3477_v23, %v64_v4  ;;  %v2684_v25 = vld [vmem:[%s3727_s1 + $0x5a0] ss:$16 sps:$4 sm:$0xff]   ;;  %v101_v30 = vmul.f32 %v77_v20, %v43_v19  ;;  %v2725_v4 = vld [vmem:[%s3727_s1 + $0x66c] ss:$16 sps:$4 sm:$0xff]   ;;  %v2741_v19 = vld [vmem:[%s3727_s1 + $0x6c8] ss:$16 sps:$4 sm:$0xff]  }
  0x8f   :  { %1835 = vmatpush1.bf16.msra.mxu0 %v2624_v28  ;;  %2007 = vmatpush1.bf16.msra.mxu1 %v2627_v29  ;;  %v2695_v28 = vld [vmem:[%s3727_s1 + $0x5cc] ss:$16 sps:$4 sm:$0xff]   ;;  %v93_v29 = vmul.f32 %v77_v20, %v35_v18  ;;  %v2738_v18 = vld [vmem:[%s3727_s1 + $0x6c0] ss:$16 sps:$4 sm:$0xff]   ;;  %v2746_v20 = vld [vmem:[%s3727_s1 + $0x6e4] ss:$16 sps:$4 sm:$0xff]  }
  0x90   :  { %1836 = vmatprep.subr.bf16.mxu0 %v2632_v31  ;;  %2008 = vmatprep.subr.bf16.mxu1 %v2635_v32  ;;  %v135_v31 = vrot.slane %v3477_v23, %v76_v9  ;;  %v148_v32 = vadd.f32 %v123_v24, %v90_v21  ;;  %v2726_v9 = vld [vmem:[%s3727_s1 + $0x680] ss:$16 sps:$4 sm:$0xff]   ;;  %v2749_v21 = vld [vmem:[%s3727_s1 + $0x6ec] ss:$16 sps:$4 sm:$0xff]  }
  0x93   :  { %1837 = vmatpush1.bf16.msra.mxu0 %v2630_v34  ;;  %2009 = vmatpush1.bf16.msra.mxu1 %v2633_v35  ;;  %v156_v34 = vadd.f32 %v123_v24, %v98_v22  ;;  %v2690_v35 = vld [vmem:[%s3727_s1 + $0x5c0] ss:$16 sps:$4 sm:$0xff]   ;;  %v2747_v24 = vld [vmem:[%s3727_s1 + $0x6e8] ss:$16 sps:$4 sm:$0xff]  }
  0x94   :  { %1838 = vmatprep.subr.bf16.mxu0 %v2638_v36  ;;  %2010 = vmatprep.subr.bf16.mxu1 %v2641_v37  ;;  %v2693_v36 = vld [vmem:[%s3727_s1 + $0x5c8] ss:$16 sps:$4 sm:$0xff]   ;;  %v2698_v37 = vld [vmem:[%s3727_s1 + $0x5e4] ss:$16 sps:$4 sm:$0xff]   ;;  %v2744_v22 = vld [vmem:[%s3727_s1 + $0x6e0] ss:$16 sps:$4 sm:$0xff]  }
  0x97   :  { %1839 = vmatpush1.bf16.msra.mxu0 %v2636_v38  ;;  %2011 = vmatpush1.bf16.msra.mxu1 %v2639_v39  ;;  %v2701_v38 = vld [vmem:[%s3727_s1 + $0x5ec] ss:$16 sps:$4 sm:$0xff]   ;;  %v151_v39 = vadd.f32 %v135_v31, %v93_v29  ;;  %v2758_v29 = vld [vmem:[%s3727_s1 + $0x724] ss:$16 sps:$4 sm:$0xff]  }
  0x98   :  { %1840 = vmatprep.subr.bf16.mxu0 %v2644_v40  ;;  %2012 = vmatprep.subr.bf16.mxu1 %v2647_v41  ;;  %v159_v40 = vadd.f32 %v135_v31, %v101_v30  ;;  %v164_v41 = vmax.f32 %v148_v32, 0.0  ;;  %v2761_v30 = vld [vmem:[%s3727_s1 + $0x72c] ss:$16 sps:$4 sm:$0xff]   ;;  %v2756_v31 = vld [vmem:[%s3727_s1 + $0x720] ss:$16 sps:$4 sm:$0xff]  }
  0x99   :  { %v2759_v32 = vld [vmem:[%s3727_s1 + $0x728] ss:$16 sps:$4 sm:$0xff]  }
  0x9b   :  { %1841 = vmatpush1.bf16.msra.mxu0 %v2642_v43  ;;  %2013 = vmatpush1.bf16.msra.mxu1 %v2645_v44  ;;  %v172_v43 = vmax.f32 %v156_v34, 0.0  ;;  %v2696_v44 = vld [vmem:[%s3727_s1 + $0x5e0] ss:$16 sps:$4 sm:$0xff]   ;;  %v2764_v34 = vld [vmem:[%s3727_s1 + $0x744] ss:$16 sps:$4 sm:$0xff]  }
  0x9c   :  { %1842 = vmatprep.subr.bf16.mxu0 %v2650_v45  ;;  %2014 = vmatprep.subr.bf16.mxu1 %v2653_v46  ;;  %v2699_v45 = vld [vmem:[%s3727_s1 + $0x5e8] ss:$16 sps:$4 sm:$0xff]   ;;  %v2704_v46 = vld [vmem:[%s3727_s1 + $0x604] ss:$16 sps:$4 sm:$0xff]  }
  0x9f   :  { %1843 = vmatpush1.bf16.msra.mxu0 %v2648_v48  ;;  %2015 = vmatpush1.bf16.msra.mxu1 %v2651_v49  ;;  %v2707_v48 = vld [vmem:[%s3727_s1 + $0x60c] ss:$16 sps:$4 sm:$0xff]   ;;  %v167_v49 = vmax.f32 %v151_v39, 0.0 }
  0xa0   :  { %1844 = vmatprep.subr.bf16.mxu0 %v2656_v50  ;;  %2016 = vmatprep.subr.bf16.mxu1 %v2659_v51  ;;  %v175_v50 = vmax.f32 %v159_v40, 0.0  ;;  %v180_v51 = vpack.c.bf16 %v172_v43, %v164_v41  ;;  %v2773_v39 = vld [vmem:[%s3727_s1 + $0x76c] ss:$16 sps:$4 sm:$0xff]   ;;  %v72_v40 = vsub.s32 6, %v2953_v42  ;;  %v2768_v41 = vld [vmem:[%s3727_s1 + $0x760] ss:$16 sps:$4 sm:$0xff]  }
  0xa1   :  { %v2771_v43 = vld [vmem:[%s3727_s1 + $0x768] ss:$16 sps:$4 sm:$0xff]   ;;  %v2779_v42 = vld [vmem:[%s3727_s1 + $0x78c] ss:$16 sps:$4 sm:$0xff]  }
  0xa3   :  { %1845 = vmatpush1.bf16.msra.mxu0 %v2654_v52  ;;  %2017 = vmatpush1.bf16.msra.mxu1 %v2657_v53  ;;  %v2702_v52 = vld [vmem:[%s3727_s1 + $0x600] ss:$16 sps:$4 sm:$0xff]   ;;  %v2705_v53 = vld [vmem:[%s3727_s1 + $0x608] ss:$16 sps:$4 sm:$0xff]  }
  0xa4   :  { %1846 = vmatprep.subr.bf16.mxu0 %v2662_v58  ;;  %2018 = vmatprep.subr.bf16.mxu1 %v2665_v59  ;;  %v2710_v58 = vld [vmem:[%s3727_s1 + $0x624] ss:$16 sps:$4 sm:$0xff]   ;;  %v2713_v59 = vld [vmem:[%s3727_s1 + $0x62c] ss:$16 sps:$4 sm:$0xff]  }
  0xa7   :  { %1847 = vmatpush1.bf16.msra.mxu0 %v2660_v60  ;;  %2019 = vmatpush1.bf16.msra.mxu1 %v2663_v61  ;;  %v183_v60 = vpack.c.bf16 %v175_v50, %v167_v49  ;;  %v2708_v61 = vld [vmem:[%s3727_s1 + $0x620] ss:$16 sps:$4 sm:$0xff]   ;;  %v2777_v50 = vld [vmem:[%s3727_s1 + $0x788] ss:$16 sps:$4 sm:$0xff]  }
  0xa8   :  { %1848 = vmatprep.subr.bf16.mxu0 %v2668_v62  ;;  %2020 = vmatprep.subr.bf16.mxu1 %v2671_v63  ;;  %v2711_v62 = vld [vmem:[%s3727_s1 + $0x628] ss:$16 sps:$4 sm:$0xff]   ;;  %v2716_v63 = vld [vmem:[%s3727_s1 + $0x644] ss:$16 sps:$4 sm:$0xff]   ;;  %v2774_v49 = vld [vmem:[%s3727_s1 + $0x780] ss:$16 sps:$4 sm:$0xff]  }
  0xab   :  { %1849 = vmatpush1.bf16.msra.mxu0 %v2666_v0  ;;  %2021 = vmatpush1.bf16.msra.mxu1 %v2669_v1  ;;  %v2719_v0 = vld [vmem:[%s3727_s1 + $0x64c] ss:$16 sps:$4 sm:$0xff]   ;;  %v2714_v1 = vld [vmem:[%s3727_s1 + $0x640] ss:$16 sps:$4 sm:$0xff]  }
  0xac   :  { %1850 = vmatprep.subr.bf16.mxu0 %v2674_v2  ;;  %2022 = vmatprep.subr.bf16.mxu1 %v2677_v3  ;;  %v2717_v2 = vld [vmem:[%s3727_s1 + $0x648] ss:$16 sps:$4 sm:$0xff]   ;;  %v2722_v3 = vld [vmem:[%s3727_s1 + $0x664] ss:$16 sps:$4 sm:$0xff]  }
  0xaf   :  { %1851 = vmatpush1.bf16.msra.mxu0 %v2672_v5  ;;  %2023 = vmatpush1.bf16.msra.mxu1 %v2675_v6  ;;  %v2720_v5 = vld [vmem:[%s3727_s1 + $0x660] ss:$16 sps:$4 sm:$0xff]   ;;  %v2723_v6 = vld [vmem:[%s3727_s1 + $0x668] ss:$16 sps:$4 sm:$0xff]  }
  0xb0   :  { %1852 = vmatprep.subr.bf16.mxu0 %v2680_v7  ;;  %2024 = vmatprep.subr.bf16.mxu1 %v2683_v8  ;;  %v2728_v7 = vld [vmem:[%s3727_s1 + $0x684] ss:$16 sps:$4 sm:$0xff]   ;;  %v2731_v8 = vld [vmem:[%s3727_s1 + $0x68c] ss:$16 sps:$4 sm:$0xff]  }
  0xb3   :  { %1853 = vmatpush1.bf16.msra.mxu0 %v2678_v11  ;;  %2025 = vmatpush1.bf16.msra.mxu1 %v2681_v12  ;;  %v2732_v11 = vld [vmem:[%s3727_s1 + $0x6a0] ss:$16 sps:$4 sm:$0xff]   ;;  %v2735_v12 = vld [vmem:[%s3727_s1 + $0x6a8] ss:$16 sps:$4 sm:$0xff]  }
  0xb4   :  { %1854 = vmatprep.subr.bf16.mxu0 %v2686_v17  ;;  %2026 = vmatprep.subr.bf16.mxu1 %v2689_v55  ;;  %v2740_v17 = vld [vmem:[%s3727_s1 + $0x6c4] ss:$16 sps:$4 sm:$0xff]   ;;  %v2743_v55 = vld [vmem:[%s3727_s1 + $0x6cc] ss:$16 sps:$4 sm:$0xff]  }
  0xb7   :  { %1855 = vmatpush1.bf16.msra.mxu0 %v2684_v25  ;;  %2027 = vmatpush1.bf16.msra.mxu1 %v2687_v26  ;;  %v2752_v25 = vld [vmem:[%s3727_s1 + $0x704] ss:$16 sps:$4 sm:$0xff]   ;;  %v2755_v26 = vld [vmem:[%s3727_s1 + $0x70c] ss:$16 sps:$4 sm:$0xff]  }
  0xb8   :  { %1856 = vmatprep.subr.bf16.mxu0 %v2692_v27  ;;  %2028 = vmatprep.subr.bf16.mxu1 %v2695_v28  ;;  %v2750_v27 = vld [vmem:[%s3727_s1 + $0x700] ss:$16 sps:$4 sm:$0xff]   ;;  %v2753_v28 = vld [vmem:[%s3727_s1 + $0x708] ss:$16 sps:$4 sm:$0xff]  }
  0xbb   :  { %1857 = vmatpush1.bf16.msra.mxu0 %v2690_v35  ;;  %2029 = vmatpush1.bf16.msra.mxu1 %v2693_v36  ;;  %v2767_v35 = vld [vmem:[%s3727_s1 + $0x74c] ss:$16 sps:$4 sm:$0xff]   ;;  %v2762_v36 = vld [vmem:[%s3727_s1 + $0x740] ss:$16 sps:$4 sm:$0xff]  }
  0xbc   :  { %1858 = vmatprep.subr.bf16.mxu0 %v2698_v37  ;;  %2030 = vmatprep.subr.bf16.mxu1 %v2701_v38  ;;  %v2765_v37 = vld [vmem:[%s3727_s1 + $0x748] ss:$16 sps:$4 sm:$0xff]   ;;  %v2770_v38 = vld [vmem:[%s3727_s1 + $0x764] ss:$16 sps:$4 sm:$0xff]  }
  0xbf   :  { %1859 = vmatpush1.bf16.msra.mxu0 %v2696_v44  ;;  %2031 = vmatpush1.bf16.msra.mxu1 %v2699_v45  ;;  %v2776_v44 = vld [vmem:[%s3727_s1 + $0x784] ss:$16 sps:$4 sm:$0xff]   ;;  %v34_v45 = vunpack.c.l.bf16 %v3452_v15 }
  0xc0   :  { %1871 = vmatprep.subr.bf16.mxu0 %v2704_v46  ;;  %2043 = vmatprep.subr.bf16.mxu1 %v2707_v48  ;;  %v42_v46 = vunpack.c.l.bf16 %v3457_v16  ;;  %v73_v48 = vrot.slane %v3446_v14, %v72_v40  ;;  %v2782_v15 = vld [vmem:[%s3727_s1 + $0x7a4] ss:$16 sps:$4 sm:$0xff]   ;;  %v2785_v14 = vld [vmem:[%s3727_s1 + $0x7ac] ss:$16 sps:$4 sm:$0xff]  }
  0xc2   :  { %1861 = vmatmul.mubr.bf16.vlgmr.msra.gmra.mrb[0].mxu0 %v180_v51  ;;  %2033 = vmatmul.mubr.bf16.vlgmr.msra.gmra.mrb[0].mxu1 %v180_v51  ;;  %v92_v16 = vmul.f32 %v73_v48, %v34_v45  ;;  %v100_v51 = vmul.f32 %v73_v48, %v42_v46 }
  0xc3   :  { %1872 = vmatpush1.bf16.msra.mxu0 %v2702_v52  ;;  %2044 = vmatpush1.bf16.msra.mxu1 %v2705_v53  ;;  %v131_v52 = vrot.slane %v3477_v23, %v72_v40  ;;  %v2780_v53 = vld [vmem:[%s3727_s1 + $0x7a0] ss:$16 sps:$4 sm:$0xff]   ;;  %v2791_v23 = vld [vmem:[%s3727_s1 + $0x7cc] ss:$16 sps:$4 sm:$0xff]  }
  0xc4   :  { %1873 = vmatprep.subr.bf16.mxu0 %v2710_v58  ;;  %2045 = vmatprep.subr.bf16.mxu1 %v2713_v59  ;;  %v2783_v58 = vld [vmem:[%s3727_s1 + $0x7a8] ss:$16 sps:$4 sm:$0xff]   ;;  %v2788_v59 = vld [vmem:[%s3727_s1 + $0x7c4] ss:$16 sps:$4 sm:$0xff]  }
  0xc5   :  { %1903 = vmatprep.mubr.bf16.mxu0 %v183_v60  ;;  %2075 = vmatprep.mubr.bf16.mxu1 %v183_v60  ;;  %v150_v60 = vadd.f32 %v131_v52, %v92_v16 }
  0xc7   :  { %1874 = vmatpush1.bf16.msra.mxu0 %v2708_v61  ;;  %2046 = vmatpush1.bf16.msra.mxu1 %v2711_v62  ;;  %v158_v61 = vadd.f32 %v131_v52, %v100_v51  ;;  %v2786_v62 = vld [vmem:[%s3727_s1 + $0x7c0] ss:$16 sps:$4 sm:$0xff]  }
  0xc8   :  { %1875 = vmatprep.subr.bf16.mxu0 %v2716_v63  ;;  %2047 = vmatprep.subr.bf16.mxu1 %v2719_v0  ;;  %v2789_v63 = vld [vmem:[%s3727_s1 + $0x7c8] ss:$16 sps:$4 sm:$0xff]   ;;  %v2794_v0 = vld [vmem:[%s3727_s1 + $0x7e4] ss:$16 sps:$4 sm:$0xff]  }
  0xcb   :  { %1876 = vmatpush1.bf16.msra.mxu0 %v2714_v1  ;;  %2048 = vmatpush1.bf16.msra.mxu1 %v2717_v2  ;;  %v2797_v1 = vld [vmem:[%s3727_s1 + $0x7ec] ss:$16 sps:$4 sm:$0xff]   ;;  %v166_v2 = vmax.f32 %v150_v60, 0.0 }
  0xcc   :  { %1877 = vmatprep.subr.bf16.mxu0 %v2722_v3  ;;  %2049 = vmatprep.subr.bf16.mxu1 %v2725_v4  ;;  %v174_v3 = vmax.f32 %v158_v61, 0.0  ;;  %v2792_v4 = vld [vmem:[%s3727_s1 + $0x7e0] ss:$16 sps:$4 sm:$0xff]  }
  0xcf   :  { %1878 = vmatpush1.bf16.msra.mxu0 %v2720_v5  ;;  %2050 = vmatpush1.bf16.msra.mxu1 %v2723_v6  ;;  %v2795_v5 = vld [vmem:[%s3727_s1 + $0x7e8] ss:$16 sps:$4 sm:$0xff]   ;;  %v182_v6 = vpack.c.bf16 %v174_v3, %v166_v2 }
  0xd0   :  { %1879 = vmatprep.subr.bf16.mxu0 %v2728_v7  ;;  %2051 = vmatprep.subr.bf16.mxu1 %v2731_v8  ;;  %v440_v7 = vld [vmem:[%s3731_s4] sm:$0xf] }
  0xd1   :  { %v445_v8 = vrot.slane %v440_v7, %v2996_v56 }
  0xd3   :  { %1880 = vmatpush1.bf16.msra.mxu0 %v2726_v9  ;;  %2052 = vmatpush1.bf16.msra.mxu1 %v2729_v10  ;;  %v453_v9 = vrot.slane %v440_v7, %v3218_v33  ;;  %v449_v10 = vrot.slane %v440_v7, %v2968_v47 }
  0xd4   :  { %1881 = vmatprep.subr.bf16.mxu0 %v2734_v13  ;;  %2053 = vmatprep.subr.bf16.mxu1 %v2737_v54  ;;  %v457_v13 = vrot.slane %v440_v7, %v3121_v57 }
  0xd7   :  { %1882 = vmatpush1.bf16.msra.mxu0 %v2732_v11  ;;  %2054 = vmatpush1.bf16.msra.mxu1 %v2735_v12 }
  0xd8   :  { %1883 = vmatprep.subr.bf16.mxu0 %v2740_v17  ;;  %2055 = vmatprep.subr.bf16.mxu1 %v2743_v55 }
  0xdb   :  { %1884 = vmatpush1.bf16.msra.mxu0 %v2738_v18  ;;  %2056 = vmatpush1.bf16.msra.mxu1 %v2741_v19 }
  0xdc   :  { %1885 = vmatprep.subr.bf16.mxu0 %v2746_v20  ;;  %2057 = vmatprep.subr.bf16.mxu1 %v2749_v21 }
  0xdf   :  { %1886 = vmatpush1.bf16.msra.mxu0 %v2744_v22  ;;  %2058 = vmatpush1.bf16.msra.mxu1 %v2747_v24 }
  0xe0   :  { %1887 = vmatprep.subr.bf16.mxu0 %v2752_v25  ;;  %2059 = vmatprep.subr.bf16.mxu1 %v2755_v26 }
  0xe3   :  { %1888 = vmatpush1.bf16.msra.mxu0 %v2750_v27  ;;  %2060 = vmatpush1.bf16.msra.mxu1 %v2753_v28 }
  0xe4   :  { %1889 = vmatprep.subr.bf16.mxu0 %v2758_v29  ;;  %2061 = vmatprep.subr.bf16.mxu1 %v2761_v30 }
  0xe7   :  { %1890 = vmatpush1.bf16.msra.mxu0 %v2756_v31  ;;  %2062 = vmatpush1.bf16.msra.mxu1 %v2759_v32 }
  0xe8   :  { %1891 = vmatprep.subr.bf16.mxu0 %v2764_v34  ;;  %2063 = vmatprep.subr.bf16.mxu1 %v2767_v35 }
  0xeb   :  { %1892 = vmatpush1.bf16.msra.mxu0 %v2762_v36  ;;  %2064 = vmatpush1.bf16.msra.mxu1 %v2765_v37 }
  0xec   :  { %1893 = vmatprep.subr.bf16.mxu0 %v2770_v38  ;;  %2065 = vmatprep.subr.bf16.mxu1 %v2773_v39 }
  0xef   :  { %1894 = vmatpush1.bf16.msra.mxu0 %v2768_v41  ;;  %2066 = vmatpush1.bf16.msra.mxu1 %v2771_v43 }
  0xf0   :  { %1895 = vmatprep.subr.bf16.mxu0 %v2776_v44  ;;  %2067 = vmatprep.subr.bf16.mxu1 %v2779_v42 }
  0xf3   :  { %1896 = vmatpush1.bf16.msra.mxu0 %v2774_v49  ;;  %2068 = vmatpush1.bf16.msra.mxu1 %v2777_v50 }
  0xf4   :  { %1897 = vmatprep.subr.bf16.mxu0 %v2782_v15  ;;  %2069 = vmatprep.subr.bf16.mxu1 %v2785_v14 }
  0xf7   :  { %1898 = vmatpush1.bf16.msra.mxu0 %v2780_v53  ;;  %2070 = vmatpush1.bf16.msra.mxu1 %v2783_v58 }
  0xf8   :  { %1899 = vmatprep.subr.bf16.mxu0 %v2788_v59  ;;  %2071 = vmatprep.subr.bf16.mxu1 %v2791_v23 }
  0xfb   :  { %1900 = vmatpush1.bf16.msra.mxu0 %v2786_v62  ;;  %2072 = vmatpush1.bf16.msra.mxu1 %v2789_v63 }
  0xfc   :  { %1901 = vmatprep.subr.bf16.mxu0 %v2794_v0  ;;  %2073 = vmatprep.subr.bf16.mxu1 %v2797_v1 }
  0xff   :  { %1902 = vmatpush1.bf16.msra.mxu0 %v2792_v4  ;;  %2074 = vmatpush1.bf16.msra.mxu1 %v2795_v5 }
 0x102   :  { %1904 = vmatmul.mubr.bf16.vlgmr.msra.gmra.mrb[0].mxu0 %v182_v6  ;;  %2076 = vmatmul.mubr.bf16.vlgmr.msra.gmra.mrb[0].mxu1 %v182_v6 }
 0x1d5   :  { %v1905_v54 = vpop.f32.mrb[0].mxu0  ;;  %v2077_v11 = vpop.f32.mrb[0].mxu1 }
 0x1d6   :  { %v2382_v12 = vadd.f32 %v1905_v54, %v445_v8  ;;  %v2386_v17 = vadd.f32 %v2077_v11, %v453_v9  ;;  %v1907_v55 = vpop.f32.mrb[1].mxu0  ;;  %v2079_v18 = vpop.f32.mrb[1].mxu1 }
 0x1d7   :  { %v2383_v19 = vadd.f32 %v1907_v55, %v449_v10  ;;  %v2387_v20 = vadd.f32 %v2079_v18, %v457_v13  ;;  %v1909_v21 = vpop.f32.mrb[2].mxu0  ;;  %v2081_v22 = vpop.f32.mrb[2].mxu1 }
 0x1d8   :  { %v2384_v24 = vadd.f32 %v1909_v21, %v445_v8  ;;  %v2388_v25 = vadd.f32 %v2081_v22, %v453_v9  ;;  %v1911_v26 = vpop.f32.mrb[3].mxu0  ;;  %v2083_v56 = vpop.f32.mrb[3].mxu1 }
 0x1d9   :  { %v2378_v27 = vpack.c.bf16 %v2383_v19, %v2382_v12  ;;  %v2379_v33 = vpack.c.bf16 %v2387_v20, %v2386_v17  ;;  %v2385_v28 = vadd.f32 %v1911_v26, %v449_v10  ;;  %v2389_v47 = vadd.f32 %v2083_v56, %v457_v13 }
 0x1db   :  { %2110 = vst [vmem:[%s3732_s5] sm:$0xff] %v2378_v27  ;;  %2111 = vst [vmem:[%s3732_s5 + $0x8] sm:$0xff] %v2379_v33  ;;  %v2380_v57 = vpack.c.bf16 %v2385_v28, %v2384_v24  ;;  %v2381_v29 = vpack.c.bf16 %v2389_v47, %v2388_v25 }
 0x1dd   :  { %2112 = vst [vmem:[%s3732_s5 + $0x10] sm:$0xff] %v2380_v57  ;;  %2113 = vst [vmem:[%s3732_s5 + $0x18] sm:$0xff] %v2381_v29 }

</bundles_post_ra>
